<compile_context>
chip_gen: v7x
topology: tpu7x:2x2x1
jax: 0.10.0
libtpu: 0.0.40
codegen_flags: <defaults>
</compile_context>

<pallas_src>
import functools

import numpy as np
import jax
import jax.numpy as jnp
from jax.experimental import pallas as pl
from jax.experimental.pallas import tpu as pltpu


# ----------------------------------------------------------------------------
# Trace-time (numpy) constant builders.
# ----------------------------------------------------------------------------
def _reflect_idx(k, n):
    """Index map for nn.ReflectionPad2d(1): k in [-1, n] -> [0, n)."""
    if k < 0:
        return -k
    if k >= n:
        return 2 * n - 2 - k
    return k


def _build_input_pad_gather(H, W):
    """G0 (H*W, (H+2)*(W+2)): x_flat @ G0 == reflect-pad-1(x), row stride W+2."""
    Hp, Wp = H + 2, W + 2
    g = np.zeros((H * W, Hp * Wp), np.float32)
    for a in range(Hp):
        ra = _reflect_idx(a - 1, H)
        for b in range(Wp):
            rb = _reflect_idx(b - 1, W)
            g[ra * W + rb, a * Wp + b] = 1.0
    return g


def _build_upsample_pad_gather(H, W, out_cols):
    """G12 (L1, out_cols): y1 @ G12 == reflect-pad-1(nearest-upsample-2x(y1)).

    y1 (conv21 output) is laid out with padded row stride (W+2); the result is
    the (2H)x(2W) upsampled image, reflect-padded by 1, flattened with row
    stride 2W+2.  Trailing columns beyond the padded grid are zero.
    """
    W1p = W + 2
    H2, W2 = 2 * H, 2 * W
    W2p = W2 + 2
    L1 = (H - 1) * W1p + W
    g = np.zeros((L1, out_cols), np.float32)
    for a in range(H2 + 2):
        si = min(max(a - 1, 0), H2 - 1) // 2
        for b in range(W2p):
            sj = min(max(b - 1, 0), W2 - 1) // 2
            g[si * W1p + sj, a * W2p + b] = 1.0
    return g


def _build_reflect_shift_masks(H2, W2, width):
    """Reflect-pad-1 of an (H2, W2) image stored with row stride W2+2 expressed
    as a small set of pure lane shifts.  Returns (shifts, masks[k, width])."""
    W2p = W2 + 2
    groups = {}
    for a in range(H2 + 2):
        ra = _reflect_idx(a - 1, H2)
        for b in range(W2p):
            rb = _reflect_idx(b - 1, W2)
            p = a * W2p + b
            src = ra * W2p + rb
            groups.setdefault(p - src, []).append(p)
    shifts = sorted(groups)
    masks = np.zeros((len(shifts), width), np.float32)
    for k, s in enumerate(shifts):
        masks[k, groups[s]] = 1.0
    return tuple(int(s) for s in shifts), masks


# ----------------------------------------------------------------------------
# Fused kernel: one batch element per grid step.
# ----------------------------------------------------------------------------
def _decoder_kernel(x_ref, g0_ref, g12_ref, m_ref,
                    w1_ref, b1_ref, w2_ref, b2_ref, w3_ref, b3_ref,
                    o_ref, p1_ref, p23_ref, *, H, W, shifts):
    f32 = jnp.float32
    C1, C2 = 32, 16
    W1p = W + 2
    L1 = (H - 1) * W1p + W                 # valid conv21 outputs (stride W1p)
    H2, W2 = 2 * H, 2 * W
    W2p = W2 + 2
    L2 = H2 * W2p                          # conv12/conv11 output length (stride W2p)
    S2 = (H2 + 2) * W2p + 2                # width of padded stage-2/3 activations

    def _roll_lanes(v, shift, width):      # circular roll along the lane axis
        s = shift % width
        if s == 0:
            return v
        return jnp.concatenate([v[:, width - s:], v[:, :width - s]], axis=1)

    # ---- stage 0: reflect-pad the input (gather matmul), channel-major ----
    x = x_ref[0]                                                  # (32, H*W)
    x1 = jnp.dot(x, g0_ref[...], preferred_element_type=f32)      # (32, (H+2)*(W+2))

    # ---- conv21: im2col (9 lane-shifted slices) + single MXU matmul ----
    for t in range(9):
        ky, kx = divmod(t, 3)
        off = ky * W1p + kx
        p1_ref[pl.ds(t * C1, C1), :] = x1[:, off:off + L1]
    y1 = jnp.dot(w1_ref[...], p1_ref[...], preferred_element_type=f32)
    y1 = jnp.maximum(y1 + b1_ref[...], 0.0)                       # (16, L1)

    # ---- nearest-upsample x2 + reflect-pad (gather matmul) ----
    x2 = jnp.dot(y1, g12_ref[...], preferred_element_type=f32)    # (16, S2)

    # ---- conv12 ----
    for t in range(9):
        ky, kx = divmod(t, 3)
        off = ky * W2p + kx
        p23_ref[pl.ds(t * C2, C2), :] = x2[:, off:off + L2]
    y2 = jnp.dot(w2_ref[...], p23_ref[...], preferred_element_type=f32)
    y2 = jnp.maximum(y2 + b2_ref[...], 0.0)                       # (16, L2)

    # ---- reflect-pad y2 via pure lane shifts (rolls) + masks ----
    y2w = jnp.concatenate([y2, jnp.zeros((C2, S2 - L2), f32)], axis=1)  # (16, S2)
    x3 = jnp.zeros((C2, S2), f32)
    for k, s in enumerate(shifts):
        rolled = _roll_lanes(y2w, s, S2)
        x3 = jnp.where(m_ref[pl.ds(k, 1), :] > 0.5, rolled, x3)

    # ---- conv11 ----
    for t in range(9):
        ky, kx = divmod(t, 3)
        off = ky * W2p + kx
        p23_ref[pl.ds(t * C2, C2), :] = x3[:, off:off + L2]
    y3 = jnp.dot(w3_ref[...], p23_ref[...], preferred_element_type=f32)
    y3 = jnp.maximum(y3 + b3_ref[...], 0.0)                       # (3, L2)

    o_ref[0] = y3


# ----------------------------------------------------------------------------
# Wrapper: single pallas_call, NCHW in / NCHW out.
# ----------------------------------------------------------------------------
@jax.jit
def small_decoder2_16x_forward(y_nchw, params):
    """SmallDecoder2_16x.forward; input/output are NCHW like the PyTorch module."""
    N, Cin, H, W = y_nchw.shape
    assert Cin == 32
    W1p = W + 2
    L1 = (H - 1) * W1p + W
    H2, W2 = 2 * H, 2 * W
    W2p = W2 + 2
    L2 = H2 * W2p
    S2 = (H2 + 2) * W2p + 2

    g0 = jnp.asarray(_build_input_pad_gather(H, W))
    g12 = jnp.asarray(_build_upsample_pad_gather(H, W, S2))
    shifts, masks_np = _build_reflect_shift_masks(H2, W2, S2)
    masks = jnp.asarray(masks_np)

    # PyTorch Conv2d weights (Cout, Cin, 3, 3) -> (Cout, 9*Cin), cols = (ky, kx, cin).
    def wmat(w):
        cout, cin = w.shape[0], w.shape[1]
        return jnp.transpose(w, (0, 2, 3, 1)).reshape(cout, 9 * cin)

    w1 = wmat(params["conv21_w"]); b1 = params["conv21_b"].reshape(-1, 1)
    w2 = wmat(params["conv12_w"]); b2 = params["conv12_b"].reshape(-1, 1)
    w3 = wmat(params["conv11_w"]); b3 = params["conv11_b"].reshape(-1, 1)

    x_flat = y_nchw.reshape(N, Cin, H * W)

    kernel = functools.partial(_decoder_kernel, H=H, W=W, shifts=shifts)

    out_flat = pl.pallas_call(
        kernel,
        out_shape=jax.ShapeDtypeStruct((N, 3, L2), jnp.float32),
        grid_spec=pltpu.PrefetchScalarGridSpec(
            num_scalar_prefetch=0,
            grid=(N,),
            in_specs=[
                pl.BlockSpec((1, Cin, H * W), lambda n: (n, 0, 0)),
                pl.BlockSpec(g0.shape, lambda n: (0, 0)),
                pl.BlockSpec(g12.shape, lambda n: (0, 0)),
                pl.BlockSpec(masks.shape, lambda n: (0, 0)),
                pl.BlockSpec(w1.shape, lambda n: (0, 0)),
                pl.BlockSpec(b1.shape, lambda n: (0, 0)),
                pl.BlockSpec(w2.shape, lambda n: (0, 0)),
                pl.BlockSpec(b2.shape, lambda n: (0, 0)),
                pl.BlockSpec(w3.shape, lambda n: (0, 0)),
                pl.BlockSpec(b3.shape, lambda n: (0, 0)),
            ],
            out_specs=pl.BlockSpec((1, 3, L2), lambda n: (n, 0, 0)),
            scratch_shapes=[
                pltpu.VMEM((9 * Cin, L1), jnp.float32),   # im2col tile, conv21
                pltpu.VMEM((9 * 16, L2), jnp.float32),    # im2col tile, conv12/conv11
            ],
        ),
        compiler_params=pltpu.CompilerParams(
            dimension_semantics=("parallel",)),
    )(x_flat, g0, g12, masks, w1, b1, w2, b2, w3, b3)

    # padded-stride -> dense NCHW: drop the 2 garbage columns per row.
    return out_flat.reshape(N, 3, H2, W2p)[:, :, :, :W2]


# ----------------------------------------------------------------------------
# Synthetic params + plain-JAX reference + self-check.
# ----------------------------------------------------------------------------
def init_params(key):
    """Deterministic synthetic parameters in the PyTorch layout (Cout, Cin, 3, 3)."""
    ks = jax.random.split(key, 6)

    def conv_w(k, cout, cin):
        return jax.random.normal(k, (cout, cin, 3, 3), jnp.float32) / np.sqrt(9.0 * cin)

    return {
        "conv21_w": conv_w(ks[0], 16, 32),
        "conv21_b": 0.01 * jax.random.normal(ks[1], (16,), jnp.float32),
        "conv12_w": conv_w(ks[2], 16, 16),
        "conv12_b": 0.01 * jax.random.normal(ks[3], (16,), jnp.float32),
        "conv11_w": conv_w(ks[4], 3, 16),
        "conv11_b": 0.01 * jax.random.normal(ks[5], (3,), jnp.float32),
    }


def _reference_forward(x, params):
    """Plain-JAX replica of the PyTorch module (for numerical self-check)."""
    def conv(x, w, b):
        xp = jnp.pad(x, ((0, 0), (0, 0), (1, 1), (1, 1)), mode="reflect")
        y = jax.lax.conv_general_dilated(
            xp, w, window_strides=(1, 1), padding="VALID",
            dimension_numbers=("NCHW", "OIHW", "NCHW"),
            precision=jax.lax.Precision.HIGHEST)
        return jax.nn.relu(y + b[None, :, None, None])

    y = conv(x, params["conv21_w"], params["conv21_b"])
    y = jnp.repeat(jnp.repeat(y, 2, axis=2), 2, axis=3)   # nearest upsample x2
    y = conv(y, params["conv12_w"], params["conv12_b"])
    y = conv(y, params["conv11_w"], params["conv11_b"])
    return y


if __name__ == "__main__":
    key = jax.random.PRNGKey(0)
    k_in, k_par = jax.random.split(key)

    y = jax.random.normal(k_in, (2, 32, 16, 16), jnp.float32)  # conv21 takes 32 ch
    params = init_params(k_par)

    out = small_decoder2_16x_forward(y, params)
    out = jax.block_until_ready(out)

    assert out.shape == (2, 3, 32, 32), out.shape
    assert out.dtype == jnp.float32
    assert bool(jnp.all(out >= 0.0))                      # final ReLU

    ref = jax.jit(_reference_forward)(y, params)
    err = float(jnp.max(jnp.abs(out - ref)))
    assert err < 2e-2, f"max abs error vs reference: {err}"

    print("KERNEL_OK")
</pallas_src>

<mosaic_0001>
module attributes {stable_mosaic.version = 11 : i64} {
  func.func @_decoder_kernel(%arg0: i32, %arg1: memref<1x32x256xf32, #tpu.memory_space<vmem>>, %arg2: memref<256x324xf32, #tpu.memory_space<vmem>>, %arg3: memref<286x1158xf32, #tpu.memory_space<vmem>>, %arg4: memref<9x1158xf32, #tpu.memory_space<vmem>>, %arg5: memref<16x288xf32, #tpu.memory_space<vmem>>, %arg6: memref<16x1xf32, #tpu.memory_space<vmem>>, %arg7: memref<16x144xf32, #tpu.memory_space<vmem>>, %arg8: memref<16x1xf32, #tpu.memory_space<vmem>>, %arg9: memref<3x144xf32, #tpu.memory_space<vmem>>, %arg10: memref<3x1xf32, #tpu.memory_space<vmem>>, %arg11: memref<1x3x1088xf32, #tpu.memory_space<vmem>>, %arg12: memref<288x286xf32, #tpu.memory_space<vmem>>, %arg13: memref<144x1088xf32, #tpu.memory_space<vmem>>) attributes {dimension_semantics = [#tpu.dimension_semantics<parallel>], iteration_bounds = array<i64: 2>, scalar_prefetch = 0 : i64, scratch_operands = 2 : i64, tpu.core_type = #tpu.core_type<tc>, window_params = [{transform_indices = @transform_0, window_bounds = array<i64: 1, 32, 256>}, {pipeline_mode = #tpu.pipeline_mode<synchronous>, transform_indices = @transform_1, window_bounds = array<i64: 256, 324>}, {pipeline_mode = #tpu.pipeline_mode<synchronous>, transform_indices = @transform_2, window_bounds = array<i64: 286, 1158>}, {pipeline_mode = #tpu.pipeline_mode<synchronous>, transform_indices = @transform_3, window_bounds = array<i64: 9, 1158>}, {pipeline_mode = #tpu.pipeline_mode<synchronous>, transform_indices = @transform_4, window_bounds = array<i64: 16, 288>}, {pipeline_mode = #tpu.pipeline_mode<synchronous>, transform_indices = @transform_5, window_bounds = array<i64: 16, 1>}, {pipeline_mode = #tpu.pipeline_mode<synchronous>, transform_indices = @transform_6, window_bounds = array<i64: 16, 144>}, {pipeline_mode = #tpu.pipeline_mode<synchronous>, transform_indices = @transform_7, window_bounds = array<i64: 16, 1>}, {pipeline_mode = #tpu.pipeline_mode<synchronous>, transform_indices = @transform_8, window_bounds = array<i64: 3, 144>}, {pipeline_mode = #tpu.pipeline_mode<synchronous>, transform_indices = @transform_9, window_bounds = array<i64: 3, 1>}, {transform_indices = @transform_10, window_bounds = array<i64: 1, 3, 1088>}]} {
    %c0 = arith.constant 0 : index
    %c0_0 = arith.constant 0 : index
    %c0_1 = arith.constant 0 : index
    %0 = vector.load %arg1[%c0, %c0_0, %c0_1] : memref<1x32x256xf32, #tpu.memory_space<vmem>>, vector<1x32x256xf32>
    %1 = vector.shape_cast %0 : vector<1x32x256xf32> to vector<32x256xf32>
    %c0_2 = arith.constant 0 : index
    %c0_3 = arith.constant 0 : index
    %2 = vector.load %arg2[%c0_2, %c0_3] : memref<256x324xf32, #tpu.memory_space<vmem>>, vector<256x324xf32>
    %cst = arith.constant dense<0.000000e+00> : vector<32x324xf32>
    %3 = tpu.matmul %1, %2, %cst {dimension_numbers = #tpu.dot_dimension_numbers<[1], [0], [0], [1], [0, 0, 1, 1], [], []>} : vector<32x256xf32>, vector<256x324xf32>, vector<32x324xf32> -> vector<32x324xf32>
    %4 = vector.extract_strided_slice %3 {offsets = [0, 0], sizes = [32, 286], strides = [1, 1]} : vector<32x324xf32> to vector<32x286xf32>
    %c0_4 = arith.constant 0 : index
    %c0_5 = arith.constant 0 : index
    %5 = vector.load %arg12[%c0_4, %c0_5] : memref<288x286xf32, #tpu.memory_space<vmem>>, vector<32x286xf32>
    tpu.vector_store %arg12[%c0_4, %c0_5], %4 {strides = array<i32>} : memref<288x286xf32, #tpu.memory_space<vmem>>, vector<32x286xf32>,
    %6 = vector.extract_strided_slice %3 {offsets = [0, 1], sizes = [32, 286], strides = [1, 1]} : vector<32x324xf32> to vector<32x286xf32>
    %c32 = arith.constant 32 : index
    %c0_6 = arith.constant 0 : index
    %7 = vector.load %arg12[%c32, %c0_6] : memref<288x286xf32, #tpu.memory_space<vmem>>, vector<32x286xf32>
    tpu.vector_store %arg12[%c32, %c0_6], %6 {strides = array<i32>} : memref<288x286xf32, #tpu.memory_space<vmem>>, vector<32x286xf32>,
    %8 = vector.extract_strided_slice %3 {offsets = [0, 2], sizes = [32, 286], strides = [1, 1]} : vector<32x324xf32> to vector<32x286xf32>
    %c64 = arith.constant 64 : index
    %c0_7 = arith.constant 0 : index
    %9 = vector.load %arg12[%c64, %c0_7] : memref<288x286xf32, #tpu.memory_space<vmem>>, vector<32x286xf32>
    tpu.vector_store %arg12[%c64, %c0_7], %8 {strides = array<i32>} : memref<288x286xf32, #tpu.memory_space<vmem>>, vector<32x286xf32>,
    %10 = vector.extract_strided_slice %3 {offsets = [0, 18], sizes = [32, 286], strides = [1, 1]} : vector<32x324xf32> to vector<32x286xf32>
    %c96 = arith.constant 96 : index
    %c0_8 = arith.constant 0 : index
    %11 = vector.load %arg12[%c96, %c0_8] : memref<288x286xf32, #tpu.memory_space<vmem>>, vector<32x286xf32>
    tpu.vector_store %arg12[%c96, %c0_8], %10 {strides = array<i32>} : memref<288x286xf32, #tpu.memory_space<vmem>>, vector<32x286xf32>,
    %12 = vector.extract_strided_slice %3 {offsets = [0, 19], sizes = [32, 286], strides = [1, 1]} : vector<32x324xf32> to vector<32x286xf32>
    %c128 = arith.constant 128 : index
    %c0_9 = arith.constant 0 : index
    %13 = vector.load %arg12[%c128, %c0_9] : memref<288x286xf32, #tpu.memory_space<vmem>>, vector<32x286xf32>
    tpu.vector_store %arg12[%c128, %c0_9], %12 {strides = array<i32>} : memref<288x286xf32, #tpu.memory_space<vmem>>, vector<32x286xf32>,
    %14 = vector.extract_strided_slice %3 {offsets = [0, 20], sizes = [32, 286], strides = [1, 1]} : vector<32x324xf32> to vector<32x286xf32>
    %c160 = arith.constant 160 : index
    %c0_10 = arith.constant 0 : index
    %15 = vector.load %arg12[%c160, %c0_10] : memref<288x286xf32, #tpu.memory_space<vmem>>, vector<32x286xf32>
    tpu.vector_store %arg12[%c160, %c0_10], %14 {strides = array<i32>} : memref<288x286xf32, #tpu.memory_space<vmem>>, vector<32x286xf32>,
    %16 = vector.extract_strided_slice %3 {offsets = [0, 36], sizes = [32, 286], strides = [1, 1]} : vector<32x324xf32> to vector<32x286xf32>
    %c192 = arith.constant 192 : index
    %c0_11 = arith.constant 0 : index
    %17 = vector.load %arg12[%c192, %c0_11] : memref<288x286xf32, #tpu.memory_space<vmem>>, vector<32x286xf32>
    tpu.vector_store %arg12[%c192, %c0_11], %16 {strides = array<i32>} : memref<288x286xf32, #tpu.memory_space<vmem>>, vector<32x286xf32>,
    %18 = vector.extract_strided_slice %3 {offsets = [0, 37], sizes = [32, 286], strides = [1, 1]} : vector<32x324xf32> to vector<32x286xf32>
    %c224 = arith.constant 224 : index
    %c0_12 = arith.constant 0 : index
    %19 = vector.load %arg12[%c224, %c0_12] : memref<288x286xf32, #tpu.memory_space<vmem>>, vector<32x286xf32>
    tpu.vector_store %arg12[%c224, %c0_12], %18 {strides = array<i32>} : memref<288x286xf32, #tpu.memory_space<vmem>>, vector<32x286xf32>,
    %20 = vector.extract_strided_slice %3 {offsets = [0, 38], sizes = [32, 286], strides = [1, 1]} : vector<32x324xf32> to vector<32x286xf32>
    %c256 = arith.constant 256 : index
    %c0_13 = arith.constant 0 : index
    %21 = vector.load %arg12[%c256, %c0_13] : memref<288x286xf32, #tpu.memory_space<vmem>>, vector<32x286xf32>
    tpu.vector_store %arg12[%c256, %c0_13], %20 {strides = array<i32>} : memref<288x286xf32, #tpu.memory_space<vmem>>, vector<32x286xf32>,
    %c0_14 = arith.constant 0 : index
    %c0_15 = arith.constant 0 : index
    %22 = vector.load %arg5[%c0_14, %c0_15] : memref<16x288xf32, #tpu.memory_space<vmem>>, vector<16x288xf32>
    %c0_16 = arith.constant 0 : index
    %c0_17 = arith.constant 0 : index
    %23 = vector.load %arg12[%c0_16, %c0_17] : memref<288x286xf32, #tpu.memory_space<vmem>>, vector<288x286xf32>
    %cst_18 = arith.constant dense<0.000000e+00> : vector<16x286xf32>
    %24 = tpu.matmul %22, %23, %cst_18 {dimension_numbers = #tpu.dot_dimension_numbers<[1], [0], [0], [1], [0, 0, 1, 1], [], []>} : vector<16x288xf32>, vector<288x286xf32>, vector<16x286xf32> -> vector<16x286xf32>
    %c0_19 = arith.constant 0 : index
    %c0_20 = arith.constant 0 : index
    %25 = vector.load %arg6[%c0_19, %c0_20] : memref<16x1xf32, #tpu.memory_space<vmem>>, vector<16x1xf32>
    %26 = vector.broadcast %25 : vector<16x1xf32> to vector<16x286xf32>
    %27 = arith.addf %24, %26 : vector<16x286xf32>
    %cst_21 = arith.constant 0.000000e+00 : f32
    %28 = vector.broadcast %cst_21 : f32 to vector<16x286xf32>
    %29 = arith.maximumf %27, %28 : vector<16x286xf32>
    %c0_22 = arith.constant 0 : index
    %c0_23 = arith.constant 0 : index
    %30 = vector.load %arg3[%c0_22, %c0_23] : memref<286x1158xf32, #tpu.memory_space<vmem>>, vector<286x1158xf32>
    %cst_24 = arith.constant dense<0.000000e+00> : vector<16x1158xf32>
    %31 = tpu.matmul %29, %30, %cst_24 {dimension_numbers = #tpu.dot_dimension_numbers<[1], [0], [0], [1], [0, 0, 1, 1], [], []>} : vector<16x286xf32>, vector<286x1158xf32>, vector<16x1158xf32> -> vector<16x1158xf32>
    %32 = vector.extract_strided_slice %31 {offsets = [0, 0], sizes = [16, 1088], strides = [1, 1]} : vector<16x1158xf32> to vector<16x1088xf32>
    %c0_25 = arith.constant 0 : index
    %c0_26 = arith.constant 0 : index
    %33 = vector.load %arg13[%c0_25, %c0_26] : memref<144x1088xf32, #tpu.memory_space<vmem>>, vector<16x1088xf32>
    tpu.vector_store %arg13[%c0_25, %c0_26], %32 {strides = array<i32>} : memref<144x1088xf32, #tpu.memory_space<vmem>>, vector<16x1088xf32>,
    %34 = vector.extract_strided_slice %31 {offsets = [0, 1], sizes = [16, 1088], strides = [1, 1]} : vector<16x1158xf32> to vector<16x1088xf32>
    %c16 = arith.constant 16 : index
    %c0_27 = arith.constant 0 : index
    %35 = vector.load %arg13[%c16, %c0_27] : memref<144x1088xf32, #tpu.memory_space<vmem>>, vector<16x1088xf32>
    tpu.vector_store %arg13[%c16, %c0_27], %34 {strides = array<i32>} : memref<144x1088xf32, #tpu.memory_space<vmem>>, vector<16x1088xf32>,
    %36 = vector.extract_strided_slice %31 {offsets = [0, 2], sizes = [16, 1088], strides = [1, 1]} : vector<16x1158xf32> to vector<16x1088xf32>
    %c32_28 = arith.constant 32 : index
    %c0_29 = arith.constant 0 : index
    %37 = vector.load %arg13[%c32_28, %c0_29] : memref<144x1088xf32, #tpu.memory_space<vmem>>, vector<16x1088xf32>
    tpu.vector_store %arg13[%c32_28, %c0_29], %36 {strides = array<i32>} : memref<144x1088xf32, #tpu.memory_space<vmem>>, vector<16x1088xf32>,
    %38 = vector.extract_strided_slice %31 {offsets = [0, 34], sizes = [16, 1088], strides = [1, 1]} : vector<16x1158xf32> to vector<16x1088xf32>
    %c48 = arith.constant 48 : index
    %c0_30 = arith.constant 0 : index
    %39 = vector.load %arg13[%c48, %c0_30] : memref<144x1088xf32, #tpu.memory_space<vmem>>, vector<16x1088xf32>
    tpu.vector_store %arg13[%c48, %c0_30], %38 {strides = array<i32>} : memref<144x1088xf32, #tpu.memory_space<vmem>>, vector<16x1088xf32>,
    %40 = vector.extract_strided_slice %31 {offsets = [0, 35], sizes = [16, 1088], strides = [1, 1]} : vector<16x1158xf32> to vector<16x1088xf32>
    %c64_31 = arith.constant 64 : index
    %c0_32 = arith.constant 0 : index
    %41 = vector.load %arg13[%c64_31, %c0_32] : memref<144x1088xf32, #tpu.memory_space<vmem>>, vector<16x1088xf32>
    tpu.vector_store %arg13[%c64_31, %c0_32], %40 {strides = array<i32>} : memref<144x1088xf32, #tpu.memory_space<vmem>>, vector<16x1088xf32>,
    %42 = vector.extract_strided_slice %31 {offsets = [0, 36], sizes = [16, 1088], strides = [1, 1]} : vector<16x1158xf32> to vector<16x1088xf32>
    %c80 = arith.constant 80 : index
    %c0_33 = arith.constant 0 : index
    %43 = vector.load %arg13[%c80, %c0_33] : memref<144x1088xf32, #tpu.memory_space<vmem>>, vector<16x1088xf32>
    tpu.vector_store %arg13[%c80, %c0_33], %42 {strides = array<i32>} : memref<144x1088xf32, #tpu.memory_space<vmem>>, vector<16x1088xf32>,
    %44 = vector.extract_strided_slice %31 {offsets = [0, 68], sizes = [16, 1088], strides = [1, 1]} : vector<16x1158xf32> to vector<16x1088xf32>
    %c96_34 = arith.constant 96 : index
    %c0_35 = arith.constant 0 : index
    %45 = vector.load %arg13[%c96_34, %c0_35] : memref<144x1088xf32, #tpu.memory_space<vmem>>, vector<16x1088xf32>
    tpu.vector_store %arg13[%c96_34, %c0_35], %44 {strides = array<i32>} : memref<144x1088xf32, #tpu.memory_space<vmem>>, vector<16x1088xf32>,
    %46 = vector.extract_strided_slice %31 {offsets = [0, 69], sizes = [16, 1088], strides = [1, 1]} : vector<16x1158xf32> to vector<16x1088xf32>
    %c112 = arith.constant 112 : index
    %c0_36 = arith.constant 0 : index
    %47 = vector.load %arg13[%c112, %c0_36] : memref<144x1088xf32, #tpu.memory_space<vmem>>, vector<16x1088xf32>
    tpu.vector_store %arg13[%c112, %c0_36], %46 {strides = array<i32>} : memref<144x1088xf32, #tpu.memory_space<vmem>>, vector<16x1088xf32>,
    %48 = vector.extract_strided_slice %31 {offsets = [0, 70], sizes = [16, 1088], strides = [1, 1]} : vector<16x1158xf32> to vector<16x1088xf32>
    %c128_37 = arith.constant 128 : index
    %c0_38 = arith.constant 0 : index
    %49 = vector.load %arg13[%c128_37, %c0_38] : memref<144x1088xf32, #tpu.memory_space<vmem>>, vector<16x1088xf32>
    tpu.vector_store %arg13[%c128_37, %c0_38], %48 {strides = array<i32>} : memref<144x1088xf32, #tpu.memory_space<vmem>>, vector<16x1088xf32>,
    %c0_39 = arith.constant 0 : index
    %c0_40 = arith.constant 0 : index
    %50 = vector.load %arg7[%c0_39, %c0_40] : memref<16x144xf32, #tpu.memory_space<vmem>>, vector<16x144xf32>
    %c0_41 = arith.constant 0 : index
    %c0_42 = arith.constant 0 : index
    %51 = vector.load %arg13[%c0_41, %c0_42] : memref<144x1088xf32, #tpu.memory_space<vmem>>, vector<144x1088xf32>
    %cst_43 = arith.constant dense<0.000000e+00> : vector<16x1088xf32>
    %52 = tpu.matmul %50, %51, %cst_43 {dimension_numbers = #tpu.dot_dimension_numbers<[1], [0], [0], [1], [0, 0, 1, 1], [], []>} : vector<16x144xf32>, vector<144x1088xf32>, vector<16x1088xf32> -> vector<16x1088xf32>
    %c0_44 = arith.constant 0 : index
    %c0_45 = arith.constant 0 : index
    %53 = vector.load %arg8[%c0_44, %c0_45] : memref<16x1xf32, #tpu.memory_space<vmem>>, vector<16x1xf32>
    %54 = vector.broadcast %53 : vector<16x1xf32> to vector<16x1088xf32>
    %55 = arith.addf %52, %54 : vector<16x1088xf32>
    %cst_46 = arith.constant 0.000000e+00 : f32
    %56 = vector.broadcast %cst_46 : f32 to vector<16x1088xf32>
    %57 = arith.maximumf %55, %56 : vector<16x1088xf32>
    %cst_47 = arith.constant 0.000000e+00 : f32
    %58 = vector.broadcast %cst_47 : f32 to vector<16x70xf32>
    %59 = tpu.concatenate %57, %58 in 1 : vector<16x1088xf32>, vector<16x70xf32> -> vector<16x1158xf32>
    %cst_48 = arith.constant 0.000000e+00 : f32
    %60 = vector.broadcast %cst_48 : f32 to vector<16x1158xf32>
    %61 = vector.extract_strided_slice %59 {offsets = [0, 35], sizes = [16, 1123], strides = [1, 1]} : vector<16x1158xf32> to vector<16x1123xf32>
    %62 = vector.extract_strided_slice %59 {offsets = [0, 0], sizes = [16, 35], strides = [1, 1]} : vector<16x1158xf32> to vector<16x35xf32>
    %63 = tpu.concatenate %61, %62 in 1 : vector<16x1123xf32>, vector<16x35xf32> -> vector<16x1158xf32>
    %c0_49 = arith.constant 0 : index
    %c0_50 = arith.constant 0 : index
    %64 = vector.load %arg4[%c0_49, %c0_50] : memref<9x1158xf32, #tpu.memory_space<vmem>>, vector<1x1158xf32>
    %cst_51 = arith.constant 5.000000e-01 : f32
    %65 = vector.broadcast %cst_51 : f32 to vector<1x1158xf32>
    %66 = arith.cmpf ogt, %64, %65 : vector<1x1158xf32>
    %67 = vector.shape_cast %66 : vector<1x1158xi1> to vector<1x1158xi1>
    %68 = vector.broadcast %67 : vector<1x1158xi1> to vector<16x1158xi1>
    %69 = arith.select %68, %63, %60 : vector<16x1158xi1>, vector<16x1158xf32>
    %70 = vector.extract_strided_slice %59 {offsets = [0, 33], sizes = [16, 1125], strides = [1, 1]} : vector<16x1158xf32> to vector<16x1125xf32>
    %71 = vector.extract_strided_slice %59 {offsets = [0, 0], sizes = [16, 33], strides = [1, 1]} : vector<16x1158xf32> to vector<16x33xf32>
    %72 = tpu.concatenate %70, %71 in 1 : vector<16x1125xf32>, vector<16x33xf32> -> vector<16x1158xf32>
    %c1 = arith.constant 1 : index
    %c0_52 = arith.constant 0 : index
    %73 = vector.load %arg4[%c1, %c0_52] : memref<9x1158xf32, #tpu.memory_space<vmem>>, vector<1x1158xf32>
    %cst_53 = arith.constant 5.000000e-01 : f32
    %74 = vector.broadcast %cst_53 : f32 to vector<1x1158xf32>
    %75 = arith.cmpf ogt, %73, %74 : vector<1x1158xf32>
    %76 = vector.shape_cast %75 : vector<1x1158xi1> to vector<1x1158xi1>
    %77 = vector.broadcast %76 : vector<1x1158xi1> to vector<16x1158xi1>
    %78 = arith.select %77, %72, %69 : vector<16x1158xi1>, vector<16x1158xf32>
    %79 = vector.extract_strided_slice %59 {offsets = [0, 31], sizes = [16, 1127], strides = [1, 1]} : vector<16x1158xf32> to vector<16x1127xf32>
    %80 = vector.extract_strided_slice %59 {offsets = [0, 0], sizes = [16, 31], strides = [1, 1]} : vector<16x1158xf32> to vector<16x31xf32>
    %81 = tpu.concatenate %79, %80 in 1 : vector<16x1127xf32>, vector<16x31xf32> -> vector<16x1158xf32>
    %c2 = arith.constant 2 : index
    %c0_54 = arith.constant 0 : index
    %82 = vector.load %arg4[%c2, %c0_54] : memref<9x1158xf32, #tpu.memory_space<vmem>>, vector<1x1158xf32>
    %cst_55 = arith.constant 5.000000e-01 : f32
    %83 = vector.broadcast %cst_55 : f32 to vector<1x1158xf32>
    %84 = arith.cmpf ogt, %82, %83 : vector<1x1158xf32>
    %85 = vector.shape_cast %84 : vector<1x1158xi1> to vector<1x1158xi1>
    %86 = vector.broadcast %85 : vector<1x1158xi1> to vector<16x1158xi1>
    %87 = arith.select %86, %81, %78 : vector<16x1158xi1>, vector<16x1158xf32>
    %88 = vector.extract_strided_slice %59 {offsets = [0, 1125], sizes = [16, 33], strides = [1, 1]} : vector<16x1158xf32> to vector<16x33xf32>
    %89 = vector.extract_strided_slice %59 {offsets = [0, 0], sizes = [16, 1125], strides = [1, 1]} : vector<16x1158xf32> to vector<16x1125xf32>
    %90 = tpu.concatenate %88, %89 in 1 : vector<16x33xf32>, vector<16x1125xf32> -> vector<16x1158xf32>
    %c3 = arith.constant 3 : index
    %c0_56 = arith.constant 0 : index
    %91 = vector.load %arg4[%c3, %c0_56] : memref<9x1158xf32, #tpu.memory_space<vmem>>, vector<1x1158xf32>
    %cst_57 = arith.constant 5.000000e-01 : f32
    %92 = vector.broadcast %cst_57 : f32 to vector<1x1158xf32>
    %93 = arith.cmpf ogt, %91, %92 : vector<1x1158xf32>
    %94 = vector.shape_cast %93 : vector<1x1158xi1> to vector<1x1158xi1>
    %95 = vector.broadcast %94 : vector<1x1158xi1> to vector<16x1158xi1>
    %96 = arith.select %95, %90, %87 : vector<16x1158xi1>, vector<16x1158xf32>
    %97 = vector.extract_strided_slice %59 {offsets = [0, 1123], sizes = [16, 35], strides = [1, 1]} : vector<16x1158xf32> to vector<16x35xf32>
    %98 = vector.extract_strided_slice %59 {offsets = [0, 0], sizes = [16, 1123], strides = [1, 1]} : vector<16x1158xf32> to vector<16x1123xf32>
    %99 = tpu.concatenate %97, %98 in 1 : vector<16x35xf32>, vector<16x1123xf32> -> vector<16x1158xf32>
    %c4 = arith.constant 4 : index
    %c0_58 = arith.constant 0 : index
    %100 = vector.load %arg4[%c4, %c0_58] : memref<9x1158xf32, #tpu.memory_space<vmem>>, vector<1x1158xf32>
    %cst_59 = arith.constant 5.000000e-01 : f32
    %101 = vector.broadcast %cst_59 : f32 to vector<1x1158xf32>
    %102 = arith.cmpf ogt, %100, %101 : vector<1x1158xf32>
    %103 = vector.shape_cast %102 : vector<1x1158xi1> to vector<1x1158xi1>
    %104 = vector.broadcast %103 : vector<1x1158xi1> to vector<16x1158xi1>
    %105 = arith.select %104, %99, %96 : vector<16x1158xi1>, vector<16x1158xf32>
    %106 = vector.extract_strided_slice %59 {offsets = [0, 1121], sizes = [16, 37], strides = [1, 1]} : vector<16x1158xf32> to vector<16x37xf32>
    %107 = vector.extract_strided_slice %59 {offsets = [0, 0], sizes = [16, 1121], strides = [1, 1]} : vector<16x1158xf32> to vector<16x1121xf32>
    %108 = tpu.concatenate %106, %107 in 1 : vector<16x37xf32>, vector<16x1121xf32> -> vector<16x1158xf32>
    %c5 = arith.constant 5 : index
    %c0_60 = arith.constant 0 : index
    %109 = vector.load %arg4[%c5, %c0_60] : memref<9x1158xf32, #tpu.memory_space<vmem>>, vector<1x1158xf32>
    %cst_61 = arith.constant 5.000000e-01 : f32
    %110 = vector.broadcast %cst_61 : f32 to vector<1x1158xf32>
    %111 = arith.cmpf ogt, %109, %110 : vector<1x1158xf32>
    %112 = vector.shape_cast %111 : vector<1x1158xi1> to vector<1x1158xi1>
    %113 = vector.broadcast %112 : vector<1x1158xi1> to vector<16x1158xi1>
    %114 = arith.select %113, %108, %105 : vector<16x1158xi1>, vector<16x1158xf32>
    %115 = vector.extract_strided_slice %59 {offsets = [0, 1057], sizes = [16, 101], strides = [1, 1]} : vector<16x1158xf32> to vector<16x101xf32>
    %116 = vector.extract_strided_slice %59 {offsets = [0, 0], sizes = [16, 1057], strides = [1, 1]} : vector<16x1158xf32> to vector<16x1057xf32>
    %117 = tpu.concatenate %115, %116 in 1 : vector<16x101xf32>, vector<16x1057xf32> -> vector<16x1158xf32>
    %c6 = arith.constant 6 : index
    %c0_62 = arith.constant 0 : index
    %118 = vector.load %arg4[%c6, %c0_62] : memref<9x1158xf32, #tpu.memory_space<vmem>>, vector<1x1158xf32>
    %cst_63 = arith.constant 5.000000e-01 : f32
    %119 = vector.broadcast %cst_63 : f32 to vector<1x1158xf32>
    %120 = arith.cmpf ogt, %118, %119 : vector<1x1158xf32>
    %121 = vector.shape_cast %120 : vector<1x1158xi1> to vector<1x1158xi1>
    %122 = vector.broadcast %121 : vector<1x1158xi1> to vector<16x1158xi1>
    %123 = arith.select %122, %117, %114 : vector<16x1158xi1>, vector<16x1158xf32>
    %124 = vector.extract_strided_slice %59 {offsets = [0, 1055], sizes = [16, 103], strides = [1, 1]} : vector<16x1158xf32> to vector<16x103xf32>
    %125 = vector.extract_strided_slice %59 {offsets = [0, 0], sizes = [16, 1055], strides = [1, 1]} : vector<16x1158xf32> to vector<16x1055xf32>
    %126 = tpu.concatenate %124, %125 in 1 : vector<16x103xf32>, vector<16x1055xf32> -> vector<16x1158xf32>
    %c7 = arith.constant 7 : index
    %c0_64 = arith.constant 0 : index
    %127 = vector.load %arg4[%c7, %c0_64] : memref<9x1158xf32, #tpu.memory_space<vmem>>, vector<1x1158xf32>
    %cst_65 = arith.constant 5.000000e-01 : f32
    %128 = vector.broadcast %cst_65 : f32 to vector<1x1158xf32>
    %129 = arith.cmpf ogt, %127, %128 : vector<1x1158xf32>
    %130 = vector.shape_cast %129 : vector<1x1158xi1> to vector<1x1158xi1>
    %131 = vector.broadcast %130 : vector<1x1158xi1> to vector<16x1158xi1>
    %132 = arith.select %131, %126, %123 : vector<16x1158xi1>, vector<16x1158xf32>
    %133 = vector.extract_strided_slice %59 {offsets = [0, 1053], sizes = [16, 105], strides = [1, 1]} : vector<16x1158xf32> to vector<16x105xf32>
    %134 = vector.extract_strided_slice %59 {offsets = [0, 0], sizes = [16, 1053], strides = [1, 1]} : vector<16x1158xf32> to vector<16x1053xf32>
    %135 = tpu.concatenate %133, %134 in 1 : vector<16x105xf32>, vector<16x1053xf32> -> vector<16x1158xf32>
    %c8 = arith.constant 8 : index
    %c0_66 = arith.constant 0 : index
    %136 = vector.load %arg4[%c8, %c0_66] : memref<9x1158xf32, #tpu.memory_space<vmem>>, vector<1x1158xf32>
    %cst_67 = arith.constant 5.000000e-01 : f32
    %137 = vector.broadcast %cst_67 : f32 to vector<1x1158xf32>
    %138 = arith.cmpf ogt, %136, %137 : vector<1x1158xf32>
    %139 = vector.shape_cast %138 : vector<1x1158xi1> to vector<1x1158xi1>
    %140 = vector.broadcast %139 : vector<1x1158xi1> to vector<16x1158xi1>
    %141 = arith.select %140, %135, %132 : vector<16x1158xi1>, vector<16x1158xf32>
    %142 = vector.extract_strided_slice %141 {offsets = [0, 0], sizes = [16, 1088], strides = [1, 1]} : vector<16x1158xf32> to vector<16x1088xf32>
    %c0_68 = arith.constant 0 : index
    %c0_69 = arith.constant 0 : index
    %143 = vector.load %arg13[%c0_68, %c0_69] : memref<144x1088xf32, #tpu.memory_space<vmem>>, vector<16x1088xf32>
    tpu.vector_store %arg13[%c0_68, %c0_69], %142 {strides = array<i32>} : memref<144x1088xf32, #tpu.memory_space<vmem>>, vector<16x1088xf32>,
    %144 = vector.extract_strided_slice %141 {offsets = [0, 1], sizes = [16, 1088], strides = [1, 1]} : vector<16x1158xf32> to vector<16x1088xf32>
    %c16_70 = arith.constant 16 : index
    %c0_71 = arith.constant 0 : index
    %145 = vector.load %arg13[%c16_70, %c0_71] : memref<144x1088xf32, #tpu.memory_space<vmem>>, vector<16x1088xf32>
    tpu.vector_store %arg13[%c16_70, %c0_71], %144 {strides = array<i32>} : memref<144x1088xf32, #tpu.memory_space<vmem>>, vector<16x1088xf32>,
    %146 = vector.extract_strided_slice %141 {offsets = [0, 2], sizes = [16, 1088], strides = [1, 1]} : vector<16x1158xf32> to vector<16x1088xf32>
    %c32_72 = arith.constant 32 : index
    %c0_73 = arith.constant 0 : index
    %147 = vector.load %arg13[%c32_72, %c0_73] : memref<144x1088xf32, #tpu.memory_space<vmem>>, vector<16x1088xf32>
    tpu.vector_store %arg13[%c32_72, %c0_73], %146 {strides = array<i32>} : memref<144x1088xf32, #tpu.memory_space<vmem>>, vector<16x1088xf32>,
    %148 = vector.extract_strided_slice %141 {offsets = [0, 34], sizes = [16, 1088], strides = [1, 1]} : vector<16x1158xf32> to vector<16x1088xf32>
    %c48_74 = arith.constant 48 : index
    %c0_75 = arith.constant 0 : index
    %149 = vector.load %arg13[%c48_74, %c0_75] : memref<144x1088xf32, #tpu.memory_space<vmem>>, vector<16x1088xf32>
    tpu.vector_store %arg13[%c48_74, %c0_75], %148 {strides = array<i32>} : memref<144x1088xf32, #tpu.memory_space<vmem>>, vector<16x1088xf32>,
    %150 = vector.extract_strided_slice %141 {offsets = [0, 35], sizes = [16, 1088], strides = [1, 1]} : vector<16x1158xf32> to vector<16x1088xf32>
    %c64_76 = arith.constant 64 : index
    %c0_77 = arith.constant 0 : index
    %151 = vector.load %arg13[%c64_76, %c0_77] : memref<144x1088xf32, #tpu.memory_space<vmem>>, vector<16x1088xf32>
    tpu.vector_store %arg13[%c64_76, %c0_77], %150 {strides = array<i32>} : memref<144x1088xf32, #tpu.memory_space<vmem>>, vector<16x1088xf32>,
    %152 = vector.extract_strided_slice %141 {offsets = [0, 36], sizes = [16, 1088], strides = [1, 1]} : vector<16x1158xf32> to vector<16x1088xf32>
    %c80_78 = arith.constant 80 : index
    %c0_79 = arith.constant 0 : index
    %153 = vector.load %arg13[%c80_78, %c0_79] : memref<144x1088xf32, #tpu.memory_space<vmem>>, vector<16x1088xf32>
    tpu.vector_store %arg13[%c80_78, %c0_79], %152 {strides = array<i32>} : memref<144x1088xf32, #tpu.memory_space<vmem>>, vector<16x1088xf32>,
    %154 = vector.extract_strided_slice %141 {offsets = [0, 68], sizes = [16, 1088], strides = [1, 1]} : vector<16x1158xf32> to vector<16x1088xf32>
    %c96_80 = arith.constant 96 : index
    %c0_81 = arith.constant 0 : index
    %155 = vector.load %arg13[%c96_80, %c0_81] : memref<144x1088xf32, #tpu.memory_space<vmem>>, vector<16x1088xf32>
    tpu.vector_store %arg13[%c96_80, %c0_81], %154 {strides = array<i32>} : memref<144x1088xf32, #tpu.memory_space<vmem>>, vector<16x1088xf32>,
    %156 = vector.extract_strided_slice %141 {offsets = [0, 69], sizes = [16, 1088], strides = [1, 1]} : vector<16x1158xf32> to vector<16x1088xf32>
    %c112_82 = arith.constant 112 : index
    %c0_83 = arith.constant 0 : index
    %157 = vector.load %arg13[%c112_82, %c0_83] : memref<144x1088xf32, #tpu.memory_space<vmem>>, vector<16x1088xf32>
    tpu.vector_store %arg13[%c112_82, %c0_83], %156 {strides = array<i32>} : memref<144x1088xf32, #tpu.memory_space<vmem>>, vector<16x1088xf32>,
    %158 = vector.extract_strided_slice %141 {offsets = [0, 70], sizes = [16, 1088], strides = [1, 1]} : vector<16x1158xf32> to vector<16x1088xf32>
    %c128_84 = arith.constant 128 : index
    %c0_85 = arith.constant 0 : index
    %159 = vector.load %arg13[%c128_84, %c0_85] : memref<144x1088xf32, #tpu.memory_space<vmem>>, vector<16x1088xf32>
    tpu.vector_store %arg13[%c128_84, %c0_85], %158 {strides = array<i32>} : memref<144x1088xf32, #tpu.memory_space<vmem>>, vector<16x1088xf32>,
    %c0_86 = arith.constant 0 : index
    %c0_87 = arith.constant 0 : index
    %160 = vector.load %arg9[%c0_86, %c0_87] : memref<3x144xf32, #tpu.memory_space<vmem>>, vector<3x144xf32>
    %c0_88 = arith.constant 0 : index
    %c0_89 = arith.constant 0 : index
    %161 = vector.load %arg13[%c0_88, %c0_89] : memref<144x1088xf32, #tpu.memory_space<vmem>>, vector<144x1088xf32>
    %cst_90 = arith.constant dense<0.000000e+00> : vector<3x1088xf32>
    %162 = tpu.matmul %160, %161, %cst_90 {dimension_numbers = #tpu.dot_dimension_numbers<[1], [0], [0], [1], [0, 0, 1, 1], [], []>} : vector<3x144xf32>, vector<144x1088xf32>, vector<3x1088xf32> -> vector<3x1088xf32>
    %c0_91 = arith.constant 0 : index
    %c0_92 = arith.constant 0 : index
    %163 = vector.load %arg10[%c0_91, %c0_92] : memref<3x1xf32, #tpu.memory_space<vmem>>, vector<3x1xf32>
    %164 = vector.broadcast %163 : vector<3x1xf32> to vector<3x1088xf32>
    %165 = arith.addf %162, %164 : vector<3x1088xf32>
    %cst_93 = arith.constant 0.000000e+00 : f32
    %166 = vector.broadcast %cst_93 : f32 to vector<3x1088xf32>
    %167 = arith.maximumf %165, %166 : vector<3x1088xf32>
    %c0_94 = arith.constant 0 : index
    %c0_95 = arith.constant 0 : index
    %c0_96 = arith.constant 0 : index
    %168 = vector.load %arg11[%c0_94, %c0_95, %c0_96] : memref<1x3x1088xf32, #tpu.memory_space<vmem>>, vector<1x3x1088xf32>
    %169 = vector.shape_cast %168 : vector<1x3x1088xf32> to vector<3x1088xf32>
    %170 = vector.shape_cast %167 : vector<3x1088xf32> to vector<1x3x1088xf32>
    tpu.vector_store %arg11[%c0_94, %c0_95, %c0_96], %170 {strides = array<i32>} : memref<1x3x1088xf32, #tpu.memory_space<vmem>>, vector<1x3x1088xf32>,
    return
  }
  func.func @transform_0(%arg0: i32) -> (i32, i32, i32) {
    %c0_i32 = arith.constant 0 : i32
    %c0_i32_0 = arith.constant 0 : i32
    %c0_i32_1 = arith.constant 0 : i32
    return %arg0, %c0_i32, %c0_i32_0 : i32, i32, i32
  }
  func.func @transform_1(%arg0: i32) -> (i32, i32) {
    %c0_i32 = arith.constant 0 : i32
    %c0_i32_0 = arith.constant 0 : i32
    %c0_i32_1 = arith.constant 0 : i32
    return %c0_i32, %c0_i32_0 : i32, i32
  }
  func.func @transform_2(%arg0: i32) -> (i32, i32) {
    %c0_i32 = arith.constant 0 : i32
    %c0_i32_0 = arith.constant 0 : i32
    %c0_i32_1 = arith.constant 0 : i32
    return %c0_i32, %c0_i32_0 : i32, i32
  }
  func.func @transform_3(%arg0: i32) -> (i32, i32) {
    %c0_i32 = arith.constant 0 : i32
    %c0_i32_0 = arith.constant 0 : i32
    %c0_i32_1 = arith.constant 0 : i32
    return %c0_i32, %c0_i32_0 : i32, i32
  }
  func.func @transform_4(%arg0: i32) -> (i32, i32) {
    %c0_i32 = arith.constant 0 : i32
    %c0_i32_0 = arith.constant 0 : i32
    %c0_i32_1 = arith.constant 0 : i32
    return %c0_i32, %c0_i32_0 : i32, i32
  }
  func.func @transform_5(%arg0: i32) -> (i32, i32) {
    %c0_i32 = arith.constant 0 : i32
    %c0_i32_0 = arith.constant 0 : i32
    %c0_i32_1 = arith.constant 0 : i32
    return %c0_i32, %c0_i32_0 : i32, i32
  }
  func.func @transform_6(%arg0: i32) -> (i32, i32) {
    %c0_i32 = arith.constant 0 : i32
    %c0_i32_0 = arith.constant 0 : i32
    %c0_i32_1 = arith.constant 0 : i32
    return %c0_i32, %c0_i32_0 : i32, i32
  }
  func.func @transform_7(%arg0: i32) -> (i32, i32) {
    %c0_i32 = arith.constant 0 : i32
    %c0_i32_0 = arith.constant 0 : i32
    %c0_i32_1 = arith.constant 0 : i32
    return %c0_i32, %c0_i32_0 : i32, i32
  }
  func.func @transform_8(%arg0: i32) -> (i32, i32) {
    %c0_i32 = arith.constant 0 : i32
    %c0_i32_0 = arith.constant 0 : i32
    %c0_i32_1 = arith.constant 0 : i32
    return %c0_i32, %c0_i32_0 : i32, i32
  }
  func.func @transform_9(%arg0: i32) -> (i32, i32) {
    %c0_i32 = arith.constant 0 : i32
    %c0_i32_0 = arith.constant 0 : i32
    %c0_i32_1 = arith.constant 0 : i32
    return %c0_i32, %c0_i32_0 : i32, i32
  }
  func.func @transform_10(%arg0: i32) -> (i32, i32, i32) {
    %c0_i32 = arith.constant 0 : i32
    %c0_i32_0 = arith.constant 0 : i32
    %c0_i32_1 = arith.constant 0 : i32
    return %arg0, %c0_i32, %c0_i32_0 : i32, i32, i32
  }
}

</mosaic_0001>

<bundles_post_ra>
// kernel: small_decoder2_16x_forward.1
= control target key start
LH: loop header
LB: loop body
LE: loop exit
PB: predicated region body
PF: predicated region fallthrough
CT: control target
= control target key end

     0   :  { %15 = vsyncpa [#allocation5], 0  ;;  %s13333_s0 = inlined_call_operand.vmem [shape: f32[2,32,256], index: 0, kind: input, shape index: {}]   ;;  %s13334_s1 = inlined_call_operand.hbm [shape: f32[256,324], index: 1, kind: input, shape index: {}]   ;;  %s13335_s2 = inlined_call_operand.hbm [shape: f32[286,1158], index: 2, kind: input, shape index: {}]   ;;  %s13336_s3 = inlined_call_operand.hbm [shape: f32[9,1158], index: 3, kind: input, shape index: {}]   ;;  %s13337_s4 = inlined_call_operand.vmem [shape: f32[16,288], index: 4, kind: input, shape index: {}]   ;;  %s13338_s5 = inlined_call_operand.vmem [shape: f32[16,1], index: 5, kind: input, shape index: {}]   ;;  %s13339_s6 = inlined_call_operand.vmem [shape: f32[16,144], index: 6, kind: input, shape index: {}]   ;;  %s13340_s7 = inlined_call_operand.vmem [shape: f32[16,1], index: 7, kind: input, shape index: {}]   ;;  %s13341_s8 = inlined_call_operand.vmem [shape: f32[3,144], index: 8, kind: input, shape index: {}]   ;;  %s13342_s9 = inlined_call_operand.vmem [shape: f32[3,1], index: 9, kind: input, shape index: {}]   ;;  %s13343_s10 = inlined_call_operand.vmem [shape: f32[2,3,1088], index: 10, kind: output, shape index: {}]  }
   0x1   :  { %16 = vsyncpa [#allocation7], 0  ;;  %s8370_s13 = smov 0  }
   0x2 LB: > { %s8279_s14 = smov [#allocation6]   ;;  %s8376_s16 = sadd.s32 4294967295, %s8277_s13   ;;  %s8277_s13 = sphi %s8370_s13, %s22_s13  }
   0x3   : > { %s293_s15 = sshll.u32 %s8279_s14, 4  ;;  %p6997_p0 = scmp.ge.s32.totalorder %s8277_s13, 1  ;;  %s8385_s15 = int_to_ptr.vmem [resolvable:$true] %s293_s15 }
   0x4   : > { %p268_p1 = scmp.lt.s32.totalorder %s8277_s13, 3  ;;  %p13344_p2 = scmp.eq.s32.totalorder %s8376_s16, 0 }
   0x5   : > { %s8280_s18 = smov [#allocation4]   ;;  %s8281_s21 = smov [#allocation8]  }
   0x6   : > { %p8381_p3 = pnand %p6997_p0, %p268_p1  ;;  %s280_s19 = sshll.u32 %s8280_s18, 4  ;;  %s8389_s19 = int_to_ptr.vmem [resolvable:$true] %s280_s19 }
   0x7   : > { %s8397_s22 = sshll.u32 %s8281_s21, 4  ;;  %s8179_s25 = scalar_lea.hbm %s13335_s2, 46080  ;;  %s307_s22 = int_to_ptr.vmem [resolvable:$true] %s8397_s22 }
   0x8   : > { %s13616_s17 = scalar_select %p8381_p3, 1, 0 }
   0x9   : > { %p8111_p4 = pneg %p8381_p3  ;;  %p8180_p6 = scmp.ne.s32.totalorder %s13335_s2, %s8179_s25 }
   0xa   : > { %p8186_p10 = scmp.lt.u32.totalorder %s8179_s25, %s13335_s2 }
   0xb   : > { %p8393_p5 = pnand %p13344_p2, %p8111_p4 }
   0xd   : > { %p8407_p7 = pneg %p8393_p5 }
   0xf   : > { %p8182_p8 = pnand %p8407_p7, %p8180_p6 }
  0x11   : > { %p8183_p9 = pneg %p8182_p8 }
  0x13   : > { %p8188_p11 = pnand %p8186_p10, %p8183_p9 }
  0x15   : > { %8191 = shalt.err (!%p8188_p11)
}
  0x16   : > { %s8192_s11 = scalar_lea.vmem %s8385_s15, 46080  ;;  %p8200_p1 = scmp.lt.s32.totalorder %s8385_s15, %s8385_s15 }
  0x17   : > { %p8193_p12 = scmp.ne.s32.totalorder %s8385_s15, %s8192_s11  ;;  %p8201_p4 = scmp.lt.s32.totalorder %s8192_s11, %s8192_s11 }
  0x19   : > { %p8195_p13 = pnand %p8193_p12, %p8407_p7  ;;  %p8202_p6 = por %p8201_p4, %p8200_p1 }
  0x1b   : > { %p8196_p0 = pneg %p8195_p13 }
  0x1d   : > { %p8203_p8 = pnand %p8202_p6, %p8196_p0 }
  0x1f   : > { %8206 = shalt.err (!%p8203_p8)
}
  0x20   : > { %s8282_s12 = smov 1280   ;;  %s8283_s14 = smov 80  }
  0x21   : > { %8117 = dma.hbm_to_vmem [thread:$0]  (!%p8393_p5), %s13335_s2, 46080, %s8385_s15, [#allocation7], %s8282_s12, %s8282_s12, %s8283_s14  }
  0x22   : > { %s8207_s25 = scalar_lea.hbm %s13334_s1, 12288 }
  0x23   : > { %p8208_p9 = scmp.ne.s32.totalorder %s13334_s1, %s8207_s25  ;;  %p8214_p12 = scmp.lt.u32.totalorder %s8207_s25, %s13334_s1 }
  0x25   : > { %p8210_p10 = pnand %p8208_p9, %p8407_p7 }
  0x27   : > { %p8211_p11 = pneg %p8210_p10 }
  0x29   : > { %p8216_p13 = pnand %p8214_p12, %p8211_p11 }
  0x2b   : > { %8219 = shalt.err (!%p8216_p13)
}
  0x2c   : > { %s8220_s15 = scalar_lea.vmem %s8389_s19, 12288  ;;  %p8228_p6 = scmp.lt.s32.totalorder %s8389_s19, %s8389_s19 }
  0x2d   : > { %p8221_p0 = scmp.ne.s32.totalorder %s8389_s19, %s8220_s15  ;;  %p8229_p8 = scmp.lt.s32.totalorder %s8220_s15, %s8220_s15 }
  0x2f   : > { %p8223_p1 = pnand %p8221_p0, %p8407_p7  ;;  %p8230_p9 = por %p8229_p8, %p8228_p6 }
  0x31   : > { %p8224_p4 = pneg %p8223_p1 }
  0x33   : > { %p8231_p10 = pnand %p8230_p9, %p8224_p4 }
  0x35   : > { %8234 = shalt.err (!%p8231_p10)
}
  0x36   : > { %s8284_s11 = smov 384   ;;  %s8285_s18 = smov 24  }
  0x37   : > { %8114 = dma.hbm_to_vmem [thread:$0]  (!%p8393_p5), %s13334_s1, 12288, %s8389_s19, [#allocation5], %s8284_s11, %s8284_s11, %s8285_s18  }
  0x38   : > { %s8235_s26 = scalar_lea.hbm %s13336_s3, 2560 }
  0x39   : > { %p8236_p11 = scmp.ne.s32.totalorder %s13336_s3, %s8235_s26  ;;  %p8242_p0 = scmp.lt.u32.totalorder %s8235_s26, %s13336_s3 }
  0x3b   : > { %p8238_p12 = pnand %p8236_p11, %p8407_p7 }
  0x3d   : > { %p8239_p13 = pneg %p8238_p12 }
  0x3f   : > { %p8244_p1 = pnand %p8242_p0, %p8239_p13 }
  0x41   : > { %8247 = shalt.err (!%p8244_p1)
}
  0x42   : > { %s8248_s21 = scalar_lea.vmem %s307_s22, 2560  ;;  %p8256_p9 = scmp.lt.s32.totalorder %s307_s22, %s307_s22 }
  0x43   : > { %p8249_p4 = scmp.ne.s32.totalorder %s307_s22, %s8248_s21  ;;  %p8257_p10 = scmp.lt.s32.totalorder %s8248_s21, %s8248_s21 }
  0x45   : > { %p8251_p6 = pnand %p8249_p4, %p8407_p7  ;;  %p8258_p2 = por %p8257_p10, %p8256_p9 }
  0x47   : > { %p8252_p8 = pneg %p8251_p6 }
  0x49   : > { %p8259_p3 = pnand %p8258_p2, %p8252_p8 }
  0x4b   : > { %8262 = shalt.err (!%p8259_p3)
}
  0x4c   : > { %8120 = dma.hbm_to_vmem [thread:$0]  (!%p8393_p5), %s13336_s3, 2560, %s307_s22, [#allocation7], %s8282_s12, %s8282_s12, %s8283_s14  }
  0x4d   : > { %p13619_p11 = scmp.ne.s32.totalorder %s13616_s17, 0 }
  0x4f   : > { %348 = sbr.rel (%p13619_p11) target bundleno = 2625 (0xa41), region = 60 }
  0x56   : > { %p13620_p7 = scmp.eq.s32.totalorder %s8376_s16, 0 }
  0x58   : > { %8268 = dma.done.wait (%p13620_p7), [#allocation5], 12288   ;;  %p13621_p12 = pmov %p13620_p7 }
  0x59   : > { %p13622_p2 = pmov %p13620_p7 }
  0x5a   : > { %8270 = vsyncadd (%p13621_p12), [#allocation5], 4294955008 }
  0x5b   : > { %8272 = dma.done.wait (%p13622_p2), [#allocation7], 48640   ;;  %p13623_p3 = pmov %p13622_p2 }
  0x5c   : > { %v413_v0 = vld [vmem:[#allocation4 + $0x8] sm:$0xff]  ;;  %v416_v1 = vld [vmem:[#allocation4 + $0x20] sm:$0xff]  ;;  %v462_v2 = vld [vmem:[#allocation4 + $0x190] sm:$0xff]  ;;  %p394_p5 = scmp.lt.s32.totalorder %s8376_s16, 1  ;;  %vm684_vm0 = vcmask 244736   ;;  %s8286_s12 = smov 126  }
  0x5d   : > { %8274 = vsyncadd (%p13623_p3), [#allocation7], 4294918656  ;;  %v7150_v3 = vpack.c.bf16 %v416_v1, %v413_v0  ;;  %v465_v4 = vld [vmem:[#allocation4 + $0x1a8] sm:$0xff]  ;;  %v412_v5 = vld [vmem:[#allocation4] sm:$0xff]  ;;  %s8287_s14 = smov 127   ;;  %s8288_s18 = smov 110  }
  0x5e   : > { %v415_v6 = vld [vmem:[#allocation4 + $0x18] sm:$0xff]  ;;  %v7214_v7 = vpack.c.bf16 %v465_v4, %v462_v2  ;;  %v414_v9 = vld [vmem:[#allocation4 + $0x10] sm:$0xff]  ;;  %v417_v10 = vld [vmem:[#allocation4 + $0x28] sm:$0xff]  ;;  %s14549_s16 = smov (!%p394_p5, %s8376_s16), 1  ;;  %s8289_s23 = smov 109   ;;  %vm13393_vm1 = vcmask 1039360  }
  0x5f   : > { %v7152_v8 = vpack.c.bf16 %v415_v6, %v412_v5  ;;  %v419_v11 = vld [vmem:[#allocation4 + $0x38] sm:$0xff]  ;;  %7151 = vmatprep.subr.bf16.mxu0 %v7150_v3  ;;  %v7216_v12 = vpack.c.bf16 %v417_v10, %v414_v9  ;;  %v422_v13 = vld [vmem:[#allocation4 + $0x50] sm:$0xff]  ;;  %v468_v14 = vld [vmem:[#allocation4 + $0x1c0] sm:$0xff]  ;;  %s7050_s17 = sshll.u32 %s14549_s16, 6  ;;  %s8290_s24 = smov 108   ;;  %vm13392_vm2 = vcmask 1031168  }
  0x60   : > { %v471_v15 = vld [vmem:[#allocation4 + $0x1d8] sm:$0xff]  ;;  %7215 = vmatprep.subr.bf16.mxu1 %v7214_v7  ;;  %v7154_v16 = vpack.c.bf16 %v422_v13, %v419_v11  ;;  %v418_v18 = vld [vmem:[#allocation4 + $0x30] sm:$0xff]  ;;  %v421_v19 = vld [vmem:[#allocation4 + $0x48] sm:$0xff]  ;;  %s8496_s28 = scalar_lea.vmem %s13333_s0, %s7050_s17  ;;  %s8291_s25 = smov 92   ;;  %vm845_vm3 = vcmask 900096   ;;  %vm902_vm4 = vcmask 891904  }
  0x61   : > { %7153 = vmatpush1.bf16.msra.mxu0 %v7152_v8  ;;  %v7218_v17 = vpack.c.bf16 %v471_v15, %v468_v14  ;;  %v420_v20 = vld [vmem:[#allocation4 + $0x40] sm:$0xff]  ;;  %7217 = vmatpush3.bf16.msra.mxu1 %v7216_v12  ;;  %v7156_v21 = vpack.c.bf16 %v421_v19, %v418_v18  ;;  %v423_v22 = vld [vmem:[#allocation4 + $0x58] sm:$0xff]  ;;  %v425_v23 = vld [vmem:[#allocation4 + $0x68] sm:$0xff]  ;;  %s8292_s26 = smov 91   ;;  %s8293_s27 = smov 90   ;;  %vm959_vm5 = vcmask 883712  }
  0x62   : > { %v428_v24 = vld [vmem:[#allocation4 + $0x80] sm:$0xff]  ;;  %7155 = vmatprep.subr.bf16.mxu0 %v7154_v16  ;;  %v7220_v25 = vpack.c.bf16 %v423_v22, %v420_v20  ;;  %v474_v27 = vld [vmem:[#allocation4 + $0x1f0] sm:$0xff]  ;;  %v477_v28 = vld [vmem:[#allocation4 + $0x208] sm:$0xff]  ;;  %vm13384_vm6 = vcmask 752640   ;;  %vm1073_vm7 = vcmask 744448   ;;  %vm1289_vm8 = vcmask 261120  }
  0x63   : > { %7219 = vmatprep.subr.bf16.mxu1 %v7218_v17  ;;  %v7158_v26 = vpack.c.bf16 %v428_v24, %v425_v23  ;;  %v424_v29 = vld [vmem:[#allocation4 + $0x60] sm:$0xff]  ;;  %v7222_v30 = vpack.c.bf16 %v477_v28, %v474_v27  ;;  %v427_v31 = vld [vmem:[#allocation4 + $0x78] sm:$0xff]  ;;  %v426_v32 = vld [vmem:[#allocation4 + $0x70] sm:$0xff]  ;;  %vm1130_vm9 = vcmask 736256   ;;  %vm1972_vm10 = vcmask 1045504   ;;  %s8297_s11 = smov 93  }
  0x64   : > { %v429_v33 = vld [vmem:[#allocation4 + $0x88] sm:$0xff]  ;;  %v7160_v34 = vpack.c.bf16 %v427_v31, %v424_v29  ;;  %v431_v35 = vld [vmem:[#allocation4 + $0x98] sm:$0xff]  ;;  %v434_v36 = vld [vmem:[#allocation4 + $0xb0] sm:$0xff]  ;;  %vm8296_vm11 = vmmov 1   ;;  %s8298_s17 = smov 95   ;;  %s8299_s20 = smov 97  }
  0x65   : > { %7157 = vmatpush1.bf16.msra.mxu0 %v7156_v21  ;;  %v480_v37 = vld [vmem:[#allocation4 + $0x220] sm:$0xff]  ;;  %7221 = vmatpush3.bf16.msra.mxu1 %v7220_v25  ;;  %v7224_v38 = vpack.c.bf16 %v429_v33, %v426_v32  ;;  %v7162_v39 = vpack.c.bf16 %v434_v36, %v431_v35  ;;  %v483_v40 = vld [vmem:[#allocation4 + $0x238] sm:$0xff]  ;;  %v430_v41 = vld [vmem:[#allocation4 + $0x90] sm:$0xff]  ;;  %s8300_s22 = smov 27   ;;  %s8307_s29 = smov 94   ;;  %vm13390_vm13 = vcmask 130048  }
  0x66   : > { %7159 = vmatprep.subr.bf16.mxu0 %v7158_v26  ;;  %v433_v42 = vld [vmem:[#allocation4 + $0xa8] sm:$0xff]  ;;  %7223 = vmatprep.subr.bf16.mxu1 %v7222_v30  ;;  %v7226_v43 = vpack.c.bf16 %v483_v40, %v480_v37  ;;  %v432_v44 = vld [vmem:[#allocation4 + $0xa0] sm:$0xff]  ;;  %v435_v45 = vld [vmem:[#allocation4 + $0xb8] sm:$0xff]  ;;  %vm13394_vm14 = vcmask 523264   ;;  %vm13380_vm15 = vcmask 474112   ;;  %s8309_s30 = smov 101  }
  0x67   : > { %v437_v46 = vld [vmem:[#allocation4 + $0xc8] sm:$0xff]  ;;  %v440_v47 = vld [vmem:[#allocation4 + $0xe0] sm:$0xff]  ;;  %v486_v48 = vld [vmem:[#allocation4 + $0x250] sm:$0xff]  ;;  %v7164_v50 = vpack.c.bf16 %v433_v42, %v430_v41  ;;  %v7228_v51 = vpack.c.bf16 %v435_v45, %v432_v44  ;;  %s8310_s15 = smov 103   ;;  %s8311_s21 = smov 35  }
  0x68   : > { %v489_v49 = vld [vmem:[#allocation4 + $0x268] sm:$0xff]  ;;  %v7166_v52 = vpack.c.bf16 %v440_v47, %v437_v46  ;;  %v436_v53 = vld [vmem:[#allocation4 + $0xc0] sm:$0xff]  ;;  %v439_v54 = vld [vmem:[#allocation4 + $0xd8] sm:$0xff]  ;;  %s8312_s19 = smov 33  }
  0x69   : > { %7161 = vmatpush1.bf16.msra.mxu0 %v7160_v34  ;;  %7225 = vmatpush3.bf16.msra.mxu1 %v7224_v38  ;;  %v438_v55 = vld [vmem:[#allocation4 + $0xd0] sm:$0xff]  ;;  %v7230_v56 = vpack.c.bf16 %v489_v49, %v486_v48  ;;  %v441_v57 = vld [vmem:[#allocation4 + $0xe8] sm:$0xff]  ;;  %v443_v58 = vld [vmem:[#allocation4 + $0xf8] sm:$0xff]  ;;  %v7168_v62 = vpack.c.bf16 %v439_v54, %v436_v53 }
  0x6a   : > { %7163 = vmatprep.subr.bf16.mxu0 %v7162_v39  ;;  %7227 = vmatprep.subr.bf16.mxu1 %v7226_v43  ;;  %v446_v59 = vld [vmem:[#allocation4 + $0x110] sm:$0xff]  ;;  %v492_v60 = vld [vmem:[#allocation4 + $0x280] sm:$0xff]  ;;  %v495_v61 = vld [vmem:[#allocation4 + $0x298] sm:$0xff]  ;;  %v7232_v63 = vpack.c.bf16 %v441_v57, %v438_v55 }
  0x6b   : > { %v7170_v0 = vpack.c.bf16 %v446_v59, %v443_v58  ;;  %v442_v1 = vld [vmem:[#allocation4 + $0xf0] sm:$0xff]  ;;  %v445_v2 = vld [vmem:[#allocation4 + $0x108] sm:$0xff]  ;;  %v444_v3 = vld [vmem:[#allocation4 + $0x100] sm:$0xff]  ;;  %v7234_v4 = vpack.c.bf16 %v495_v61, %v492_v60 }
  0x6c   : > { %v447_v5 = vld [vmem:[#allocation4 + $0x118] sm:$0xff]  ;;  %v449_v6 = vld [vmem:[#allocation4 + $0x128] sm:$0xff]  ;;  %v452_v7 = vld [vmem:[#allocation4 + $0x140] sm:$0xff]  ;;  %v7172_v10 = vpack.c.bf16 %v445_v2, %v442_v1 }
  0x6d   : > { %7165 = vmatpush1.bf16.msra.mxu0 %v7164_v50  ;;  %7229 = vmatpush3.bf16.msra.mxu1 %v7228_v51  ;;  %v498_v8 = vld [vmem:[#allocation4 + $0x2b0] sm:$0xff]  ;;  %v501_v9 = vld [vmem:[#allocation4 + $0x2c8] sm:$0xff]  ;;  %v448_v11 = vld [vmem:[#allocation4 + $0x120] sm:$0xff]  ;;  %v7236_v12 = vpack.c.bf16 %v447_v5, %v444_v3  ;;  %v7174_v13 = vpack.c.bf16 %v452_v7, %v449_v6 }
  0x6e   : > { %7167 = vmatprep.subr.bf16.mxu0 %v7166_v52  ;;  %7231 = vmatprep.subr.bf16.mxu1 %v7230_v56  ;;  %v451_v14 = vld [vmem:[#allocation4 + $0x138] sm:$0xff]  ;;  %v450_v15 = vld [vmem:[#allocation4 + $0x130] sm:$0xff]  ;;  %v7238_v17 = vpack.c.bf16 %v501_v9, %v498_v8  ;;  %v453_v18 = vld [vmem:[#allocation4 + $0x148] sm:$0xff] }
  0x6f   : > { %v405_v16 = vld [vmem:[%s8496_s28 + $0x8] sm:$0xff]  ;;  %v458_v20 = vld [vmem:[#allocation4 + $0x170] sm:$0xff]  ;;  %v504_v21 = vld [vmem:[#allocation4 + $0x2e0] sm:$0xff]  ;;  %v7176_v23 = vpack.c.bf16 %v451_v14, %v448_v11  ;;  %v7240_v24 = vpack.c.bf16 %v453_v18, %v450_v15 }
  0x70   : > { %v455_v19 = vld [vmem:[#allocation4 + $0x158] sm:$0xff]  ;;  %661 = vmatprep.mubr.f32.mxu1 %v405_v16  ;;  %572 = vmatprep.mubr.f32.mxu0 %v405_v16  ;;  %v454_v26 = vld [vmem:[#allocation4 + $0x150] sm:$0xff]  ;;  %v457_v27 = vld [vmem:[#allocation4 + $0x168] sm:$0xff] }
  0x71   : > { %7169 = vmatpush1.bf16.msra.mxu0 %v7168_v62  ;;  %7233 = vmatpush3.bf16.msra.mxu1 %v7232_v63  ;;  %v507_v22 = vld [vmem:[#allocation4 + $0x2f8] sm:$0xff]  ;;  %v7178_v25 = vpack.c.bf16 %v458_v20, %v455_v19  ;;  %v456_v28 = vld [vmem:[#allocation4 + $0x160] sm:$0xff]  ;;  %v461_v31 = vld [vmem:[#allocation4 + $0x188] sm:$0xff]  ;;  %v7180_v33 = vpack.c.bf16 %v457_v27, %v454_v26 }
  0x72   : > { %7171 = vmatprep.subr.bf16.mxu0 %v7170_v0  ;;  %7235 = vmatprep.subr.bf16.mxu1 %v7234_v4  ;;  %v7242_v29 = vpack.c.bf16 %v507_v22, %v504_v21  ;;  %v459_v30 = vld [vmem:[#allocation4 + $0x178] sm:$0xff]  ;;  %v464_v32 = vld [vmem:[#allocation4 + $0x1a0] sm:$0xff]  ;;  %v470_v39 = vld [vmem:[#allocation4 + $0x1d0] sm:$0xff] }
  0x73   : > { %v7244_v34 = vpack.c.bf16 %v459_v30, %v456_v28  ;;  %v7182_v35 = vpack.c.bf16 %v464_v32, %v461_v31  ;;  %v460_v36 = vld [vmem:[#allocation4 + $0x180] sm:$0xff]  ;;  %v463_v37 = vld [vmem:[#allocation4 + $0x198] sm:$0xff]  ;;  %v8500_v41 = vld [vmem:[%s8496_s28] sm:$0xff] }
  0x74   : > { %v467_v38 = vld [vmem:[#allocation4 + $0x1b8] sm:$0xff]  ;;  %v7184_v40 = vpack.c.bf16 %v463_v37, %v460_v36  ;;  %v466_v43 = vld [vmem:[#allocation4 + $0x1b0] sm:$0xff]  ;;  %v469_v44 = vld [vmem:[#allocation4 + $0x1c8] sm:$0xff] }
  0x75   : > { %7173 = vmatpush1.bf16.msra.mxu0 %v7172_v10  ;;  %7237 = vmatpush3.bf16.msra.mxu1 %v7236_v12  ;;  %v7186_v42 = vpack.c.bf16 %v470_v39, %v467_v38  ;;  %v473_v45 = vld [vmem:[#allocation4 + $0x1e8] sm:$0xff]  ;;  %v476_v46 = vld [vmem:[#allocation4 + $0x200] sm:$0xff]  ;;  %v7188_v48 = vpack.c.bf16 %v469_v44, %v466_v43  ;;  %v475_v51 = vld [vmem:[#allocation4 + $0x1f8] sm:$0xff] }
  0x76   : > { %7175 = vmatprep.subr.bf16.mxu0 %v7174_v13  ;;  %7239 = vmatprep.subr.bf16.mxu1 %v7238_v17  ;;  %v8503_v47 = vld [vmem:[%s8496_s28 + $0x18] sm:$0xff]  ;;  %v7190_v49 = vpack.c.bf16 %v476_v46, %v473_v45  ;;  %v472_v50 = vld [vmem:[#allocation4 + $0x1e0] sm:$0xff]  ;;  %v479_v53 = vld [vmem:[#allocation4 + $0x218] sm:$0xff] }
  0x77   : > { %v406_v52 = vld [vmem:[%s8496_s28 + $0x10] sm:$0xff]  ;;  %v482_v54 = vld [vmem:[#allocation4 + $0x230] sm:$0xff]  ;;  %v409_v55 = vld [vmem:[%s8496_s28 + $0x28] sm:$0xff]  ;;  %v7192_v56 = vpack.c.bf16 %v475_v51, %v472_v50 }
  0x78   : > { %v7194_v57 = vpack.c.bf16 %v482_v54, %v479_v53  ;;  %v478_v58 = vld [vmem:[#allocation4 + $0x210] sm:$0xff]  ;;  %v481_v59 = vld [vmem:[#allocation4 + $0x228] sm:$0xff]  ;;  %v488_v62 = vld [vmem:[#allocation4 + $0x260] sm:$0xff] }
  0x79   : > { %7177 = vmatpush1.bf16.msra.mxu0 %v7176_v23  ;;  %7241 = vmatpush3.bf16.msra.mxu1 %v7240_v24  ;;  %v408_v60 = vld [vmem:[%s8496_s28 + $0x20] sm:$0xff]  ;;  %v485_v61 = vld [vmem:[#allocation4 + $0x248] sm:$0xff]  ;;  %v7196_v0 = vpack.c.bf16 %v481_v59, %v478_v58  ;;  %v484_v2 = vld [vmem:[#allocation4 + $0x240] sm:$0xff] }
  0x7a   : > { %7179 = vmatprep.subr.bf16.mxu0 %v7178_v25  ;;  %7243 = vmatprep.subr.bf16.mxu1 %v7242_v29  ;;  %v411_v63 = vld [vmem:[%s8496_s28 + $0x38] sm:$0xff]  ;;  %v7198_v1 = vpack.c.bf16 %v488_v62, %v485_v61  ;;  %v487_v3 = vld [vmem:[#allocation4 + $0x258] sm:$0xff]  ;;  %v410_v4 = vld [vmem:[%s8496_s28 + $0x30] sm:$0xff]  ;;  %s8301_s28 = smov 29  }
  0x7b   : > { %v491_v5 = vld [vmem:[#allocation4 + $0x278] sm:$0xff]  ;;  %v494_v6 = vld [vmem:[#allocation4 + $0x290] sm:$0xff]  ;;  %v7200_v7 = vpack.c.bf16 %v487_v3, %v484_v2  ;;  %v493_v10 = vld [vmem:[#allocation4 + $0x288] sm:$0xff] }
  0x7c   : > { %v7202_v8 = vpack.c.bf16 %v494_v6, %v491_v5  ;;  %v490_v9 = vld [vmem:[#allocation4 + $0x270] sm:$0xff]  ;;  %v497_v11 = vld [vmem:[#allocation4 + $0x2a8] sm:$0xff]  ;;  %v500_v12 = vld [vmem:[#allocation4 + $0x2c0] sm:$0xff] }
  0x7d   : > { %7181 = vmatpush1.bf16.msra.mxu0 %v7180_v33  ;;  %7245 = vmatpush3.bf16.msra.mxu1 %v7244_v34  ;;  %v7204_v13 = vpack.c.bf16 %v493_v10, %v490_v9  ;;  %v7206_v14 = vpack.c.bf16 %v500_v12, %v497_v11  ;;  %v496_v15 = vld [vmem:[#allocation4 + $0x2a0] sm:$0xff]  ;;  %v499_v16 = vld [vmem:[#allocation4 + $0x2b8] sm:$0xff]  ;;  %v506_v18 = vld [vmem:[#allocation4 + $0x2f0] sm:$0xff] }
  0x7e   : > { %7183 = vmatprep.subr.bf16.mxu0 %v7182_v35  ;;  %v503_v17 = vld [vmem:[#allocation4 + $0x2d8] sm:$0xff]  ;;  %v7208_v19 = vpack.c.bf16 %v499_v16, %v496_v15  ;;  %v502_v21 = vld [vmem:[#allocation4 + $0x2d0] sm:$0xff]  ;;  %v505_v22 = vld [vmem:[#allocation4 + $0x2e8] sm:$0xff] }
  0x7f   : > { %v7210_v20 = vpack.c.bf16 %v506_v18, %v503_v17  ;;  %v7212_v23 = vpack.c.bf16 %v505_v22, %v502_v21  ;;  %vm9205_vm12 = vmpackc.low %vm1972_vm10, %vm8296_vm11 }
  0x80   : > { %662 = vmatmul.mubr.f32.vlgmr.msra.gmra.mrb[0].mxu1 %v8500_v41 }
  0x81   : > { %7185 = vmatpush1.bf16.msra.mxu0 %v7184_v40  ;;  %666 = vmatprep.mubr.f32.mxu1 %v8503_v47 }
  0x82   : > { %7187 = vmatprep.subr.bf16.mxu0 %v7186_v42 }
  0x84   : > { %667 = vmatmul.mubr.f32.gmra.mrb[2].mxu1 %v406_v52 }
  0x85   : > { %7189 = vmatpush1.bf16.msra.mxu0 %v7188_v48  ;;  %671 = vmatprep.mubr.f32.mxu1 %v409_v55 }
  0x86   : > { %7191 = vmatprep.subr.bf16.mxu0 %v7190_v49 }
  0x88   : > { %672 = vmatmul.mubr.f32.gmra.mrb[4].mxu1 %v408_v60 }
  0x89   : > { %7193 = vmatpush1.bf16.msra.mxu0 %v7192_v56  ;;  %676 = vmatprep.mubr.f32.mxu1 %v411_v63 }
  0x8a   : > { %7195 = vmatprep.subr.bf16.mxu0 %v7194_v57 }
  0x8c   : > { %677 = vmatmul.mubr.f32.gmra.mrb[6].mxu1 %v410_v4 }
  0x8d   : > { %7197 = vmatpush1.bf16.msra.mxu0 %v7196_v0 }
  0x8e   : > { %7199 = vmatprep.subr.bf16.mxu0 %v7198_v1 }
  0x91   : > { %7201 = vmatpush1.bf16.msra.mxu0 %v7200_v7 }
  0x92   : > { %7203 = vmatprep.subr.bf16.mxu0 %v7202_v8 }
  0x95   : > { %7205 = vmatpush1.bf16.msra.mxu0 %v7204_v13 }
  0x96   : > { %7207 = vmatprep.subr.bf16.mxu0 %v7206_v14  ;;  %v1164_v14 = vld [vmem:[%s13337_s4 + $0x8] sm:$0xff] }
  0x97   : > { %1360 = vmatprep.mubr.f32.mxu1 %v1164_v14 }
  0x99   : > { %7209 = vmatpush1.bf16.msra.mxu0 %v7208_v19 }
  0x9a   : > { %7211 = vmatprep.subr.bf16.mxu0 %v7210_v20 }
  0x9d   : > { %7213 = vmatpush1.bf16.msra.mxu0 %v7212_v23 }
  0xa0   : > { %573 = vmatmul.mubr.f32.vlgmr.msra.gmra.mrb[0].mxu0 %v8500_v41 }
  0xa1   : > { %578 = vmatprep.mubr.f32.mxu0 %v8503_v47 }
  0xa4   : > { %579 = vmatmul.mubr.f32.gmra.mrb[2].mxu0 %v406_v52 }
  0xa5   : > { %584 = vmatprep.mubr.f32.mxu0 %v409_v55 }
  0xa8   : > { %585 = vmatmul.mubr.f32.gmra.mrb[4].mxu0 %v408_v60 }
  0xa9   : > { %590 = vmatprep.mubr.f32.mxu0 %v411_v63 }
  0xac   : > { %591 = vmatmul.mubr.f32.gmra.mrb[6].mxu0 %v410_v4 }
  0xad   : > { %1514 = vmatprep.mubr.f32.mxu0 %v1164_v14 }
 0x153   : > { %v7083_v24 = vpop.f32.mrb[0].mxu1 }
 0x154   : > { %v7084_v25 = vpop.f32.mrb[1].mxu1 }
 0x155   : > { %v8514_v26 = vadd.f32 %v7084_v25, %v7083_v24 }
 0x157   : > { %768 = vrot.lane.b32.xlu1 %v8514_v26, %s8286_s12  ;;  %v7086_v27 = vpop.f32.mrb[2].mxu1  ;;  %711 = vrot.lane.b32.xlu0 %v8514_v26, %s8287_s14  ;;  %685 = vst.msk [vmem:[#allocation2 + $0x10] sm:$0xff] %vm684_vm0, %v8514_v26 }
 0x158   : > { %v7087_v28 = vpop.f32.mrb[3].mxu1 }
 0x159   : > { %v8522_v29 = vadd.f32 %v7087_v28, %v7086_v27 }
 0x15b   : > { %825 = vrot.lane.b32.xlu1 %v8514_v26, %s8288_s18  ;;  %v7089_v30 = vpop.f32.mrb[4].mxu1  ;;  %688 = vst.msk [vmem:[#allocation2 + $0x28] sm:$0xff] %vm684_vm0, %v8522_v29 }
 0x15c   : > { %v7090_v31 = vpop.f32.mrb[5].mxu1 }
 0x15d   : > { %v8528_v32 = vadd.f32 %v7090_v31, %v7089_v30 }
 0x15e   : > { %v1171_v0 = vld [vmem:[#allocation2 + $0x10] sm:$0xff] }
 0x15f   : > { %882 = vrot.lane.b32.xlu1 %v8514_v26, %s8289_s23  ;;  %v7092_v33 = vpop.f32.mrb[6].mxu1  ;;  %691 = vst.msk [vmem:[#allocation2 + $0x40] sm:$0xff] %vm684_vm0, %v8528_v32 }
 0x160   : > { %v7093_v34 = vpop.f32.mrb[7].mxu1 }
 0x161   : > { %v8534_v35 = vadd.f32 %v7093_v34, %v7092_v33 }
 0x162   : > { %v1174_v1 = vld [vmem:[#allocation2 + $0x28] sm:$0xff] }
 0x163   : > { %939 = vrot.lane.b32.xlu1 %v8514_v26, %s8290_s24  ;;  %694 = vst.msk [vmem:[#allocation2 + $0x58] sm:$0xff] %vm684_vm0, %v8534_v35  ;;  %v7320_v7 = vpack.c.bf16 %v1174_v1, %v1171_v0  ;;  %v13346_v1 = vmov 0  }
 0x164   : > { %8171 = vset.pattern.permute.xlu0 %v13346_v1  ;;  %8172 = vset.pattern.permute.xlu1 %v13346_v1 }
 0x167   : > { %996 = vrot.lane.b32.xlu1 %v8514_v26, %s8291_s25 }
 0x16b   : > { %1053 = vrot.lane.b32.xlu1 %v8514_v26, %s8292_s26 }
 0x16f   : > { %717 = vrot.lane.b32.xlu1 %v8522_v29, %s8287_s14 }
 0x173   : > { %v8546_v36 = vpop.f32.mrb[0].mxu0  ;;  %774 = vrot.lane.b32.xlu1 %v8522_v29, %s8286_s12 }
 0x174   : > { %707 = vrot.lane.b32.xlu0 %v8546_v36, %s8287_s14  ;;  %v8552_v37 = vpop.f32.mrb[1].mxu0 }
 0x177   : > { %v8554_v38 = vpop.f32.mrb[2].mxu0  ;;  %831 = vrot.lane.b32.xlu1 %v8522_v29, %s8288_s18 }
 0x178   : > { %764 = vrot.lane.b32.xlu0 %v8546_v36, %s8286_s12  ;;  %v8560_v39 = vpop.f32.mrb[3].mxu0  ;;  %v7248_v40 = vpack.c.bf16 %v8554_v38, %v8546_v36 }
 0x179   : > { %v7246_v41 = vpack.c.bf16 %v8560_v39, %v8552_v37 }
 0x17b   : > { %7247 = vmatprep.subr.bf16.mxu1 %v7246_v41  ;;  %v8566_v42 = vpop.f32.mrb[4].mxu0  ;;  %888 = vrot.lane.b32.xlu1 %v8522_v29, %s8289_s23 }
 0x17c   : > { %821 = vrot.lane.b32.xlu0 %v8546_v36, %s8288_s18  ;;  %v8572_v43 = vpop.f32.mrb[5].mxu0  ;;  %7249 = vmatpush1.bf16.msra.mxu1 %v7248_v40 }
 0x17f   : > { %v8574_v44 = vpop.f32.mrb[6].mxu0  ;;  %945 = vrot.lane.b32.xlu1 %v8522_v29, %s8290_s24 }
 0x180   : > { %878 = vrot.lane.b32.xlu0 %v8546_v36, %s8289_s23  ;;  %v8580_v45 = vpop.f32.mrb[7].mxu0  ;;  %v7252_v46 = vpack.c.bf16 %v8574_v44, %v8566_v42 }
 0x181   : > { %v7250_v47 = vpack.c.bf16 %v8580_v45, %v8572_v43 }
 0x183   : > { %7251 = vmatprep.subr.bf16.mxu1 %v7250_v47  ;;  %1002 = vrot.lane.b32.xlu1 %v8522_v29, %s8291_s25 }
 0x184   : > { %935 = vrot.lane.b32.xlu0 %v8546_v36, %s8290_s24  ;;  %7253 = vmatpush1.bf16.msra.mxu1 %v7252_v46 }
 0x187   : > { %1059 = vrot.lane.b32.xlu1 %v8522_v29, %s8292_s26 }
 0x188   : > { %992 = vrot.lane.b32.xlu0 %v8546_v36, %s8291_s25 }
 0x18b   : > { %723 = vrot.lane.b32.xlu1 %v8528_v32, %s8287_s14 }
 0x18c   : > { %709 = vrot.lane.b32.xlu0 %v8552_v37, %s8287_s14 }
 0x18f   : > { %780 = vrot.lane.b32.xlu1 %v8528_v32, %s8286_s12 }
 0x190   : > { %766 = vrot.lane.b32.xlu0 %v8552_v37, %s8286_s12 }
 0x193   : > { %837 = vrot.lane.b32.xlu1 %v8528_v32, %s8288_s18 }
 0x194   : > { %823 = vrot.lane.b32.xlu0 %v8552_v37, %s8288_s18 }
 0x197   : > { %894 = vrot.lane.b32.xlu1 %v8528_v32, %s8289_s23 }
 0x198   : > { %880 = vrot.lane.b32.xlu0 %v8552_v37, %s8289_s23 }
 0x19b   : > { %951 = vrot.lane.b32.xlu1 %v8528_v32, %s8290_s24 }
 0x19c   : > { %937 = vrot.lane.b32.xlu0 %v8552_v37, %s8290_s24 }
 0x19f   : > { %1008 = vrot.lane.b32.xlu1 %v8528_v32, %s8291_s25 }
 0x1a0   : > { %994 = vrot.lane.b32.xlu0 %v8552_v37, %s8291_s25 }
 0x1a3   : > { %729 = vrot.lane.b32.xlu1 %v8534_v35, %s8287_s14 }
 0x1a4   : > { %1051 = vrot.lane.b32.xlu0 %v8552_v37, %s8292_s26 }
 0x1a7   : > { %786 = vrot.lane.b32.xlu1 %v8534_v35, %s8286_s12 }
 0x1a8   : > { %772 = vrot.lane.b32.xlu0 %v8560_v39, %s8286_s12 }
 0x1ab   : > { %843 = vrot.lane.b32.xlu1 %v8534_v35, %s8288_s18 }
 0x1ac   : > { %829 = vrot.lane.b32.xlu0 %v8560_v39, %s8288_s18 }
 0x1af   : > { %900 = vrot.lane.b32.xlu1 %v8534_v35, %s8289_s23 }
 0x1b0   : > { %886 = vrot.lane.b32.xlu0 %v8560_v39, %s8289_s23 }
 0x1b3   : > { %957 = vrot.lane.b32.xlu1 %v8534_v35, %s8290_s24 }
 0x1b4   : > { %943 = vrot.lane.b32.xlu0 %v8560_v39, %s8290_s24 }
 0x1b7   : > { %1014 = vrot.lane.b32.xlu1 %v8534_v35, %s8291_s25 }
 0x1b8   : > { %1000 = vrot.lane.b32.xlu0 %v8560_v39, %s8291_s25 }
 0x1bb   : > { %713 = vrot.lane.b32.xlu1 %v8554_v38, %s8287_s14 }
 0x1bc   : > { %1057 = vrot.lane.b32.xlu0 %v8560_v39, %s8292_s26 }
 0x1bf   : > { %770 = vrot.lane.b32.xlu1 %v8554_v38, %s8286_s12 }
 0x1c0   : > { %719 = vrot.lane.b32.xlu0 %v8566_v42, %s8287_s14 }
 0x1c3   : > { %827 = vrot.lane.b32.xlu1 %v8554_v38, %s8288_s18 }
 0x1c4   : > { %776 = vrot.lane.b32.xlu0 %v8566_v42, %s8286_s12 }
 0x1c7   : > { %884 = vrot.lane.b32.xlu1 %v8554_v38, %s8289_s23 }
 0x1c8   : > { %833 = vrot.lane.b32.xlu0 %v8566_v42, %s8288_s18 }
 0x1c9   : > { %v8658_v48 = vpop.permute.xlu1 %768  ;;  %v8660_v49 = vpop.permute.xlu0 %711 }
 0x1ca   : > { %811 = vst.msk [vmem:[#allocation2 + $0xd0] sm:$0xff] %vm684_vm0, %v8658_v48  ;;  %754 = vst.msk [vmem:[#allocation2 + $0x70] sm:$0xff] %vm684_vm0, %v8660_v49 }
 0x1cb   : > { %941 = vrot.lane.b32.xlu1 %v8554_v38, %s8290_s24 }
 0x1cc   : > { %890 = vrot.lane.b32.xlu0 %v8566_v42, %s8289_s23 }
 0x1cd   : > { %v8670_v50 = vpop.permute.xlu1 %825 }
 0x1ce   : > { %868 = vst.msk [vmem:[#allocation2 + $0x130] sm:$0xff] %vm684_vm0, %v8670_v50 }
 0x1cf   : > { %998 = vrot.lane.b32.xlu1 %v8554_v38, %s8291_s25 }
 0x1d0   : > { %947 = vrot.lane.b32.xlu0 %v8566_v42, %s8290_s24 }
 0x1d1   : > { %v8678_v51 = vpop.permute.xlu1 %882 }
 0x1d2   : > { %925 = vst.msk [vmem:[#allocation2 + $0x190] sm:$0xff] %vm684_vm0, %v8678_v51 }
 0x1d3   : > { %715 = vrot.lane.b32.xlu1 %v8560_v39, %s8287_s14 }
 0x1d4   : > { %1004 = vrot.lane.b32.xlu0 %v8566_v42, %s8291_s25 }
 0x1d5   : > { %v8686_v52 = vpop.permute.xlu1 %939 }
 0x1d6   : > { %982 = vst.msk [vmem:[#allocation2 + $0x1f0] sm:$0xff] %vm684_vm0, %v8686_v52 }
 0x1d7   : > { %725 = vrot.lane.b32.xlu1 %v8574_v44, %s8287_s14 }
 0x1d8   : > { %721 = vrot.lane.b32.xlu0 %v8572_v43, %s8287_s14 }
 0x1d9   : > { %v8694_v53 = vpop.permute.xlu1 %996  ;;  %v1219_v4 = vld [vmem:[#allocation2 + $0x190] sm:$0xff] }
 0x1da   : > { %1039 = vst.msk [vmem:[#allocation2 + $0x250] sm:$0xff] %vm684_vm0, %v8694_v53 }
 0x1db   : > { %782 = vrot.lane.b32.xlu1 %v8574_v44, %s8286_s12 }
 0x1dc   : > { %778 = vrot.lane.b32.xlu0 %v8572_v43, %s8286_s12 }
 0x1dd   : > { %v8702_v54 = vpop.permute.xlu1 %1053 }
 0x1de   : > { %1096 = vst.msk [vmem:[#allocation2 + $0x2b0] sm:$0xff] %vm684_vm0, %v8702_v54 }
 0x1df   : > { %839 = vrot.lane.b32.xlu1 %v8574_v44, %s8288_s18 }
 0x1e0   : > { %835 = vrot.lane.b32.xlu0 %v8572_v43, %s8288_s18 }
 0x1e1   : > { %v8710_v55 = vpop.permute.xlu1 %717 }
 0x1e2   : > { %757 = vst.msk [vmem:[#allocation2 + $0x88] sm:$0xff] %vm684_vm0, %v8710_v55 }
 0x1e3   : > { %896 = vrot.lane.b32.xlu1 %v8574_v44, %s8289_s23 }
 0x1e4   : > { %892 = vrot.lane.b32.xlu0 %v8572_v43, %s8289_s23 }
 0x1e5   : > { %v8718_v56 = vpop.permute.xlu1 %774 }
 0x1e6   : > { %v708_v57 = vpop.permute.xlu0 %707  ;;  %814 = vst.msk [vmem:[#allocation2 + $0xe8] sm:$0xff] %vm684_vm0, %v8718_v56 }
 0x1e7   : > { %953 = vrot.lane.b32.xlu1 %v8574_v44, %s8290_s24 }
 0x1e8   : > { %949 = vrot.lane.b32.xlu0 %v8572_v43, %s8290_s24 }
 0x1e9   : > { %v8726_v58 = vpop.permute.xlu1 %831  ;;  %v1186_v14 = vld [vmem:[#allocation2 + $0x88] sm:$0xff] }
 0x1ea   : > { %v765_v59 = vpop.permute.xlu0 %764  ;;  %871 = vst.msk [vmem:[#allocation2 + $0x148] sm:$0xff] %vm684_vm0, %v8726_v58 }
 0x1eb   : > { %1010 = vrot.lane.b32.xlu1 %v8574_v44, %s8291_s25 }
 0x1ec   : > { %1006 = vrot.lane.b32.xlu0 %v8572_v43, %s8291_s25 }
 0x1ed   : > { %v8734_v60 = vpop.permute.xlu1 %888 }
 0x1ee   : > { %v822_v61 = vpop.permute.xlu0 %821  ;;  %928 = vst.msk [vmem:[#allocation2 + $0x1a8] sm:$0xff] %vm684_vm0, %v8734_v60 }
 0x1ef   : > { %1055 = vrot.lane.b32.xlu1 %v8554_v38, %s8292_s26 }
 0x1f0   : > { %727 = vrot.lane.b32.xlu0 %v8580_v45, %s8287_s14 }
 0x1f1   : > { %v8742_v62 = vpop.permute.xlu1 %945 }
 0x1f2   : > { %v879_v63 = vpop.permute.xlu0 %878  ;;  %985 = vst.msk [vmem:[#allocation2 + $0x208] sm:$0xff] %vm684_vm0, %v8742_v62 }
 0x1f3   : > { %1065 = vrot.lane.b32.xlu1 %v8528_v32, %s8292_s26 }
 0x1f4   : > { %1049 = vrot.lane.b32.xlu0 %v8546_v36, %s8292_s26 }
 0x1f5   : > { %v8750_v2 = vpop.permute.xlu1 %1002  ;;  %v1222_v5 = vld [vmem:[#allocation2 + $0x1a8] sm:$0xff] }
 0x1f6   : > { %v936_v3 = vpop.permute.xlu0 %935  ;;  %1042 = vst.msk [vmem:[#allocation2 + $0x268] sm:$0xff] %vm684_vm0, %v8750_v2  ;;  %v7318_v6 = vpack.c.bf16 %v1222_v5, %v1219_v4  ;;  %v1231_v5 = vld [vmem:[#allocation2 + $0x1f0] sm:$0xff] }
 0x1f7   : > { %1071 = vrot.lane.b32.xlu1 %v8534_v35, %s8292_s26 }
 0x1f8   : > { %784 = vrot.lane.b32.xlu0 %v8580_v45, %s8286_s12  ;;  %7319 = vmatprep.subr.bf16.mxu0 %v7318_v6 }
 0x1f9   : > { %v8758_v8 = vpop.permute.xlu1 %1059  ;;  %7321 = vmatpush3.bf16.msra.mxu0 %v7320_v7  ;;  %v3705_v7 = vld [vmem:[%s13340_s7] sm:$0xff] }
 0x1fa   : > { %v993_v9 = vpop.permute.xlu0 %992  ;;  %1099 = vst.msk [vmem:[#allocation2 + $0x2c8] sm:$0xff] %vm684_vm0, %v8758_v8 }
 0x1fb   : > { %1067 = vrot.lane.b32.xlu1 %v8574_v44, %s8292_s26 }
 0x1fc   : > { %1063 = vrot.lane.b32.xlu0 %v8572_v43, %s8292_s26 }
 0x1fd   : > { %v8766_v10 = vpop.permute.xlu1 %723 }
 0x1fe   : > { %v710_v11 = vpop.permute.xlu0 %709  ;;  %760 = vst.msk [vmem:[#allocation2 + $0xa0] sm:$0xff] %vm684_vm0, %v8766_v10 }
 0x1ff   : > { %v8771_v12 = vsel %vm13393_vm1, %v708_v57, %v710_v11  ;;  %v8775_v13 = vsel %vm13393_vm1, %v710_v11, %v8660_v49  ;;  %1110 = vrot.lane.b32.xlu1 %v8514_v26, %s8293_s27  ;;  %v1177_v57 = vld [vmem:[#allocation2 + $0x40] sm:$0xff]  ;;  %v1183_v11 = vld [vmem:[#allocation2 + $0x70] sm:$0xff] }
 0x200   : > { %841 = vrot.lane.b32.xlu0 %v8580_v45, %s8288_s18  ;;  %s8302_s18 = smov 31  }
 0x201   : > { %v8784_v15 = vpop.permute.xlu1 %780 }
 0x202   : > { %v767_v16 = vpop.permute.xlu0 %766  ;;  %817 = vst.msk [vmem:[#allocation2 + $0x100] sm:$0xff] %vm684_vm0, %v8784_v15 }
 0x203   : > { %v8789_v17 = vsel %vm13392_vm2, %v765_v59, %v767_v16  ;;  %v8793_v18 = vsel %vm13392_vm2, %v767_v16, %v8658_v48  ;;  %1116 = vrot.lane.b32.xlu1 %v8522_v29, %s8293_s27  ;;  %v1278_v59 = vld [vmem:[%s13338_s5 + $0x8] sm:$0xff] }
 0x204   : > { %1061 = vrot.lane.b32.xlu0 %v8566_v42, %s8292_s26 }
 0x205   : > { %v8799_v19 = vpop.permute.xlu1 %837 }
 0x206   : > { %v824_v20 = vpop.permute.xlu0 %823  ;;  %874 = vst.msk [vmem:[#allocation2 + $0x160] sm:$0xff] %vm684_vm0, %v8799_v19 }
 0x207   : > { %v8804_v21 = vsel %vm845_vm3, %v822_v61, %v824_v20  ;;  %v8808_v22 = vsel %vm845_vm3, %v824_v20, %v8670_v50  ;;  %1112 = vrot.lane.b32.xlu1 %v8554_v38, %s8293_s27 }
 0x208   : > { %898 = vrot.lane.b32.xlu0 %v8580_v45, %s8289_s23  ;;  %s8303_s23 = smov 99  }
 0x209   : > { %v8814_v23 = vpop.permute.xlu1 %894 }
 0x20a   : > { %v881_v24 = vpop.permute.xlu0 %880  ;;  %931 = vst.msk [vmem:[#allocation2 + $0x1c0] sm:$0xff] %vm684_vm0, %v8814_v23 }
 0x20b   : > { %v8819_v25 = vsel %vm902_vm4, %v879_v63, %v881_v24  ;;  %v8823_v26 = vsel %vm902_vm4, %v881_v24, %v8678_v51  ;;  %1122 = vrot.lane.b32.xlu1 %v8528_v32, %s8293_s27 }
 0x20c   : > { %1108 = vrot.lane.b32.xlu0 %v8552_v37, %s8293_s27 }
 0x20d   : > { %v8829_v27 = vpop.permute.xlu1 %951 }
 0x20e   : > { %v938_v28 = vpop.permute.xlu0 %937  ;;  %988 = vst.msk [vmem:[#allocation2 + $0x220] sm:$0xff] %vm684_vm0, %v8829_v27 }
 0x20f   : > { %v8834_v29 = vsel %vm959_vm5, %v936_v3, %v938_v28  ;;  %v8838_v30 = vsel %vm959_vm5, %v938_v28, %v8686_v52  ;;  %1128 = vrot.lane.b32.xlu1 %v8534_v35, %s8293_s27  ;;  %v7328_v28 = vpack.c.bf16 %v1186_v14, %v1183_v11  ;;  %v1198_v11 = vld [vmem:[#allocation2 + $0xe8] sm:$0xff] }
 0x210   : > { %955 = vrot.lane.b32.xlu0 %v8580_v45, %s8290_s24  ;;  %s8304_s24 = smov 60  }
 0x211   : > { %v8844_v31 = vpop.permute.xlu1 %1008  ;;  %v1225_v63 = vld [vmem:[#allocation2 + $0x1c0] sm:$0xff] }
 0x212   : > { %v995_v32 = vpop.permute.xlu0 %994  ;;  %1045 = vst.msk [vmem:[#allocation2 + $0x280] sm:$0xff] %vm684_vm0, %v8844_v31 }
 0x213   : > { %v8849_v33 = vsel %vm13384_vm6, %v993_v9, %v995_v32  ;;  %v8853_v34 = vsel %vm13384_vm6, %v995_v32, %v8694_v53  ;;  %1124 = vrot.lane.b32.xlu1 %v8574_v44, %s8293_s27 }
 0x214   : > { %1114 = vrot.lane.b32.xlu0 %v8560_v39, %s8293_s27 }
 0x215   : > { %v8859_v35 = vpop.permute.xlu1 %729  ;;  %v1237_v32 = vld [vmem:[#allocation2 + $0x220] sm:$0xff] }
 0x216   : > { %v8861_v37 = vpop.permute.xlu0 %1051  ;;  %763 = vst.msk [vmem:[#allocation2 + $0xb8] sm:$0xff] %vm684_vm0, %v8859_v35 }
 0x217   : > { %v8868_v38 = vsel %vm1073_vm7, %v8861_v37, %v8702_v54  ;;  %1286 = vperm.xlu1 %8172, %v1278_v59   ;;  %v1189_v59 = vld [vmem:[#allocation2 + $0xa0] sm:$0xff] }
 0x218   : > { %1012 = vrot.lane.b32.xlu0 %v8580_v45, %s8291_s25 }
 0x219   : > { %v8872_v40 = vpop.permute.xlu1 %786 }
 0x21a   : > { %v8874_v41 = vpop.permute.xlu0 %772  ;;  %820 = vst.msk [vmem:[#allocation2 + $0x118] sm:$0xff] %vm684_vm0, %v8872_v40 }
 0x21b   : > { %v8881_v39 = vsel %vm13392_vm2, %v8874_v41, %v8718_v56  ;;  %3709 = vperm.xlu1 %8172, %v3705_v7   ;;  %v1243_v7 = vld [vmem:[#allocation2 + $0x250] sm:$0xff] }
 0x21c   : > { %1106 = vrot.lane.b32.xlu0 %v8546_v36, %s8293_s27  ;;  %v7262_v44 = vpack.c.bf16 %v8881_v39, %v8793_v18 }
 0x21d   : > { %v8887_v46 = vpop.permute.xlu1 %843 }
 0x21e   : > { %v8889_v47 = vpop.permute.xlu0 %829  ;;  %877 = vst.msk [vmem:[#allocation2 + $0x178] sm:$0xff] %vm684_vm0, %v8887_v46 }
 0x21f   : > { %v8896_v48 = vsel %vm845_vm3, %v8889_v47, %v8726_v58  ;;  %v1180_v58 = vld [vmem:[#allocation2 + $0x58] sm:$0xff] }
 0x220   : > { %1069 = vrot.lane.b32.xlu0 %v8580_v45, %s8292_s26  ;;  %v7270_v36 = vpack.c.bf16 %v8896_v48, %v8808_v22  ;;  %v7324_v4 = vpack.c.bf16 %v1180_v58, %v1177_v57  ;;  %v1249_v57 = vld [vmem:[#allocation2 + $0x280] sm:$0xff]  ;;  %s13372_s26 = smov 59  }
 0x221   : > { %v8902_v49 = vpop.permute.xlu1 %900 }
 0x222   : > { %v8904_v50 = vpop.permute.xlu0 %886  ;;  %934 = vst.msk [vmem:[#allocation2 + $0x1d8] sm:$0xff] %vm684_vm0, %v8902_v49 }
 0x223   : > { %v8911_v51 = vsel %vm902_vm4, %v8904_v50, %v8734_v60 }
 0x224   : > { %1120 = vrot.lane.b32.xlu0 %v8572_v43, %s8293_s27  ;;  %v7278_v52 = vpack.c.bf16 %v8911_v51, %v8823_v26 }
 0x225   : > { %v8917_v53 = vpop.permute.xlu1 %957  ;;  %v1216_v39 = vld [vmem:[#allocation2 + $0x178] sm:$0xff] }
 0x226   : > { %v8919_v54 = vpop.permute.xlu0 %943  ;;  %991 = vst.msk [vmem:[#allocation2 + $0x238] sm:$0xff] %vm684_vm0, %v8917_v53 }
 0x227   : > { %v8926_v56 = vsel %vm959_vm5, %v8919_v54, %v8742_v62  ;;  %v1234_v62 = vld [vmem:[#allocation2 + $0x208] sm:$0xff] }
 0x228   : > { %1126 = vrot.lane.b32.xlu0 %v8580_v45, %s8293_s27  ;;  %v7286_v43 = vpack.c.bf16 %v8926_v56, %v8838_v30  ;;  %v7326_v9 = vpack.c.bf16 %v1234_v62, %v1231_v5 }
 0x229   : > { %v8935_v60 = vpop.permute.xlu1 %1014  ;;  %v1228_v0 = vld [vmem:[#allocation2 + $0x1d8] sm:$0xff] }
 0x22a   : > { %v8937_v61 = vpop.permute.xlu0 %1000  ;;  %1048 = vst.msk [vmem:[#allocation2 + $0x298] sm:$0xff] %vm684_vm0, %v8935_v60  ;;  %v7322_v3 = vpack.c.bf16 %v1228_v0, %v1225_v63  ;;  %v1192_v63 = vld [vmem:[#allocation2 + $0xb8] sm:$0xff]  ;;  %v3706_v0 = vld [vmem:[%s13340_s7 + $0x8] sm:$0xff] }
 0x22b   : > { %v8946_v45 = vsel %vm13384_vm6, %v8937_v61, %v8750_v2  ;;  %v1277_v2 = vld [vmem:[%s13338_s5] sm:$0xff]  ;;  %v7332_v5 = vpack.c.bf16 %v1192_v63, %v1189_v59  ;;  %v1258_v63 = vld [vmem:[#allocation2 + $0x2c8] sm:$0xff] }
 0x22c   : > { %1118 = vrot.lane.b32.xlu0 %v8566_v42, %s8293_s27  ;;  %7323 = vmatprep.subr.bf16.mxu0 %v7322_v3  ;;  %s13370_s27 = smov 58  }
 0x22d   : > { %7325 = vmatpush3.bf16.msra.mxu0 %v7324_v4  ;;  %v8958_v16 = vpop.permute.xlu1 %713  ;;  %v1240_v20 = vld [vmem:[#allocation2 + $0x238] sm:$0xff]  ;;  %v1246_v4 = vld [vmem:[#allocation2 + $0x268] sm:$0xff] }
 0x22e   : > { %v8960_v42 = vpop.permute.xlu0 %1057  ;;  %7327 = vmatprep.subr.bf16.mxu0 %v7326_v9  ;;  %v7330_v58 = vpack.c.bf16 %v1240_v20, %v1237_v32  ;;  %v7334_v9 = vpack.c.bf16 %v1246_v4, %v1243_v7  ;;  %v1195_v32 = vld [vmem:[#allocation2 + $0xd0] sm:$0xff]  ;;  %v1201_v4 = vld [vmem:[#allocation2 + $0x100] sm:$0xff] }
 0x22f   : > { %v8965_v24 = vsel %vm1073_vm7, %v8960_v42, %v8758_v8  ;;  %v7336_v1 = vpack.c.bf16 %v1198_v11, %v1195_v32  ;;  %v1255_v7 = vld [vmem:[#allocation2 + $0x2b0] sm:$0xff] }
 0x230   : > { %1281 = vperm.xlu0 %8171, %v1277_v2  }
 0x231   : > { %7329 = vmatpush3.bf16.msra.mxu0 %v7328_v28  ;;  %v771_v62 = vpop.permute.xlu1 %770  ;;  %v1252_v20 = vld [vmem:[#allocation2 + $0x298] sm:$0xff] }
 0x232   : > { %v720_v3 = vpop.permute.xlu0 %719  ;;  %v8974_v8 = vsel %vm13392_vm2, %v771_v62, %v8874_v41  ;;  %7331 = vmatprep.subr.bf16.mxu0 %v7330_v58  ;;  %v7338_v41 = vpack.c.bf16 %v1252_v20, %v1249_v57  ;;  %v1204_v62 = vld [vmem:[#allocation2 + $0x118] sm:$0xff] }
 0x234   : > { %3714 = vperm.xlu0 %8171, %v3706_v0  }
 0x235   : > { %7333 = vmatpush3.bf16.msra.mxu0 %v7332_v5  ;;  %v828_v14 = vpop.permute.xlu1 %827  ;;  %v7340_v5 = vpack.c.bf16 %v1204_v62, %v1201_v4 }
 0x236   : > { %v777_v2 = vpop.permute.xlu0 %776  ;;  %v8978_v28 = vsel %vm845_vm3, %v828_v14, %v8889_v47  ;;  %7335 = vmatprep.subr.bf16.mxu0 %v7334_v9  ;;  %v7342_v47 = vpack.c.bf16 %v1258_v63, %v1255_v7  ;;  %v1210_v14 = vld [vmem:[#allocation2 + $0x148] sm:$0xff] }
 0x239   : > { %7337 = vmatpush3.bf16.msra.mxu0 %v7336_v1  ;;  %v885_v58 = vpop.permute.xlu1 %884  ;;  %v1207_v1 = vld [vmem:[#allocation2 + $0x130] sm:$0xff] }
 0x23a   : > { %v834_v59 = vpop.permute.xlu0 %833  ;;  %v8982_v0 = vsel %vm902_vm4, %v885_v58, %v8904_v50  ;;  %7339 = vmatprep.subr.bf16.mxu0 %v7338_v41  ;;  %v7344_v20 = vpack.c.bf16 %v1210_v14, %v1207_v1 }
 0x23d   : > { %7341 = vmatpush3.bf16.msra.mxu0 %v7340_v5  ;;  %v942_v9 = vpop.permute.xlu1 %941 }
 0x23e   : > { %v891_v11 = vpop.permute.xlu0 %890  ;;  %v8986_v57 = vsel %vm959_vm5, %v942_v9, %v8919_v54  ;;  %7343 = vmatprep.subr.bf16.mxu0 %v7342_v47 }
 0x23f   : > { %v7288_v50 = vpack.c.bf16 %v8986_v57, %v8834_v29 }
 0x241   : > { %7345 = vmatpush3.bf16.msra.mxu0 %v7344_v20  ;;  %v999_v32 = vpop.permute.xlu1 %998 }
 0x242   : > { %v948_v41 = vpop.permute.xlu0 %947  ;;  %v8992_v62 = vsel %vm13384_vm6, %v999_v32, %v8937_v61 }
 0x245   : > { %v716_v63 = vpop.permute.xlu1 %715 }
 0x246   : > { %v1005_v4 = vpop.permute.xlu0 %1004  ;;  %v734_v54 = vsel %vm13393_vm1, %v8958_v16, %v716_v63  ;;  %v735_v5 = vsel %vm13393_vm1, %v716_v63, %v8710_v55 }
 0x247   : > { %v7254_v7 = vpack.c.bf16 %v735_v5, %v8775_v13  ;;  %v7256_v47 = vpack.c.bf16 %v734_v54, %v8771_v12 }
 0x249   : > { %v726_v14 = vpop.permute.xlu1 %725  ;;  %7255 = vmatprep.subr.bf16.mxu1 %v7254_v7 }
 0x24a   : > { %v722_v9 = vpop.permute.xlu0 %721  ;;  %7257 = vmatpush1.bf16.msra.mxu1 %v7256_v47 }
 0x24b   : > { %v736_v61 = vsel %vm13393_vm1, %v720_v3, %v722_v9  ;;  %v737_v1 = vsel %vm13393_vm1, %v722_v9, %v8766_v10 }
 0x24d   : > { %v783_v20 = vpop.permute.xlu1 %782 }
 0x24e   : > { %v779_v32 = vpop.permute.xlu0 %778 }
 0x24f   : > { %v793_v16 = vsel %vm13392_vm2, %v777_v2, %v779_v32  ;;  %v794_v55 = vsel %vm13392_vm2, %v779_v32, %v8784_v15 }
 0x251   : > { %v840_v63 = vpop.permute.xlu1 %839 }
 0x252   : > { %v836_v13 = vpop.permute.xlu0 %835 }
 0x253   : > { %v9009_v12 = vsel %vm845_vm3, %v834_v59, %v836_v13  ;;  %v851_v54 = vsel %vm845_vm3, %v836_v13, %v8799_v19 }
 0x255   : > { %v9013_v3 = vpop.permute.xlu1 %896 }
 0x256   : > { %v893_v5 = vpop.permute.xlu0 %892 }
 0x257   : > { %v9016_v10 = vsel %vm902_vm4, %v891_v11, %v893_v5  ;;  %v9020_v2 = vsel %vm902_vm4, %v893_v5, %v8814_v23 }
 0x259   : > { %v9022_v7 = vpop.permute.xlu1 %953 }
 0x25a   : > { %v950_v15 = vpop.permute.xlu0 %949 }
 0x25b   : > { %v9025_v47 = vsel %vm959_vm5, %v948_v41, %v950_v15  ;;  %v9029_v59 = vsel %vm959_vm5, %v950_v15, %v8829_v27 }
 0x25d   : > { %v9031_v19 = vpop.permute.xlu1 %1010 }
 0x25e   : > { %v1007_v9 = vpop.permute.xlu0 %1006 }
 0x25f   : > { %v9034_v11 = vsel %vm13384_vm6, %v1005_v4, %v1007_v9  ;;  %v9038_v23 = vsel %vm13384_vm6, %v1007_v9, %v8844_v31 }
 0x261   : > { %v1056_v32 = vpop.permute.xlu1 %1055 }
 0x262   : > { %v728_v13 = vpop.permute.xlu0 %727  ;;  %v9042_v41 = vsel %vm1073_vm7, %v1056_v32, %v8960_v42  ;;  %v7264_v42 = vpack.c.bf16 %v8974_v8, %v8789_v17 }
 0x263   : > { %v738_v5 = vsel %vm13393_vm1, %v726_v14, %v728_v13  ;;  %v739_v27 = vsel %vm13393_vm1, %v728_v13, %v8859_v35  ;;  %v1213_v13 = vld [vmem:[#allocation2 + $0x160] sm:$0xff] }
 0x264   : > { %v7258_v15 = vpack.c.bf16 %v739_v27, %v737_v1  ;;  %v7260_v58 = vpack.c.bf16 %v738_v5, %v736_v61  ;;  %v7348_v22 = vpack.c.bf16 %v1216_v39, %v1213_v13  ;;  %v9082_v5 = vld [vmem:[%s13337_s4] sm:$0xff]  ;;  %v1617_v39 = vld [vmem:[#allocation6 + $0x58] sm:$0xff] }
 0x265   : > { %v1066_v6 = vpop.permute.xlu1 %1065  ;;  %v1636_v13 = vld [vmem:[#allocation6 + $0xf0] sm:$0xff] }
 0x266   : > { %v1050_v4 = vpop.permute.xlu0 %1049  ;;  %7259 = vmatprep.subr.bf16.mxu1 %v7258_v15  ;;  %1102 = vst.msk [vmem:[#allocation2 + $0x2e0] sm:$0xff] %vm684_vm0, %v1066_v6 }
 0x267   : > { %v9050_v31 = vsel %vm1073_vm7, %v1050_v4, %v8861_v37  ;;  %7261 = vmatpush1.bf16.msra.mxu1 %v7260_v58 }
 0x268   : > { %7263 = vmatprep.subr.bf16.mxu1 %v7262_v44  ;;  %v7272_v44 = vpack.c.bf16 %v8978_v28, %v8804_v21 }
 0x269   : > { %v9057_v35 = vpop.permute.xlu1 %1071 }
 0x26a   : > { %v785_v14 = vpop.permute.xlu0 %784  ;;  %1105 = vst.msk [vmem:[#allocation2 + $0x2f8] sm:$0xff] %vm684_vm0, %v9057_v35 }
 0x26b   : > { %v795_v61 = vsel %vm13392_vm2, %v783_v20, %v785_v14  ;;  %v796_v37 = vsel %vm13392_vm2, %v785_v14, %v8872_v40  ;;  %7265 = vmatpush1.bf16.msra.mxu1 %v7264_v42 }
 0x26c   : > { %v7266_v58 = vpack.c.bf16 %v796_v37, %v794_v55  ;;  %v7268_v1 = vpack.c.bf16 %v795_v61, %v793_v16 }
 0x26d   : > { %v9064_v9 = vpop.permute.xlu1 %1067  ;;  %v1261_v20 = vld [vmem:[#allocation2 + $0x2e0] sm:$0xff] }
 0x26e   : > { %v1064_v18 = vpop.permute.xlu0 %1063  ;;  %7267 = vmatprep.subr.bf16.mxu1 %v7266_v58 }
 0x26f   : > { %v9067_v17 = vsel %vm1073_vm7, %v1064_v18, %v1066_v6  ;;  %7269 = vmatpush1.bf16.msra.mxu1 %v7268_v1 }
 0x270   : > { %7271 = vmatprep.subr.bf16.mxu1 %v7270_v36 }
 0x271   : > { %v1111_v40 = vpop.permute.xlu1 %1110  ;;  %v1264_v16 = vld [vmem:[#allocation2 + $0x2f8] sm:$0xff] }
 0x272   : > { %v842_v8 = vpop.permute.xlu0 %841  ;;  %1153 = vst.msk [vmem:[#allocation2 + $0x310] sm:$0xff] %vm684_vm0, %v1111_v40  ;;  %v7346_v32 = vpack.c.bf16 %v1264_v16, %v1261_v20  ;;  %v1606_v20 = vld [vmem:[#allocation6] sm:$0xff] }
 0x273   : > { %v852_v55 = vsel %vm845_vm3, %v840_v63, %v842_v8  ;;  %v853_v6 = vsel %vm845_vm3, %v842_v8, %v8887_v46  ;;  %7273 = vmatpush1.bf16.msra.mxu1 %v7272_v44  ;;  %v7280_v63 = vpack.c.bf16 %v8982_v0, %v8819_v25  ;;  %v9107_v25 = vld [vmem:[%s13337_s4 + $0x10] sm:$0xff]  ;;  %v9114_v0 = vld [vmem:[%s13337_s4 + $0x18] sm:$0xff]  ;;  %vm13414_vm3 = vcmask 760832  }
 0x274   : > { %v7274_v48 = vpack.c.bf16 %v853_v6, %v851_v54  ;;  %v7276_v36 = vpack.c.bf16 %v852_v55, %v9009_v12  ;;  %7347 = vmatprep.subr.bf16.mxu0 %v7346_v32  ;;  %v9097_v12 = vld [vmem:[%s13337_s4 + $0x20] sm:$0xff]  ;;  %v1627_v55 = vld [vmem:[#allocation6 + $0xa8] sm:$0xff]  ;;  %v1637_v6 = vld [vmem:[#allocation6 + $0xf8] sm:$0xff] }
 0x275   : > { %7349 = vmatpush3.bf16.msra.mxu0 %v7348_v22  ;;  %v1117_v21 = vpop.permute.xlu1 %1116  ;;  %v7362_v32 = vpack.c.bf16 %v1637_v6, %v1627_v55  ;;  %v1647_v22 = vld [vmem:[#allocation6 + $0x148] sm:$0xff]  ;;  %v1628_v6 = vld [vmem:[#allocation6 + $0xb0] sm:$0xff] }
 0x276   : > { %v1062_v28 = vpop.permute.xlu0 %1061  ;;  %7275 = vmatprep.subr.bf16.mxu1 %v7274_v48  ;;  %1156 = vst.msk [vmem:[#allocation2 + $0x328] sm:$0xff] %vm684_vm0, %v1117_v21  ;;  %v1657_v48 = vld [vmem:[#allocation6 + $0x198] sm:$0xff] }
 0x277   : > { %v9086_v46 = vsel %vm1073_vm7, %v1062_v28, %v1064_v18  ;;  %7277 = vmatpush1.bf16.msra.mxu1 %v7276_v36  ;;  %v7304_v36 = vpack.c.bf16 %v9042_v41, %v9050_v31  ;;  %v1667_v31 = vld [vmem:[#allocation6 + $0x1e8] sm:$0xff] }
 0x278   : > { %7279 = vmatprep.subr.bf16.mxu1 %v7278_v52  ;;  %1515 = vmatmul.mubr.f32.vlgmr.msra.gmra.mrb[8].mxu0 %v9082_v5 }
 0x279   : > { %v1113_v54 = vpop.permute.xlu1 %1112  ;;  %1519 = vmatprep.mubr.f32.mxu0 %v9097_v12  ;;  %v1267_v4 = vld [vmem:[#allocation2 + $0x310] sm:$0xff] }
 0x27a   : > { %v899_v27 = vpop.permute.xlu0 %898 }
 0x27b   : > { %v909_v15 = vsel %vm902_vm4, %v9013_v3, %v899_v27  ;;  %v910_v26 = vsel %vm902_vm4, %v899_v27, %v8902_v49  ;;  %7281 = vmatpush1.bf16.msra.mxu1 %v7280_v63  ;;  %v1656_v27 = vld [vmem:[#allocation6 + $0x190] sm:$0xff]  ;;  %vm13383_vm4 = vcmask 490496  }
 0x27c   : > { %v7282_v51 = vpack.c.bf16 %v910_v26, %v9020_v2  ;;  %v7284_v52 = vpack.c.bf16 %v909_v15, %v9016_v10  ;;  %1520 = vmatmul.mubr.f32.gmra.mrb[10].mxu0 %v9114_v0  ;;  %v1677_v26 = vld [vmem:[#allocation6 + $0x238] sm:$0xff] }
 0x27d   : > { %v9117_v49 = vpop.permute.xlu1 %1122  ;;  %v1270_v42 = vld [vmem:[#allocation2 + $0x328] sm:$0xff]  ;;  %7147 = vmatprep.mubr.msk.f32.mxu0 %vm1289_vm8, %v9107_v25 }
 0x27e   : > { %v1109_v3 = vpop.permute.xlu0 %1108  ;;  %7283 = vmatprep.subr.bf16.mxu1 %v7282_v51  ;;  %1159 = vst.msk [vmem:[#allocation2 + $0x340] sm:$0xff] %vm684_vm0, %v9117_v49  ;;  %v7350_v2 = vpack.c.bf16 %v1270_v42, %v1267_v4  ;;  %v1666_v4 = vld [vmem:[#allocation6 + $0x1e0] sm:$0xff]  ;;  %v1676_v42 = vld [vmem:[#allocation6 + $0x230] sm:$0xff] }
 0x27f   : > { %v9124_v10 = vsel %vm1130_vm9, %v1109_v3, %v1111_v40  ;;  %7285 = vmatpush1.bf16.msra.mxu1 %v7284_v52  ;;  %v13625_v40 = vpack.c.bf16 %v8992_v62, %v8849_v33 }
 0x280   : > { %7287 = vmatprep.subr.bf16.mxu1 %v7286_v43  ;;  %7351 = vmatprep.subr.bf16.mxu0 %v7350_v2 }
 0x281   : > { %7353 = vmatpush3.bf16.msra.mxu0 %v7350_v2  ;;  %v9129_v14 = vpop.permute.xlu1 %1128  ;;  %v1697_v2 = vld [vmem:[#allocation6 + $0x2d8] sm:$0xff] }
 0x282   : > { %v956_v61 = vpop.permute.xlu0 %955  ;;  %1162 = vst.msk [vmem:[#allocation2 + $0x358] sm:$0xff] %vm684_vm0, %v9129_v14 }
 0x283   : > { %v966_v37 = vsel %vm959_vm5, %v9022_v7, %v956_v61  ;;  %v967_v58 = vsel %vm959_vm5, %v956_v61, %v8917_v53  ;;  %7289 = vmatpush1.bf16.msra.mxu1 %v7288_v50  ;;  %v13624_v7 = vpack.c.bf16 %v8946_v45, %v8853_v34  ;;  %v1607_v53 = vld [vmem:[#allocation6 + $0x8] sm:$0xff]  ;;  %v1616_v34 = vld [vmem:[#allocation6 + $0x50] sm:$0xff]  ;;  %vm13381_vm5 = vcmask 482304  }
 0x284   : > { %v7290_v30 = vpack.c.bf16 %v967_v58, %v9029_v59  ;;  %v7292_v56 = vpack.c.bf16 %v966_v37, %v9025_v47  ;;  %v7358_v8 = vpack.c.bf16 %v1617_v39, %v1607_v53  ;;  %v7360_v33 = vpack.c.bf16 %v1616_v34, %v1606_v20  ;;  %v1609_v58 = vld [vmem:[#allocation6 + $0x18] sm:$0xff]  ;;  %v1707_v53 = vld [vmem:[#allocation6 + $0x328] sm:$0xff]  ;;  %v1706_v20 = vld [vmem:[#allocation6 + $0x320] sm:$0xff] }
 0x285   : > { %v1273_v57 = vld [vmem:[#allocation2 + $0x340] sm:$0xff]  ;;  %v1125_v61 = vpop.permute.xlu1 %1124  ;;  %v1717_v39 = vld [vmem:[#allocation6 + $0x378] sm:$0xff] }
 0x286   : > { %v1115_v43 = vpop.permute.xlu0 %1114  ;;  %7291 = vmatprep.subr.bf16.mxu1 %v7290_v30  ;;  %v7372_v30 = vpack.c.bf16 %v1676_v42, %v1666_v4  ;;  %v1716_v34 = vld [vmem:[#allocation6 + $0x370] sm:$0xff]  ;;  %v1699_v4 = vld [vmem:[#allocation6 + $0x2e8] sm:$0xff] }
 0x287   : > { %v9143_v1 = vsel %vm1130_vm9, %v1113_v54, %v1115_v43  ;;  %v1134_v18 = vsel %vm1130_vm9, %v1115_v43, %v1117_v21  ;;  %7293 = vmatpush1.bf16.msra.mxu1 %v7292_v56  ;;  %v1619_v43 = vld [vmem:[#allocation6 + $0x68] sm:$0xff] }
 0x288   : > { %7295 = vmatprep.subr.bf16.mxu1 %v13624_v7  ;;  %v7310_v52 = vpack.c.bf16 %v1134_v18, %v9124_v10  ;;  %v1686_v18 = vld [vmem:[#allocation6 + $0x280] sm:$0xff]  ;;  %v1696_v7 = vld [vmem:[#allocation6 + $0x2d0] sm:$0xff] }
 0x289   : > { %v1276_v50 = vld [vmem:[#allocation2 + $0x358] sm:$0xff] }
 0x28a   : > { %v1013_v29 = vpop.permute.xlu0 %1012  ;;  %v7354_v44 = vpack.c.bf16 %v1276_v50, %v1273_v57  ;;  %v1608_v57 = vld [vmem:[#allocation6 + $0x10] sm:$0xff]  ;;  %v1618_v50 = vld [vmem:[#allocation6 + $0x60] sm:$0xff] }
 0x28b   : > { %v1023_v47 = vsel %vm13384_vm6, %v9031_v19, %v1013_v29  ;;  %v1024_v59 = vsel %vm13384_vm6, %v1013_v29, %v8935_v60  ;;  %7297 = vmatpush1.bf16.msra.mxu1 %v13625_v40  ;;  %v9161_v60 = vld [vmem:[%s13337_s4 + $0x28] sm:$0xff]  ;;  %v1639_v40 = vld [vmem:[#allocation6 + $0x108] sm:$0xff] }
 0x28c   : > { %v7298_v45 = vpack.c.bf16 %v1024_v59, %v9038_v23  ;;  %v7300_v16 = vpack.c.bf16 %v1023_v47, %v9034_v11  ;;  %7355 = vmatprep.subr.bf16.mxu0 %v7354_v44  ;;  %v1626_v23 = vld [vmem:[#allocation6 + $0xa0] sm:$0xff]  ;;  %v13626_v11 = vpack.c.bf16 %v8965_v24, %v8868_v38  ;;  %v7366_v38 = vpack.c.bf16 %v1657_v48, %v1647_v22  ;;  %v1629_v47 = vld [vmem:[#allocation6 + $0xb8] sm:$0xff]  ;;  %v1747_v22 = vld [vmem:[#allocation6 + $0x468] sm:$0xff] }
 0x28d   : > { %7357 = vmatpush3.bf16.msra.mxu0 %v7354_v44  ;;  %v7364_v28 = vpack.c.bf16 %v1636_v13, %v1626_v23  ;;  %v1646_v24 = vld [vmem:[#allocation6 + $0x140] sm:$0xff]  ;;  %v7376_v59 = vpack.c.bf16 %v1696_v7, %v1686_v18  ;;  %v7436_v55 = vpack.c.bf16 %v1639_v40, %v1629_v47  ;;  %v1757_v48 = vld [vmem:[#allocation6 + $0x4b8] sm:$0xff]  ;;  %v1796_v18 = vld [vmem:[#allocation6 + $0x5f0] sm:$0xff] }
 0x28e   : > { %v1107_v19 = vpop.permute.xlu0 %1106  ;;  %7299 = vmatprep.subr.bf16.mxu1 %v7298_v45  ;;  %7359 = vmatprep.subr.bf16.mxu0 %v7358_v8  ;;  %v7378_v8 = vpack.c.bf16 %v1717_v39, %v1707_v53  ;;  %v1727_v45 = vld [vmem:[#allocation6 + $0x3c8] sm:$0xff]  ;;  %v1726_v13 = vld [vmem:[#allocation6 + $0x3c0] sm:$0xff]  ;;  %v1817_v53 = vld [vmem:[#allocation6 + $0x698] sm:$0xff] }
 0x28f   : > { %v1131_v62 = vsel %vm1130_vm9, %v1107_v19, %v1109_v3  ;;  %7301 = vmatpush1.bf16.msra.mxu1 %v7300_v16  ;;  %v7370_v3 = vpack.c.bf16 %v1677_v26, %v1667_v31  ;;  %v1737_v16 = vld [vmem:[#allocation6 + $0x418] sm:$0xff]  ;;  %v1638_v19 = vld [vmem:[#allocation6 + $0x100] sm:$0xff]  ;;  %v1807_v7 = vld [vmem:[#allocation6 + $0x648] sm:$0xff] }
 0x290   : > { %7303 = vmatprep.subr.bf16.mxu1 %v13626_v11  ;;  %7148 = vmatmul.mubr.msk.f32.vlgmr.msra.gmra.mrb[12].mxu0 %vm1289_vm8, %v9161_v60  ;;  %v7382_v23 = vpack.c.bf16 %v1737_v16, %v1727_v45  ;;  %v1736_v11 = vld [vmem:[#allocation6 + $0x410] sm:$0xff]  ;;  %v1777_v31 = vld [vmem:[#allocation6 + $0x558] sm:$0xff]  ;;  %v1739_v47 = vld [vmem:[#allocation6 + $0x428] sm:$0xff] }
 0x291   : > { %7361 = vmatpush1.bf16.msra.mxu0 %v7360_v33  ;;  %v1649_v33 = vld [vmem:[#allocation6 + $0x158] sm:$0xff]  ;;  %v1816_v40 = vld [vmem:[#allocation6 + $0x690] sm:$0xff] }
 0x292   : > { %v1070_v21 = vpop.permute.xlu0 %1069  ;;  %7363 = vmatprep.subr.bf16.mxu0 %v7362_v32  ;;  %v1659_v32 = vld [vmem:[#allocation6 + $0x1a8] sm:$0xff]  ;;  %v1728_v16 = vld [vmem:[#allocation6 + $0x3d0] sm:$0xff] }
 0x293   : > { %v1080_v63 = vsel %vm1073_vm7, %v9064_v9, %v1070_v21  ;;  %v1081_v54 = vsel %vm1073_vm7, %v1070_v21, %v9057_v35  ;;  %7305 = vmatpush1.bf16.msra.mxu1 %v7304_v36  ;;  %v7368_v9 = vpack.c.bf16 %v1656_v27, %v1646_v24  ;;  %v7438_v36 = vpack.c.bf16 %v1638_v19, %v1628_v6  ;;  %v1679_v24 = vld [vmem:[#allocation6 + $0x248] sm:$0xff] }
 0x294   : > { %v7306_v15 = vpack.c.bf16 %v1081_v54, %v9067_v17  ;;  %v7308_v41 = vpack.c.bf16 %v1080_v63, %v9086_v46  ;;  %v7312_v17 = vpack.c.bf16 %v9143_v1, %v1131_v62  ;;  %v1687_v46 = vld [vmem:[#allocation6 + $0x288] sm:$0xff]  ;;  %v7380_v62 = vpack.c.bf16 %v1716_v34, %v1706_v20  ;;  %v1658_v63 = vld [vmem:[#allocation6 + $0x1a0] sm:$0xff]  ;;  %v1669_v54 = vld [vmem:[#allocation6 + $0x1f8] sm:$0xff] }
 0x295   : > { %7365 = vmatpush1.bf16.msra.mxu0 %v7364_v28  ;;  %v7374_v1 = vpack.c.bf16 %v1697_v2, %v1687_v46  ;;  %v7440_v21 = vpack.c.bf16 %v1659_v32, %v1649_v33  ;;  %v1648_v28 = vld [vmem:[#allocation6 + $0x150] sm:$0xff]  ;;  %v7386_v27 = vpack.c.bf16 %v1757_v48, %v1747_v22  ;;  %v1787_v2 = vld [vmem:[#allocation6 + $0x5a8] sm:$0xff]  ;;  %v1837_v20 = vld [vmem:[#allocation6 + $0x738] sm:$0xff] }
 0x296   : > { %v1121_v51 = vpop.permute.xlu0 %1120  ;;  %7307 = vmatprep.subr.bf16.mxu1 %v7306_v15  ;;  %7367 = vmatprep.subr.bf16.mxu0 %v7366_v38  ;;  %v7384_v38 = vpack.c.bf16 %v1736_v11, %v1726_v13  ;;  %v1746_v15 = vld [vmem:[#allocation6 + $0x460] sm:$0xff]  ;;  %v7442_v26 = vpack.c.bf16 %v1658_v63, %v1648_v28  ;;  %v1776_v46 = vld [vmem:[#allocation6 + $0x550] sm:$0xff]  ;;  %v1759_v19 = vld [vmem:[#allocation6 + $0x4c8] sm:$0xff] }
 0x297   : > { %v1136_v35 = vsel %vm1130_vm9, %v1121_v51, %v9117_v49  ;;  %7309 = vmatpush1.bf16.msra.mxu1 %v7308_v41  ;;  %v1756_v41 = vld [vmem:[#allocation6 + $0x4b0] sm:$0xff]  ;;  %v1857_v13 = vld [vmem:[#allocation6 + $0x7d8] sm:$0xff]  ;;  %v1779_v63 = vld [vmem:[#allocation6 + $0x568] sm:$0xff] }
 0x298   : > { %7311 = vmatprep.subr.bf16.mxu1 %v7310_v52  ;;  %v1668_v52 = vld [vmem:[#allocation6 + $0x1f0] sm:$0xff] }
 0x299   : > { %7369 = vmatpush1.bf16.msra.mxu0 %v7368_v9  ;;  %v1678_v9 = vld [vmem:[#allocation6 + $0x240] sm:$0xff]  ;;  %v1836_v32 = vld [vmem:[#allocation6 + $0x730] sm:$0xff] }
 0x29a   : > { %v1127_v37 = vpop.permute.xlu0 %1126  ;;  %1361 = vmatmul.mubr.f32.vlgmr.msra.gmra.mrb[8].mxu1 %v9082_v5  ;;  %7371 = vmatprep.subr.bf16.mxu0 %v7370_v3  ;;  %v7388_v3 = vpack.c.bf16 %v1756_v41, %v1746_v15  ;;  %v1748_v48 = vld [vmem:[#allocation6 + $0x470] sm:$0xff]  ;;  %v1877_v15 = vld [vmem:[#allocation6 + $0x878] sm:$0xff] }
 0x29b   : > { %v1137_v10 = vsel %vm1130_vm9, %v1125_v61, %v1127_v37  ;;  %v1138_v49 = vsel %vm1130_vm9, %v1127_v37, %v9129_v14  ;;  %7313 = vmatpush1.bf16.msra.mxu1 %v7312_v17  ;;  %1366 = vmatprep.mubr.f32.mxu1 %v9097_v12  ;;  %v8295_v14 = vmov 0.0   ;;  %v7432_v12 = vpack.c.bf16 %v1619_v43, %v1609_v58  ;;  %v1766_v17 = vld [vmem:[#allocation6 + $0x500] sm:$0xff]  ;;  %v1797_v61 = vld [vmem:[#allocation6 + $0x5f8] sm:$0xff] }
 0x29c   : > { %v7314_v56 = vpack.c.bf16 %v1138_v49, %v1136_v35  ;;  %v1689_v35 = vld [vmem:[#allocation6 + $0x298] sm:$0xff]  ;;  %v1698_v49 = vld [vmem:[#allocation6 + $0x2e0] sm:$0xff]  ;;  %v7394_v43 = vpack.c.bf16 %v1797_v61, %v1787_v2  ;;  %v1788_v61 = vld [vmem:[#allocation6 + $0x5b0] sm:$0xff]  ;;  %4164 = vrot.lane.b32.xlu0 %v8295_v14, %s8297_s11  ;;  %4326 = vrot.lane.b32.xlu1 %v8295_v14, %s8298_s17 }
 0x29d   : > { %7373 = vmatpush1.bf16.msra.mxu0 %v7372_v30  ;;  %v7448_v37 = vpack.c.bf16 %v1699_v4, %v1689_v35  ;;  %v1709_v58 = vld [vmem:[#allocation6 + $0x338] sm:$0xff]  ;;  %v7392_v30 = vpack.c.bf16 %v1776_v46, %v1766_v17  ;;  %v1876_v4 = vld [vmem:[#allocation6 + $0x870] sm:$0xff] }
 0x29e   : > { %v1119_v5 = vpop.permute.xlu0 %1118  ;;  %7315 = vmatprep.subr.bf16.mxu1 %v7314_v56  ;;  %1367 = vmatmul.mubr.f32.gmra.mrb[10].mxu1 %v9114_v0  ;;  %v7434_v0 = vpack.c.bf16 %v1618_v50, %v1608_v57  ;;  %v1719_v56 = vld [vmem:[#allocation6 + $0x388] sm:$0xff]  ;;  %v1729_v57 = vld [vmem:[#allocation6 + $0x3d8] sm:$0xff] }
 0x29f   : > { %v1135_v29 = vsel %vm1130_vm9, %v1119_v5, %v1121_v51  ;;  %1437 = vmatprep.mubr.f32.mxu1 %v8295_v14  ;;  %7375 = vmatprep.subr.bf16.mxu0 %v7374_v1  ;;  %v7444_v51 = vpack.c.bf16 %v1679_v24, %v1669_v54  ;;  %v1786_v1 = vld [vmem:[#allocation6 + $0x5a0] sm:$0xff]  ;;  %v7452_v5 = vpack.c.bf16 %v1719_v56, %v1709_v58  ;;  %v1856_v24 = vld [vmem:[#allocation6 + $0x7d0] sm:$0xff]  ;;  %v1897_v17 = vld [vmem:[#allocation6 + $0x918] sm:$0xff] }
 0x2a0   : > { %v7316_v44 = vpack.c.bf16 %v1137_v10, %v1135_v29  ;;  %v1688_v10 = vld [vmem:[#allocation6 + $0x290] sm:$0xff]  ;;  %v7396_v50 = vpack.c.bf16 %v1796_v18, %v1786_v1  ;;  %v7456_v45 = vpack.c.bf16 %v1739_v47, %v1729_v57  ;;  %v1818_v1 = vld [vmem:[#allocation6 + $0x6a0] sm:$0xff]  ;;  %v1829_v18 = vld [vmem:[#allocation6 + $0x6f8] sm:$0xff]  ;;  %4490 = vrot.lane.b32.xlu0 %v8295_v14, %s8299_s20  ;;  %4638 = vrot.lane.b32.xlu1 %v8295_v14, %s8300_s22 }
 0x2a1   : > { %7377 = vmatpush1.bf16.msra.mxu0 %v7376_v59  ;;  %v7450_v39 = vpack.c.bf16 %v1698_v49, %v1688_v10  ;;  %v1708_v29 = vld [vmem:[#allocation6 + $0x330] sm:$0xff]  ;;  %v7398_v59 = vpack.c.bf16 %v1817_v53, %v1807_v7  ;;  %v1809_v10 = vld [vmem:[#allocation6 + $0x658] sm:$0xff]  ;;  %v1819_v49 = vld [vmem:[#allocation6 + $0x6a8] sm:$0xff] }
 0x2a2   : > { %7317 = vmatpush1.bf16.msra.mxu1 %v7316_v44  ;;  %7379 = vmatprep.subr.bf16.mxu0 %v7378_v8  ;;  %v1806_v44 = vld [vmem:[#allocation6 + $0x640] sm:$0xff]  ;;  %v1827_v8 = vld [vmem:[#allocation6 + $0x6e8] sm:$0xff]  ;;  %v7472_v56 = vpack.c.bf16 %v1819_v49, %v1809_v10  ;;  %v1896_v47 = vld [vmem:[#allocation6 + $0x910] sm:$0xff] }
 0x2a3   : > { %7433 = vmatprep.subr.bf16.mxu1 %v7432_v12  ;;  %v1718_v12 = vld [vmem:[#allocation6 + $0x380] sm:$0xff]  ;;  %v7400_v6 = vpack.c.bf16 %v1816_v40, %v1806_v44  ;;  %v7402_v33 = vpack.c.bf16 %v1837_v20, %v1827_v8  ;;  %v1839_v7 = vld [vmem:[#allocation6 + $0x748] sm:$0xff]  ;;  %v1848_v8 = vld [vmem:[#allocation6 + $0x790] sm:$0xff] }
 0x2a4   : > { %v7454_v34 = vpack.c.bf16 %v1718_v12, %v1708_v29  ;;  %v1838_v29 = vld [vmem:[#allocation6 + $0x740] sm:$0xff]  ;;  %v1849_v12 = vld [vmem:[#allocation6 + $0x798] sm:$0xff]  ;;  %v1859_v57 = vld [vmem:[#allocation6 + $0x7e8] sm:$0xff]  ;;  %4804 = vrot.lane.b32.xlu0 %v8295_v14, %s8301_s28  ;;  %4970 = vrot.lane.b32.xlu1 %v8295_v14, %s8302_s18 }
 0x2a5   : > { %7009 = vmatmul.mubr.msk.f32.vlgmr.msra.gmra.mrb[8].mxu1 %vm1289_vm8, %v9107_v25  ;;  %7381 = vmatpush1.bf16.msra.mxu0 %v7380_v62  ;;  %v1767_v25 = vld [vmem:[#allocation6 + $0x508] sm:$0xff]  ;;  %v1826_v62 = vld [vmem:[#allocation6 + $0x6e0] sm:$0xff]  ;;  %v7480_v40 = vpack.c.bf16 %v1859_v57, %v1849_v12  ;;  %v1957_v12 = vld [vmem:[#allocation6 + $0xaf8] sm:$0x3f] }
 0x2a6   : > { %1443 = vmatprep.mubr.f32.mxu1 %v8295_v14  ;;  %7435 = vmatpush1.bf16.msra.mxu1 %v7434_v0  ;;  %v7390_v42 = vpack.c.bf16 %v1777_v31, %v1767_v25  ;;  %v1738_v0 = vld [vmem:[#allocation6 + $0x420] sm:$0xff]  ;;  %v7404_v28 = vpack.c.bf16 %v1836_v32, %v1826_v62  ;;  %v1768_v31 = vld [vmem:[#allocation6 + $0x510] sm:$0xff]  ;;  %v1949_v57 = vld [vmem:[#allocation6 + $0xab8] sm:$0xff] }
 0x2a7   : > { %7437 = vmatprep.subr.bf16.mxu1 %v7436_v55  ;;  %7383 = vmatprep.subr.bf16.mxu0 %v7382_v23  ;;  %v1749_v55 = vld [vmem:[#allocation6 + $0x478] sm:$0xff]  ;;  %v1847_v23 = vld [vmem:[#allocation6 + $0x788] sm:$0xff]  ;;  %v7458_v11 = vpack.c.bf16 %v1738_v0, %v1728_v16  ;;  %v1858_v20 = vld [vmem:[#allocation6 + $0x7e0] sm:$0xff] }
 0x2a8   : > { %v7460_v22 = vpack.c.bf16 %v1759_v19, %v1749_v55  ;;  %v7406_v54 = vpack.c.bf16 %v1857_v13, %v1847_v23  ;;  %v7482_v16 = vpack.c.bf16 %v1858_v20, %v1848_v8  ;;  %v1868_v55 = vld [vmem:[#allocation6 + $0x830] sm:$0xff]  ;;  %v1889_v19 = vld [vmem:[#allocation6 + $0x8d8] sm:$0xff]  ;;  %v1898_v13 = vld [vmem:[#allocation6 + $0x920] sm:$0xff]  ;;  %5428 = vrot.lane.b32.xlu0 %v8295_v14, %s8303_s23 }
 0x2a9   : > { %7010 = vmatmul.mubr.msk.f32.gmra.mrb[10].mxu1 %vm1289_vm8, %v9161_v60  ;;  %7385 = vmatpush1.bf16.msra.mxu0 %v7384_v38  ;;  %v7446_v60 = vpack.c.bf16 %v1678_v9, %v1668_v52  ;;  %v1846_v38 = vld [vmem:[#allocation6 + $0x780] sm:$0xff]  ;;  %v1799_v9 = vld [vmem:[#allocation6 + $0x608] sm:$0xff]  ;;  %v1888_v23 = vld [vmem:[#allocation6 + $0x8d0] sm:$0xff] }
 0x2aa   : > { %7439 = vmatpush1.bf16.msra.mxu1 %v7438_v36  ;;  %7387 = vmatprep.subr.bf16.mxu0 %v7386_v27  ;;  %v1758_v36 = vld [vmem:[#allocation6 + $0x4c0] sm:$0xff]  ;;  %v1867_v27 = vld [vmem:[#allocation6 + $0x828] sm:$0xff]  ;;  %v7408_v52 = vpack.c.bf16 %v1856_v24, %v1846_v38  ;;  %v1948_v20 = vld [vmem:[#allocation6 + $0xab0] sm:$0xff] }
 0x2ab   : > { %7441 = vmatprep.subr.bf16.mxu1 %v7440_v21  ;;  %v1769_v21 = vld [vmem:[#allocation6 + $0x518] sm:$0xff]  ;;  %v7462_v41 = vpack.c.bf16 %v1758_v36, %v1748_v48  ;;  %v7410_v35 = vpack.c.bf16 %v1877_v15, %v1867_v27  ;;  %v1908_v27 = vld [vmem:[#allocation6 + $0x970] sm:$0xff]  ;;  %v1918_v15 = vld [vmem:[#allocation6 + $0x9c0] sm:$0xff] }
 0x2ac   : > { %v7464_v25 = vpack.c.bf16 %v1779_v63, %v1769_v21  ;;  %v1917_v48 = vld [vmem:[#allocation6 + $0x9b8] sm:$0xff]  ;;  %v1906_v63 = vld [vmem:[#allocation6 + $0x960] sm:$0xff] }
 0x2ad   : > { %7389 = vmatpush1.bf16.msra.mxu0 %v7388_v3  ;;  %v1866_v3 = vld [vmem:[#allocation6 + $0x820] sm:$0xff]  ;;  %v1909_v36 = vld [vmem:[#allocation6 + $0x978] sm:$0xff] }
 0x2ae   : > { %7443 = vmatpush1.bf16.msra.mxu1 %v7442_v26  ;;  %7391 = vmatprep.subr.bf16.mxu0 %v7390_v42  ;;  %v1778_v26 = vld [vmem:[#allocation6 + $0x560] sm:$0xff]  ;;  %v1887_v42 = vld [vmem:[#allocation6 + $0x8c8] sm:$0xff] }
 0x2af   : > { %7445 = vmatprep.subr.bf16.mxu1 %v7444_v51  ;;  %v1789_v51 = vld [vmem:[#allocation6 + $0x5b8] sm:$0xff]  ;;  %v7466_v46 = vpack.c.bf16 %v1778_v26, %v1768_v31  ;;  %v7414_v58 = vpack.c.bf16 %v1897_v17, %v1887_v42  ;;  %v1946_v8 = vld [vmem:[#allocation6 + $0xaa0] sm:$0xff] }
 0x2b0   : > { %v7468_v2 = vpack.c.bf16 %v1799_v9, %v1789_v51  ;;  %v1937_v31 = vld [vmem:[#allocation6 + $0xa58] sm:$0xff] }
 0x2b1   : > { %7393 = vmatpush1.bf16.msra.mxu0 %v7392_v30  ;;  %v1929_v26 = vld [vmem:[#allocation6 + $0xa18] sm:$0xff] }
 0x2b2   : > { %7447 = vmatpush1.bf16.msra.mxu1 %v7446_v60  ;;  %7395 = vmatprep.subr.bf16.mxu0 %v7394_v43  ;;  %v1798_v60 = vld [vmem:[#allocation6 + $0x600] sm:$0xff]  ;;  %v1808_v43 = vld [vmem:[#allocation6 + $0x650] sm:$0xff] }
 0x2b3   : > { %7449 = vmatprep.subr.bf16.mxu1 %v7448_v37  ;;  %v7412_v37 = vpack.c.bf16 %v1876_v4, %v1866_v3  ;;  %v7470_v30 = vpack.c.bf16 %v1798_v60, %v1788_v61  ;;  %v7474_v53 = vpack.c.bf16 %v1818_v1, %v1808_v43  ;;  %v1282_v61 = vpop.permute.xlu0 %1281  ;;  %v1926_v43 = vld [vmem:[#allocation6 + $0xa00] sm:$0xff]  ;;  %v1936_v1 = vld [vmem:[#allocation6 + $0xa50] sm:$0xff] }
 0x2b5   : > { %7397 = vmatpush1.bf16.msra.mxu0 %v7396_v50  ;;  %v1886_v50 = vld [vmem:[#allocation6 + $0x8c0] sm:$0xff] }
 0x2b6   : > { %7451 = vmatpush1.bf16.msra.mxu1 %v7450_v39  ;;  %7399 = vmatprep.subr.bf16.mxu0 %v7398_v59  ;;  %v7476_v39 = vpack.c.bf16 %v1839_v7, %v1829_v18  ;;  %v7416_v59 = vpack.c.bf16 %v1896_v47, %v1886_v50  ;;  %v1959_v50 = vld [vmem:[#allocation6 + $0xb08] sm:$0x3f] }
 0x2b7   : > { %7453 = vmatprep.subr.bf16.mxu1 %v7452_v5  ;;  %v1828_v5 = vld [vmem:[#allocation6 + $0x6f0] sm:$0xff] }
 0x2b8   : > { %v7478_v44 = vpack.c.bf16 %v1838_v29, %v1828_v5  ;;  %v1947_v5 = vld [vmem:[#allocation6 + $0xaa8] sm:$0xff] }
 0x2b9   : > { %7401 = vmatpush1.bf16.msra.mxu0 %v7400_v6  ;;  %v1878_v6 = vld [vmem:[#allocation6 + $0x880] sm:$0xff] }
 0x2ba   : > { %7455 = vmatpush1.bf16.msra.mxu1 %v7454_v34  ;;  %7403 = vmatprep.subr.bf16.mxu0 %v7402_v33  ;;  %v1869_v34 = vld [vmem:[#allocation6 + $0x838] sm:$0xff]  ;;  %v1899_v33 = vld [vmem:[#allocation6 + $0x928] sm:$0xff]  ;;  %v7486_v62 = vpack.c.bf16 %v1878_v6, %v1868_v55  ;;  %v7500_v55 = vpack.c.bf16 %v1959_v50, %v1949_v57  ;;  %v1956_v6 = vld [vmem:[#allocation6 + $0xaf0] sm:$0x3f] }
 0x2bb   : > { %7457 = vmatprep.subr.bf16.mxu1 %v7456_v45  ;;  %v1879_v45 = vld [vmem:[#allocation6 + $0x888] sm:$0xff]  ;;  %v7488_v32 = vpack.c.bf16 %v1899_v33, %v1889_v19  ;;  %v1958_v19 = vld [vmem:[#allocation6 + $0xb00] sm:$0x3f]  ;;  %v1680_v50 = vld [vmem:[#allocation6 + $0x250] sm:$0xff] }
 0x2bc   : > { %v7484_v0 = vpack.c.bf16 %v1879_v45, %v1869_v34  ;;  %v1670_v57 = vld [vmem:[#allocation6 + $0x200] sm:$0xff] }
 0x2bd   : > { %7405 = vmatpush1.bf16.msra.mxu0 %v7404_v28  ;;  %v1919_v28 = vld [vmem:[#allocation6 + $0x9c8] sm:$0xff] }
 0x2be   : > { %7459 = vmatpush1.bf16.msra.mxu1 %v7458_v11  ;;  %7407 = vmatprep.subr.bf16.mxu0 %v7406_v54  ;;  %v7490_v11 = vpack.c.bf16 %v1898_v13, %v1888_v23  ;;  %v1916_v54 = vld [vmem:[#allocation6 + $0x9b0] sm:$0xff]  ;;  %v7492_v38 = vpack.c.bf16 %v1919_v28, %v1909_v36  ;;  %v1621_v23 = vld [vmem:[#allocation6 + $0x78] sm:$0xff]  ;;  %v7503_v36 = vpack.c.bf16 %v1958_v19, %v1948_v20  ;;  %v1691_v20 = vld [vmem:[#allocation6 + $0x2a8] sm:$0xff] }
 0x2bf   : > { %7461 = vmatprep.subr.bf16.mxu1 %v7460_v22  ;;  %v1907_v22 = vld [vmem:[#allocation6 + $0x968] sm:$0xff]  ;;  %v7420_v24 = vpack.c.bf16 %v1916_v54, %v1906_v63  ;;  %v1613_v13 = vld [vmem:[#allocation6 + $0x38] sm:$0xff]  ;;  %v1620_v63 = vld [vmem:[#allocation6 + $0x70] sm:$0xff] }
 0x2c0   : > { %v7418_v21 = vpack.c.bf16 %v1917_v48, %v1907_v22  ;;  %v7429_v48 = vpack.c.bf16 %v1956_v6, %v1946_v8  ;;  %v1612_v54 = vld [vmem:[#allocation6 + $0x30] sm:$0xff]  ;;  %v1682_v8 = vld [vmem:[#allocation6 + $0x260] sm:$0xff] }
 0x2c1   : > { %7409 = vmatpush1.bf16.msra.mxu0 %v7408_v52  ;;  %v1939_v52 = vld [vmem:[#allocation6 + $0xa68] sm:$0xff]  ;;  %v1690_v19 = vld [vmem:[#allocation6 + $0x2a0] sm:$0xff] }
 0x2c2   : > { %7463 = vmatpush1.bf16.msra.mxu1 %v7462_v41  ;;  %7411 = vmatprep.subr.bf16.mxu0 %v7410_v35  ;;  %v7494_v41 = vpack.c.bf16 %v1918_v15, %v1908_v27  ;;  %v7496_v9 = vpack.c.bf16 %v1939_v52, %v1929_v26  ;;  %v1631_v15 = vld [vmem:[#allocation6 + $0xc8] sm:$0xff]  ;;  %v1630_v52 = vld [vmem:[#allocation6 + $0xc0] sm:$0xff] }
 0x2c3   : > { %7465 = vmatprep.subr.bf16.mxu1 %v7464_v25  ;;  %v1927_v25 = vld [vmem:[#allocation6 + $0xa08] sm:$0xff] }
 0x2c4   : > { %v7422_v51 = vpack.c.bf16 %v1937_v31, %v1927_v25  ;;  %v1633_v25 = vld [vmem:[#allocation6 + $0xd8] sm:$0xff]  ;;  %v1643_v31 = vld [vmem:[#allocation6 + $0x128] sm:$0xff] }
 0x2c5   : > { %7413 = vmatpush1.bf16.msra.mxu0 %v7412_v37 }
 0x2c6   : > { %7467 = vmatpush1.bf16.msra.mxu1 %v7466_v46  ;;  %7415 = vmatprep.subr.bf16.mxu0 %v7414_v58 }
 0x2c7   : > { %7469 = vmatprep.subr.bf16.mxu1 %v7468_v2  ;;  %v1287_v2 = vpop.permute.xlu1 %1286 }
 0x2c9   : > { %7417 = vmatpush1.bf16.msra.mxu0 %v7416_v59 }
 0x2ca   : > { %7471 = vmatpush1.bf16.msra.mxu1 %v7470_v30  ;;  %7419 = vmatprep.subr.bf16.mxu0 %v7418_v21  ;;  %v1610_v21 = vld [vmem:[#allocation6 + $0x20] sm:$0xff] }
 0x2cb   : > { %7473 = vmatprep.subr.bf16.mxu1 %v7472_v56  ;;  %v7508_v26 = vpack.c.bf16 %v1620_v63, %v1610_v21  ;;  %v1713_v21 = vld [vmem:[#allocation6 + $0x358] sm:$0xff]  ;;  %v1723_v63 = vld [vmem:[#allocation6 + $0x3a8] sm:$0xff] }
 0x2cd   : > { %7421 = vmatpush1.bf16.msra.mxu0 %v7420_v24 }
 0x2ce   : > { %7475 = vmatpush1.bf16.msra.mxu1 %v7474_v53  ;;  %7423 = vmatprep.subr.bf16.mxu0 %v7422_v51  ;;  %v1928_v53 = vld [vmem:[#allocation6 + $0xa10] sm:$0xff] }
 0x2cf   : > { %7477 = vmatprep.subr.bf16.mxu1 %v7476_v39  ;;  %v1938_v39 = vld [vmem:[#allocation6 + $0xa60] sm:$0xff] }
 0x2d2   : > { %7479 = vmatpush1.bf16.msra.mxu1 %v7478_v44  ;;  %v7424_v44 = vpack.c.bf16 %v1936_v1, %v1926_v43  ;;  %v1652_v43 = vld [vmem:[#allocation6 + $0x170] sm:$0xff]  ;;  %v1662_v1 = vld [vmem:[#allocation6 + $0x1c0] sm:$0xff] }
 0x2d3   : > { %7481 = vmatprep.subr.bf16.mxu1 %v7480_v40  ;;  %v7498_v40 = vpack.c.bf16 %v1938_v39, %v1928_v53  ;;  %v1681_v39 = vld [vmem:[#allocation6 + $0x258] sm:$0xff] }
 0x2d6   : > { %7483 = vmatpush1.bf16.msra.mxu1 %v7482_v16 }
 0x2d7   : > { %7485 = vmatprep.subr.bf16.mxu1 %v7484_v0  ;;  %v7426_v0 = vpack.c.bf16 %v1957_v12, %v1947_v5  ;;  %v1673_v5 = vld [vmem:[#allocation6 + $0x218] sm:$0xff]  ;;  %v7590_v12 = vpack.c.bf16 %v1662_v1, %v1652_v43 }
 0x2da   : > { %7487 = vmatpush1.bf16.msra.mxu1 %v7486_v62 }
 0x2db   : > { %7489 = vmatprep.subr.bf16.mxu1 %v7488_v32  ;;  %v1611_v32 = vld [vmem:[#allocation6 + $0x28] sm:$0xff] }
 0x2dc   : > { %v7506_v24 = vpack.c.bf16 %v1621_v23, %v1611_v32 }
 0x2de   : > { %7491 = vmatpush1.bf16.msra.mxu1 %v7490_v11  ;;  %v1623_v11 = vld [vmem:[#allocation6 + $0x88] sm:$0xff] }
 0x2df   : > { %7493 = vmatprep.subr.bf16.mxu1 %v7492_v38  ;;  %v1622_v38 = vld [vmem:[#allocation6 + $0x80] sm:$0xff]  ;;  %v7580_v27 = vpack.c.bf16 %v1623_v11, %v1613_v13  ;;  %v1692_v13 = vld [vmem:[#allocation6 + $0x2b0] sm:$0xff] }
 0x2e0   : > { %v7582_v51 = vpack.c.bf16 %v1622_v38, %v1612_v54  ;;  %v1702_v11 = vld [vmem:[#allocation6 + $0x300] sm:$0xff] }
 0x2e1   : > { %v7598_v38 = vpack.c.bf16 %v1702_v11, %v1692_v13  ;;  %v1790_v13 = vld [vmem:[#allocation6 + $0x5c0] sm:$0xff]  ;;  %v1800_v11 = vld [vmem:[#allocation6 + $0x610] sm:$0xff] }
 0x2e2   : > { %7495 = vmatpush1.bf16.msra.mxu1 %v7494_v41  ;;  %v1641_v41 = vld [vmem:[#allocation6 + $0x118] sm:$0xff] }
 0x2e3   : > { %7497 = vmatprep.subr.bf16.mxu1 %v7496_v9 }
 0x34b   : > { %v7127_v35 = vpop.f32.mrb[8].mxu0 }
 0x34c   : > { %v7128_v3 = vpop.f32.mrb[9].mxu0 }
 0x34d   : > { %v7129_v4 = vadd.f32 %v7128_v3, %v7127_v35  ;;  %v1640_v35 = vld [vmem:[#allocation6 + $0x110] sm:$0xff] }
 0x34e   : > { %v1632_v3 = vld [vmem:[#allocation6 + $0xd0] sm:$0xff] }
 0x34f   : > { %v7130_v42 = vpop.f32.mrb[10].mxu0  ;;  %v1517_v37 = vadd.f32 %v7129_v4, %v1282_v61  ;;  %v1642_v4 = vld [vmem:[#allocation6 + $0x120] sm:$0xff] }
 0x350   : > { %v7131_v17 = vpop.f32.mrb[11].mxu0 }
 0x351   : > { %v7132_v46 = vadd.f32 %v7131_v17, %v7130_v42  ;;  %v7510_v42 = vpack.c.bf16 %v1641_v41, %v1631_v15  ;;  %v7584_v17 = vpack.c.bf16 %v1643_v31, %v1633_v25  ;;  %v7600_v41 = vpack.c.bf16 %v1723_v63, %v1713_v21  ;;  %v1712_v25 = vld [vmem:[#allocation6 + $0x350] sm:$0xff]  ;;  %v1722_v31 = vld [vmem:[#allocation6 + $0x3a0] sm:$0xff] }
 0x352   : > { %v1792_v21 = vld [vmem:[#allocation6 + $0x5d0] sm:$0xff]  ;;  %v1802_v63 = vld [vmem:[#allocation6 + $0x620] sm:$0xff] }
 0x353   : > { %v1522_v60 = vadd.f32 %v7132_v46, %v1287_v2  ;;  %v1651_v46 = vld [vmem:[#allocation6 + $0x168] sm:$0xff] }
 0x363   : > { %v7149_v10 = vpop.f32.mrb[12].mxu0 }
 0x364   : > { %v9194_v49 = vadd.f32 %v7149_v10, %v1522_v60  ;;  %v1591_v58 = vpop.f32.mrb[13].mxu0  ;;  %v1663_v60 = vld [vmem:[#allocation6 + $0x1c8] sm:$0xff]  ;;  %v7586_v10 = vpack.c.bf16 %v1642_v4, %v1632_v3  ;;  %v7602_v4 = vpack.c.bf16 %v1722_v31, %v1712_v25  ;;  %v1810_v25 = vld [vmem:[#allocation6 + $0x660] sm:$0xff]  ;;  %v1820_v31 = vld [vmem:[#allocation6 + $0x6b0] sm:$0xff] }
 0x365   : > { %v9196_v30 = vadd.f32 %v1591_v58, %v1517_v37  ;;  %v7512_v37 = vpack.c.bf16 %v1640_v35, %v1630_v52  ;;  %v1650_v58 = vld [vmem:[#allocation6 + $0x160] sm:$0xff]  ;;  %v1733_v52 = vld [vmem:[#allocation6 + $0x3f8] sm:$0xff]  ;;  %v1743_v35 = vld [vmem:[#allocation6 + $0x448] sm:$0xff] }
 0x367   : > { %v9228_v9 = vmax.f32 %v9196_v30, 0.0  ;;  %v1660_v30 = vld [vmem:[#allocation6 + $0x1b0] sm:$0xff] }
 0x378   : > { %v1439_v56 = vpop.f32.mrb[8].mxu1 }
 0x379   : > { %v8070_v18 = vadd.f32 %v1439_v56, %v1282_v61  ;;  %v1441_v7 = vpop.f32.mrb[9].mxu1  ;;  %v9237_v56 = vmax.f32 %v9194_v49, 0.0  ;;  %v7516_v49 = vpack.c.bf16 %v1660_v30, %v1650_v58  ;;  %v1753_v58 = vld [vmem:[#allocation6 + $0x498] sm:$0xff]  ;;  %v1763_v30 = vld [vmem:[#allocation6 + $0x4e8] sm:$0xff] }
 0x37a   : > { %v8071_v29 = vadd.f32 %v1441_v7, %v1282_v61  ;;  %v1653_v61 = vld [vmem:[#allocation6 + $0x178] sm:$0xff] }
 0x37b   : > { %v9200_v34 = vmax.f32 %v8070_v18, 0.0  ;;  %v1671_v18 = vld [vmem:[#allocation6 + $0x208] sm:$0xff]  ;;  %v7588_v53 = vpack.c.bf16 %v1663_v60, %v1653_v61  ;;  %v1732_v61 = vld [vmem:[#allocation6 + $0x3f0] sm:$0xff]  ;;  %v1742_v60 = vld [vmem:[#allocation6 + $0x440] sm:$0xff] }
 0x37c   : > { %v9198_v47 = vmax.f32 %v8071_v29, 0.0  ;;  %v1445_v59 = vpop.f32.mrb[10].mxu1  ;;  %v1683_v29 = vld [vmem:[#allocation6 + $0x268] sm:$0xff]  ;;  %v7606_v1 = vpack.c.bf16 %v1742_v60, %v1732_v61  ;;  %v1830_v61 = vld [vmem:[#allocation6 + $0x700] sm:$0xff]  ;;  %v1840_v60 = vld [vmem:[#allocation6 + $0x750] sm:$0xff] }
 0x37d   : > { %v8072_v45 = vadd.f32 %v1445_v59, %v1287_v2  ;;  %v1447_v16 = vpop.f32.mrb[11].mxu1  ;;  %v7518_v59 = vpack.c.bf16 %v1681_v39, %v1671_v18  ;;  %v1750_v18 = vld [vmem:[#allocation6 + $0x480] sm:$0xff]  ;;  %v7608_v39 = vpack.c.bf16 %v1763_v30, %v1753_v58  ;;  %v1832_v58 = vld [vmem:[#allocation6 + $0x710] sm:$0xff] }
 0x37e   : > { %v8073_v33 = vadd.f32 %v1447_v16, %v1287_v2  ;;  %2067 = vmatprep.mubr.f32.mxu0 %v9198_v47  ;;  %2221 = vmatprep.mubr.f32.mxu1 %v9198_v47  ;;  %v1661_v2 = vld [vmem:[#allocation6 + $0x1b8] sm:$0xff]  ;;  %v1842_v30 = vld [vmem:[#allocation6 + $0x760] sm:$0xff] }
 0x37f   : > { %2068 = vmatmul.mubr.f32.vlgmr.msra.gmra.mrb[14].mxu0 %v9200_v34  ;;  %2222 = vmatmul.mubr.f32.vlgmr.msra.gmra.mrb[12].mxu1 %v9200_v34  ;;  %v9213_v28 = vmax.f32 %v8072_v45, 0.0  ;;  %v7514_v7 = vpack.c.bf16 %v1661_v2, %v1651_v46  ;;  %v1701_v45 = vld [vmem:[#allocation6 + $0x2f8] sm:$0xff]  ;;  %v7604_v2 = vpack.c.bf16 %v1743_v35, %v1733_v52  ;;  %v1812_v52 = vld [vmem:[#allocation6 + $0x670] sm:$0xff]  ;;  %v1822_v35 = vld [vmem:[#allocation6 + $0x6c0] sm:$0xff] }
 0x380   : > { %v9211_v22 = vmax.f32 %v8073_v33, 0.0  ;;  %7425 = vmatpush1.bf16.msra.mxu0 %v7424_v44  ;;  %7499 = vmatpush1.bf16.msra.mxu1 %v7498_v40  ;;  %v7592_v44 = vpack.c.bf16 %v1683_v29, %v1673_v5  ;;  %v1672_v40 = vld [vmem:[#allocation6 + $0x210] sm:$0xff]  ;;  %v1693_v16 = vld [vmem:[#allocation6 + $0x2b8] sm:$0xff]  ;;  %v7522_v32 = vpack.c.bf16 %v1701_v45, %v1691_v20  ;;  %v1762_v29 = vld [vmem:[#allocation6 + $0x4e0] sm:$0xff] }
 0x381   : > { %7428 = vmatprep.subr.msk.bf16.mxu0 %vm9205_vm12, %v7426_v0  ;;  %7502 = vmatprep.subr.msk.bf16.mxu1 %vm9205_vm12, %v7500_v55  ;;  %v1703_v0 = vld [vmem:[#allocation6 + $0x308] sm:$0xff]  ;;  %v7520_v55 = vpack.c.bf16 %v1680_v50, %v1670_v57  ;;  %v7594_v6 = vpack.c.bf16 %v1682_v8, %v1672_v40  ;;  %v1700_v33 = vld [vmem:[#allocation6 + $0x2f0] sm:$0xff]  ;;  %v1773_v57 = vld [vmem:[#allocation6 + $0x538] sm:$0xff] }
 0x382   : > { %2073 = vmatprep.mubr.f32.mxu0 %v9211_v22  ;;  %2227 = vmatprep.mubr.f32.mxu1 %v9211_v22  ;;  %v7596_v23 = vpack.c.bf16 %v1703_v0, %v1693_v16  ;;  %v7524_v54 = vpack.c.bf16 %v1700_v33, %v1690_v19  ;;  %v1752_v5 = vld [vmem:[#allocation6 + $0x490] sm:$0xff]  ;;  %v1783_v50 = vld [vmem:[#allocation6 + $0x588] sm:$0xff]  ;;  %v1770_v40 = vld [vmem:[#allocation6 + $0x520] sm:$0xff] }
 0x383   : > { %2074 = vmatmul.mubr.f32.gmra.mrb[16].mxu0 %v9213_v28  ;;  %2228 = vmatmul.mubr.f32.gmra.mrb[14].mxu1 %v9213_v28  ;;  %v1780_v8 = vld [vmem:[#allocation6 + $0x570] sm:$0xff]  ;;  %v7612_v45 = vpack.c.bf16 %v1783_v50, %v1773_v57  ;;  %v1782_v0 = vld [vmem:[#allocation6 + $0x580] sm:$0xff]  ;;  %v1793_v19 = vld [vmem:[#allocation6 + $0x5d8] sm:$0xff] }
 0x384   : > { %7431 = vmatpush1.bf16.msk.msra.mxu0 %vm9205_vm12, %v7429_v48  ;;  %7505 = vmatpush1.bf16.msk.msra.mxu1 %vm9205_vm12, %v7503_v36  ;;  %v1711_v48 = vld [vmem:[#allocation6 + $0x348] sm:$0xff]  ;;  %v1721_v36 = vld [vmem:[#allocation6 + $0x398] sm:$0xff]  ;;  %v1772_v16 = vld [vmem:[#allocation6 + $0x530] sm:$0xff] }
 0x385   : > { %2144 = vmatprep.mubr.f32.mxu0 %v8295_v14  ;;  %2298 = vmatprep.mubr.f32.mxu1 %v8295_v14  ;;  %v7526_v15 = vpack.c.bf16 %v1721_v36, %v1711_v48  ;;  %v1803_v33 = vld [vmem:[#allocation6 + $0x628] sm:$0xff]  ;;  %v1852_v57 = vld [vmem:[#allocation6 + $0x7b0] sm:$0xff]  ;;  %v1862_v50 = vld [vmem:[#allocation6 + $0x800] sm:$0xff] }
 0x386   : > { %7507 = vmatprep.subr.bf16.mxu0 %v7506_v24  ;;  %7581 = vmatprep.subr.bf16.mxu1 %v7580_v27  ;;  %v1710_v24 = vld [vmem:[#allocation6 + $0x340] sm:$0xff]  ;;  %v1720_v27 = vld [vmem:[#allocation6 + $0x390] sm:$0xff]  ;;  %v7616_v36 = vpack.c.bf16 %v1803_v33, %v1793_v19 }
 0x387   : > { %7015 = vmatmul.mubr.msk.f32.vlgmr.msra.gmra.mrb[14].mxu0 %vm684_vm0, %v9228_v9  ;;  %7019 = vmatmul.mubr.msk.f32.vlgmr.msra.gmra.mrb[12].mxu1 %vm684_vm0, %v9228_v9  ;;  %v7528_v3 = vpack.c.bf16 %v1720_v27, %v1710_v24  ;;  %v1813_v24 = vld [vmem:[#allocation6 + $0x678] sm:$0xff]  ;;  %v1823_v27 = vld [vmem:[#allocation6 + $0x6c8] sm:$0xff]  ;;  %v1872_v19 = vld [vmem:[#allocation6 + $0x850] sm:$0xff] }
 0x388   : > { %7509 = vmatpush1.bf16.msra.mxu0 %v7508_v26  ;;  %7583 = vmatpush1.bf16.msra.mxu1 %v7582_v51  ;;  %v1731_v26 = vld [vmem:[#allocation6 + $0x3e8] sm:$0xff]  ;;  %v1741_v51 = vld [vmem:[#allocation6 + $0x438] sm:$0xff]  ;;  %v1882_v33 = vld [vmem:[#allocation6 + $0x8a0] sm:$0xff] }
 0x389   : > { %2150 = vmatprep.mubr.f32.mxu0 %v8295_v14  ;;  %2304 = vmatprep.mubr.f32.mxu1 %v8295_v14  ;;  %v7530_v46 = vpack.c.bf16 %v1741_v51, %v1731_v26  ;;  %v7620_v51 = vpack.c.bf16 %v1823_v27, %v1813_v24  ;;  %v1892_v24 = vld [vmem:[#allocation6 + $0x8f0] sm:$0xff]  ;;  %v1902_v27 = vld [vmem:[#allocation6 + $0x940] sm:$0xff] }
 0x38a   : > { %7511 = vmatprep.subr.bf16.mxu0 %v7510_v42  ;;  %7585 = vmatprep.subr.bf16.mxu1 %v7584_v17  ;;  %v1730_v42 = vld [vmem:[#allocation6 + $0x3e0] sm:$0xff]  ;;  %v1740_v17 = vld [vmem:[#allocation6 + $0x430] sm:$0xff] }
 0x38b   : > { %7016 = vmatmul.mubr.msk.f32.gmra.mrb[16].mxu0 %vm684_vm0, %v9237_v56  ;;  %7020 = vmatmul.mubr.msk.f32.gmra.mrb[14].mxu1 %vm684_vm0, %v9237_v56  ;;  %v7532_v43 = vpack.c.bf16 %v1740_v17, %v1730_v42  ;;  %v1833_v42 = vld [vmem:[#allocation6 + $0x718] sm:$0xff]  ;;  %v1843_v17 = vld [vmem:[#allocation6 + $0x768] sm:$0xff] }
 0x38c   : > { %7513 = vmatpush1.bf16.msra.mxu0 %v7512_v37  ;;  %7587 = vmatpush1.bf16.msra.mxu1 %v7586_v10  ;;  %v1751_v37 = vld [vmem:[#allocation6 + $0x488] sm:$0xff]  ;;  %v1761_v10 = vld [vmem:[#allocation6 + $0x4d8] sm:$0xff] }
 0x38d   : > { %2375 = vmatprep.mubr.f32.mxu0 %v9198_v47  ;;  %2529 = vmatprep.mubr.f32.mxu1 %v9198_v47 }
 0x38e   : > { %7515 = vmatprep.subr.bf16.mxu0 %v7514_v7  ;;  %7589 = vmatprep.subr.bf16.mxu1 %v7588_v53  ;;  %v1760_v7 = vld [vmem:[#allocation6 + $0x4d0] sm:$0xff]  ;;  %v7534_v53 = vpack.c.bf16 %v1761_v10, %v1751_v37  ;;  %v7624_v10 = vpack.c.bf16 %v1843_v17, %v1833_v42  ;;  %v1922_v17 = vld [vmem:[#allocation6 + $0x9e0] sm:$0xff] }
 0x38f   : > { %v1912_v42 = vld [vmem:[#allocation6 + $0x990] sm:$0xff] }
 0x390   : > { %7517 = vmatpush1.bf16.msra.mxu0 %v7516_v49  ;;  %7591 = vmatpush1.bf16.msra.mxu1 %v7590_v12  ;;  %v1771_v49 = vld [vmem:[#allocation6 + $0x528] sm:$0xff]  ;;  %v1781_v12 = vld [vmem:[#allocation6 + $0x578] sm:$0xff] }
 0x391   : > { %7519 = vmatprep.subr.bf16.mxu0 %v7518_v59  ;;  %7593 = vmatprep.subr.bf16.mxu1 %v7592_v44  ;;  %v7536_v59 = vpack.c.bf16 %v1760_v7, %v1750_v18  ;;  %v7610_v44 = vpack.c.bf16 %v1762_v29, %v1752_v5  ;;  %v7538_v20 = vpack.c.bf16 %v1781_v12, %v1771_v49  ;;  %v1853_v18 = vld [vmem:[#allocation6 + $0x7b8] sm:$0xff]  ;;  %v1863_v7 = vld [vmem:[#allocation6 + $0x808] sm:$0xff]  ;;  %v1850_v5 = vld [vmem:[#allocation6 + $0x7a0] sm:$0xff] }
 0x392   : > { %v1860_v29 = vld [vmem:[#allocation6 + $0x7f0] sm:$0xff]  ;;  %v7628_v12 = vpack.c.bf16 %v1863_v7, %v1853_v18  ;;  %v1942_v7 = vld [vmem:[#allocation6 + $0xa80] sm:$0xff] }
 0x393   : > { %v1932_v18 = vld [vmem:[#allocation6 + $0xa30] sm:$0xff] }
 0x394   : > { %7521 = vmatpush1.bf16.msra.mxu0 %v7520_v55  ;;  %7595 = vmatpush1.bf16.msra.mxu1 %v7594_v6  ;;  %v1791_v55 = vld [vmem:[#allocation6 + $0x5c8] sm:$0xff]  ;;  %v1801_v6 = vld [vmem:[#allocation6 + $0x618] sm:$0xff] }
 0x395   : > { %7523 = vmatprep.subr.bf16.mxu0 %v7522_v32  ;;  %7597 = vmatprep.subr.bf16.mxu1 %v7596_v23  ;;  %v7540_v32 = vpack.c.bf16 %v1780_v8, %v1770_v40  ;;  %v7614_v23 = vpack.c.bf16 %v1782_v0, %v1772_v16  ;;  %v7542_v48 = vpack.c.bf16 %v1801_v6, %v1791_v55  ;;  %v1873_v40 = vld [vmem:[#allocation6 + $0x858] sm:$0xff]  ;;  %v1883_v8 = vld [vmem:[#allocation6 + $0x8a8] sm:$0xff]  ;;  %v1870_v16 = vld [vmem:[#allocation6 + $0x840] sm:$0xff] }
 0x396   : > { %v1880_v0 = vld [vmem:[#allocation6 + $0x890] sm:$0xff]  ;;  %v7632_v6 = vpack.c.bf16 %v1883_v8, %v1873_v40  ;;  %v1962_v8 = vld [vmem:[#allocation6 + $0xb20] sm:$0x3f] }
 0x397   : > { %v1952_v40 = vld [vmem:[#allocation6 + $0xad0] sm:$0xff] }
 0x398   : > { %7525 = vmatpush1.bf16.msra.mxu0 %v7524_v54  ;;  %7599 = vmatpush1.bf16.msra.mxu1 %v7598_v38  ;;  %v1811_v54 = vld [vmem:[#allocation6 + $0x668] sm:$0xff]  ;;  %v1821_v38 = vld [vmem:[#allocation6 + $0x6b8] sm:$0xff] }
 0x399   : > { %7527 = vmatprep.subr.bf16.mxu0 %v7526_v15  ;;  %7601 = vmatprep.subr.bf16.mxu1 %v7600_v41  ;;  %v7544_v15 = vpack.c.bf16 %v1800_v11, %v1790_v13  ;;  %v7618_v41 = vpack.c.bf16 %v1802_v63, %v1792_v21  ;;  %v7546_v26 = vpack.c.bf16 %v1821_v38, %v1811_v54  ;;  %v1893_v13 = vld [vmem:[#allocation6 + $0x8f8] sm:$0xff]  ;;  %v1903_v11 = vld [vmem:[#allocation6 + $0x948] sm:$0xff]  ;;  %v1890_v21 = vld [vmem:[#allocation6 + $0x8e0] sm:$0xff] }
 0x39a   : > { %v1900_v63 = vld [vmem:[#allocation6 + $0x930] sm:$0xff]  ;;  %v7636_v38 = vpack.c.bf16 %v1903_v11, %v1893_v13  ;;  %v1634_v13 = vld [vmem:[#allocation6 + $0xe0] sm:$0xff] }
 0x39b   : > { %v1644_v11 = vld [vmem:[#allocation6 + $0x130] sm:$0xff] }
 0x39c   : > { %7529 = vmatpush1.bf16.msra.mxu0 %v7528_v3  ;;  %7603 = vmatpush1.bf16.msra.mxu1 %v7602_v4  ;;  %v1831_v3 = vld [vmem:[#allocation6 + $0x708] sm:$0xff]  ;;  %v1841_v4 = vld [vmem:[#allocation6 + $0x758] sm:$0xff] }
 0x39d   : > { %7531 = vmatprep.subr.bf16.mxu0 %v7530_v46  ;;  %7605 = vmatprep.subr.bf16.mxu1 %v7604_v2  ;;  %v7548_v46 = vpack.c.bf16 %v1820_v31, %v1810_v25  ;;  %v7622_v2 = vpack.c.bf16 %v1822_v35, %v1812_v52  ;;  %v7550_v37 = vpack.c.bf16 %v1841_v4, %v1831_v3  ;;  %v1913_v25 = vld [vmem:[#allocation6 + $0x998] sm:$0xff]  ;;  %v1923_v31 = vld [vmem:[#allocation6 + $0x9e8] sm:$0xff]  ;;  %v1910_v52 = vld [vmem:[#allocation6 + $0x980] sm:$0xff] }
 0x39e   : > { %v1920_v35 = vld [vmem:[#allocation6 + $0x9d0] sm:$0xff]  ;;  %v7640_v4 = vpack.c.bf16 %v1923_v31, %v1913_v25  ;;  %v1674_v31 = vld [vmem:[#allocation6 + $0x220] sm:$0xff] }
 0x3a0   : > { %7533 = vmatpush1.bf16.msra.mxu0 %v7532_v43  ;;  %7607 = vmatpush1.bf16.msra.mxu1 %v7606_v1  ;;  %v1851_v43 = vld [vmem:[#allocation6 + $0x7a8] sm:$0xff]  ;;  %v1861_v1 = vld [vmem:[#allocation6 + $0x7f8] sm:$0xff] }
 0x3a1   : > { %7535 = vmatprep.subr.bf16.mxu0 %v7534_v53  ;;  %7609 = vmatprep.subr.bf16.mxu1 %v7608_v39  ;;  %v7552_v53 = vpack.c.bf16 %v1840_v60, %v1830_v61  ;;  %v7626_v39 = vpack.c.bf16 %v1842_v30, %v1832_v58  ;;  %v7554_v49 = vpack.c.bf16 %v1861_v1, %v1851_v43  ;;  %v1933_v61 = vld [vmem:[#allocation6 + $0xa38] sm:$0xff]  ;;  %v1943_v60 = vld [vmem:[#allocation6 + $0xa88] sm:$0xff]  ;;  %v1930_v43 = vld [vmem:[#allocation6 + $0xa20] sm:$0xff] }
 0x3a2   : > { %v7644_v30 = vpack.c.bf16 %v1943_v60, %v1933_v61  ;;  %v1940_v1 = vld [vmem:[#allocation6 + $0xa70] sm:$0xff]  ;;  %v1714_v60 = vld [vmem:[#allocation6 + $0x360] sm:$0xff] }
 0x3a4   : > { %7537 = vmatpush1.bf16.msra.mxu0 %v7536_v59  ;;  %7611 = vmatpush1.bf16.msra.mxu1 %v7610_v44  ;;  %v1871_v59 = vld [vmem:[#allocation6 + $0x848] sm:$0xff]  ;;  %v1881_v44 = vld [vmem:[#allocation6 + $0x898] sm:$0xff] }
 0x3a5   : > { %7539 = vmatprep.subr.bf16.mxu0 %v7538_v20  ;;  %7613 = vmatprep.subr.bf16.mxu1 %v7612_v45  ;;  %v7556_v20 = vpack.c.bf16 %v1860_v29, %v1850_v5  ;;  %v7630_v45 = vpack.c.bf16 %v1862_v50, %v1852_v57  ;;  %v7558_v55 = vpack.c.bf16 %v1881_v44, %v1871_v59  ;;  %v1953_v5 = vld [vmem:[#allocation6 + $0xad8] sm:$0xff]  ;;  %v1963_v29 = vld [vmem:[#allocation6 + $0xb28] sm:$0x3f]  ;;  %v1950_v57 = vld [vmem:[#allocation6 + $0xac0] sm:$0xff] }
 0x3a6   : > { %v1960_v50 = vld [vmem:[#allocation6 + $0xb10] sm:$0x3f]  ;;  %v7648_v44 = vpack.c.bf16 %v1963_v29, %v1953_v5  ;;  %v1754_v5 = vld [vmem:[#allocation6 + $0x4a0] sm:$0xff] }
 0x3a7   : > { %v1764_v29 = vld [vmem:[#allocation6 + $0x4f0] sm:$0xff] }
 0x3a8   : > { %7541 = vmatpush1.bf16.msra.mxu0 %v7540_v32  ;;  %7615 = vmatpush1.bf16.msra.mxu1 %v7614_v23  ;;  %v1891_v32 = vld [vmem:[#allocation6 + $0x8e8] sm:$0xff]  ;;  %v1901_v23 = vld [vmem:[#allocation6 + $0x938] sm:$0xff] }
 0x3a9   : > { %7543 = vmatprep.subr.bf16.mxu0 %v7542_v48  ;;  %7617 = vmatprep.subr.bf16.mxu1 %v7616_v36  ;;  %v7560_v48 = vpack.c.bf16 %v1880_v0, %v1870_v16  ;;  %v7634_v36 = vpack.c.bf16 %v1882_v33, %v1872_v19  ;;  %v7562_v54 = vpack.c.bf16 %v1901_v23, %v1891_v32  ;;  %v1635_v33 = vld [vmem:[#allocation6 + $0xe8] sm:$0xff]  ;;  %v1645_v32 = vld [vmem:[#allocation6 + $0x138] sm:$0xff] }
 0x3aa   : > { %v7577_v16 = vpack.c.bf16 %v1960_v50, %v1950_v57  ;;  %v7651_v0 = vpack.c.bf16 %v1962_v8, %v1952_v40  ;;  %v7684_v57 = vpack.c.bf16 %v1764_v29, %v1754_v5  ;;  %v1795_v40 = vld [vmem:[#allocation6 + $0x5e8] sm:$0xff]  ;;  %v1805_v8 = vld [vmem:[#allocation6 + $0x638] sm:$0xff] }
 0x3ab   : > { %v1965_v5 = vld [vmem:[#allocation6 + $0xb38] sm:$0x3f] }
 0x3ac   : > { %7545 = vmatpush1.bf16.msra.mxu0 %v7544_v15  ;;  %7619 = vmatpush1.bf16.msra.mxu1 %v7618_v41  ;;  %v1911_v15 = vld [vmem:[#allocation6 + $0x988] sm:$0xff]  ;;  %v1921_v41 = vld [vmem:[#allocation6 + $0x9d8] sm:$0xff] }
 0x3ad   : > { %7547 = vmatprep.subr.bf16.mxu0 %v7546_v26  ;;  %7621 = vmatprep.subr.bf16.mxu1 %v7620_v51  ;;  %v7564_v26 = vpack.c.bf16 %v1900_v63, %v1890_v21  ;;  %v7638_v51 = vpack.c.bf16 %v1902_v27, %v1892_v24  ;;  %v7566_v3 = vpack.c.bf16 %v1921_v41, %v1911_v15  ;;  %v1665_v21 = vld [vmem:[#allocation6 + $0x1d8] sm:$0xff]  ;;  %v1664_v24 = vld [vmem:[#allocation6 + $0x1d0] sm:$0xff]  ;;  %v1675_v27 = vld [vmem:[#allocation6 + $0x228] sm:$0xff] }
 0x3ae   : > { %v7660_v63 = vpack.c.bf16 %v1644_v11, %v1634_v13  ;;  %v1685_v15 = vld [vmem:[#allocation6 + $0x278] sm:$0xff]  ;;  %v1835_v13 = vld [vmem:[#allocation6 + $0x728] sm:$0xff] }
 0x3af   : > { %v7666_v25 = vpack.c.bf16 %v1685_v15, %v1675_v27  ;;  %v1845_v11 = vld [vmem:[#allocation6 + $0x778] sm:$0xff]  ;;  %v1854_v15 = vld [vmem:[#allocation6 + $0x7c0] sm:$0xff] }
 0x3b0   : > { %7549 = vmatpush1.bf16.msra.mxu0 %v7548_v46  ;;  %7623 = vmatpush1.bf16.msra.mxu1 %v7622_v2  ;;  %v1931_v46 = vld [vmem:[#allocation6 + $0xa28] sm:$0xff]  ;;  %v1941_v2 = vld [vmem:[#allocation6 + $0xa78] sm:$0xff] }
 0x3b1   : > { %7551 = vmatprep.subr.bf16.mxu0 %v7550_v37  ;;  %7625 = vmatprep.subr.bf16.mxu1 %v7624_v10  ;;  %v7568_v37 = vpack.c.bf16 %v1920_v35, %v1910_v52  ;;  %v7642_v10 = vpack.c.bf16 %v1922_v17, %v1912_v42  ;;  %v7570_v58 = vpack.c.bf16 %v1941_v2, %v1931_v46  ;;  %v1705_v52 = vld [vmem:[#allocation6 + $0x318] sm:$0xff]  ;;  %v1704_v42 = vld [vmem:[#allocation6 + $0x310] sm:$0xff]  ;;  %v1715_v17 = vld [vmem:[#allocation6 + $0x368] sm:$0xff] }
 0x3b2   : > { %v1725_v46 = vld [vmem:[#allocation6 + $0x3b8] sm:$0xff] }
 0x3b3   : > { %v7674_v61 = vpack.c.bf16 %v1725_v46, %v1715_v17  ;;  %v1894_v46 = vld [vmem:[#allocation6 + $0x900] sm:$0xff] }
 0x3b4   : > { %7553 = vmatpush1.bf16.msra.mxu0 %v7552_v53  ;;  %7627 = vmatpush1.bf16.msra.mxu1 %v7626_v39  ;;  %v1951_v53 = vld [vmem:[#allocation6 + $0xac8] sm:$0xff]  ;;  %v1961_v39 = vld [vmem:[#allocation6 + $0xb18] sm:$0x3f] }
 0x3b5   : > { %7555 = vmatprep.subr.bf16.mxu0 %v7554_v49  ;;  %7629 = vmatprep.subr.bf16.mxu1 %v7628_v12  ;;  %v7572_v49 = vpack.c.bf16 %v1940_v1, %v1930_v43  ;;  %v7646_v12 = vpack.c.bf16 %v1942_v7, %v1932_v18  ;;  %v7574_v59 = vpack.c.bf16 %v1961_v39, %v1951_v53  ;;  %v1734_v43 = vld [vmem:[#allocation6 + $0x400] sm:$0xff]  ;;  %v1744_v1 = vld [vmem:[#allocation6 + $0x450] sm:$0xff]  ;;  %v1755_v18 = vld [vmem:[#allocation6 + $0x4a8] sm:$0xff] }
 0x3b6   : > { %v1765_v7 = vld [vmem:[#allocation6 + $0x4f8] sm:$0xff]  ;;  %v7680_v53 = vpack.c.bf16 %v1744_v1, %v1734_v43 }
 0x3b7   : > { %v7682_v39 = vpack.c.bf16 %v1765_v7, %v1755_v18  ;;  %v1945_v43 = vld [vmem:[#allocation6 + $0xa98] sm:$0xff]  ;;  %v1934_v7 = vld [vmem:[#allocation6 + $0xa40] sm:$0xff] }
 0x3b8   : > { %7557 = vmatpush1.bf16.msra.mxu0 %v7556_v20  ;;  %7631 = vmatpush1.bf16.msra.mxu1 %v7630_v45  ;;  %v1615_v20 = vld [vmem:[#allocation6 + $0x48] sm:$0xff]  ;;  %v1625_v45 = vld [vmem:[#allocation6 + $0x98] sm:$0xff] }
 0x3b9   : > { %7559 = vmatprep.subr.bf16.mxu0 %v7558_v55  ;;  %7633 = vmatprep.subr.bf16.mxu1 %v7632_v6  ;;  %v1614_v55 = vld [vmem:[#allocation6 + $0x40] sm:$0xff]  ;;  %v1624_v6 = vld [vmem:[#allocation6 + $0x90] sm:$0xff]  ;;  %v7654_v19 = vpack.c.bf16 %v1625_v45, %v1615_v20  ;;  %v7690_v45 = vpack.c.bf16 %v1805_v8, %v1795_v40 }
 0x3ba   : > { %v7656_v23 = vpack.c.bf16 %v1624_v6, %v1614_v55  ;;  %v1815_v55 = vld [vmem:[#allocation6 + $0x688] sm:$0xff]  ;;  %v1825_v6 = vld [vmem:[#allocation6 + $0x6d8] sm:$0xff] }
 0x3bc   : > { %7561 = vmatpush1.bf16.msra.mxu0 %v7560_v48  ;;  %7635 = vmatpush1.bf16.msra.mxu1 %v7634_v36  ;;  %v7658_v48 = vpack.c.bf16 %v1645_v32, %v1635_v33  ;;  %v1655_v36 = vld [vmem:[#allocation6 + $0x188] sm:$0xff]  ;;  %v7694_v33 = vpack.c.bf16 %v1825_v6, %v1815_v55  ;;  %v1814_v32 = vld [vmem:[#allocation6 + $0x680] sm:$0xff] }
 0x3bd   : > { %7563 = vmatprep.subr.bf16.mxu0 %v7562_v54  ;;  %7637 = vmatprep.subr.bf16.mxu1 %v7636_v38  ;;  %v7662_v54 = vpack.c.bf16 %v1665_v21, %v1655_v36  ;;  %v1654_v38 = vld [vmem:[#allocation6 + $0x180] sm:$0xff]  ;;  %v7698_v36 = vpack.c.bf16 %v1845_v11, %v1835_v13  ;;  %v9415_v11 = vpop.permute.xlu0 %3714 }
 0x3be   : > { %v7664_v41 = vpack.c.bf16 %v1664_v24, %v1654_v38  ;;  %v1834_v21 = vld [vmem:[#allocation6 + $0x720] sm:$0xff]  ;;  %v1865_v38 = vld [vmem:[#allocation6 + $0x818] sm:$0xff]  ;;  %13629 = vst [vmem:[#allocation11_spill] sm:$0xff] %v9415_v11 }
 0x3c0   : > { %7565 = vmatpush1.bf16.msra.mxu0 %v7564_v26  ;;  %7639 = vmatpush1.bf16.msra.mxu1 %v7638_v51  ;;  %v1684_v26 = vld [vmem:[#allocation6 + $0x270] sm:$0xff]  ;;  %v1695_v51 = vld [vmem:[#allocation6 + $0x2c8] sm:$0xff] }
 0x3c1   : > { %7567 = vmatprep.subr.bf16.mxu0 %v7566_v3  ;;  %7641 = vmatprep.subr.bf16.mxu1 %v7640_v4  ;;  %v7668_v35 = vpack.c.bf16 %v1684_v26, %v1674_v31  ;;  %v7670_v3 = vpack.c.bf16 %v1705_v52, %v1695_v51  ;;  %v1694_v4 = vld [vmem:[#allocation6 + $0x2c0] sm:$0xff]  ;;  %v1885_v31 = vld [vmem:[#allocation6 + $0x8b8] sm:$0xff] }
 0x3c2   : > { %v7672_v2 = vpack.c.bf16 %v1704_v42, %v1694_v4  ;;  %v1874_v52 = vld [vmem:[#allocation6 + $0x860] sm:$0xff]  ;;  %v1905_v4 = vld [vmem:[#allocation6 + $0x958] sm:$0xff] }
 0x3c4   : > { %7569 = vmatpush1.bf16.msra.mxu0 %v7568_v37  ;;  %7643 = vmatpush1.bf16.msra.mxu1 %v7642_v10  ;;  %v1735_v37 = vld [vmem:[#allocation6 + $0x408] sm:$0xff]  ;;  %v1745_v10 = vld [vmem:[#allocation6 + $0x458] sm:$0xff] }
 0x3c5   : > { %7571 = vmatprep.subr.bf16.mxu0 %v7570_v58  ;;  %7645 = vmatprep.subr.bf16.mxu1 %v7644_v30  ;;  %v7678_v30 = vpack.c.bf16 %v1745_v10, %v1735_v37  ;;  %v1914_v10 = vld [vmem:[#allocation6 + $0x9a0] sm:$0xff] }
 0x3c7   : > { %2376 = vmatmul.mubr.f32.vlgmr.msra.gmra.mrb[18].mxu0 %v9200_v34  ;;  %2530 = vmatmul.mubr.f32.vlgmr.msra.gmra.mrb[16].mxu1 %v9200_v34 }
 0x3c8   : > { %2381 = vmatprep.mubr.f32.mxu0 %v9211_v22  ;;  %7573 = vmatpush1.bf16.msra.mxu0 %v7572_v49  ;;  %v1775_v49 = vld [vmem:[#allocation6 + $0x548] sm:$0xff] }
 0x3c9   : > { %2535 = vmatprep.mubr.f32.mxu1 %v9211_v22  ;;  %7647 = vmatpush1.bf16.msra.mxu1 %v7646_v12  ;;  %v1785_v12 = vld [vmem:[#allocation6 + $0x598] sm:$0xff] }
 0x3ca   : > { %7576 = vmatprep.subr.msk.bf16.mxu0 %vm9205_vm12, %v7574_v59  ;;  %7650 = vmatprep.subr.msk.bf16.mxu1 %vm9205_vm12, %v7648_v44  ;;  %v7686_v50 = vpack.c.bf16 %v1785_v12, %v1775_v49  ;;  %v1774_v59 = vld [vmem:[#allocation6 + $0x540] sm:$0xff]  ;;  %v1784_v44 = vld [vmem:[#allocation6 + $0x590] sm:$0xff] }
 0x3cb   : > { %2382 = vmatmul.mubr.f32.gmra.mrb[20].mxu0 %v9213_v28  ;;  %2536 = vmatmul.mubr.f32.gmra.mrb[18].mxu1 %v9213_v28  ;;  %v7688_v20 = vpack.c.bf16 %v1784_v44, %v1774_v59  ;;  %v1954_v12 = vld [vmem:[#allocation6 + $0xae0] sm:$0xff] }
 0x3cc   : > { %7579 = vmatpush1.bf16.msk.msra.mxu0 %vm9205_vm12, %v7577_v16  ;;  %2452 = vmatprep.mubr.f32.mxu0 %v8295_v14  ;;  %v1794_v16 = vld [vmem:[#allocation6 + $0x5e0] sm:$0xff] }
 0x3cd   : > { %7653 = vmatpush1.bf16.msk.msra.mxu1 %vm9205_vm12, %v7651_v0  ;;  %2606 = vmatprep.mubr.f32.mxu1 %v8295_v14  ;;  %v1804_v0 = vld [vmem:[#allocation6 + $0x630] sm:$0xff] }
 0x3ce   : > { %7655 = vmatprep.subr.bf16.mxu0 %v7654_v19  ;;  %v7692_v19 = vpack.c.bf16 %v1804_v0, %v1794_v16 }
 0x3cf   : > { %7023 = vmatmul.mubr.msk.f32.vlgmr.msra.gmra.mrb[18].mxu0 %vm684_vm0, %v9228_v9 }
 0x3d0   : > { %7027 = vmatmul.mubr.msk.f32.vlgmr.msra.gmra.mrb[16].mxu1 %vm684_vm0, %v9228_v9  ;;  %7657 = vmatpush1.bf16.msra.mxu0 %v7656_v23  ;;  %v1824_v23 = vld [vmem:[#allocation6 + $0x6d0] sm:$0xff] }
 0x3d1   : > { %2458 = vmatprep.mubr.f32.mxu0 %v8295_v14  ;;  %2612 = vmatprep.mubr.f32.mxu1 %v8295_v14 }
 0x3d2   : > { %7659 = vmatprep.subr.bf16.mxu0 %v7658_v48  ;;  %v7696_v48 = vpack.c.bf16 %v1824_v23, %v1814_v32 }
 0x3d3   : > { %7024 = vmatmul.mubr.msk.f32.gmra.mrb[20].mxu0 %vm684_vm0, %v9237_v56 }
 0x3d4   : > { %7028 = vmatmul.mubr.msk.f32.gmra.mrb[18].mxu1 %vm684_vm0, %v9237_v56  ;;  %7661 = vmatpush1.bf16.msra.mxu0 %v7660_v63  ;;  %v1844_v63 = vld [vmem:[#allocation6 + $0x770] sm:$0xff] }
 0x3d5   : > { %2683 = vmatprep.mubr.f32.mxu0 %v9198_v47  ;;  %7663 = vmatprep.subr.bf16.mxu0 %v7662_v54  ;;  %v1724_v47 = vld [vmem:[#allocation6 + $0x3b0] sm:$0xff]  ;;  %v1855_v54 = vld [vmem:[#allocation6 + $0x7c8] sm:$0xff]  ;;  %v7700_v24 = vpack.c.bf16 %v1844_v63, %v1834_v21 }
 0x3d6   : > { %v7676_v58 = vpack.c.bf16 %v1724_v47, %v1714_v60  ;;  %v7702_v27 = vpack.c.bf16 %v1865_v38, %v1855_v54  ;;  %v1925_v60 = vld [vmem:[#allocation6 + $0x9f8] sm:$0xff] }
 0x3d8   : > { %7665 = vmatpush1.bf16.msra.mxu0 %v7664_v41  ;;  %v1864_v41 = vld [vmem:[#allocation6 + $0x810] sm:$0xff] }
 0x3d9   : > { %7667 = vmatprep.subr.bf16.mxu0 %v7666_v25  ;;  %v1875_v25 = vld [vmem:[#allocation6 + $0x868] sm:$0xff]  ;;  %v7704_v26 = vpack.c.bf16 %v1864_v41, %v1854_v15  ;;  %v9464_v15 = vld [vmem:[%s13339_s6 + $0x8] sm:$0xff] }
 0x3da   : > { %v7706_v51 = vpack.c.bf16 %v1885_v31, %v1875_v25  ;;  %13638 = vst [vmem:[#allocation20_spill] sm:$0xff] %v9464_v15  ;;  %7033 = vmatprep.mubr.msk.f32.mxu1 %vm13390_vm13, %v9464_v15 }
 0x3dc   : > { %7669 = vmatpush1.bf16.msra.mxu0 %v7668_v35  ;;  %v1884_v35 = vld [vmem:[#allocation6 + $0x8b0] sm:$0xff] }
 0x3dd   : > { %7671 = vmatprep.subr.bf16.mxu0 %v7670_v3  ;;  %v1895_v3 = vld [vmem:[#allocation6 + $0x908] sm:$0xff]  ;;  %v7708_v42 = vpack.c.bf16 %v1884_v35, %v1874_v52 }
 0x3de   : > { %v7710_v17 = vpack.c.bf16 %v1905_v4, %v1895_v3 }
 0x3e0   : > { %7673 = vmatpush1.bf16.msra.mxu0 %v7672_v2  ;;  %v1904_v2 = vld [vmem:[#allocation6 + $0x950] sm:$0xff] }
 0x3e1   : > { %7675 = vmatprep.subr.bf16.mxu0 %v7674_v61  ;;  %v1915_v61 = vld [vmem:[#allocation6 + $0x9a8] sm:$0xff]  ;;  %v7712_v47 = vpack.c.bf16 %v1904_v2, %v1894_v46 }
 0x3e2   : > { %v7714_v37 = vpack.c.bf16 %v1925_v60, %v1915_v61 }
 0x3e4   : > { %7677 = vmatpush1.bf16.msra.mxu0 %v7676_v58  ;;  %v1924_v58 = vld [vmem:[#allocation6 + $0x9f0] sm:$0xff] }
 0x3e5   : > { %7679 = vmatprep.subr.bf16.mxu0 %v7678_v30  ;;  %v1935_v30 = vld [vmem:[#allocation6 + $0xa48] sm:$0xff]  ;;  %v7716_v1 = vpack.c.bf16 %v1924_v58, %v1914_v10 }
 0x3e6   : > { %v7718_v18 = vpack.c.bf16 %v1945_v43, %v1935_v30 }
 0x3e8   : > { %7681 = vmatpush1.bf16.msra.mxu0 %v7680_v53  ;;  %v1944_v53 = vld [vmem:[#allocation6 + $0xa90] sm:$0xff] }
 0x3e9   : > { %7683 = vmatprep.subr.bf16.mxu0 %v7682_v39  ;;  %v1955_v39 = vld [vmem:[#allocation6 + $0xae8] sm:$0xff]  ;;  %v7720_v29 = vpack.c.bf16 %v1944_v53, %v1934_v7 }
 0x3ea   : > { %v7722_v49 = vpack.c.bf16 %v1965_v5, %v1955_v39 }
 0x3ec   : > { %7685 = vmatpush1.bf16.msra.mxu0 %v7684_v57  ;;  %v1964_v57 = vld [vmem:[#allocation6 + $0xb30] sm:$0x3f] }
 0x3ed   : > { %7687 = vmatprep.subr.bf16.mxu0 %v7686_v50  ;;  %v7725_v50 = vpack.c.bf16 %v1964_v57, %v1954_v12 }
 0x3f0   : > { %7689 = vmatpush1.bf16.msra.mxu0 %v7688_v20 }
 0x3f1   : > { %7691 = vmatprep.subr.bf16.mxu0 %v7690_v45 }
 0x3f4   : > { %7693 = vmatpush1.bf16.msra.mxu0 %v7692_v19 }
 0x3f5   : > { %7695 = vmatprep.subr.bf16.mxu0 %v7694_v33 }
 0x3f8   : > { %7697 = vmatpush1.bf16.msra.mxu0 %v7696_v48  ;;  %v9421_v48 = vpop.permute.xlu0 %4164 }
 0x3f9   : > { %7699 = vmatprep.subr.bf16.mxu0 %v7698_v36  ;;  %13630 = vst [vmem:[#allocation12_spill] sm:$0xff] %v9421_v48  ;;  %v9423_v36 = vpop.permute.xlu1 %3709 }
 0x3fa   : > { %13631 = vst [vmem:[#allocation13_spill] sm:$0xff] %v9423_v36 }
 0x3fc   : > { %7701 = vmatpush1.bf16.msra.mxu0 %v7700_v24  ;;  %v9435_v63 = vpop.permute.xlu0 %4490 }
 0x3fd   : > { %7703 = vmatprep.subr.bf16.mxu0 %v7702_v27  ;;  %v9433_v21 = vpop.permute.xlu1 %4326  ;;  %13633 = vst [vmem:[#allocation15_spill] sm:$0xff] %v9435_v63 }
 0x3fe   : > { %13632 = vst [vmem:[#allocation14_spill] sm:$0xff] %v9433_v21 }
 0x400   : > { %7705 = vmatpush1.bf16.msra.mxu0 %v7704_v26  ;;  %v9443_v38 = vpop.permute.xlu0 %4804 }
 0x401   : > { %7707 = vmatprep.subr.bf16.mxu0 %v7706_v51  ;;  %v9441_v54 = vpop.permute.xlu1 %4638  ;;  %13635 = vst [vmem:[#allocation17_spill] sm:$0xff] %v9443_v38 }
 0x402   : > { %13634 = vst [vmem:[#allocation16_spill] sm:$0xff] %v9441_v54 }
 0x404   : > { %7709 = vmatpush1.bf16.msra.mxu0 %v7708_v42  ;;  %v9455_v27 = vpop.permute.xlu0 %5428 }
 0x405   : > { %7711 = vmatprep.subr.bf16.mxu0 %v7710_v17  ;;  %v9453_v24 = vpop.permute.xlu1 %4970  ;;  %13637 = vst [vmem:[#allocation19_spill] sm:$0xff] %v9455_v27 }
 0x406   : > { %13636 = vst [vmem:[#allocation18_spill] sm:$0xff] %v9453_v24 }
 0x408   : > { %7713 = vmatpush1.bf16.msra.mxu0 %v7712_v47 }
 0x409   : > { %7715 = vmatprep.subr.bf16.mxu0 %v7714_v37 }
 0x40c   : > { %7717 = vmatpush1.bf16.msra.mxu0 %v7716_v1 }
 0x40d   : > { %7719 = vmatprep.subr.bf16.mxu0 %v7718_v18 }
 0x40f   : > { %2684 = vmatmul.mubr.f32.vlgmr.msra.gmra.mrb[22].mxu0 %v9200_v34 }
 0x410   : > { %2689 = vmatprep.mubr.f32.mxu0 %v9211_v22  ;;  %7721 = vmatpush1.bf16.msra.mxu0 %v7720_v29 }
 0x411   : > { %7724 = vmatprep.subr.msk.bf16.mxu0 %vm9205_vm12, %v7722_v49 }
 0x413   : > { %2690 = vmatmul.mubr.f32.gmra.mrb[24].mxu0 %v9213_v28 }
 0x414   : > { %7727 = vmatpush1.bf16.msk.msra.mxu0 %vm9205_vm12, %v7725_v50  ;;  %2760 = vmatprep.mubr.f32.mxu0 %v8295_v14 }
 0x417   : > { %7031 = vmatmul.mubr.msk.f32.vlgmr.msra.gmra.mrb[22].mxu0 %vm684_vm0, %v9228_v9 }
 0x418   : > { %2766 = vmatprep.mubr.f32.mxu0 %v8295_v14 }
 0x41b   : > { %7032 = vmatmul.mubr.msk.f32.gmra.mrb[24].mxu0 %vm684_vm0, %v9237_v56  ;;  %vm13386_vm0 = vcmask 769024  }
 0x41c   : > { %7037 = vmatprep.mubr.msk.f32.mxu0 %vm13390_vm13, %v9464_v15 }
 0x45a   : > { %v2146_v34 = vpop.f32.mrb[14].mxu0  ;;  %v9301_v22 = vpop.f32.mrb[12].mxu1 }
 0x45b   : > { %3258 = vrot.lane.b32.xlu0 %v9301_v22, %s8304_s24  ;;  %v9305_v28 = vpop.f32.mrb[13].mxu1  ;;  %2810 = vrot.lane.b32.xlu1 %v2146_v34, %s8287_s14  ;;  %v2148_v62 = vpop.f32.mrb[15].mxu0 }
 0x45e   : > { %v9308_v59 = vpop.f32.mrb[16].mxu0  ;;  %v9310_v9 = vpop.f32.mrb[14].mxu1 }
 0x45f   : > { %3353 = vrot.lane.b32.xlu0 %v9301_v22, %s13372_s26  ;;  %v9314_v14 = vpop.f32.mrb[15].mxu1  ;;  %2814 = vrot.lane.b32.xlu1 %v9301_v22, %s8287_s14  ;;  %v9318_v56 = vpop.f32.mrb[17].mxu0  ;;  %v7730_v44 = vpack.c.bf16 %v9308_v59, %v2146_v34 }
 0x460   : > { %v7728_v8 = vpack.c.bf16 %v9318_v56, %v2148_v62 }
 0x462   : > { %7729 = vmatprep.subr.bf16.mxu1 %v7728_v8 }
 0x463   : > { %3448 = vrot.lane.b32.xlu0 %v9301_v22, %s13370_s27  ;;  %2898 = vrot.lane.b32.xlu1 %v2146_v34, %s8286_s12 }
 0x464   : > { %7731 = vmatpush1.bf16.msra.mxu1 %v7730_v44 }
 0x467   : > { %2902 = vrot.lane.b32.xlu1 %v9301_v22, %s8286_s12  ;;  %2812 = vrot.lane.b32.xlu0 %v2148_v62, %s8287_s14 }
 0x46b   : > { %2986 = vrot.lane.b32.xlu1 %v2146_v34, %s8307_s29  ;;  %2816 = vrot.lane.b32.xlu0 %v9305_v28, %s8287_s14 }
 0x46f   : > { %2990 = vrot.lane.b32.xlu1 %v9301_v22, %s8307_s29  ;;  %2900 = vrot.lane.b32.xlu0 %v2148_v62, %s8286_s12 }
 0x473   : > { %3075 = vrot.lane.b32.xlu1 %v2146_v34, %s8297_s11  ;;  %2904 = vrot.lane.b32.xlu0 %v9305_v28, %s8286_s12 }
 0x477   : > { %3079 = vrot.lane.b32.xlu1 %v9301_v22, %s8297_s11  ;;  %2988 = vrot.lane.b32.xlu0 %v2148_v62, %s8307_s29 }
 0x47b   : > { %3164 = vrot.lane.b32.xlu1 %v2146_v34, %s8291_s25  ;;  %2992 = vrot.lane.b32.xlu0 %v9305_v28, %s8307_s29 }
 0x47f   : > { %3168 = vrot.lane.b32.xlu1 %v9301_v22, %s8291_s25  ;;  %3077 = vrot.lane.b32.xlu0 %v2148_v62, %s8297_s11 }
 0x483   : > { %3254 = vrot.lane.b32.xlu1 %v2146_v34, %s8304_s24  ;;  %3081 = vrot.lane.b32.xlu0 %v9305_v28, %s8297_s11 }
 0x487   : > { %3349 = vrot.lane.b32.xlu1 %v2146_v34, %s13372_s26  ;;  %3166 = vrot.lane.b32.xlu0 %v2148_v62, %s8291_s25 }
 0x48b   : > { %3444 = vrot.lane.b32.xlu1 %v2146_v34, %s13370_s27  ;;  %3170 = vrot.lane.b32.xlu0 %v9305_v28, %s8291_s25 }
 0x48f   : > { %3256 = vrot.lane.b32.xlu1 %v2148_v62, %s8304_s24  ;;  %3355 = vrot.lane.b32.xlu0 %v9305_v28, %s13372_s26 }
 0x493   : > { %3351 = vrot.lane.b32.xlu1 %v2148_v62, %s13372_s26  ;;  %3450 = vrot.lane.b32.xlu0 %v9305_v28, %s13370_s27 }
 0x497   : > { %3446 = vrot.lane.b32.xlu1 %v2148_v62, %s13370_s27  ;;  %2828 = vrot.lane.b32.xlu0 %v9308_v59, %s8287_s14 }
 0x49b   : > { %3260 = vrot.lane.b32.xlu1 %v9305_v28, %s8304_s24  ;;  %2832 = vrot.lane.b32.xlu0 %v9310_v9, %s8287_s14 }
 0x49f   : > { %2916 = vrot.lane.b32.xlu0 %v9308_v59, %s8286_s12  ;;  %2830 = vrot.lane.b32.xlu1 %v9318_v56, %s8287_s14 }
 0x4a2   : > { %v9375_v45 = vpop.f32.mrb[18].mxu0 }
 0x4a3   : > { %v9377_v16 = vpop.f32.mrb[16].mxu1  ;;  %v9379_v0 = vpop.f32.mrb[19].mxu0  ;;  %2920 = vrot.lane.b32.xlu0 %v9310_v9, %s8286_s12  ;;  %2834 = vrot.lane.b32.xlu1 %v9314_v14, %s8287_s14 }
 0x4a4   : > { %2779 = vst [vmem:[#allocation3 + $0x30] sm:$0xff] %v9377_v16  ;;  %v9386_v55 = vpop.f32.mrb[17].mxu1 }
 0x4a5   : > { %2780 = vst [vmem:[#allocation3 + $0x38] sm:$0xff] %v9386_v55 }
 0x4a6   : > { %v9389_v6 = vpop.f32.mrb[20].mxu0 }
 0x4a7   : > { %v9391_v19 = vpop.f32.mrb[18].mxu1  ;;  %v9393_v33 = vpop.f32.mrb[21].mxu0  ;;  %3004 = vrot.lane.b32.xlu0 %v9308_v59, %s8307_s29  ;;  %2918 = vrot.lane.b32.xlu1 %v9318_v56, %s8286_s12  ;;  %v7802_v32 = vpack.c.bf16 %v9389_v6, %v9375_v45 }
 0x4a8   : > { %2789 = vst [vmem:[#allocation3 + $0x78] sm:$0xff] %v9391_v19  ;;  %v9402_v23 = vpop.f32.mrb[19].mxu1  ;;  %v7800_v13 = vpack.c.bf16 %v9393_v33, %v9379_v0 }
 0x4a9   : > { %2790 = vst [vmem:[#allocation3 + $0x80] sm:$0xff] %v9402_v23 }
 0x4aa   : > { %7801 = vmatprep.subr.bf16.mxu0 %v7800_v13 }
 0x4ab   : > { %3008 = vrot.lane.b32.xlu0 %v9310_v9, %s8307_s29  ;;  %2922 = vrot.lane.b32.xlu1 %v9314_v14, %s8286_s12 }
 0x4ac   : > { %7803 = vmatpush1.bf16.msra.mxu0 %v7802_v32 }
 0x4af   : > { %3093 = vrot.lane.b32.xlu0 %v9308_v59, %s8297_s11  ;;  %3006 = vrot.lane.b32.xlu1 %v9318_v56, %s8307_s29 }
 0x4b3   : > { %3097 = vrot.lane.b32.xlu0 %v9310_v9, %s8297_s11  ;;  %3010 = vrot.lane.b32.xlu1 %v9314_v14, %s8307_s29 }
 0x4b7   : > { %3182 = vrot.lane.b32.xlu0 %v9308_v59, %s8291_s25  ;;  %3095 = vrot.lane.b32.xlu1 %v9318_v56, %s8297_s11 }
 0x4bb   : > { %3186 = vrot.lane.b32.xlu0 %v9310_v9, %s8291_s25  ;;  %3099 = vrot.lane.b32.xlu1 %v9314_v14, %s8297_s11 }
 0x4bf   : > { %3278 = vrot.lane.b32.xlu0 %v9310_v9, %s8304_s24  ;;  %3184 = vrot.lane.b32.xlu1 %v9318_v56, %s8291_s25 }
 0x4c3   : > { %3274 = vrot.lane.b32.xlu0 %v9308_v59, %s8304_s24  ;;  %3188 = vrot.lane.b32.xlu1 %v9314_v14, %s8291_s25 }
 0x4c7   : > { %3373 = vrot.lane.b32.xlu0 %v9310_v9, %s13372_s26  ;;  %3276 = vrot.lane.b32.xlu1 %v9318_v56, %s8304_s24 }
 0x4cb   : > { %3369 = vrot.lane.b32.xlu0 %v9308_v59, %s13372_s26  ;;  %3371 = vrot.lane.b32.xlu1 %v9318_v56, %s13372_s26 }
 0x4cd   : > { %v9466_v41 = vpop.permute.xlu0 %3258  ;;  %v9468_v25 = vpop.permute.xlu1 %2810 }
 0x4cf   : > { %3468 = vrot.lane.b32.xlu0 %v9310_v9, %s13370_s27  ;;  %3466 = vrot.lane.b32.xlu1 %v9318_v56, %s13370_s27 }
 0x4d1   : > { %v9478_v31 = vpop.permute.xlu0 %3353  ;;  %v9480_v26 = vpop.permute.xlu1 %2814 }
 0x4d3   : > { %3464 = vrot.lane.b32.xlu0 %v9308_v59, %s13370_s27  ;;  %3375 = vrot.lane.b32.xlu1 %v9314_v14, %s13372_s26 }
 0x4d5   : > { %v9486_v51 = vpop.permute.xlu0 %3448  ;;  %v9488_v52 = vpop.permute.xlu1 %2898 }
 0x4d7   : > { %3280 = vrot.lane.b32.xlu0 %v9314_v14, %s8304_s24  ;;  %3470 = vrot.lane.b32.xlu1 %v9314_v14, %s13370_s27 }
 0x4d9   : > { %v9494_v35 = vpop.permute.xlu1 %2902  ;;  %v9496_v3 = vpop.permute.xlu0 %2812 }
 0x4db   : > { %3266 = vrot.lane.b32.xlu0 %v9377_v16, %s8304_s24  ;;  %2818 = vrot.lane.b32.xlu1 %v9375_v45, %s8287_s14 }
 0x4dd   : > { %v9502_v4 = vpop.permute.xlu1 %2986  ;;  %v9504_v42 = vpop.permute.xlu0 %2816 }
 0x4df   : > { %3361 = vrot.lane.b32.xlu0 %v9377_v16, %s13372_s26  ;;  %2822 = vrot.lane.b32.xlu1 %v9377_v16, %s8287_s14 }
 0x4e1   : > { %v9510_v17 = vpop.permute.xlu1 %2990  ;;  %v9512_v46 = vpop.permute.xlu0 %2900 }
 0x4e3   : > { %3456 = vrot.lane.b32.xlu0 %v9377_v16, %s13370_s27  ;;  %2906 = vrot.lane.b32.xlu1 %v9375_v45, %s8286_s12 }
 0x4e5   : > { %v9518_v2 = vpop.permute.xlu1 %3075  ;;  %v9520_v61 = vpop.permute.xlu0 %2904 }
 0x4e7   : > { %2910 = vrot.lane.b32.xlu1 %v9377_v16, %s8286_s12  ;;  %2820 = vrot.lane.b32.xlu0 %v9379_v0, %s8287_s14 }
 0x4e9   : > { %v9526_v60 = vpop.permute.xlu1 %3079  ;;  %v9528_v47 = vpop.permute.xlu0 %2988 }
 0x4ea   : > { %v9530_v37 = vpop.f32.mrb[22].mxu0 }
 0x4eb   : > { %2782 = vst.msk [vmem:[#allocation3 + $0x40] sm:$0xff] %vm13394_vm14, %v9530_v37  ;;  %v9534_v10 = vpop.f32.mrb[23].mxu0  ;;  %2994 = vrot.lane.b32.xlu1 %v9375_v45, %s8307_s29  ;;  %2824 = vrot.lane.b32.xlu0 %v9386_v55, %s8287_s14 }
 0x4ed   : > { %v9540_v58 = vpop.permute.xlu1 %3164  ;;  %v9542_v30 = vpop.permute.xlu0 %2992 }
 0x4ee   : > { %v9544_v43 = vpop.f32.mrb[24].mxu0 }
 0x4ef   : > { %2791 = vst.msk [vmem:[#allocation3 + $0x88] sm:$0xff] %vm13394_vm14, %v9544_v43  ;;  %v9548_v1 = vpop.f32.mrb[25].mxu0  ;;  %2998 = vrot.lane.b32.xlu1 %v9377_v16, %s8307_s29  ;;  %2908 = vrot.lane.b32.xlu0 %v9379_v0, %s8286_s12 }
 0x4f1   : > { %v9554_v18 = vpop.permute.xlu1 %3168  ;;  %v9556_v7 = vpop.permute.xlu0 %3077 }
 0x4f3   : > { %3083 = vrot.lane.b32.xlu1 %v9375_v45, %s8297_s11  ;;  %2912 = vrot.lane.b32.xlu0 %v9386_v55, %s8286_s12 }
 0x4f5   : > { %v9562_v53 = vpop.permute.xlu1 %3254  ;;  %v9564_v39 = vpop.permute.xlu0 %3081 }
 0x4f7   : > { %3087 = vrot.lane.b32.xlu1 %v9377_v16, %s8297_s11  ;;  %2996 = vrot.lane.b32.xlu0 %v9379_v0, %s8307_s29 }
 0x4f9   : > { %v9570_v5 = vpop.permute.xlu1 %3349  ;;  %v9572_v29 = vpop.permute.xlu0 %3166 }
 0x4fb   : > { %3172 = vrot.lane.b32.xlu1 %v9375_v45, %s8291_s25  ;;  %3000 = vrot.lane.b32.xlu0 %v9386_v55, %s8307_s29 }
 0x4fd   : > { %v9578_v49 = vpop.permute.xlu1 %3444  ;;  %v9580_v12 = vpop.permute.xlu0 %3170 }
 0x4ff   : > { %3176 = vrot.lane.b32.xlu1 %v9377_v16, %s8291_s25  ;;  %3085 = vrot.lane.b32.xlu0 %v9379_v0, %s8297_s11 }
 0x501   : > { %v9586_v57 = vpop.permute.xlu1 %3256  ;;  %v9588_v50 = vpop.permute.xlu0 %3355 }
 0x503   : > { %3262 = vrot.lane.b32.xlu1 %v9375_v45, %s8304_s24  ;;  %3089 = vrot.lane.b32.xlu0 %v9386_v55, %s8297_s11 }
 0x505   : > { %v9594_v34 = vpop.permute.xlu1 %3351  ;;  %v9596_v62 = vpop.permute.xlu0 %3450 }
 0x506   : > { %v3487_v59 = vsel %vm13380_vm15, %v9486_v51, %v9596_v62 }
 0x507   : > { %3523 = vst [vmem:[#allocation3 + $0x490] sm:$0xff] %v3487_v59  ;;  %3357 = vrot.lane.b32.xlu1 %v9375_v45, %s13372_s26  ;;  %3174 = vrot.lane.b32.xlu0 %v9379_v0, %s8291_s25  ;;  %v2846_v59 = vsel %vm13393_vm1, %v9468_v25, %v9496_v3 }
 0x509   : > { %v9605_v56 = vpop.permute.xlu1 %3446  ;;  %v2829_v44 = vpop.permute.xlu0 %2828 }
 0x50b   : > { %3452 = vrot.lane.b32.xlu1 %v9375_v45, %s13370_s27  ;;  %3178 = vrot.lane.b32.xlu0 %v9386_v55, %s8291_s25  ;;  %v2847_v45 = vsel %vm13393_vm1, %v9496_v3, %v9480_v26 }
 0x50d   : > { %v9611_v8 = vpop.permute.xlu1 %3260  ;;  %v9613_v16 = vpop.permute.xlu0 %2832 }
 0x50f   : > { %3264 = vrot.lane.b32.xlu1 %v9379_v0, %s8304_s24  ;;  %2836 = vrot.lane.b32.xlu0 %v9389_v6, %s8287_s14 }
 0x511   : > { %v2917_v32 = vpop.permute.xlu0 %2916  ;;  %v2831_v13 = vpop.permute.xlu1 %2830 }
 0x512   : > { %v2854_v40 = vsel %vm13393_vm1, %v2829_v44, %v2831_v13  ;;  %v2855_v20 = vsel %vm13393_vm1, %v2831_v13, %v9613_v16  ;;  %v2934_v13 = vsel %vm13392_vm2, %v9488_v52, %v9512_v46 }
 0x513   : > { %3359 = vrot.lane.b32.xlu1 %v9379_v0, %s13372_s26  ;;  %2840 = vrot.lane.b32.xlu0 %v9391_v19, %s8287_s14  ;;  %v7732_v48 = vpack.c.bf16 %v2855_v20, %v2847_v45  ;;  %v7734_v24 = vpack.c.bf16 %v2854_v40, %v2846_v59  ;;  %v2935_v40 = vsel %vm13392_vm2, %v9512_v46, %v9494_v35 }
 0x514   : > { %v3023_v45 = vsel %vm13386_vm0, %v9502_v4, %v9528_v47 }
 0x515   : > { %v9632_v27 = vpop.permute.xlu0 %2920  ;;  %v9634_v25 = vpop.permute.xlu1 %2834  ;;  %7733 = vmatprep.subr.bf16.mxu1 %v7732_v48 }
 0x516   : > { %7735 = vmatpush1.bf16.msra.mxu1 %v7734_v24  ;;  %v2856_v36 = vsel %vm13393_vm1, %v9613_v16, %v9634_v25 }
 0x517   : > { %3454 = vrot.lane.b32.xlu1 %v9379_v0, %s13370_s27  ;;  %2924 = vrot.lane.b32.xlu0 %v9389_v6, %s8286_s12 }
 0x519   : > { %v3005_v3 = vpop.permute.xlu0 %3004  ;;  %v2919_v44 = vpop.permute.xlu1 %2918 }
 0x51a   : > { %v2942_v20 = vsel %vm13392_vm2, %v2917_v32, %v2919_v44  ;;  %v2943_v48 = vsel %vm13392_vm2, %v2919_v44, %v9632_v27  ;;  %v3024_v44 = vsel %vm13386_vm0, %v9528_v47, %v9510_v17 }
 0x51b   : > { %3268 = vrot.lane.b32.xlu1 %v9386_v55, %s8304_s24  ;;  %2928 = vrot.lane.b32.xlu0 %v9391_v19, %s8286_s12  ;;  %v7736_v0 = vpack.c.bf16 %v2943_v48, %v2935_v40  ;;  %v7738_v24 = vpack.c.bf16 %v2942_v20, %v2934_v13 }
 0x51d   : > { %v9653_v59 = vpop.permute.xlu0 %3008  ;;  %v9655_v52 = vpop.permute.xlu1 %2922  ;;  %7737 = vmatprep.subr.bf16.mxu1 %v7736_v0 }
 0x51e   : > { %7739 = vmatpush1.bf16.msra.mxu1 %v7738_v24  ;;  %v3113_v24 = vsel %vm13414_vm3, %v9556_v7, %v9526_v60 }
 0x51f   : > { %3363 = vrot.lane.b32.xlu1 %v9386_v55, %s13372_s26  ;;  %3012 = vrot.lane.b32.xlu0 %v9389_v6, %s8307_s29 }
 0x521   : > { %v3094_v46 = vpop.permute.xlu0 %3093  ;;  %v3007_v32 = vpop.permute.xlu1 %3006 }
 0x522   : > { %v3031_v13 = vsel %vm13386_vm0, %v3005_v3, %v3007_v32  ;;  %v3032_v40 = vsel %vm13386_vm0, %v3007_v32, %v9653_v59  ;;  %v3112_v3 = vsel %vm13414_vm3, %v9518_v2, %v9556_v7 }
 0x523   : > { %3458 = vrot.lane.b32.xlu1 %v9386_v55, %s13370_s27  ;;  %3016 = vrot.lane.b32.xlu0 %v9391_v19, %s8307_s29  ;;  %v7740_v20 = vpack.c.bf16 %v3032_v40, %v3024_v44  ;;  %v7742_v48 = vpack.c.bf16 %v3031_v13, %v3023_v45 }
 0x525   : > { %v9674_v0 = vpop.permute.xlu0 %3097  ;;  %v9676_v4 = vpop.permute.xlu1 %3010  ;;  %7741 = vmatprep.subr.bf16.mxu1 %v7740_v20  ;;  %v3200_v20 = vsel %vm13384_vm6, %v9540_v58, %v9572_v29 }
 0x526   : > { %7743 = vmatpush1.bf16.msra.mxu1 %v7742_v48  ;;  %v3201_v48 = vsel %vm13384_vm6, %v9572_v29, %v9554_v18 }
 0x527   : > { %3101 = vrot.lane.b32.xlu0 %v9389_v6, %s8297_s11  ;;  %2838 = vrot.lane.b32.xlu1 %v9393_v33, %s8287_s14 }
 0x529   : > { %v3183_v47 = vpop.permute.xlu0 %3182  ;;  %v3096_v55 = vpop.permute.xlu1 %3095 }
 0x52a   : > { %v3120_v32 = vsel %vm13414_vm3, %v3094_v46, %v3096_v55  ;;  %v3121_v45 = vsel %vm13414_vm3, %v3096_v55, %v9674_v0 }
 0x52b   : > { %3105 = vrot.lane.b32.xlu0 %v9391_v19, %s8297_s11  ;;  %2842 = vrot.lane.b32.xlu1 %v9402_v23, %s8287_s14  ;;  %v7744_v44 = vpack.c.bf16 %v3121_v45, %v3113_v24  ;;  %v7746_v13 = vpack.c.bf16 %v3120_v32, %v3112_v3 }
 0x52d   : > { %v9695_v40 = vpop.permute.xlu0 %3186  ;;  %v9697_v2 = vpop.permute.xlu1 %3099  ;;  %7745 = vmatprep.subr.bf16.mxu1 %v7744_v44 }
 0x52e   : > { %7747 = vmatpush1.bf16.msra.mxu1 %v7746_v13  ;;  %v3296_v13 = vsel %vm13383_vm4, %v9586_v57, %v9466_v41 }
 0x52f   : > { %3190 = vrot.lane.b32.xlu0 %v9389_v6, %s8291_s25  ;;  %2926 = vrot.lane.b32.xlu1 %v9393_v33, %s8286_s12 }
 0x531   : > { %v9703_v7 = vpop.permute.xlu0 %3278  ;;  %v3185_v46 = vpop.permute.xlu1 %3184 }
 0x532   : > { %v3208_v55 = vsel %vm13384_vm6, %v3183_v47, %v3185_v46  ;;  %v3209_v3 = vsel %vm13384_vm6, %v3185_v46, %v9695_v40  ;;  %v3295_v47 = vsel %vm13383_vm4, %v9562_v53, %v9586_v57  ;;  %v3390_v57 = vsel %vm13381_vm5, %v9570_v5, %v9594_v34 }
 0x533   : > { %3194 = vrot.lane.b32.xlu0 %v9391_v19, %s8291_s25  ;;  %2930 = vrot.lane.b32.xlu1 %v9402_v23, %s8286_s12  ;;  %v7748_v24 = vpack.c.bf16 %v3209_v3, %v3201_v48  ;;  %v7750_v32 = vpack.c.bf16 %v3208_v55, %v3200_v20 }
 0x535   : > { %v3275_v45 = vpop.permute.xlu0 %3274  ;;  %v9718_v44 = vpop.permute.xlu1 %3188  ;;  %7749 = vmatprep.subr.bf16.mxu1 %v7748_v24  ;;  %v3391_v24 = vsel %vm13381_vm5, %v9594_v34, %v9478_v31  ;;  %v3486_v34 = vsel %vm13380_vm15, %v9605_v56, %v9486_v51 }
 0x536   : > { %7751 = vmatpush1.bf16.msra.mxu1 %v7750_v32 }
 0x537   : > { %3286 = vrot.lane.b32.xlu0 %v9391_v19, %s8304_s24  ;;  %3014 = vrot.lane.b32.xlu1 %v9393_v33, %s8307_s29 }
 0x539   : > { %v9724_v58 = vpop.permute.xlu0 %3373  ;;  %v3277_v29 = vpop.permute.xlu1 %3276 }
 0x53a   : > { %v3304_v46 = vsel %vm13383_vm4, %v3275_v45, %v3277_v29  ;;  %v3305_v20 = vsel %vm13383_vm4, %v3277_v29, %v9703_v7 }
 0x53b   : > { %3282 = vrot.lane.b32.xlu0 %v9389_v6, %s8304_s24  ;;  %3018 = vrot.lane.b32.xlu1 %v9402_v23, %s8307_s29  ;;  %v7752_v48 = vpack.c.bf16 %v3305_v20, %v3296_v13  ;;  %v7754_v55 = vpack.c.bf16 %v3304_v46, %v3295_v47 }
 0x53d   : > { %v3370_v3 = vpop.permute.xlu0 %3369  ;;  %v3372_v53 = vpop.permute.xlu1 %3371  ;;  %7753 = vmatprep.subr.bf16.mxu1 %v7752_v48 }
 0x53e   : > { %v3399_v32 = vsel %vm13381_vm5, %v3370_v3, %v3372_v53  ;;  %v3400_v45 = vsel %vm13381_vm5, %v3372_v53, %v9724_v58  ;;  %7755 = vmatpush1.bf16.msra.mxu1 %v7754_v55  ;;  %v3485_v3 = vsel %vm13380_vm15, %v9578_v49, %v9605_v56  ;;  %v13639_v49 = vpack.c.bf16 %v9314_v14, %v9305_v28  ;;  %v9807_v14 = vld [vmem:[%s13339_s6 + $0x10] sm:$0xff] }
 0x53f   : > { %3381 = vrot.lane.b32.xlu0 %v9391_v19, %s13372_s26  ;;  %3103 = vrot.lane.b32.xlu1 %v9393_v33, %s8297_s11  ;;  %v7756_v29 = vpack.c.bf16 %v3400_v45, %v3391_v24  ;;  %v7758_v47 = vpack.c.bf16 %v3399_v32, %v3390_v57  ;;  %v9780_v32 = vld [vmem:[%s13339_s6] sm:$0xff]  ;;  %v13641_v28 = vpack.c.bf16 %v9310_v9, %v9301_v22 }
 0x540   : > { %13642 = vst [vmem:[#allocation22_spill] sm:$0xff] %v9807_v14 }
 0x541   : > { %v9752_v13 = vpop.permute.xlu0 %3468  ;;  %v3467_v5 = vpop.permute.xlu1 %3466  ;;  %7757 = vmatprep.subr.bf16.mxu1 %v7756_v29 }
 0x542   : > { %v3495_v46 = vsel %vm13380_vm15, %v3467_v5, %v9752_v13  ;;  %7759 = vmatpush1.bf16.msra.mxu1 %v7758_v47 }
 0x543   : > { %3377 = vrot.lane.b32.xlu0 %v9389_v6, %s13372_s26  ;;  %3107 = vrot.lane.b32.xlu1 %v9402_v23, %s8297_s11  ;;  %v7760_v20 = vpack.c.bf16 %v3495_v46, %v3486_v34 }
 0x545   : > { %v3465_v48 = vpop.permute.xlu0 %3464  ;;  %v9763_v55 = vpop.permute.xlu1 %3375  ;;  %7761 = vmatprep.subr.bf16.mxu1 %v7760_v20 }
 0x546   : > { %v3494_v51 = vsel %vm13380_vm15, %v3465_v48, %v3467_v5 }
 0x547   : > { %3476 = vrot.lane.b32.xlu0 %v9391_v19, %s13370_s27  ;;  %3192 = vrot.lane.b32.xlu1 %v9393_v33, %s8291_s25  ;;  %v7762_v53 = vpack.c.bf16 %v3494_v51, %v3485_v3  ;;  %v9788_v19 = vld [vmem:[%s13339_s6 + $0x18] sm:$0xff] }
 0x548   : > { %13640 = vst [vmem:[#allocation21_spill] sm:$0xff] %v9788_v19 }
 0x549   : > { %v9773_v57 = vpop.permute.xlu0 %3280  ;;  %v9775_v24 = vpop.permute.xlu1 %3470  ;;  %7763 = vmatpush1.bf16.msra.mxu1 %v7762_v53 }
 0x54a   : > { %7765 = vmatprep.subr.bf16.mxu1 %v13639_v49 }
 0x54b   : > { %3472 = vrot.lane.b32.xlu0 %v9389_v6, %s13370_s27  ;;  %3284 = vrot.lane.b32.xlu1 %v9393_v33, %s8304_s24 }
 0x54c   : > { %3789 = vmatmul.mubr.f32.vlgmr.msra.gmra.mrb[20].mxu1 %v9780_v32 }
 0x54d   : > { %v9795_v56 = vpop.permute.xlu0 %3266  ;;  %v9797_v45 = vpop.permute.xlu1 %2818  ;;  %7767 = vmatpush1.bf16.msra.mxu1 %v13641_v28  ;;  %7034 = vmatprep.mubr.msk.f32.mxu1 %vm13390_vm13, %v9788_v19 }
 0x54f   : > { %3196 = vrot.lane.b32.xlu0 %v9402_v23, %s8291_s25  ;;  %3379 = vrot.lane.b32.xlu1 %v9393_v33, %s13372_s26 }
 0x550   : > { %3795 = vmatmul.mubr.f32.gmra.mrb[22].mxu1 %v9807_v14 }
 0x551   : > { %v9814_v6 = vpop.permute.xlu0 %3361  ;;  %v9816_v22 = vpop.permute.xlu1 %2822  ;;  %7035 = vmatprep.mubr.msk.f32.mxu1 %vm13390_vm13, %v9464_v15 }
 0x553   : > { %3288 = vrot.lane.b32.xlu0 %v9402_v23, %s8304_s24  ;;  %3474 = vrot.lane.b32.xlu1 %v9393_v33, %s13370_s27 }
 0x555   : > { %v9824_v9 = vpop.permute.xlu0 %3456  ;;  %v9826_v29 = vpop.permute.xlu1 %2906 }
 0x556   : > { %13643 = vst [vmem:[#allocation23_spill] sm:$0xff] %v9824_v9 }
 0x557   : > { %3383 = vrot.lane.b32.xlu0 %v9402_v23, %s13372_s26  ;;  %2826 = vrot.lane.b32.xlu1 %v9530_v37, %s8287_s14 }
 0x559   : > { %v9832_v47 = vpop.permute.xlu1 %2910  ;;  %v9834_v5 = vpop.permute.xlu0 %2820 }
 0x55b   : > { %3478 = vrot.lane.b32.xlu0 %v9402_v23, %s13370_s27  ;;  %2914 = vrot.lane.b32.xlu1 %v9530_v37, %s8286_s12 }
 0x55d   : > { %v9840_v33 = vpop.permute.xlu1 %2994  ;;  %v9842_v34 = vpop.permute.xlu0 %2824 }
 0x55e   : > { %13644 = vst [vmem:[#allocation24_spill] sm:$0xff] %v9842_v34  ;;  %v2848_v34 = vsel %vm13393_vm1, %v9480_v26, %v9504_v42 }
 0x55f   : > { %3270 = vrot.lane.b32.xlu0 %v9530_v37, %s8304_s24  ;;  %3002 = vrot.lane.b32.xlu1 %v9530_v37, %s8307_s29  ;;  %v7770_v15 = vpack.c.bf16 %v2856_v36, %v2848_v34  ;;  %v2936_v36 = vsel %vm13392_vm2, %v9494_v35, %v9520_v61 }
 0x561   : > { %v9848_v46 = vpop.permute.xlu1 %2998  ;;  %v9850_v20 = vpop.permute.xlu0 %2908 }
 0x563   : > { %3365 = vrot.lane.b32.xlu0 %v9530_v37, %s13372_s26  ;;  %3091 = vrot.lane.b32.xlu1 %v9530_v37, %s8297_s11 }
 0x565   : > { %v9856_v23 = vpop.permute.xlu1 %3083  ;;  %v9858_v48 = vpop.permute.xlu0 %2912 }
 0x566   : > { %13645 = vst [vmem:[#allocation25_spill] sm:$0xff] %v9858_v48  ;;  %v2849_v48 = vsel %vm13393_vm1, %v9504_v42, %v9797_v45  ;;  %v2937_v42 = vsel %vm13392_vm2, %v9520_v61, %v9826_v29  ;;  %v3025_v61 = vsel %vm13386_vm0, %v9510_v17, %v9542_v30  ;;  %v2851_v17 = vsel %vm13393_vm1, %v9834_v5, %v9816_v22 }
 0x567   : > { %3460 = vrot.lane.b32.xlu0 %v9530_v37, %s13370_s27  ;;  %3180 = vrot.lane.b32.xlu1 %v9530_v37, %s8291_s25 }
 0x569   : > { %v9864_v3 = vpop.permute.xlu1 %3087  ;;  %v9866_v51 = vpop.permute.xlu0 %2996 }
 0x56b   : > { %3272 = vrot.lane.b32.xlu1 %v9534_v10, %s8304_s24  ;;  %2844 = vrot.lane.b32.xlu0 %v9544_v43, %s8287_s14 }
 0x56d   : > { %v9872_v53 = vpop.permute.xlu1 %3172  ;;  %v9874_v49 = vpop.permute.xlu0 %3000 }
 0x56e   : > { %13646 = vst [vmem:[#allocation26_spill] sm:$0xff] %v9874_v49 }
 0x56f   : > { %3367 = vrot.lane.b32.xlu1 %v9534_v10, %s13372_s26  ;;  %2932 = vrot.lane.b32.xlu0 %v9544_v43, %s8286_s12 }
 0x571   : > { %v9880_v37 = vpop.permute.xlu1 %3176  ;;  %v9882_v28 = vpop.permute.xlu0 %3085 }
 0x573   : > { %3462 = vrot.lane.b32.xlu1 %v9534_v10, %s13370_s27  ;;  %3020 = vrot.lane.b32.xlu0 %v9544_v43, %s8307_s29 }
 0x575   : > { %v9888_v21 = vpop.permute.xlu1 %3262  ;;  %v9890_v63 = vpop.permute.xlu0 %3089 }
 0x576   : > { %13647 = vst [vmem:[#allocation27_spill] sm:$0xff] %v9890_v63 }
 0x577   : > { %3198 = vrot.lane.b32.xlu1 %v9544_v43, %s8291_s25  ;;  %3109 = vrot.lane.b32.xlu0 %v9544_v43, %s8297_s11 }
 0x579   : > { %v9896_v38 = vpop.permute.xlu1 %3357  ;;  %v9898_v54 = vpop.permute.xlu0 %3174 }
 0x57b   : > { %3290 = vrot.lane.b32.xlu0 %v9544_v43, %s8304_s24  ;;  %3292 = vrot.lane.b32.xlu1 %v9548_v1, %s8304_s24 }
 0x57d   : > { %v9904_v10 = vpop.permute.xlu1 %3452  ;;  %v9906_v11 = vpop.permute.xlu0 %3178 }
 0x57e   : > { %13648 = vst [vmem:[#allocation28_spill] sm:$0xff] %v9906_v11 }
 0x57f   : > { %3385 = vrot.lane.b32.xlu0 %v9544_v43, %s13372_s26  ;;  %3387 = vrot.lane.b32.xlu1 %v9548_v1, %s13372_s26  ;;  %s8314_s26 = smov 37  }
 0x581   : > { %v9915_v63 = vpop.permute.xlu1 %3264  ;;  %v2837_v49 = vpop.permute.xlu0 %2836 }
 0x582   : > { %v2857_v11 = vsel %vm13393_vm1, %v9634_v25, %v2837_v49  ;;  %v2944_v25 = vsel %vm13392_vm2, %v9632_v27, %v9655_v52  ;;  %v3033_v27 = vsel %vm13386_vm0, %v9653_v59, %v9676_v4  ;;  %v3122_v59 = vsel %vm13414_vm3, %v9674_v0, %v9697_v2 }
 0x583   : > { %3480 = vrot.lane.b32.xlu0 %v9544_v43, %s13370_s27  ;;  %3482 = vrot.lane.b32.xlu1 %v9548_v1, %s13370_s27  ;;  %v7768_v16 = vpack.c.bf16 %v2857_v11, %v2849_v48  ;;  %s8313_s27 = smov 105  }
 0x585   : > { %v9929_v14 = vpop.permute.xlu1 %3359  ;;  %v9931_v19 = vpop.permute.xlu0 %2840  ;;  %7769 = vmatprep.subr.bf16.mxu1 %v7768_v16 }
 0x586   : > { %7771 = vmatpush1.bf16.msra.mxu1 %v7770_v15  ;;  %v7774_v15 = vpack.c.bf16 %v2944_v25, %v2936_v36 }
 0x589   : > { %v9936_v9 = vpop.permute.xlu1 %3454  ;;  %v2925_v26 = vpop.permute.xlu0 %2924 }
 0x58a   : > { %v2945_v11 = vsel %vm13392_vm2, %v9655_v52, %v2925_v26  ;;  %v3026_v52 = vsel %vm13386_vm0, %v9542_v30, %v9840_v33 }
 0x58b   : > { %v7772_v43 = vpack.c.bf16 %v2945_v11, %v2937_v42  ;;  %v7778_v42 = vpack.c.bf16 %v3033_v27, %v3025_v61 }
 0x58d   : > { %v9946_v1 = vpop.permute.xlu1 %3268  ;;  %v9948_v34 = vpop.permute.xlu0 %2928  ;;  %7773 = vmatprep.subr.bf16.mxu1 %v7772_v43 }
 0x58e   : > { %7775 = vmatpush1.bf16.msra.mxu1 %v7774_v15  ;;  %v3115_v15 = vsel %vm13414_vm3, %v9564_v39, %v9856_v23 }
 0x591   : > { %v9953_v48 = vpop.permute.xlu1 %3363  ;;  %v3013_v16 = vpop.permute.xlu0 %3012 }
 0x592   : > { %v3034_v35 = vsel %vm13386_vm0, %v9676_v4, %v3013_v16  ;;  %v2850_v4 = vsel %vm13393_vm1, %v9797_v45, %v9834_v5  ;;  %v3114_v45 = vsel %vm13414_vm3, %v9526_v60, %v9564_v39  ;;  %v2938_v60 = vsel %vm13392_vm2, %v9826_v29, %v9850_v20 }
 0x593   : > { %v7776_v25 = vpack.c.bf16 %v3034_v35, %v3026_v52  ;;  %v2939_v39 = vsel %vm13392_vm2, %v9850_v20, %v9832_v47  ;;  %v3202_v29 = vsel %vm13384_vm6, %v9554_v18, %v9580_v12  ;;  %v3028_v18 = vsel %vm13386_vm0, %v9866_v51, %v9848_v46 }
 0x595   : > { %v9963_v11 = vpop.permute.xlu1 %3458  ;;  %v9965_v36 = vpop.permute.xlu0 %3016  ;;  %7777 = vmatprep.subr.bf16.mxu1 %v7776_v25  ;;  %v7782_v25 = vpack.c.bf16 %v3122_v59, %v3114_v45 }
 0x596   : > { %13649 = vst [vmem:[#allocation29_spill] sm:$0xff] %v9963_v11  ;;  %7779 = vmatpush1.bf16.msra.mxu1 %v7778_v42 }
 0x599   : > { %v3102_v30 = vpop.permute.xlu0 %3101  ;;  %v2839_v43 = vpop.permute.xlu1 %2838 }
 0x59a   : > { %v3123_v27 = vsel %vm13414_vm3, %v9697_v2, %v3102_v30  ;;  %v2858_v52 = vsel %vm13393_vm1, %v2837_v49, %v2839_v43  ;;  %v2859_v0 = vsel %vm13393_vm1, %v2839_v43, %v9931_v19  ;;  %v3210_v2 = vsel %vm13384_vm6, %v9695_v40, %v9718_v44 }
 0x59b   : > { %v7780_v35 = vpack.c.bf16 %v3123_v27, %v3115_v15  ;;  %v7804_v5 = vpack.c.bf16 %v2859_v0, %v2851_v17  ;;  %v7806_v61 = vpack.c.bf16 %v2858_v52, %v2850_v4  ;;  %v3203_v4 = vsel %vm13384_vm6, %v9580_v12, %v9872_v53 }
 0x59c   : > { %v7786_v52 = vpack.c.bf16 %v3210_v2, %v3202_v29  ;;  %v3306_v2 = vsel %vm13383_vm4, %v9703_v7, %v9773_v57 }
 0x59d   : > { %v9987_v42 = vpop.permute.xlu0 %3105  ;;  %v9989_v11 = vpop.permute.xlu1 %2842  ;;  %7781 = vmatprep.subr.bf16.mxu1 %v7780_v35  ;;  %7805 = vmatprep.subr.bf16.mxu0 %v7804_v5  ;;  %v3027_v35 = vsel %vm13386_vm0, %v9840_v33, %v9866_v51  ;;  %v3298_v33 = vsel %vm13383_vm4, %v9611_v8, %v9888_v21 }
 0x59e   : > { %7783 = vmatpush1.bf16.msra.mxu1 %v7782_v25  ;;  %7807 = vmatpush1.bf16.msra.mxu0 %v7806_v61 }
 0x5a1   : > { %v3191_v49 = vpop.permute.xlu0 %3190  ;;  %v2927_v59 = vpop.permute.xlu1 %2926 }
 0x5a2   : > { %v3211_v17 = vsel %vm13384_vm6, %v9718_v44, %v3191_v49  ;;  %v2946_v43 = vsel %vm13392_vm2, %v2925_v26, %v2927_v59  ;;  %v2947_v40 = vsel %vm13392_vm2, %v2927_v59, %v9948_v34 }
 0x5a3   : > { %v7784_v15 = vpack.c.bf16 %v3211_v17, %v3203_v4  ;;  %v7808_v20 = vpack.c.bf16 %v2947_v40, %v2939_v39  ;;  %v7810_v27 = vpack.c.bf16 %v2946_v43, %v2938_v60  ;;  %v3116_v43 = vsel %vm13414_vm3, %v9856_v23, %v9882_v28 }
 0x5a4   : > { %v3117_v40 = vsel %vm13414_vm3, %v9882_v28, %v9864_v3  ;;  %v3393_v23 = vsel %vm13381_vm5, %v9588_v50, %v9896_v38 }
 0x5a5   : > { %v10011_v0 = vpop.permute.xlu0 %3194  ;;  %v10013_v45 = vpop.permute.xlu1 %2930  ;;  %7785 = vmatprep.subr.bf16.mxu1 %v7784_v15  ;;  %7809 = vmatprep.subr.bf16.mxu0 %v7808_v20  ;;  %v3401_v15 = vsel %vm13381_vm5, %v9724_v58, %v9763_v55 }
 0x5a6   : > { %7787 = vmatpush1.bf16.msra.mxu1 %v7786_v52  ;;  %7811 = vmatpush1.bf16.msra.mxu0 %v7810_v27 }
 0x5a9   : > { %v10015_v44 = vpop.permute.xlu0 %3286  ;;  %v3015_v26 = vpop.permute.xlu1 %3014 }
 0x5aa   : > { %v3035_v12 = vsel %vm13386_vm0, %v3013_v16, %v3015_v26  ;;  %v3036_v5 = vsel %vm13386_vm0, %v3015_v26, %v9965_v36  ;;  %v3297_v16 = vsel %vm13383_vm4, %v9466_v41, %v9611_v8 }
 0x5ab   : > { %v7812_v61 = vpack.c.bf16 %v3036_v5, %v3028_v18  ;;  %v7814_v25 = vpack.c.bf16 %v3035_v12, %v3027_v35  ;;  %v7790_v4 = vpack.c.bf16 %v3306_v2, %v3297_v16  ;;  %v3204_v18 = vsel %vm13384_vm6, %v9872_v53, %v9898_v54 }
 0x5ac   : > { %v3205_v12 = vsel %vm13384_vm6, %v9898_v54, %v9880_v37  ;;  %v3488_v53 = vsel %vm13380_vm15, %v9596_v62, %v9904_v10  ;;  %v3299_v54 = vsel %vm13383_vm4, %v9888_v21, %v9915_v63  ;;  %v3300_v2 = vsel %vm13383_vm4, %v9915_v63, %v9795_v56  ;;  %v3559_v62 = vld [vmem:[#allocation3 + $0x80] sm:$0xff]  ;;  %v3689_v21 = vld [vmem:[#allocation3 + $0x490] sm:$0xff] }
 0x5ad   : > { %v3283_v60 = vpop.permute.xlu0 %3282  ;;  %v10029_v39 = vpop.permute.xlu1 %3018  ;;  %7813 = vmatprep.subr.bf16.mxu0 %v7812_v61  ;;  %v3496_v61 = vsel %vm13380_vm15, %v9752_v13, %v9775_v24  ;;  %v3394_v63 = vsel %vm13381_vm5, %v9896_v38, %v9929_v14 }
 0x5ae   : > { %v3307_v51 = vsel %vm13383_vm4, %v9773_v57, %v3283_v60  ;;  %7815 = vmatpush1.bf16.msra.mxu0 %v7814_v25 }
 0x5af   : > { %v7788_v59 = vpack.c.bf16 %v3307_v51, %v3298_v33 }
 0x5b1   : > { %v10039_v17 = vpop.permute.xlu0 %3381  ;;  %v3104_v7 = vpop.permute.xlu1 %3103  ;;  %7789 = vmatprep.subr.bf16.mxu1 %v7788_v59 }
 0x5b2   : > { %v3124_v57 = vsel %vm13414_vm3, %v3102_v30, %v3104_v7  ;;  %v3125_v29 = vsel %vm13414_vm3, %v3104_v7, %v9987_v42  ;;  %7791 = vmatpush1.bf16.msra.mxu1 %v7790_v4  ;;  %v3392_v30 = vsel %vm13381_vm5, %v9478_v31, %v9588_v50  ;;  %v7798_v7 = vpack.c.bf16 %v3496_v61, %v3689_v21  ;;  %v3560_v61 = vld [vmem:[#allocation3 + $0x88] sm:$0xff] }
 0x5b3   : > { %v7816_v41 = vpack.c.bf16 %v3125_v29, %v3117_v40  ;;  %v7818_v8 = vpack.c.bf16 %v3124_v57, %v3116_v43  ;;  %v7794_v26 = vpack.c.bf16 %v3401_v15, %v3392_v30  ;;  %v3550_v43 = vld [vmem:[#allocation3 + $0x38] sm:$0xff]  ;;  %v3395_v29 = vsel %vm13381_vm5, %v9929_v14, %v9814_v6  ;;  %v13650_v14 = vld [vmem:[#allocation23_spill] sm:$0xff] }
 0x5b4   : > { %v3558_v57 = vld [vmem:[#allocation3 + $0x78] sm:$0xff]  ;;  %v3489_v30 = vsel %vm13380_vm15, %v9904_v10, %v9936_v9  ;;  %v2860_v21 = vsel %vm13393_vm1, %v9931_v19, %v9989_v11 }
 0x5b5   : > { %v3378_v20 = vpop.permute.xlu0 %3377  ;;  %v10053_v27 = vpop.permute.xlu1 %3107  ;;  %7817 = vmatprep.subr.bf16.mxu0 %v7816_v41 }
 0x5b6   : > { %v3402_v28 = vsel %vm13381_vm5, %v9763_v55, %v3378_v20  ;;  %7819 = vmatpush1.bf16.msra.mxu0 %v7818_v8 }
 0x5b7   : > { %v7792_v52 = vpack.c.bf16 %v3402_v28, %v3393_v23  ;;  %v3549_v23 = vld [vmem:[#allocation3 + $0x30] sm:$0xff] }
 0x5b8   : > { %v7838_v28 = vpack.c.bf16 %v3558_v57, %v3549_v23 }
 0x5b9   : > { %v10063_v35 = vpop.permute.xlu0 %3476  ;;  %v3193_v58 = vpop.permute.xlu1 %3192  ;;  %7793 = vmatprep.subr.bf16.mxu1 %v7792_v52 }
 0x5ba   : > { %v3212_v55 = vsel %vm13384_vm6, %v3191_v49, %v3193_v58  ;;  %v3213_v5 = vsel %vm13384_vm6, %v3193_v58, %v10011_v0  ;;  %7795 = vmatpush1.bf16.msra.mxu1 %v7794_v26 }
 0x5bb   : > { %v7820_v31 = vpack.c.bf16 %v3213_v5, %v3205_v12  ;;  %v7822_v50 = vpack.c.bf16 %v3212_v55, %v3204_v18  ;;  %v13651_v12 = vld [vmem:[#allocation21_spill] sm:$0xff] }
 0x5bd   : > { %v3473_v25 = vpop.permute.xlu0 %3472  ;;  %v3285_v49 = vpop.permute.xlu1 %3284  ;;  %7821 = vmatprep.subr.bf16.mxu0 %v7820_v31 }
 0x5be   : > { %v3497_v33 = vsel %vm13380_vm15, %v9775_v24, %v3473_v25  ;;  %v3308_v13 = vsel %vm13383_vm4, %v3283_v60, %v3285_v49  ;;  %v3309_v51 = vsel %vm13383_vm4, %v3285_v49, %v10015_v44  ;;  %7823 = vmatpush1.bf16.msra.mxu0 %v7822_v50  ;;  %v7836_v60 = vpack.c.bf16 %v3559_v62, %v3550_v43  ;;  %v13652_v50 = vld [vmem:[#allocation22_spill] sm:$0xff]  ;;  %v13654_v43 = vld [vmem:[#allocation24_spill] sm:$0xff] }
 0x5bf   : > { %v7796_v16 = vpack.c.bf16 %v3497_v33, %v3488_v53  ;;  %v7824_v59 = vpack.c.bf16 %v3309_v51, %v3300_v2  ;;  %v7826_v4 = vpack.c.bf16 %v3308_v13, %v3299_v54  ;;  %v13374_v53 = vmov 0.0|0.0   ;;  %v3551_v54 = vld [vmem:[#allocation3 + $0x40] sm:$0xff] }
 0x5c0   : > { %v2852_v57 = vsel %vm13393_vm1, %v9816_v22, %v13654_v43 }
 0x5c1   : > { %v10094_v40 = vpop.permute.xlu0 %3196  ;;  %v3380_v24 = vpop.permute.xlu1 %3379  ;;  %7797 = vmatprep.subr.bf16.mxu1 %v7796_v16  ;;  %7825 = vmatprep.subr.bf16.mxu0 %v7824_v59 }
 0x5c2   : > { %v3403_v41 = vsel %vm13381_vm5, %v3378_v20, %v3380_v24  ;;  %v3404_v8 = vsel %vm13381_vm5, %v3380_v24, %v10039_v17  ;;  %7799 = vmatpush1.bf16.msra.mxu1 %v7798_v7  ;;  %7827 = vmatpush1.bf16.msra.mxu0 %v7826_v4  ;;  %v3490_v20 = vsel %vm13380_vm15, %v9936_v9, %v13650_v14  ;;  %v13653_v9 = vld [vmem:[#allocation20_spill] sm:$0xff] }
 0x5c3   : > { %7837 = vmatprep.subr.bf16.mxu1 %v7836_v60  ;;  %v7828_v38 = vpack.c.bf16 %v3404_v8, %v3395_v29  ;;  %v7830_v15 = vpack.c.bf16 %v3403_v41, %v3394_v63  ;;  %v7842_v29 = vpack.c.bf16 %v2860_v21, %v2852_v57  ;;  %v2948_v41 = vsel %vm13392_vm2, %v9948_v34, %v10013_v45 }
 0x5c5   : > { %v10105_v52 = vpop.permute.xlu0 %3288  ;;  %v3475_v26 = vpop.permute.xlu1 %3474  ;;  %3866 = vmatmul.mubr.f32.vlgmr.msra.gmra.mrb[24].mxu1 %v9780_v32  ;;  %7829 = vmatprep.subr.bf16.mxu0 %v7828_v38 }
 0x5c6   : > { %v3498_v58 = vsel %vm13380_vm15, %v3473_v25, %v3475_v26  ;;  %v3499_v18 = vsel %vm13380_vm15, %v3475_v26, %v10063_v35  ;;  %7831 = vmatpush1.bf16.msra.mxu0 %v7830_v15  ;;  %7839 = vmatpush1.bf16.msra.mxu1 %v7838_v28  ;;  %v7873_v25 = vpack.c.bf16 %v3560_v61, %v3551_v54  ;;  %v13655_v15 = vld [vmem:[#allocation25_spill] sm:$0xff] }
 0x5c7   : > { %7036 = vmatprep.mubr.msk.f32.mxu1 %vm13390_vm13, %v13651_v12  ;;  %v7832_v10 = vpack.c.bf16 %v3499_v18, %v3490_v20  ;;  %v7834_v55 = vpack.c.bf16 %v3498_v58, %v3489_v30  ;;  %v2940_v28 = vsel %vm13392_vm2, %v9832_v47, %v13655_v15  ;;  %v3037_v26 = vsel %vm13386_vm0, %v9965_v36, %v10029_v39 }
 0x5c8   : > { %v7846_v30 = vpack.c.bf16 %v2948_v41, %v2940_v28 }
 0x5c9   : > { %v10116_v5 = vpop.permute.xlu0 %3383  ;;  %v2827_v31 = vpop.permute.xlu1 %2826  ;;  %3872 = vmatmul.mubr.f32.gmra.mrb[26].mxu1 %v13652_v50  ;;  %7833 = vmatprep.subr.bf16.mxu0 %v7832_v10 }
 0x5ca   : > { %2888 = vst.msk [vmem:[#allocation3 + $0xd0] sm:$0xff] %vm13394_vm14, %v2827_v31  ;;  %7835 = vmatpush1.bf16.msra.mxu0 %v7834_v55  ;;  %7039 = vmatprep.mubr.msk.f32.mxu1 %vm13390_vm13, %v13653_v9  ;;  %v2853_v63 = vsel %vm13393_vm1, %v13654_v43, %v2827_v31 }
 0x5cb   : > { %7872 = vmatprep.subr.bf16.mxu0 %v13374_v53 }
 0x5cd   : > { %v10123_v49 = vpop.permute.xlu0 %3478  ;;  %v2915_v2 = vpop.permute.xlu1 %2914  ;;  %3943 = vmatmul.mubr.f32.vlgmr.msra.gmra.mrb[26].mxu0 %v9780_v32 }
 0x5ce   : > { %2976 = vst.msk [vmem:[#allocation3 + $0x160] sm:$0xff] %vm13394_vm14, %v2915_v2  ;;  %7874 = vmatpush1.bf16.msra.mxu0 %v7873_v25  ;;  %7038 = vmatprep.mubr.msk.f32.mxu0 %vm13390_vm13, %v13651_v12  ;;  %v3126_v25 = vsel %vm13414_vm3, %v9987_v42, %v10053_v27 }
 0x5cf   : > { %7875 = vmatprep.subr.bf16.mxu0 %v13374_v53 }
 0x5d1   : > { %v10130_v33 = vpop.permute.xlu0 %3270  ;;  %v3003_v13 = vpop.permute.xlu1 %3002  ;;  %3949 = vmatmul.mubr.f32.gmra.mrb[28].mxu0 %v13652_v50  ;;  %v3569_v18 = vld [vmem:[#allocation3 + $0xd0] sm:$0xff] }
 0x5d2   : > { %3065 = vst.msk [vmem:[#allocation3 + $0x1f0] sm:$0xff] %vm13394_vm14, %v3003_v13  ;;  %7041 = vmatprep.mubr.msk.f32.mxu0 %vm13390_vm13, %v13653_v9 }
 0x5d5   : > { %v10136_v51 = vpop.permute.xlu0 %3365  ;;  %v3092_v62 = vpop.permute.xlu1 %3091 }
 0x5d6   : > { %3154 = vst.msk [vmem:[#allocation3 + $0x280] sm:$0xff] %vm13394_vm14, %v3092_v62 }
 0x5d9   : > { %v10139_v16 = vpop.permute.xlu0 %3460  ;;  %v3181_v59 = vpop.permute.xlu1 %3180  ;;  %v3605_v41 = vld [vmem:[#allocation3 + $0x1f0] sm:$0xff] }
 0x5da   : > { %3242 = vst.msk [vmem:[#allocation3 + $0x310] sm:$0xff] %vm13394_vm14, %v3181_v59 }
 0x5dd   : > { %v3273_v4 = vpop.permute.xlu1 %3272  ;;  %v2845_v7 = vpop.permute.xlu0 %2844 }
 0x5de   : > { %v3303_v24 = vsel %vm13383_vm4, %v10130_v33, %v3273_v4  ;;  %v2861_v60 = vsel %vm13393_vm1, %v9989_v11, %v2845_v7  ;;  %2897 = vst.msk [vmem:[#allocation3 + $0x118] sm:$0xff] %vm13394_vm14, %v2845_v7  ;;  %v2941_v11 = vsel %vm13392_vm2, %v13655_v15, %v2915_v2  ;;  %v13657_v4 = vld [vmem:[#allocation27_spill] sm:$0xff] }
 0x5df   : > { %3339 = vst.msk [vmem:[#allocation3 + $0x3a0] sm:$0xff] %vm13394_vm14, %v3303_v24  ;;  %v7840_v19 = vpack.c.bf16 %v2861_v60, %v2853_v63  ;;  %v3119_v7 = vsel %vm13414_vm3, %v13657_v4, %v3092_v62  ;;  %v3118_v63 = vsel %vm13414_vm3, %v9864_v3, %v13657_v4  ;;  %v13658_v60 = vld [vmem:[#allocation28_spill] sm:$0xff] }
 0x5e0   : > { %v3207_v62 = vsel %vm13384_vm6, %v13658_v60, %v3181_v59  ;;  %v7854_v57 = vpack.c.bf16 %v3126_v25, %v3118_v63 }
 0x5e1   : > { %v3368_v8 = vpop.permute.xlu1 %3367  ;;  %v2933_v38 = vpop.permute.xlu0 %2932  ;;  %7841 = vmatprep.subr.bf16.mxu1 %v7840_v19  ;;  %v3214_v19 = vsel %vm13384_vm6, %v10011_v0, %v10094_v40  ;;  %v3302_v0 = vsel %vm13383_vm4, %v9946_v1, %v10130_v33  ;;  %v3301_v33 = vsel %vm13383_vm4, %v9795_v56, %v9946_v1 }
 0x5e2   : > { %v3398_v23 = vsel %vm13381_vm5, %v10136_v51, %v3368_v8  ;;  %v2949_v22 = vsel %vm13392_vm2, %v10013_v45, %v2933_v38  ;;  %2985 = vst.msk [vmem:[#allocation3 + $0x1a8] sm:$0xff] %vm13394_vm14, %v2933_v38  ;;  %7843 = vmatpush1.bf16.msra.mxu1 %v7842_v29  ;;  %v13656_v45 = vld [vmem:[#allocation26_spill] sm:$0xff]  ;;  %vm13411_vm2 = vcmask 842752  }
 0x5e3   : > { %3434 = vst.msk [vmem:[#allocation3 + $0x430] sm:$0xff] %vm13394_vm14, %v3398_v23  ;;  %v7844_v34 = vpack.c.bf16 %v2949_v22, %v2941_v11  ;;  %v3030_v55 = vsel %vm13386_vm0, %v13656_v45, %v3003_v13  ;;  %v3029_v36 = vsel %vm13386_vm0, %v9848_v46, %v13656_v45  ;;  %v3206_v11 = vsel %vm13384_vm6, %v9880_v37, %v13658_v60 }
 0x5e4   : > { %v7850_v54 = vpack.c.bf16 %v3037_v26, %v3029_v36  ;;  %v3310_v23 = vsel %vm13383_vm4, %v10015_v44, %v10105_v52 }
 0x5e5   : > { %v3463_v20 = vpop.permute.xlu1 %3462  ;;  %v3021_v58 = vpop.permute.xlu0 %3020  ;;  %v3578_v10 = vld [vmem:[#allocation3 + $0x118] sm:$0xff]  ;;  %7845 = vmatprep.subr.bf16.mxu1 %v7844_v34  ;;  %v3623_v34 = vld [vmem:[#allocation3 + $0x280] sm:$0xff] }
 0x5e6   : > { %v3493_v31 = vsel %vm13380_vm15, %v10139_v16, %v3463_v20  ;;  %v3038_v47 = vsel %vm13386_vm0, %v10029_v39, %v3021_v58  ;;  %3074 = vst.msk [vmem:[#allocation3 + $0x238] sm:$0xff] %vm13394_vm14, %v3021_v58  ;;  %v7876_v61 = vpack.c.bf16 %v3578_v10, %v3569_v18  ;;  %7847 = vmatpush1.bf16.msra.mxu1 %v7846_v30  ;;  %v3587_v39 = vld [vmem:[#allocation3 + $0x160] sm:$0xff] }
 0x5e7   : > { %3529 = vst.msk [vmem:[#allocation3 + $0x4c0] sm:$0xff] %vm13394_vm14, %v3493_v31  ;;  %v7848_v9 = vpack.c.bf16 %v3038_v47, %v3030_v55  ;;  %v7862_v18 = vpack.c.bf16 %v3310_v23, %v3301_v33  ;;  %v3405_v10 = vsel %vm13381_vm5, %v10039_v17, %v10116_v5  ;;  %v3641_v31 = vld [vmem:[#allocation3 + $0x310] sm:$0xff]  ;;  %v3659_v25 = vld [vmem:[#allocation3 + $0x3a0] sm:$0xff] }
 0x5e8   : > { %7877 = vmatpush1.bf16.msra.mxu0 %v7876_v61 }
 0x5e9   : > { %v3199_v2 = vpop.permute.xlu1 %3198  ;;  %v3110_v13 = vpop.permute.xlu0 %3109  ;;  %7878 = vmatprep.subr.bf16.mxu0 %v13374_v53  ;;  %v3596_v21 = vld [vmem:[#allocation3 + $0x1a8] sm:$0xff]  ;;  %7849 = vmatprep.subr.bf16.mxu1 %v7848_v9 }
 0x5ea   : > { %v3215_v46 = vsel %vm13384_vm6, %v10094_v40, %v3199_v2  ;;  %3251 = vst.msk [vmem:[#allocation3 + $0x358] sm:$0xff] %vm13394_vm14, %v3199_v2  ;;  %v3127_v43 = vsel %vm13414_vm3, %v10053_v27, %v3110_v13  ;;  %3163 = vst.msk [vmem:[#allocation3 + $0x2c8] sm:$0xff] %vm13394_vm14, %v3110_v13  ;;  %v7879_v42 = vpack.c.bf16 %v3596_v21, %v3587_v39  ;;  %7851 = vmatpush1.bf16.msra.mxu1 %v7850_v54  ;;  %v3677_v39 = vld [vmem:[#allocation3 + $0x430] sm:$0xff] }
 0x5eb   : > { %v7852_v24 = vpack.c.bf16 %v3127_v43, %v3119_v7  ;;  %v7856_v38 = vpack.c.bf16 %v3215_v46, %v3207_v62  ;;  %v7858_v40 = vpack.c.bf16 %v3214_v19, %v3206_v11  ;;  %v3500_v54 = vsel %vm13380_vm15, %v10063_v35, %v10123_v49  ;;  %v13660_v7 = vld [vmem:[#allocation13_spill] sm:$0xff] }
 0x5ec   : > { %7880 = vmatpush1.bf16.msra.mxu0 %v7879_v42 }
 0x5ed   : > { %v3291_v29 = vpop.permute.xlu0 %3290  ;;  %v3293_v27 = vpop.permute.xlu1 %3292  ;;  %7881 = vmatprep.subr.bf16.mxu0 %v13374_v53  ;;  %v3614_v8 = vld [vmem:[#allocation3 + $0x238] sm:$0xff]  ;;  %7853 = vmatprep.subr.bf16.mxu1 %v7852_v24 }
 0x5ee   : > { %v3311_v3 = vsel %vm13383_vm4, %v10105_v52, %v3291_v29  ;;  %v3312_v15 = vsel %vm13383_vm4, %v3291_v29, %v3293_v27  ;;  %v7882_v59 = vpack.c.bf16 %v3614_v8, %v3605_v41  ;;  %7855 = vmatpush1.bf16.msra.mxu1 %v7854_v57  ;;  %v3397_v52 = vsel %vm13381_vm5, %v9953_v48, %v10136_v51  ;;  %v4233_v27 = vld [vmem:[#allocation8 + $0x40] ss:$8 sm:$0x3]  ;;  %v4397_v8 = vld [vmem:[#allocation8 + $0x41] ss:$8 sm:$0x3] }
 0x5ef   : > { %3348 = vst.msk [vmem:[#allocation3 + $0x3e8] sm:$0xff] %vm13394_vm14, %v3312_v15  ;;  %7857 = vmatprep.subr.bf16.mxu1 %v7856_v38  ;;  %v7860_v37 = vpack.c.bf16 %v3311_v3, %v3302_v0  ;;  %v3396_v51 = vsel %vm13381_vm5, %v9814_v6, %v9953_v48  ;;  %v4238_v29 = vlaneseq  ;;  %vm4235_vm7 = vcmp.gt.f32.partialorder %v4233_v27, 0.5 }
 0x5f0   : > { %7883 = vmatpush1.bf16.msra.mxu0 %v7882_v59  ;;  %v7866_v9 = vpack.c.bf16 %v3405_v10, %v3396_v51  ;;  %vm4399_vm8 = vcmp.gt.f32.partialorder %v4397_v8, 0.5  ;;  %v13664_v3 = vmov 0   ;;  %vm13423_vm4 = vcmask 302080  }
 0x5f1   : > { %v3386_v22 = vpop.permute.xlu0 %3385  ;;  %v3388_v28 = vpop.permute.xlu1 %3387  ;;  %7884 = vmatprep.subr.bf16.mxu0 %v13374_v53  ;;  %v3632_v30 = vld [vmem:[#allocation3 + $0x2c8] sm:$0xff]  ;;  %v3650_v44 = vld [vmem:[#allocation3 + $0x358] sm:$0xff]  ;;  %v10302_v41 = vshrl.u32 %v4238_v29, 7  ;;  %v10308_v15 = vsel %vm4235_vm7, 1, %v13664_v3  ;;  %v10311_v59 = vsel %vm4399_vm8, 1, %v13664_v3 }
 0x5f2   : > { %v3406_v26 = vsel %vm13381_vm5, %v10116_v5, %v3386_v22  ;;  %v3407_v20 = vsel %vm13381_vm5, %v3386_v22, %v3388_v28  ;;  %v7885_v58 = vpack.c.bf16 %v3632_v30, %v3623_v34  ;;  %7859 = vmatpush1.bf16.msra.mxu1 %v7858_v40  ;;  %v7888_v61 = vpack.c.bf16 %v3650_v44, %v3641_v31  ;;  %v13659_v5 = vld [vmem:[#allocation29_spill] sm:$0xff] }
 0x5f3   : > { %3443 = vst.msk [vmem:[#allocation3 + $0x478] sm:$0xff] %vm13394_vm14, %v3407_v20  ;;  %7861 = vmatprep.subr.bf16.mxu1 %v7860_v37  ;;  %v7864_v56 = vpack.c.bf16 %v3406_v26, %v3397_v52  ;;  %v3492_v36 = vsel %vm13380_vm15, %v13659_v5, %v10139_v16  ;;  %v3491_v6 = vsel %vm13380_vm15, %v13650_v14, %v13659_v5  ;;  %13662 = vst [vmem:[#allocation23_spill] sm:$0xff] %v10302_v41 }
 0x5f4   : > { %7886 = vmatpush1.bf16.msra.mxu0 %v7885_v58  ;;  %v7870_v16 = vpack.c.bf16 %v3500_v54, %v3491_v6  ;;  %v10305_v38 = vsub.s32 1, %v10302_v41  ;;  %13665 = vst [vmem:[#allocation22_spill] sm:$0xff] %v10308_v15  ;;  %13666 = vst [vmem:[#allocation20_spill] sm:$0xff] %v10311_v59 }
 0x5f5   : > { %v3481_v45 = vpop.permute.xlu0 %3480  ;;  %v3483_v55 = vpop.permute.xlu1 %3482  ;;  %7887 = vmatprep.subr.bf16.mxu0 %v13374_v53 }
 0x5f6   : > { %v3501_v1 = vsel %vm13380_vm15, %v10123_v49, %v3481_v45  ;;  %v3502_v47 = vsel %vm13380_vm15, %v3481_v45, %v3483_v55  ;;  %7863 = vmatpush1.bf16.msra.mxu1 %v7862_v18  ;;  %v3668_v17 = vld [vmem:[#allocation3 + $0x3e8] sm:$0xff]  ;;  %v3695_v49 = vld [vmem:[#allocation3 + $0x4c0] sm:$0xff]  ;;  %13663 = vst [vmem:[#allocation21_spill] sm:$0xff] %v10305_v38  ;;  %v4277_v11 = vrot.slane %v10308_v15, %v10305_v38 }
 0x5f7   : > { %3538 = vst.msk [vmem:[#allocation3 + $0x508] sm:$0xff] %vm13394_vm14, %v3502_v47  ;;  %7865 = vmatprep.subr.bf16.mxu1 %v7864_v56  ;;  %v7868_v2 = vpack.c.bf16 %v3501_v1, %v3492_v36  ;;  %v7891_v13 = vpack.c.bf16 %v3668_v17, %v3659_v25  ;;  %v4441_v0 = vrot.slane %v10311_v59, %v10305_v38  ;;  %v5348_v59 = vld [vmem:[#allocation8 + $0x7] ss:$8 sm:$0xf0] }
 0x5f8   : > { %7889 = vmatpush1.bf16.msra.mxu0 %v7888_v61  ;;  %vm10321_vm9 = vcmp.eq.s32.totalorder %v4277_v11, 1 }
 0x5f9   : > { %7890 = vmatprep.subr.bf16.mxu0 %v13374_v53  ;;  %vm10325_vm10 = vcmp.eq.s32.totalorder %v4441_v0, 1 }
 0x5fa   : > { %7867 = vmatpush1.bf16.msra.mxu1 %v7866_v9  ;;  %v3686_v48 = vld [vmem:[#allocation3 + $0x478] sm:$0xff] }
 0x5fb   : > { %7869 = vmatprep.subr.bf16.mxu1 %v7868_v2  ;;  %v7894_v21 = vpack.c.bf16 %v3686_v48, %v3677_v39 }
 0x5fc   : > { %7892 = vmatpush1.bf16.msra.mxu0 %v7891_v13 }
 0x5fd   : > { %7893 = vmatprep.subr.bf16.mxu0 %v13374_v53 }
 0x5fe   : > { %7871 = vmatpush1.bf16.msra.mxu1 %v7870_v16  ;;  %v3704_v35 = vld [vmem:[#allocation3 + $0x508] sm:$0xff] }
 0x5ff   : > { %v7897_v4 = vpack.c.bf16 %v3704_v35, %v3695_v49 }
 0x600   : > { %7895 = vmatpush1.bf16.msra.mxu0 %v7894_v21 }
 0x601   : > { %7896 = vmatprep.subr.bf16.mxu0 %v13374_v53  ;;  %4020 = vmatmul.mubr.f32.vlgmr.msra.gmra.mrb[28].mxu1 %v9780_v32  ;;  %v4890_v53 = vld [vmem:[#allocation8 + $0x4] ss:$8 sm:$0xf0] }
 0x602   : > { %7040 = vmatprep.mubr.msk.f32.mxu1 %vm13390_vm13, %v13651_v12 }
 0x604   : > { %7898 = vmatpush1.bf16.msra.mxu0 %v7897_v4 }
 0x605   : > { %4026 = vmatmul.mubr.f32.gmra.mrb[30].mxu1 %v13652_v50 }
 0x607   : > { %4097 = vmatmul.mubr.f32.vlgmr.msra.gmra.mrb[30].mxu0 %v9780_v32 }
 0x608   : > { %7042 = vmatprep.mubr.msk.f32.mxu0 %vm13390_vm13, %v13651_v12 }
 0x60b   : > { %4102 = vmatmul.mubr.f32.gmra.mrb[32].mxu0 %v13652_v50  ;;  %v13661_v50 = vld [vmem:[#allocation11_spill] sm:$0xff] }
 0x61f   : > { %v3790_v14 = vpop.f32.mrb[20].mxu1 }
 0x620   : > { %v3791_v46 = vadd.f32 %v3790_v14, %v13660_v7  ;;  %v3792_v43 = vpop.f32.mrb[21].mxu1 }
 0x621   : > { %v3793_v32 = vadd.f32 %v3792_v43, %v13660_v7 }
 0x622   : > { %v4107_v42 = vmax.f32 %v3791_v46, 0.0 }
 0x623   : > { %v3796_v63 = vpop.f32.mrb[22].mxu1  ;;  %v4108_v12 = vmax.f32 %v3793_v32, 0.0 }
 0x624   : > { %v3798_v24 = vpop.f32.mrb[23].mxu1  ;;  %4220 = vrot.lane.b32.xlu0 %v4107_v42, %s8303_s23  ;;  %4146 = vrot.lane.b32.xlu1 %v4107_v42, %s8297_s11  ;;  %v3797_v60 = vadd.f32 %v3796_v63, %v13661_v50 }
 0x625   : > { %v3799_v57 = vadd.f32 %v3798_v24, %v13661_v50 }
 0x626   : > { %v4116_v62 = vmax.f32 %v3797_v60, 0.0 }
 0x627   : > { %v4117_v19 = vmax.f32 %v3799_v57, 0.0 }
 0x628   : > { %4308 = vrot.lane.b32.xlu0 %v4107_v42, %s8298_s17  ;;  %4383 = vrot.lane.b32.xlu1 %v4107_v42, %s8309_s30 }
 0x62c   : > { %4547 = vrot.lane.b32.xlu0 %v4107_v42, %s8310_s15  ;;  %4472 = vrot.lane.b32.xlu1 %v4107_v42, %s8299_s20 }
 0x630   : > { %4813 = vrot.lane.b32.xlu0 %v4107_v42, %s8311_s21  ;;  %4647 = vrot.lane.b32.xlu1 %v4107_v42, %s8312_s19 }
 0x634   : > { %5436 = vrot.lane.b32.xlu0 %v4107_v42, %s8313_s27  ;;  %4979 = vrot.lane.b32.xlu1 %v4107_v42, %s8314_s26 }
 0x638   : > { %4148 = vrot.lane.b32.xlu0 %v4108_v12, %s8297_s11  ;;  %4310 = vrot.lane.b32.xlu1 %v4108_v12, %s8298_s17 }
 0x63c   : > { %4474 = vrot.lane.b32.xlu0 %v4108_v12, %s8299_s20  ;;  %4815 = vrot.lane.b32.xlu1 %v4108_v12, %s8311_s21 }
 0x640   : > { %4649 = vrot.lane.b32.xlu0 %v4108_v12, %s8312_s19  ;;  %5134 = vrot.lane.b32.xlu1 %v4108_v12, %s8309_s30 }
 0x644   : > { %4981 = vrot.lane.b32.xlu0 %v4108_v12, %s8314_s26  ;;  %5280 = vrot.lane.b32.xlu1 %v4108_v12, %s8310_s15 }
 0x648   : > { %4328 = vrot.lane.b32.xlu0 %v4116_v62, %s8298_s17  ;;  %5438 = vrot.lane.b32.xlu1 %v4108_v12, %s8313_s27 }
 0x64c   : > { %4385 = vrot.lane.b32.xlu0 %v4116_v62, %s8309_s30  ;;  %4166 = vrot.lane.b32.xlu1 %v4116_v62, %s8297_s11 }
 0x650   : > { %4665 = vrot.lane.b32.xlu0 %v4116_v62, %s8312_s19  ;;  %4222 = vrot.lane.b32.xlu1 %v4116_v62, %s8303_s23 }
 0x654   : > { %4997 = vrot.lane.b32.xlu0 %v4116_v62, %s8314_s26  ;;  %4492 = vrot.lane.b32.xlu1 %v4116_v62, %s8299_s20 }
 0x658   : > { %4168 = vrot.lane.b32.xlu0 %v4117_v19, %s8297_s11  ;;  %4549 = vrot.lane.b32.xlu1 %v4116_v62, %s8310_s15 }
 0x65c   : > { %4494 = vrot.lane.b32.xlu0 %v4117_v19, %s8299_s20  ;;  %4831 = vrot.lane.b32.xlu1 %v4116_v62, %s8311_s21 }
 0x660   : > { %4833 = vrot.lane.b32.xlu0 %v4117_v19, %s8311_s21  ;;  %5454 = vrot.lane.b32.xlu1 %v4116_v62, %s8313_s27 }
 0x664   : > { %5456 = vrot.lane.b32.xlu0 %v4117_v19, %s8313_s27  ;;  %4330 = vrot.lane.b32.xlu1 %v4117_v19, %s8298_s17 }
 0x668   : > { %4667 = vrot.lane.b32.xlu1 %v4117_v19, %s8312_s19 }
 0x66c   : > { %4999 = vrot.lane.b32.xlu1 %v4117_v19, %s8314_s26 }
 0x670   : > { %5150 = vrot.lane.b32.xlu1 %v4117_v19, %s8309_s30 }
 0x674   : > { %5296 = vrot.lane.b32.xlu1 %v4117_v19, %s8310_s15 }
 0x696   : > { %v10317_v40 = vpop.permute.xlu0 %4220  ;;  %v10319_v23 = vpop.permute.xlu1 %4146 }
 0x697   : > { %13667 = vst [vmem:[#allocation24_spill] sm:$0xff] %v10317_v40  ;;  %13668 = vst [vmem:[#allocation25_spill] sm:$0xff] %v10319_v23  ;;  %v4297_v26 = vsel %vm10321_vm9, %v10317_v40, 0.0  ;;  %v5347_v40 = vld [vmem:[#allocation8 + $0x7] ss:$8 sm:$0xf] }
 0x698   : > { %v3867_v28 = vpop.f32.mrb[24].mxu1  ;;  %v5513_v23 = vld [vmem:[#allocation8 + $0x50] ss:$8 sm:$0xf0] }
 0x699   : > { %v3868_v30 = vadd.f32 %v3867_v28, %v13660_v7  ;;  %v3869_v37 = vpop.f32.mrb[25].mxu1 }
 0x69a   : > { %v10333_v20 = vpop.permute.xlu0 %4308  ;;  %v10335_v58 = vpop.permute.xlu1 %4383  ;;  %v3870_v54 = vadd.f32 %v3869_v37, %v13660_v7 }
 0x69b   : > { %13673 = vst [vmem:[#allocation26_spill] sm:$0xff] %v10333_v20  ;;  %13674 = vst [vmem:[#allocation27_spill] sm:$0xff] %v10335_v58  ;;  %v4109_v33 = vmax.f32 %v3868_v30, 0.0  ;;  %v10340_v44 = vsel %vm10325_vm10, %v10335_v58, %v4297_v26  ;;  %v5512_v20 = vld [vmem:[#allocation8 + $0x50] ss:$8 sm:$0xf] }
 0x69c   : > { %13675 = vst [vmem:[#allocation28_spill] sm:$0xff] %v10340_v44  ;;  %v3873_v52 = vpop.f32.mrb[26].mxu1  ;;  %v4110_v6 = vmax.f32 %v3870_v54, 0.0  ;;  %v4230_v54 = vld [vmem:[#allocation8] ss:$8 sm:$0xf0] }
 0x69d   : > { %v10342_v18 = vpop.f32.mrb[27].mxu1  ;;  %4312 = vrot.lane.b32.xlu0 %v4109_v33, %s8298_s17  ;;  %4150 = vrot.lane.b32.xlu1 %v4109_v33, %s8297_s11  ;;  %v3874_v32 = vadd.f32 %v3873_v52, %v13661_v50 }
 0x69e   : > { %v10346_v10 = vpop.permute.xlu0 %4547  ;;  %v10348_v45 = vpop.permute.xlu1 %4472  ;;  %v3876_v34 = vadd.f32 %v10342_v18, %v13661_v50 }
 0x69f   : > { %13676 = vst [vmem:[#allocation29_spill] sm:$0xff] %v10346_v10  ;;  %13677 = vst [vmem:[#allocation13_spill] sm:$0xff] %v10348_v45  ;;  %v4118_v62 = vmax.f32 %v3874_v32, 0.0 }
 0x6a0   : > { %v3944_v55 = vpop.f32.mrb[26].mxu0  ;;  %v10463_v26 = vmax.f32 %v3876_v34, 0.0  ;;  %v4889_v34 = vld [vmem:[#allocation8 + $0x4] ss:$8 sm:$0xf] }
 0x6a1   : > { %4817 = vrot.lane.b32.xlu0 %v4109_v33, %s8311_s21  ;;  %4476 = vrot.lane.b32.xlu1 %v4109_v33, %s8299_s20  ;;  %v3946_v31 = vpop.f32.mrb[27].mxu0  ;;  %v3945_v5 = vadd.f32 %v3944_v55, %v13660_v7 }
 0x6a2   : > { %v10352_v56 = vpop.permute.xlu0 %4813  ;;  %v10354_v1 = vpop.permute.xlu1 %4647  ;;  %v3947_v63 = vadd.f32 %v3946_v31, %v13660_v7 }
 0x6a3   : > { %13678 = vst [vmem:[#allocation11_spill] sm:$0xff] %v10352_v56  ;;  %13679 = vst [vmem:[#allocation30_spill] sm:$0xff] %v10354_v1  ;;  %v4111_v25 = vmax.f32 %v3945_v5, 0.0  ;;  %v4229_v5 = vld [vmem:[#allocation8] ss:$8 sm:$0xf] }
 0x6a4   : > { %v10356_v47 = vpop.f32.mrb[28].mxu0  ;;  %v4112_v24 = vmax.f32 %v3947_v63, 0.0 }
 0x6a5   : > { %5136 = vrot.lane.b32.xlu0 %v4109_v33, %s8309_s30  ;;  %4651 = vrot.lane.b32.xlu1 %v4109_v33, %s8312_s19  ;;  %v10360_v61 = vpop.f32.mrb[29].mxu0  ;;  %v3951_v28 = vadd.f32 %v10356_v47, %v13661_v50 }
 0x6a6   : > { %v10362_v51 = vpop.permute.xlu0 %5436  ;;  %v10364_v17 = vpop.permute.xlu1 %4979  ;;  %v3953_v15 = vadd.f32 %v10360_v61, %v13661_v50 }
 0x6a7   : > { %13680 = vst [vmem:[#allocation31_spill] sm:$0xff] %v10362_v51  ;;  %13681 = vst [vmem:[#allocation32_spill] sm:$0xff] %v10364_v17  ;;  %v10456_v30 = vmax.f32 %v3951_v28, 0.0  ;;  %v4724_v28 = vld [vmem:[#allocation8 + $0x3] ss:$8 sm:$0xf0] }
 0x6a9   : > { %5282 = vrot.lane.b32.xlu0 %v4109_v33, %s8310_s15  ;;  %4983 = vrot.lane.b32.xlu1 %v4109_v33, %s8314_s26 }
 0x6aa   : > { %v10369_v36 = vpop.permute.xlu0 %4148  ;;  %v10371_v9 = vpop.permute.xlu1 %4310 }
 0x6ab   : > { %13682 = vst [vmem:[#allocation33_spill] sm:$0xff] %v10369_v36  ;;  %13683 = vst [vmem:[#allocation34_spill] sm:$0xff] %v10371_v9 }
 0x6ad   : > { %5440 = vrot.lane.b32.xlu0 %v4109_v33, %s8313_s27  ;;  %4154 = vrot.lane.b32.xlu1 %v4111_v25, %s8297_s11 }
 0x6ae   : > { %v10376_v2 = vpop.permute.xlu0 %4474  ;;  %v10378_v13 = vpop.permute.xlu1 %4815 }
 0x6af   : > { %13684 = vst [vmem:[#allocation35_spill] sm:$0xff] %v10376_v2 }
 0x6b1   : > { %4152 = vrot.lane.b32.xlu0 %v4110_v6, %s8297_s11  ;;  %4314 = vrot.lane.b32.xlu1 %v4110_v6, %s8298_s17 }
 0x6b2   : > { %v10382_v48 = vpop.permute.xlu0 %4649  ;;  %v10384_v16 = vpop.permute.xlu1 %5134 }
 0x6b5   : > { %4316 = vrot.lane.b32.xlu0 %v4111_v25, %s8298_s17  ;;  %4480 = vrot.lane.b32.xlu1 %v4111_v25, %s8299_s20 }
 0x6b6   : > { %v10388_v39 = vpop.permute.xlu1 %5280  ;;  %v10390_v21 = vpop.permute.xlu0 %4981 }
 0x6b9   : > { %4478 = vrot.lane.b32.xlu0 %v4110_v6, %s8299_s20  ;;  %4655 = vrot.lane.b32.xlu1 %v4111_v25, %s8312_s19 }
 0x6ba   : > { %v10394_v35 = vpop.permute.xlu1 %5438  ;;  %v10396_v49 = vpop.permute.xlu0 %4328 }
 0x6bb   : > { %13685 = vst [vmem:[#allocation36_spill] sm:$0xff] %v10396_v49  ;;  %v5201_v49 = vld [vmem:[#allocation8 + $0x6] ss:$8 sm:$0xf] }
 0x6bd   : > { %4653 = vrot.lane.b32.xlu0 %v4110_v6, %s8312_s19  ;;  %4819 = vrot.lane.b32.xlu1 %v4110_v6, %s8311_s21 }
 0x6be   : > { %v10400_v4 = vpop.permute.xlu1 %4166  ;;  %v10406_v46 = vpop.permute.xlu0 %4385 }
 0x6bf   : > { %13686 = vst [vmem:[#allocation37_spill] sm:$0xff] %v10400_v4  ;;  %13688 = vst [vmem:[#allocation39_spill] sm:$0xff] %v10406_v46 }
 0x6c1   : > { %4821 = vrot.lane.b32.xlu0 %v4111_v25, %s8311_s21  ;;  %4987 = vrot.lane.b32.xlu1 %v4111_v25, %s8314_s26 }
 0x6c2   : > { %v10404_v14 = vpop.permute.xlu1 %4222  ;;  %v10465_v33 = vpop.permute.xlu0 %4665 }
 0x6c3   : > { %13687 = vst [vmem:[#allocation38_spill] sm:$0xff] %v10404_v14  ;;  %v4307_v43 = vsel %vm10321_vm9, %v10404_v14, 0.0  ;;  %13695 = vst [vmem:[#allocation46_spill] sm:$0xff] %v10465_v33  ;;  %v5514_v14 = vor.u32 %v5513_v23, %v5512_v20 }
 0x6c4   : > { %v10414_v42 = vsel %vm10325_vm10, %v10406_v46, %v4307_v43  ;;  %v4231_v43 = vor.u32 %v4230_v54, %v4229_v5  ;;  %v4558_v54 = vld [vmem:[#allocation8 + $0x2] ss:$8 sm:$0xf0] }
 0x6c5   : > { %13689 = vst [vmem:[#allocation40_spill] sm:$0xff] %v10414_v42  ;;  %4985 = vrot.lane.b32.xlu0 %v4110_v6, %s8314_s26  ;;  %5140 = vrot.lane.b32.xlu1 %v4111_v25, %s8309_s30  ;;  %v4891_v42 = vor.u32 %v4890_v53, %v4889_v34  ;;  %v5349_v53 = vor.u32 %v5348_v59, %v5347_v40 }
 0x6c6   : > { %v10440_v27 = vpop.permute.xlu1 %4492  ;;  %v10475_v18 = vpop.permute.xlu0 %4997  ;;  %vm10499_vm11 = vcmp.gt.f32.partialorder %v4231_v43, 0.5 }
 0x6c7   : > { %13692 = vst [vmem:[#allocation43_spill] sm:$0xff] %v10440_v27  ;;  %13697 = vst [vmem:[#allocation48_spill] sm:$0xff] %v10475_v18  ;;  %vm4894_vm8 = vcmp.gt.f32.partialorder %v4891_v42, 0.5  ;;  %vm5352_vm15 = vcmp.gt.f32.partialorder %v5349_v53, 0.5 }
 0x6c8   : > { %v10588_v53 = vsel %vm5352_vm15, 1, %v13664_v3  ;;  %vm13398_vm15 = vcmask 285696  }
 0x6c9   : > { %5138 = vrot.lane.b32.xlu0 %v4110_v6, %s8309_s30  ;;  %5286 = vrot.lane.b32.xlu1 %v4111_v25, %s8310_s15  ;;  %13719 = vst [vmem:[#allocation60_spill] sm:$0xff] %v10588_v53 }
 0x6ca   : > { %v10446_v22 = vpop.permute.xlu1 %4549  ;;  %v10482_v31 = vpop.permute.xlu0 %4168 }
 0x6cb   : > { %13693 = vst [vmem:[#allocation44_spill] sm:$0xff] %v10446_v22  ;;  %13699 = vst [vmem:[#allocation50_spill] sm:$0xff] %v10482_v31  ;;  %v13727_v22 = vmov 0 }
 0x6cd   : > { %5284 = vrot.lane.b32.xlu0 %v4110_v6, %s8310_s15  ;;  %5444 = vrot.lane.b32.xlu1 %v4111_v25, %s8313_s27  ;;  %v4393_v25 = vld [vmem:[#allocation8 + $0x1] ss:$8 sm:$0xf] }
 0x6ce   : > { %v10458_v37 = vpop.permute.xlu1 %4831 }
 0x6cf   : > { %13694 = vst [vmem:[#allocation45_spill] sm:$0xff] %v10458_v37 }
 0x6d1   : > { %5442 = vrot.lane.b32.xlu0 %v4110_v6, %s8313_s27  ;;  %4318 = vrot.lane.b32.xlu1 %v4112_v24, %s8298_s17  ;;  %v4394_v6 = vld [vmem:[#allocation8 + $0x1] ss:$8 sm:$0xf0] }
 0x6d2   : > { %v10467_v52 = vpop.permute.xlu1 %5454  ;;  %v4395_v63 = vor.u32 %v4394_v6, %v4393_v25  ;;  %v5055_v25 = vld [vmem:[#allocation8 + $0x5] ss:$8 sm:$0xf] }
 0x6d3   : > { %13696 = vst [vmem:[#allocation47_spill] sm:$0xff] %v10467_v52  ;;  %v5056_v6 = vld [vmem:[#allocation8 + $0x5] ss:$8 sm:$0xf0] }
 0x6d4   : > { %v10426_v12 = vpop.f32.mrb[28].mxu1  ;;  %vm10503_vm12 = vcmp.gt.f32.partialorder %v4395_v63, 0.5  ;;  %v5202_v63 = vld [vmem:[#allocation8 + $0x6] ss:$8 sm:$0xf0]  ;;  %v5057_v45 = vor.u32 %v5056_v6, %v5055_v25 }
 0x6d5   : > { %v10428_v60 = vpop.f32.mrb[29].mxu1  ;;  %4156 = vrot.lane.b32.xlu0 %v4112_v24, %s8297_s11  ;;  %4823 = vrot.lane.b32.xlu1 %v4112_v24, %s8311_s21  ;;  %v5203_v44 = vor.u32 %v5202_v63, %v5201_v49  ;;  %v10529_v61 = vsel %vm10503_vm12, 1, %v13664_v3  ;;  %vm13421_vm12 = vcmask 777216  }
 0x6d6   : > { %v10477_v55 = vpop.permute.xlu1 %4330  ;;  %v4409_v42 = vrot.slane %v10529_v61, %v10305_v38  ;;  %vm5060_vm10 = vcmp.gt.f32.partialorder %v5057_v45, 0.5  ;;  %v13724_v45 = vmov 0 }
 0x6d7   : > { %13698 = vst [vmem:[#allocation49_spill] sm:$0xff] %v10477_v55 }
 0x6d8   : > { %v10432_v57 = vpop.f32.mrb[30].mxu1 }
 0x6d9   : > { %13690 = vst [vmem:[#allocation41_spill] sm:$0xff] %v10432_v57  ;;  %v10434_v19 = vpop.f32.mrb[31].mxu1  ;;  %4482 = vrot.lane.b32.xlu0 %v4112_v24, %s8299_s20  ;;  %4170 = vrot.lane.b32.xlu1 %v4118_v62, %s8297_s11 }
 0x6da   : > { %13691 = vst [vmem:[#allocation42_spill] sm:$0xff] %v10434_v19  ;;  %v10438_v29 = vpop.f32.mrb[30].mxu0  ;;  %v10484_v47 = vpop.permute.xlu1 %4667  ;;  %v10520_v19 = vsel %vm10499_vm11, 1, %v13664_v3  ;;  %vm5206_vm11 = vcmp.gt.f32.partialorder %v5203_v44, 0.5  ;;  %v10563_v44 = vsel %vm5060_vm10, 1, %v13664_v3  ;;  %vm13395_vm10 = vcmask 269312  }
 0x6db   : > { %v4100_v8 = vpop.f32.mrb[31].mxu0  ;;  %v4245_v49 = vrot.slane %v10520_v19, %v10305_v38  ;;  %v4099_v59 = vadd.f32 %v10438_v29, %v13660_v7  ;;  %13713 = vst [vmem:[#allocation58_spill] sm:$0xff] %v10563_v44  ;;  %v10578_v25 = vsel %vm5206_vm11, 1, %v13664_v3 }
 0x6dc   : > { %v4557_v8 = vld [vmem:[#allocation8 + $0x2] ss:$8 sm:$0xf]  ;;  %13716 = vst [vmem:[#allocation59_spill] sm:$0xff] %v10578_v25 }
 0x6dd   : > { %4657 = vrot.lane.b32.xlu0 %v4112_v24, %s8312_s19  ;;  %4496 = vrot.lane.b32.xlu1 %v4118_v62, %s8299_s20  ;;  %v4559_v4 = vor.u32 %v4558_v54, %v4557_v8  ;;  %v10533_v8 = vmax.f32 %v3953_v15, 0.0  ;;  %vm10556_vm5 = vcmp.eq.s32.totalorder %v4245_v49, 1  ;;  %v4115_v6 = vmax.f32 %v4099_v59, 0.0 }
 0x6de   : > { %v10444_v11 = vpop.f32.mrb[32].mxu0  ;;  %v10494_v32 = vpop.permute.xlu1 %4999 }
 0x6df   : > { %v4105_v0 = vpop.f32.mrb[33].mxu0  ;;  %13701 = vst [vmem:[#allocation52_spill] sm:$0xff] %v10494_v32  ;;  %vm4562_vm9 = vcmp.gt.f32.partialorder %v4559_v4, 0.5  ;;  %v10547_v4 = vsel %vm4894_vm8, 1, %v13664_v3  ;;  %vm13427_vm8 = vcmask 793600   ;;  %v10627_v57 = vsel %vm13394_vm14, %v4115_v6, 0.0 }
 0x6e0   : > { %v4723_v0 = vld [vmem:[#allocation8 + $0x3] ss:$8 sm:$0xf]  ;;  %13710 = vst [vmem:[#allocation57_spill] sm:$0xff] %v10547_v4  ;;  %v10550_v15 = vsel %vm4562_vm9, 1, %v13664_v3  ;;  %v4905_v54 = vrot.slane %v10547_v4, %v10305_v38  ;;  %vm10580_vm9 = vcmp.eq.s32.totalorder %v4409_v42, 1  ;;  %v5071_v42 = vrot.slane %v10563_v44, %v10305_v38 }
 0x6e1   : > { %4989 = vrot.lane.b32.xlu0 %v4112_v24, %s8314_s26  ;;  %4835 = vrot.lane.b32.xlu1 %v4118_v62, %s8311_s21  ;;  %v4725_v43 = vor.u32 %v4724_v28, %v4723_v0  ;;  %v4573_v20 = vrot.slane %v10550_v15, %v10305_v38  ;;  %vm13402_vm14 = vcmask 859136   ;;  %v13753_v32 = vmov 0 }
 0x6e2   : > { %vm10618_vm0 = vcmp.eq.s32.totalorder %v4905_v54, 1  ;;  %vm10639_vm13 = vcmp.eq.s32.totalorder %v5071_v42, 1 }
 0x6e3   : > { %vm4728_vm7 = vcmp.gt.f32.partialorder %v4725_v43, 0.5  ;;  %vm10606_vm11 = vcmp.eq.s32.totalorder %v4573_v20, 1  ;;  %v13725_v45 = vsel %vm10618_vm0, 4294967295, %v13724_v45  ;;  %v5363_v20 = vrot.slane %v10588_v53, %v10305_v38 }
 0x6e4   : > { %v10544_v40 = vsel %vm4728_vm7, 1, %v13664_v3  ;;  %vm10565_vm7 = vcmp.gt.f32.partialorder %v5514_v14, 0.5  ;;  %13726 = vst [vmem:[#allocation61_spill] sm:$0xff] %v13725_v45  ;;  %v13728_v22 = vsel %vm10639_vm13, 4294967295, %v13727_v22  ;;  %v13750_v45 = vmov 0 }
 0x6e5   : > { %5142 = vrot.lane.b32.xlu0 %v4112_v24, %s8309_s30  ;;  %5458 = vrot.lane.b32.xlu1 %v4118_v62, %s8313_s27  ;;  %13709 = vst [vmem:[#allocation56_spill] sm:$0xff] %v10544_v40  ;;  %v4739_v5 = vrot.slane %v10544_v40, %v10305_v38  ;;  %v10604_v59 = vsel %vm10565_vm7, 1, %v13664_v3  ;;  %vm13416_vm7 = vcmask 826368   ;;  %13729 = vst [vmem:[#allocation62_spill] sm:$0xff] %v13728_v22  ;;  %v13745_v22 = vmov 0 }
 0x6e7   : > { %vm10614_vm6 = vcmp.eq.s32.totalorder %v4739_v5, 1  ;;  %v5528_v5 = vrot.slane %v10604_v59, %v10305_v38 }
 0x6e9   : > { %5288 = vrot.lane.b32.xlu0 %v4112_v24, %s8310_s15  ;;  %4174 = vrot.lane.b32.xlu1 %v10456_v30, %s8297_s11 }
 0x6ed   : > { %5446 = vrot.lane.b32.xlu0 %v4112_v24, %s8313_s27  ;;  %4334 = vrot.lane.b32.xlu1 %v10463_v26, %s8298_s17  ;;  %v10492_v24 = vpop.permute.xlu0 %4494 }
 0x6ee   : > { %13700 = vst [vmem:[#allocation51_spill] sm:$0xff] %v10492_v24 }
 0x6f1   : > { %4332 = vrot.lane.b32.xlu0 %v4118_v62, %s8298_s17  ;;  %4500 = vrot.lane.b32.xlu1 %v10456_v30, %s8299_s20  ;;  %v10507_v27 = vpop.permute.xlu0 %4833 }
 0x6f5   : > { %4669 = vrot.lane.b32.xlu0 %v4118_v62, %s8312_s19  ;;  %4671 = vrot.lane.b32.xlu1 %v10463_v26, %s8312_s19  ;;  %v10535_v0 = vpop.permute.xlu0 %5456 }
 0x6f6   : > { %13707 = vst [vmem:[#allocation54_spill] sm:$0xff] %v10535_v0  ;;  %v4684_v0 = vsel %vm13395_vm10, %v10354_v1, %v10382_v48  ;;  %vm10661_vm10 = vcmp.eq.s32.totalorder %v5363_v20, 1 }
 0x6f9   : > { %5001 = vrot.lane.b32.xlu0 %v4118_v62, %s8314_s26  ;;  %4839 = vrot.lane.b32.xlu1 %v10456_v30, %s8311_s21 }
 0x6fd   : > { %5152 = vrot.lane.b32.xlu0 %v4118_v62, %s8309_s30  ;;  %5005 = vrot.lane.b32.xlu1 %v10456_v30, %s8314_s26 }
 0x701   : > { %5298 = vrot.lane.b32.xlu0 %v4118_v62, %s8310_s15  ;;  %5156 = vrot.lane.b32.xlu1 %v10456_v30, %s8309_s30  ;;  %v10509_v62 = vpop.permute.xlu1 %5150 }
 0x702   : > { %13706 = vst [vmem:[#allocation53_spill] sm:$0xff] %v10509_v62 }
 0x705   : > { %4172 = vrot.lane.b32.xlu0 %v10463_v26, %s8297_s11  ;;  %5302 = vrot.lane.b32.xlu1 %v10456_v30, %s8310_s15  ;;  %v10537_v28 = vpop.permute.xlu1 %5296 }
 0x706   : > { %13708 = vst [vmem:[#allocation55_spill] sm:$0xff] %v10537_v28 }
 0x709   : > { %4336 = vrot.lane.b32.xlu0 %v10456_v30, %s8298_s17  ;;  %5462 = vrot.lane.b32.xlu1 %v10456_v30, %s8313_s27 }
 0x70d   : > { %4498 = vrot.lane.b32.xlu0 %v10463_v26, %s8299_s20  ;;  %4338 = vrot.lane.b32.xlu1 %v10533_v8, %s8298_s17 }
 0x70f   : > { %v10569_v29 = vpop.permute.xlu0 %4312  ;;  %v10571_v34 = vpop.permute.xlu1 %4150 }
 0x710   : > { %v4185_v63 = vsel %vm13414_vm3, %v10369_v36, %v10571_v34  ;;  %v4348_v49 = vsel %vm13421_vm12, %v10371_v9, %v10569_v29  ;;  %v13852_v9 = vld [vmem:[#allocation53_spill] sm:$0xff]  ;;  %v13856_v36 = vld [vmem:[#allocation55_spill] sm:$0xff] }
 0x711   : > { %v4289_v14 = vsel %vm10556_vm5, %v4185_v63, 0.0  ;;  %4673 = vrot.lane.b32.xlu0 %v10456_v30, %s8312_s19  ;;  %4675 = vrot.lane.b32.xlu1 %v10533_v8, %s8312_s19  ;;  %v5217_v30 = vrot.slane %v10578_v25, %v10305_v38 }
 0x712   : > { %v4453_v52 = vsel %vm10580_vm9, %v4348_v49, %v4289_v14  ;;  %v4850_v49 = vsel %vm13398_vm15, %v10352_v56, %v10378_v13  ;;  %v13730_v14 = vmov 0  ;;  %vm10674_vm15 = vcmp.eq.s32.totalorder %v5528_v5, 1 }
 0x713   : > { %v10612_v63 = vpop.permute.xlu0 %4817  ;;  %v10624_v3 = vpop.permute.xlu1 %4476  ;;  %vm10652_vm1 = vcmp.eq.s32.totalorder %v5217_v30, 1  ;;  %v5473_v5 = vsel %vm13402_vm14, %v10362_v51, %v10394_v35 }
 0x714   : > { %v4512_v54 = vsel %vm13427_vm8, %v10376_v2, %v10624_v3  ;;  %v13731_v14 = vsel %vm10652_vm1, 4294967295, %v13730_v14  ;;  %v13740_v2 = vmov 0 }
 0x715   : > { %v4617_v6 = vsel %vm10606_vm11, %v4512_v54, %v4453_v52  ;;  %4837 = vrot.lane.b32.xlu0 %v10463_v26, %s8311_s21  ;;  %4162 = vrot.lane.b32.xlu1 %v10627_v57, %s8297_s11  ;;  %13732 = vst [vmem:[#allocation63_spill] sm:$0xff] %v13731_v14  ;;  %v5016_v52 = vsel %vm13423_vm4, %v10364_v17, %v10390_v21  ;;  %v13733_v54 = vmov 0  ;;  %v13743_v14 = vmov 0 }
 0x716   : > { %v4783_v42 = vsel %vm10614_vm6, %v4684_v0, %v4617_v6  ;;  %v13734_v54 = vsel %vm10661_vm10, 4294967295, %v13733_v54  ;;  %v5166_v0 = vsel %vm13416_vm7, %v10335_v58, %v10384_v16  ;;  %v13736_v6 = vmov 0 }
 0x717   : > { %13735 = vst [vmem:[#allocation64_spill] sm:$0xff] %v13734_v54  ;;  %v4949_v56 = vsel %vm10618_vm0, %v4850_v49, %v4783_v42  ;;  %v10667_v1 = vpop.permute.xlu0 %5136  ;;  %v10669_v30 = vpop.permute.xlu1 %4651  ;;  %v13737_v6 = vsel %vm10674_vm15, 4294967295, %v13736_v6  ;;  %v5312_v17 = vsel %vm13411_vm2, %v10346_v10, %v10388_v39  ;;  %vm13752_vm4 = vcmask 269312  }
 0x718   : > { %13738 = vst [vmem:[#allocation65_spill] sm:$0xff] %v13737_v6  ;;  %v5115_v20 = vsel %vm10639_vm13, %v5016_v52, %v4949_v56  ;;  %v4685_v18 = vsel %vm13752_vm4, %v10382_v48, %v10669_v30  ;;  %vm13760_vm4 = vcmask 302080  }
 0x719   : > { %v5261_v49 = vsel %vm10652_vm1, %v5166_v0, %v5115_v20  ;;  %5003 = vrot.lane.b32.xlu0 %v10463_v26, %s8314_s26  ;;  %4488 = vrot.lane.b32.xlu1 %v10627_v57, %s8299_s20  ;;  %v4248_v20 = vsub.s32 2, %v10302_v41 }
 0x71a   : > { %v5407_v56 = vsel %vm10661_vm10, %v5312_v17, %v5261_v49 }
 0x71b   : > { %v10696_v42 = vsel %vm10674_vm15, %v5473_v5, %v5407_v56  ;;  %v10698_v52 = vpop.permute.xlu0 %5282  ;;  %v10700_v0 = vpop.permute.xlu1 %4983  ;;  %v4249_v17 = vrot.slane %v10520_v19, %v4248_v20  ;;  %v4413_v56 = vrot.slane %v10529_v61, %v4248_v20  ;;  %v4577_v38 = vrot.slane %v10550_v15, %v4248_v20 }
 0x71c   : > { %13739 = vst [vmem:[#allocation66_spill] sm:$0xff] %v10696_v42  ;;  %v4743_v54 = vrot.slane %v10544_v40, %v4248_v20  ;;  %v5075_v28 = vrot.slane %v10563_v44, %v4248_v20 }
 0x71d   : > { %5154 = vrot.lane.b32.xlu0 %v10463_v26, %s8309_s30  ;;  %4663 = vrot.lane.b32.xlu1 %v10627_v57, %s8312_s19  ;;  %vm10725_vm14 = vcmp.eq.s32.totalorder %v4249_v17, 1  ;;  %vm10741_vm2 = vcmp.eq.s32.totalorder %v4413_v56, 1  ;;  %v13747_v56 = vmov 0 }
 0x71e   : > { %v13741_v2 = vsel %vm10725_vm14, 4294967295, %v13740_v2  ;;  %v13744_v14 = vsel %vm10741_vm2, 4294967295, %v13743_v14  ;;  %vm10758_vm7 = vcmp.eq.s32.totalorder %v4743_v54, 1 }
 0x71f   : > { %v10707_v51 = vpop.permute.xlu0 %5440  ;;  %v10709_v58 = vpop.permute.xlu1 %4154  ;;  %13742 = vst [vmem:[#allocation67_spill] sm:$0xff] %v13741_v2  ;;  %v13748_v56 = vsel %vm10758_vm7, 4294967295, %v13747_v56 }
 0x721   : > { %5300 = vrot.lane.b32.xlu0 %v10463_v26, %s8310_s15  ;;  %4802 = vrot.lane.b32.xlu1 %v10627_v57, %s8301_s28 }
 0x723   : > { %v10716_v49 = vpop.permute.xlu0 %4152  ;;  %v10718_v5 = vpop.permute.xlu1 %4314 }
 0x724   : > { %v4186_v10 = vsel %vm13414_vm3, %v10571_v34, %v10716_v49  ;;  %v4349_v34 = vsel %vm13421_vm12, %v10569_v29, %v10718_v5  ;;  %vm10753_vm3 = vcmp.eq.s32.totalorder %v4577_v38, 1  ;;  %v5367_v29 = vrot.slane %v10588_v53, %v4248_v20 }
 0x725   : > { %5460 = vrot.lane.b32.xlu0 %v10463_v26, %s8313_s27  ;;  %5426 = vrot.lane.b32.xlu1 %v10627_v57, %s8303_s23  ;;  %v4909_v26 = vrot.slane %v10547_v4, %v4248_v20  ;;  %v4290_v17 = vsel %vm10725_vm14, %v4186_v10, 0.0  ;;  %v13746_v22 = vsel %vm10753_vm3, 4294967295, %v13745_v22  ;;  %v5221_v10 = vrot.slane %v10578_v25, %v4248_v20 }
 0x726   : > { %v4454_v62 = vsel %vm10741_vm2, %v4349_v34, %v4290_v17  ;;  %v5532_v38 = vrot.slane %v10604_v59, %v4248_v20  ;;  %vm10777_vm14 = vcmp.eq.s32.totalorder %v5075_v28, 1  ;;  %v13757_v20 = vmov 0 }
 0x727   : > { %v10733_v42 = vpop.permute.xlu0 %4316  ;;  %v10735_v6 = vpop.permute.xlu1 %4480  ;;  %vm10767_vm12 = vcmp.eq.s32.totalorder %v4909_v26, 1  ;;  %v13754_v32 = vsel %vm10777_vm14, 4294967295, %v13753_v32  ;;  %vm10790_vm2 = vcmp.eq.s32.totalorder %v5221_v10, 1  ;;  %v13761_v28 = vmov 0 }
 0x728   : > { %v13751_v45 = vsel %vm10767_vm12, 4294967295, %v13750_v45  ;;  %13755 = vst [vmem:[#allocation69_spill] sm:$0xff] %v13754_v32  ;;  %v13758_v20 = vsel %vm10790_vm2, 4294967295, %v13757_v20 }
 0x729   : > { %4176 = vrot.lane.b32.xlu0 %v10533_v8, %s8297_s11  ;;  %4995 = vrot.lane.b32.xlu1 %v10627_v57, %s8314_s26  ;;  %13759 = vst [vmem:[#allocation70_spill] sm:$0xff] %v13758_v20 }
 0x72b   : > { %v4479_v2 = vpop.permute.xlu0 %4478  ;;  %v10763_v46 = vpop.permute.xlu1 %4655 }
 0x72c   : > { %13749 = vst [vmem:[#allocation68_spill] sm:$0xff] %v10763_v46  ;;  %v4513_v54 = vsel %vm13427_vm8, %v10624_v3, %v4479_v2  ;;  %vm13756_vm8 = vcmask 285696  }
 0x72d   : > { %v4618_v17 = vsel %vm10753_vm3, %v4513_v54, %v4454_v62  ;;  %4502 = vrot.lane.b32.xlu0 %v10533_v8, %s8299_s20  ;;  %5148 = vrot.lane.b32.xlu1 %v10627_v57, %s8309_s30  ;;  %v4851_v3 = vsel %vm13756_vm8, %v10378_v13, %v10612_v63  ;;  %v5017_v62 = vsel %vm13760_vm4, %v10390_v21, %v10700_v0  ;;  %vm10799_vm3 = vcmp.eq.s32.totalorder %v5367_v29, 1 }
 0x72e   : > { %v4784_v48 = vsel %vm10758_vm7, %v4685_v18, %v4618_v17  ;;  %v13762_v28 = vsel %vm10799_vm3, 4294967295, %v13761_v28  ;;  %vm13764_vm8 = vcmask 826368   ;;  %v4252_v18 = vsub.s32 3, %v10302_v41 }
 0x72f   : > { %13763 = vst [vmem:[#allocation71_spill] sm:$0xff] %v13762_v28  ;;  %v4950_v26 = vsel %vm10767_vm12, %v4851_v3, %v4784_v48  ;;  %v10805_v34 = vpop.permute.xlu0 %4653  ;;  %v10807_v13 = vpop.permute.xlu1 %4819  ;;  %v5167_v10 = vsel %vm13764_vm8, %v10384_v16, %v10667_v1  ;;  %vm10813_vm7 = vcmp.eq.s32.totalorder %v5532_v38, 1  ;;  %v13765_v54 = vmov 0 }
 0x730   : > { %v13766_v54 = vsel %vm10813_vm7, 4294967295, %v13765_v54  ;;  %v5116_v21 = vsel %vm10777_vm14, %v5017_v62, %v4950_v26  ;;  %vm13768_vm4 = vcmask 842752   ;;  %vm13769_vm8 = vcmask 859136  }
 0x731   : > { %13767 = vst [vmem:[#allocation72_spill] sm:$0xff] %v13766_v54  ;;  %v5313_v29 = vsel %vm13768_vm4, %v10388_v39, %v10698_v52  ;;  %v5262_v17 = vsel %vm10790_vm2, %v5167_v10, %v5116_v21  ;;  %4841 = vrot.lane.b32.xlu0 %v10533_v8, %s8311_s21  ;;  %5294 = vrot.lane.b32.xlu1 %v10627_v57, %s8310_s15 }
 0x732   : > { %v5474_v16 = vsel %vm13769_vm8, %v10394_v35, %v10707_v51  ;;  %v5408_v38 = vsel %vm10799_vm3, %v5313_v29, %v5262_v17  ;;  %v4022_v3 = vadd.f32 %v10426_v12, %v13660_v7  ;;  %v4253_v26 = vrot.slane %v10520_v19, %v4252_v18 }
 0x733   : > { %v10837_v39 = vsel %vm10813_vm7, %v5474_v16, %v5408_v38  ;;  %v10839_v48 = vpop.permute.xlu0 %4821  ;;  %v10841_v62 = vpop.permute.xlu1 %4987  ;;  %v4417_v10 = vrot.slane %v10529_v61, %v4252_v18  ;;  %v4581_v35 = vrot.slane %v10550_v15, %v4252_v18  ;;  %v4747_v21 = vrot.slane %v10544_v40, %v4252_v18 }
 0x734   : > { %13770 = vst [vmem:[#allocation73_spill] sm:$0xff] %v10837_v39  ;;  %13771 = vst [vmem:[#allocation74_spill] sm:$0xff] %v10839_v48  ;;  %v10850_v12 = vmax.f32 %v4022_v3, 0.0  ;;  %vm10857_vm4 = vcmp.eq.s32.totalorder %v4253_v26, 1  ;;  %v13774_v16 = vmov 0  ;;  %vm13777_vm8 = vcmask 760832  }
 0x735   : > { %13772 = vst [vmem:[#allocation75_spill] sm:$0xff] %v10841_v62  ;;  %5007 = vrot.lane.b32.xlu0 %v10533_v8, %s8314_s26  ;;  %5452 = vrot.lane.b32.xlu1 %v10627_v57, %s8313_s27  ;;  %v13775_v16 = vsel %vm10857_vm4, 4294967295, %v13774_v16  ;;  %v4187_v38 = vsel %vm13777_vm8, %v10716_v49, %v10709_v58  ;;  %vm10864_vm7 = vcmp.eq.s32.totalorder %v4417_v10, 1  ;;  %v13778_v39 = vmov 0 }
 0x736   : > { %13776 = vst [vmem:[#allocation77_spill] sm:$0xff] %v13775_v16  ;;  %v13779_v39 = vsel %vm10864_vm7, 4294967295, %v13778_v39  ;;  %vm13781_vm3 = vcmask 777216   ;;  %v4913_v54 = vrot.slane %v10547_v4, %v4252_v18  ;;  %vm10876_vm2 = vcmp.eq.s32.totalorder %v4581_v35, 1 }
 0x737   : > { %v10853_v29 = vpop.permute.xlu0 %4985  ;;  %v10855_v17 = vpop.permute.xlu1 %5140  ;;  %13780 = vst [vmem:[#allocation78_spill] sm:$0xff] %v13779_v39  ;;  %v4350_v3 = vsel %vm13781_vm3, %v10718_v5, %v10733_v42  ;;  %v13782_v26 = vmov 0  ;;  %vm13785_vm8 = vcmask 793600   ;;  %v4291_v10 = vsel %vm10857_vm4, %v4187_v38, 0.0 }
 0x738   : > { %13773 = vst [vmem:[#allocation76_spill] sm:$0xff] %v10855_v17  ;;  %v13783_v26 = vsel %vm10876_vm2, 4294967295, %v13782_v26  ;;  %v4514_v49 = vsel %vm13785_vm8, %v4479_v2, %v10735_v6  ;;  %vm10884_vm14 = vcmp.eq.s32.totalorder %v4747_v21, 1  ;;  %v13786_v5 = vmov 0 }
 0x739   : > { %5158 = vrot.lane.b32.xlu0 %v10533_v8, %s8309_s30  ;;  %4158 = vrot.lane.b32.xlu1 %v10850_v12, %s8297_s11  ;;  %13784 = vst [vmem:[#allocation79_spill] sm:$0xff] %v13783_v26  ;;  %v13787_v5 = vsel %vm10884_vm14, 4294967295, %v13786_v5  ;;  %vm13788_vm3 = vcmask 269312   ;;  %v5079_v20 = vrot.slane %v10563_v44, %v4252_v18  ;;  %v4455_v2 = vsel %vm10864_vm7, %v4350_v3, %v4291_v10 }
 0x73a   : > { %v4686_v28 = vsel %vm13788_vm3, %v10669_v30, %v10805_v34  ;;  %v5225_v16 = vrot.slane %v10578_v25, %v4252_v18  ;;  %v4619_v21 = vsel %vm10876_vm2, %v4514_v49, %v4455_v2  ;;  %vm10901_vm8 = vcmp.eq.s32.totalorder %v4913_v54, 1 }
 0x73b   : > { %v10892_v35 = vpop.permute.xlu0 %5138  ;;  %v10894_v32 = vpop.permute.xlu1 %5286  ;;  %v13790_v38 = vmov 0  ;;  %v5371_v30 = vrot.slane %v10588_v53, %v4252_v18  ;;  %v4785_v3 = vsel %vm10884_vm14, %v4686_v28, %v4619_v21  ;;  %vm13792_vm3 = vcmask 285696  }
 0x73c   : > { %13789 = vst [vmem:[#allocation80_spill] sm:$0xff] %v10894_v32  ;;  %v13791_v38 = vsel %vm10901_vm8, 4294967295, %v13790_v38  ;;  %v4852_v10 = vsel %vm13792_vm3, %v10612_v63, %v10807_v13  ;;  %v5536_v54 = vrot.slane %v10604_v59, %v4252_v18  ;;  %v10917_v49 = vsub.s32 4, %v10302_v41 }
 0x73d   : > { %5304 = vrot.lane.b32.xlu0 %v10533_v8, %s8310_s15  ;;  %4484 = vrot.lane.b32.xlu1 %v10850_v12, %s8299_s20  ;;  %vm10919_vm2 = vcmp.eq.s32.totalorder %v5079_v20, 1  ;;  %v13793_v2 = vmov 0  ;;  %vm13795_vm7 = vcmask 302080   ;;  %vm10930_vm14 = vcmp.eq.s32.totalorder %v5225_v16, 1 }
 0x73e   : > { %v13794_v2 = vsel %vm10919_vm2, 4294967295, %v13793_v2  ;;  %v5018_v26 = vsel %vm13795_vm7, %v10700_v0, %v10853_v29  ;;  %v13797_v21 = vmov 0  ;;  %vm13799_vm3 = vcmask 826368  }
 0x73f   : > { %v10926_v39 = vpop.permute.xlu0 %5284  ;;  %v10928_v28 = vpop.permute.xlu1 %5444  ;;  %v13798_v21 = vsel %vm10930_vm14, 4294967295, %v13797_v21  ;;  %v5168_v63 = vsel %vm13799_vm3, %v10667_v1, %v10892_v35  ;;  %v4951_v20 = vsel %vm10901_vm8, %v4852_v10, %v4785_v3  ;;  %vm10939_vm4 = vcmp.eq.s32.totalorder %v5371_v30, 1 }
 0x740   : > { %13796 = vst [vmem:[#allocation81_spill] sm:$0xff] %v10928_v28  ;;  %v13800_v18 = vmov 0  ;;  %vm13802_vm7 = vcmask 842752   ;;  %v5117_v1 = vsel %vm10919_vm2, %v5018_v26, %v4951_v20  ;;  %vm10952_vm3 = vcmp.eq.s32.totalorder %v5536_v54, 1 }
 0x741   : > { %v13801_v18 = vsel %vm10939_vm4, 4294967295, %v13800_v18  ;;  %v5314_v0 = vsel %vm13802_vm7, %v10698_v52, %v10926_v39  ;;  %5464 = vrot.lane.b32.xlu0 %v10533_v8, %s8313_s27  ;;  %4659 = vrot.lane.b32.xlu1 %v10850_v12, %s8312_s19  ;;  %v13803_v16 = vmov 0  ;;  %v4257_v30 = vrot.slane %v10520_v19, %v10917_v49 }
 0x742   : > { %v13804_v16 = vsel %vm10952_vm3, 4294967295, %v13803_v16  ;;  %v5263_v3 = vsel %vm10930_vm14, %v5168_v63, %v5117_v1  ;;  %vm13806_vm7 = vcmask 859136   ;;  %v4421_v54 = vrot.slane %v10529_v61, %v10917_v49 }
 0x743   : > { %v5443_v52 = vpop.permute.xlu0 %5442  ;;  %v10960_v10 = vpop.permute.xlu1 %4318  ;;  %v5409_v8 = vsel %vm10939_vm4, %v5314_v0, %v5263_v3  ;;  %vm10977_vm14 = vcmp.eq.s32.totalorder %v4257_v30, 1  ;;  %v13807_v63 = vmov 0  ;;  %v4751_v0 = vrot.slane %v10544_v40, %v10917_v49 }
 0x744   : > { %13805 = vst [vmem:[#allocation82_spill] sm:$0xff] %v10960_v10  ;;  %v5475_v41 = vsel %vm13806_vm7, %v10707_v51, %v5443_v52  ;;  %v13808_v63 = vsel %vm10977_vm14, 4294967295, %v13807_v63  ;;  %v4585_v51 = vrot.slane %v10550_v15, %v10917_v49  ;;  %vm13811_vm7 = vcmask 760832  }
 0x745   : > { %v10968_v26 = vsel %vm10952_vm3, %v5475_v41, %v5409_v8  ;;  %4324 = vrot.lane.b32.xlu0 %v10627_v57, %s8298_s17  ;;  %4991 = vrot.lane.b32.xlu1 %v10850_v12, %s8314_s26  ;;  %v4917_v30 = vrot.slane %v10547_v4, %v10917_v49  ;;  %vm10994_vm3 = vcmp.eq.s32.totalorder %v4421_v54, 1  ;;  %v13812_v3 = vmov 0 }
 0x746   : > { %5594 = vst [vmem:[#allocation3 + $0x18] sm:$0xff] %v10968_v26  ;;  %v13813_v3 = vsel %vm10994_vm3, 4294967295, %v13812_v3  ;;  %v5229_v54 = vrot.slane %v10578_v25, %v10917_v49  ;;  %vm13816_vm4 = vcmask 777216   ;;  %v5375_v4 = vrot.slane %v10588_v53, %v10917_v49 }
 0x747   : > { %v10983_v41 = vpop.permute.xlu0 %4156  ;;  %v10985_v20 = vpop.permute.xlu1 %4823  ;;  %vm11027_vm2 = vcmp.eq.s32.totalorder %v4917_v30, 1  ;;  %vm13823_vm8 = vcmask 269312  }
 0x748   : > { %13809 = vst [vmem:[#allocation83_spill] sm:$0xff] %v10983_v41  ;;  %13810 = vst [vmem:[#allocation84_spill] sm:$0xff] %v10985_v20  ;;  %v4188_v1 = vsel %vm13811_vm7, %v10709_v58, %v10983_v41  ;;  %v5083_v20 = vrot.slane %v10563_v44, %v10917_v49  ;;  %vm11006_vm7 = vcmp.eq.s32.totalorder %v4585_v51, 1  ;;  %v13814_v58 = vmov 0 }
 0x749   : > { %v4292_v8 = vsel %vm10977_vm14, %v4188_v1, 0.0  ;;  %4636 = vrot.lane.b32.xlu0 %v10627_v57, %s8300_s22  ;;  %5144 = vrot.lane.b32.xlu1 %v10850_v12, %s8309_s30  ;;  %v13815_v58 = vsel %vm11006_vm7, 4294967295, %v13814_v58  ;;  %v4351_v1 = vsel %vm13816_vm4, %v10733_v42, %v10960_v10  ;;  %vm11015_vm14 = vcmp.eq.s32.totalorder %v4751_v0, 1 }
 0x74a   : > { %v13817_v41 = vmov 0  ;;  %v4456_v44 = vsel %vm10994_vm3, %v4351_v1, %v4292_v8  ;;  %v5540_v42 = vrot.slane %v10604_v59, %v10917_v49  ;;  %vm13822_vm4 = vcmask 793600  }
 0x74b   : > { %v13818_v41 = vsel %vm11015_vm14, 4294967295, %v13817_v41  ;;  %v11021_v40 = vpop.permute.xlu0 %4482  ;;  %v11023_v51 = vpop.permute.xlu1 %4170  ;;  %v4687_v10 = vsel %vm13823_vm8, %v10805_v34, %v10763_v46  ;;  %vm11039_vm12 = vcmp.eq.s32.totalorder %v5083_v20, 1  ;;  %vm11052_vm3 = vcmp.eq.s32.totalorder %v5229_v54, 1  ;;  %v4561_v46 = vld [vmem:[#allocation8 + $0x42] ss:$8 sm:$0x3] }
 0x74c   : > { %13819 = vst [vmem:[#allocation85_spill] sm:$0xff] %v11021_v40  ;;  %v4515_v0 = vsel %vm13822_vm4, %v10735_v6, %v11021_v40  ;;  %vm13826_vm4 = vcmask 285696   ;;  %vm13829_vm8 = vcmask 302080  }
 0x74d   : > { %v4620_v30 = vsel %vm11006_vm7, %v4515_v0, %v4456_v44  ;;  %4829 = vrot.lane.b32.xlu0 %v10627_v57, %s8311_s21  ;;  %5290 = vrot.lane.b32.xlu1 %v10850_v12, %s8310_s15  ;;  %v4853_v6 = vsel %vm13826_vm4, %v10807_v13, %v10839_v48  ;;  %v4024_v44 = vadd.f32 %v10428_v60, %v13660_v7  ;;  %vm11063_vm7 = vcmp.eq.s32.totalorder %v5375_v4, 1 }
 0x74e   : > { %v4786_v34 = vsel %vm11015_vm14, %v4687_v10, %v4620_v30  ;;  %v5019_v20 = vsel %vm13829_vm8, %v10853_v29, %v10841_v62  ;;  %vm13833_vm4 = vcmask 826368   ;;  %vm11076_vm14 = vcmp.eq.s32.totalorder %v5540_v42, 1 }
 0x74f   : > { %v4952_v13 = vsel %vm11027_vm2, %v4853_v6, %v4786_v34  ;;  %v11069_v54 = vpop.permute.xlu0 %4657  ;;  %v11071_v1 = vpop.permute.xlu1 %4496  ;;  %v5169_v10 = vsel %vm13833_vm4, %v10892_v35, %v10855_v17  ;;  %v13834_v7 = vmov 0  ;;  %vm13836_vm8 = vcmask 842752  }
 0x750   : > { %13832 = vst [vmem:[#allocation86_spill] sm:$0xff] %v11069_v54  ;;  %v13835_v7 = vsel %vm11076_vm14, 4294967295, %v13834_v7  ;;  %v5118_v60 = vsel %vm11039_vm12, %v5019_v20, %v4952_v13  ;;  %v5315_v4 = vsel %vm13836_vm8, %v10926_v39, %v10894_v32  ;;  %vm13837_vm4 = vcmask 859136  }
 0x751   : > { %v5264_v29 = vsel %vm11052_vm3, %v5169_v10, %v5118_v60  ;;  %4968 = vrot.lane.b32.xlu0 %v10627_v57, %s8302_s18  ;;  %5448 = vrot.lane.b32.xlu1 %v10850_v12, %s8313_s27  ;;  %v5476_v35 = vsel %vm13837_vm4, %v5443_v52, %v10928_v28  ;;  %v4114_v0 = vmax.f32 %v4024_v44, 0.0  ;;  %v4104_v57 = vadd.f32 %v10444_v11, %v13661_v50 }
 0x752   : > { %v5410_v42 = vsel %vm11063_vm7, %v5315_v4, %v5264_v29  ;;  %vm13841_vm8 = vcmask 523264   ;;  %vm13843_vm4 = vcmask 760832  }
 0x753   : > { %v11097_v30 = vsel %vm11076_vm14, %v5476_v35, %v5410_v42  ;;  %v11099_v39 = vpop.permute.xlu0 %4989  ;;  %v11101_v6 = vpop.permute.xlu1 %4835  ;;  %v4124_v44 = vmax.f32 %v4104_v57, 0.0  ;;  %vm13845_vm14 = vcmask 793600  }
 0x754   : > { %13838 = vst [vmem:[#allocation87_spill] sm:$0xff] %v11099_v39  ;;  %5595 = vst [vmem:[#allocation3 + $0x20] sm:$0xff] %v11097_v30  ;;  %v4521_v57 = vsel %vm13845_vm14, %v10492_v24, %v11071_v1  ;;  %v13848_v24 = vld [vmem:[#allocation52_spill] sm:$0xff]  ;;  %vm13850_vm14 = vcmask 302080  }
 0x755   : > { %4320 = vrot.lane.b32.xlu0 %v10850_v12, %s8298_s17  ;;  %4322 = vrot.lane.b32.xlu1 %v4114_v0, %s8298_s17  ;;  %v11121_v13 = vsel %vm13841_vm8, %v4124_v44, 0.0  ;;  %vm13844_vm8 = vcmask 777216  }
 0x757   : > { %v11109_v52 = vpop.permute.xlu0 %5142  ;;  %v11111_v34 = vpop.permute.xlu1 %5458 }
 0x758   : > { %13839 = vst [vmem:[#allocation88_spill] sm:$0xff] %v11109_v52 }
 0x759   : > { %4825 = vrot.lane.b32.xlu0 %v10850_v12, %s8311_s21  ;;  %4827 = vrot.lane.b32.xlu1 %v4114_v0, %s8311_s21  ;;  %v4194_v12 = vsel %vm13843_vm4, %v10482_v31, %v11023_v51  ;;  %vm13846_vm4 = vcmask 269312   ;;  %v13849_v31 = vld [vmem:[#allocation48_spill] sm:$0xff] }
 0x75a   : > { %v4299_v35 = vsel %vm10556_vm5, %v4194_v12, 0.0  ;;  %v4692_v23 = vsel %vm13846_vm4, %v10465_v33, %v10484_v47  ;;  %vm13847_vm5 = vcmask 285696   ;;  %v5024_v28 = vsel %vm13850_vm14, %v13849_v31, %v13848_v24 }
 0x75b   : > { %v11116_v20 = vpop.permute.xlu0 %5288  ;;  %v11118_v11 = vpop.permute.xlu1 %4174  ;;  %vm13882_vm14 = vnez %v13748_v56  ;;  %v13893_v56 = vmov 0  }
 0x75c   : > { %13840 = vst [vmem:[#allocation89_spill] sm:$0xff] %v11116_v20 }
 0x75d   : > { %4160 = vrot.lane.b32.xlu0 %v4114_v0, %s8297_s11  ;;  %4182 = vrot.lane.b32.xlu1 %v11121_v13, %s8297_s11 }
 0x75f   : > { %v11126_v10 = vpop.permute.xlu0 %5446  ;;  %v11128_v60 = vpop.permute.xlu1 %4334 }
 0x760   : > { %13842 = vst [vmem:[#allocation90_spill] sm:$0xff] %v11126_v10 }
 0x761   : > { %4486 = vrot.lane.b32.xlu0 %v4114_v0, %s8299_s20  ;;  %4508 = vrot.lane.b32.xlu1 %v11121_v13, %s8299_s20 }
 0x763   : > { %v4333_v4 = vpop.permute.xlu0 %4332  ;;  %v11136_v29 = vpop.permute.xlu1 %4500 }
 0x764   : > { %v4357_v42 = vsel %vm13844_vm8, %v10477_v55, %v4333_v4  ;;  %v4858_v55 = vsel %vm13847_vm5, %v10458_v37, %v10507_v27 }
 0x765   : > { %v4463_v44 = vsel %vm10580_vm9, %v4357_v42, %v4299_v35  ;;  %4661 = vrot.lane.b32.xlu0 %v4114_v0, %s8312_s19  ;;  %4806 = vrot.lane.b32.xlu1 %v11121_v13, %s8301_s28  ;;  %vm13854_vm9 = vcmask 826368  }
 0x766   : > { %v4627_v12 = vsel %vm10606_vm11, %v4521_v57, %v4463_v44  ;;  %v13853_v57 = vld [vmem:[#allocation39_spill] sm:$0xff]  ;;  %vm13879_vm11 = vcmask 793600  }
 0x767   : > { %v4793_v43 = vsel %vm10614_vm6, %v4692_v23, %v4627_v12  ;;  %v11160_v35 = vpop.permute.xlu0 %4669  ;;  %v11162_v42 = vpop.permute.xlu1 %4671  ;;  %v5174_v44 = vsel %vm13854_vm9, %v13853_v57, %v13852_v9  ;;  %v13857_v23 = vld [vmem:[#allocation44_spill] sm:$0xff]  ;;  %vm13858_vm6 = vcmask 842752   ;;  %vm4563_vm9 = vcmp.gt.f32.partialorder %v4561_v46, 0.5 }
 0x768   : > { %v4959_v33 = vsel %vm10618_vm0, %v4858_v55, %v4793_v43  ;;  %v5320_v12 = vsel %vm13858_vm6, %v13857_v23, %v13856_v36  ;;  %v13860_v55 = vld [vmem:[#allocation54_spill] sm:$0xff]  ;;  %v13861_v43 = vld [vmem:[#allocation47_spill] sm:$0xff]  ;;  %vm13862_vm0 = vcmask 859136   ;;  %vm13883_vm6 = vcmask 302080  }
 0x769   : > { %v5125_v37 = vsel %vm10639_vm13, %v5024_v28, %v4959_v33  ;;  %4993 = vrot.lane.b32.xlu0 %v4114_v0, %s8314_s26  ;;  %4847 = vrot.lane.b32.xlu1 %v11121_v13, %s8311_s21  ;;  %v5481_v20 = vsel %vm13862_vm0, %v13861_v43, %v13860_v55  ;;  %vm13884_vm0 = vnez %v13751_v45 }
 0x76a   : > { %v5271_v10 = vsel %vm10652_vm1, %v5174_v44, %v5125_v37  ;;  %v13867_v37 = vld [vmem:[#allocation66_spill] sm:$0xff]  ;;  %vm13871_vm1 = vcmask 760832  }
 0x76b   : > { %v5417_v32 = vsel %vm10661_vm10, %v5320_v12, %v5271_v10  ;;  %v11187_v33 = vpop.permute.xlu0 %5001  ;;  %v11189_v28 = vpop.permute.xlu1 %4839  ;;  %vm13878_vm10 = vnez %v13744_v14  ;;  %v4859_v14 = vsel %vm13847_vm5, %v10507_v27, %v11101_v6 }
 0x76c   : > { %13864 = vst [vmem:[#allocation52_spill] sm:$0xff] %v11189_v28  ;;  %v11193_v52 = vsel %vm10674_vm15, %v5481_v20, %v5417_v32  ;;  %vm13876_vm15 = vmmov %vm13844_vm8 }
 0x76d   : > { %13866 = vst [vmem:[#allocation61_spill] sm:$0xff] %v11193_v52  ;;  %5601 = vst [vmem:[#allocation3 + $0x50] sm:$0xff] %v11193_v52  ;;  %5146 = vrot.lane.b32.xlu0 %v4114_v0, %s8309_s30  ;;  %5430 = vrot.lane.b32.xlu1 %v11121_v13, %s8303_s23  ;;  %v7899_v31 = vpack.c.bf16 %v11193_v52, %v13867_v37  ;;  %v13874_v52 = vld [vmem:[#allocation67_spill] sm:$0xff] }
 0x76e   : > { %vm13875_vm13 = vnez %v13874_v52  ;;  %vm13880_vm8 = vmmov %vm13846_vm4  ;;  %vm13881_vm4 = vnez %v13746_v22 }
 0x76f   : > { %v11201_v57 = vpop.permute.xlu0 %5152  ;;  %v11203_v44 = vpop.permute.xlu1 %5005  ;;  %7900 = vmatprep.subr.bf16.mxu1 %v7899_v31  ;;  %v13872_v31 = vld [vmem:[#allocation41_spill] sm:$0xff]  ;;  %v4693_v40 = vsel %vm13880_vm8, %v10484_v47, %v11160_v35  ;;  %v5025_v47 = vsel %vm13883_vm6, %v13848_v24, %v11187_v33  ;;  %v13891_v24 = vld [vmem:[#allocation70_spill] sm:$0xff]  ;;  %vm13894_vm8 = vcmask 859136   ;;  %vm13908_vm6 = vcmask 777216  }
 0x770   : > { %13868 = vst [vmem:[#allocation53_spill] sm:$0xff] %v11203_v44  ;;  %v4028_v43 = vadd.f32 %v13872_v31, %v13661_v50 }
 0x771   : > { %5292 = vrot.lane.b32.xlu0 %v4114_v0, %s8310_s15  ;;  %5013 = vrot.lane.b32.xlu1 %v11121_v13, %s8314_s26 }
 0x772   : > { %v11235_v39 = vmax.f32 %v4028_v43, 0.0 }
 0x773   : > { %v11208_v17 = vpop.permute.xlu0 %5298  ;;  %v11210_v20 = vpop.permute.xlu1 %5156 }
 0x774   : > { %13869 = vst [vmem:[#allocation62_spill] sm:$0xff] %v11210_v20 }
 0x775   : > { %5450 = vrot.lane.b32.xlu0 %v4114_v0, %s8313_s27  ;;  %5164 = vrot.lane.b32.xlu1 %v11121_v13, %s8309_s30 }
 0x777   : > { %v4173_v12 = vpop.permute.xlu0 %4172  ;;  %v11215_v10 = vpop.permute.xlu1 %5302 }
 0x778   : > { %13870 = vst [vmem:[#allocation55_spill] sm:$0xff] %v11215_v10  ;;  %v4195_v32 = vsel %vm13871_vm1, %v11023_v51, %v4173_v12  ;;  %v4358_v51 = vsel %vm13876_vm15, %v4333_v4, %v11128_v60  ;;  %v13888_v4 = vld [vmem:[#allocation69_spill] sm:$0xff] }
 0x779   : > { %4344 = vrot.lane.b32.xlu0 %v11121_v13, %s8298_s17  ;;  %5310 = vrot.lane.b32.xlu1 %v11121_v13, %s8310_s15  ;;  %v4300_v62 = vsel %vm13875_vm13, %v4195_v32, 0.0  ;;  %v4727_v32 = vld [vmem:[#allocation8 + $0x43] ss:$8 sm:$0x3]  ;;  %vm13887_vm13 = vcmask 826368   ;;  %vm13889_vm15 = vnez %v13888_v4 }
 0x77a   : > { %v4464_v54 = vsel %vm13878_vm10, %v4358_v51, %v4300_v62  ;;  %vm4729_vm1 = vcmp.gt.f32.partialorder %v4727_v32, 0.5  ;;  %v5175_v27 = vsel %vm13887_vm13, %v13852_v9, %v11201_v57  ;;  %vm13890_vm10 = vcmask 842752  }
 0x77b   : > { %v11225_v23 = vpop.permute.xlu0 %4336  ;;  %v11227_v0 = vpop.permute.xlu1 %5462  ;;  %v5321_v46 = vsel %vm13890_vm10, %v13856_v36, %v11208_v17  ;;  %v11283_v51 = vsel %vm4563_vm9, 1, %v13893_v56  ;;  %v5482_v9 = vsel %vm13894_vm8, %v13860_v55, %v11111_v34  ;;  %v11291_v36 = vsel %vm4729_vm1, 1, %v13893_v56 }
 0x77c   : > { %13873 = vst [vmem:[#allocation63_spill] sm:$0xff] %v11227_v0  ;;  %13897 = vst [vmem:[#allocation66_spill] sm:$0xff] %v11291_v36  ;;  %vm13912_vm1 = vcmask 793600   ;;  %vm13922_vm8 = vcmask 269312  }
 0x77d   : > { %4640 = vrot.lane.b32.xlu0 %v11121_v13, %s8300_s22  ;;  %5470 = vrot.lane.b32.xlu1 %v11121_v13, %s8313_s27 }
 0x77f   : > { %v4499_v48 = vpop.permute.xlu0 %4498  ;;  %v11239_v31 = vpop.permute.xlu1 %4338 }
 0x780   : > { %13877 = vst [vmem:[#allocation54_spill] sm:$0xff] %v11239_v31  ;;  %v4522_v52 = vsel %vm13879_vm11, %v11071_v1, %v4499_v48  ;;  %vm13892_vm11 = vnez %v13891_v24 }
 0x781   : > { %v4628_v43 = vsel %vm13881_vm4, %v4522_v52, %v4464_v54  ;;  %4681 = vrot.lane.b32.xlu0 %v11121_v13, %s8312_s19  ;;  %4178 = vrot.lane.b32.xlu1 %v11235_v39, %s8297_s11  ;;  %v13895_v52 = vld [vmem:[#allocation71_spill] sm:$0xff] }
 0x782   : > { %v4794_v62 = vsel %vm13882_vm14, %v4693_v40, %v4628_v43  ;;  %vm13896_vm4 = vnez %v13895_v52  ;;  %v13898_v43 = vld [vmem:[#allocation72_spill] sm:$0xff]  ;;  %vm13904_vm14 = vcmask 760832  }
 0x783   : > { %v4960_v22 = vsel %vm13884_vm0, %v4859_v14, %v4794_v62  ;;  %v11264_v54 = vpop.permute.xlu0 %4673  ;;  %v11266_v1 = vpop.permute.xlu1 %4675  ;;  %vm13899_vm5 = vnez %v13898_v43  ;;  %v4196_v24 = vsel %vm13904_vm14, %v4173_v12, %v11118_v11  ;;  %v4523_v12 = vsel %vm13912_vm1, %v4499_v48, %v11136_v29 }
 0x784   : > { %13885 = vst [vmem:[#allocation64_spill] sm:$0xff] %v11264_v54  ;;  %13886 = vst [vmem:[#allocation65_spill] sm:$0xff] %v11266_v1  ;;  %v5126_v40 = vsel %vm13889_vm15, %v5025_v47, %v4960_v22  ;;  %v13902_v47 = vld [vmem:[#allocation21_spill] sm:$0xff]  ;;  %vm13925_vm14 = vcmask 826368   ;;  %vm13927_vm1 = vcmask 842752  }
 0x785   : > { %v5272_v45 = vsel %vm13892_vm11, %v5175_v27, %v5126_v40  ;;  %4972 = vrot.lane.b32.xlu0 %v11121_v13, %s8302_s18  ;;  %4504 = vrot.lane.b32.xlu1 %v11235_v39, %s8299_s20  ;;  %v4605_v22 = vrot.slane %v11283_v51, %v13902_v47  ;;  %v4771_v55 = vrot.slane %v11291_v36, %v13902_v47  ;;  %v13903_v27 = vld [vmem:[#allocation42_spill] sm:$0xff]  ;;  %vm13921_vm11 = vcmask 285696   ;;  %s8098_s18 = smul.u32 36, %s14549_s16 }
 0x786   : > { %v5418_v32 = vsel %vm13896_vm4, %v5321_v46, %v5272_v45  ;;  %v4030_v4 = vadd.f32 %v13903_v27, %v13661_v50  ;;  %v13905_v45 = vmov 0  ;;  %v13909_v50 = vmov 0  ;;  %v13916_v27 = vld [vmem:[#allocation29_spill] sm:$0xff] }
 0x787   : > { %v11295_v14 = vsel %vm13899_vm5, %v5482_v9, %v5418_v32  ;;  %v11297_v13 = vpop.permute.xlu0 %4837  ;;  %v11299_v62 = vpop.permute.xlu1 %4162  ;;  %vm11315_vm9 = vcmp.eq.s32.totalorder %v4605_v22, 1  ;;  %v4359_v9 = vsel %vm13908_vm6, %v11128_v60, %v11225_v23  ;;  %vm11326_vm0 = vcmp.eq.s32.totalorder %v4771_v55, 1  ;;  %v13913_v32 = vld [vmem:[#allocation77_spill] sm:$0xff]  ;;  %v13915_v60 = vld [vmem:[#allocation28_spill] sm:$0xff]  ;;  %v13917_v55 = vld [vmem:[#allocation78_spill] sm:$0xff] }
 0x788   : > { %13900 = vst [vmem:[#allocation41_spill] sm:$0xff] %v11295_v14  ;;  %13901 = vst [vmem:[#allocation67_spill] sm:$0xff] %v11299_v62  ;;  %v13906_v45 = vsel %vm11315_vm9, 4294967295, %v13905_v45  ;;  %v13910_v50 = vsel %vm11326_vm0, 4294967295, %v13909_v50  ;;  %v11332_v52 = vmax.f32 %v4030_v4, 0.0  ;;  %vm13914_vm13 = vnez %v13913_v32  ;;  %v13919_v4 = vld [vmem:[#allocation79_spill] sm:$0xff] }
 0x789   : > { %4340 = vrot.lane.b32.xlu0 %v11235_v39, %s8298_s17  ;;  %4843 = vrot.lane.b32.xlu1 %v11235_v39, %s8311_s21  ;;  %13907 = vst [vmem:[#allocation69_spill] sm:$0xff] %v13906_v45  ;;  %13911 = vst [vmem:[#allocation70_spill] sm:$0xff] %v13910_v50  ;;  %v4301_v43 = vsel %vm13914_vm13, %v4196_v24, 0.0  ;;  %v4625_v1 = vsel %vm11315_vm9, %v13916_v27, %v13915_v60  ;;  %vm13918_vm15 = vnez %v13917_v55  ;;  %vm13920_vm10 = vnez %v13919_v4 }
 0x78a   : > { %v4465_v36 = vsel %vm13918_vm15, %v4359_v9, %v4301_v43  ;;  %v4860_v24 = vsel %vm13921_vm11, %v11101_v6, %v11297_v13  ;;  %v4694_v9 = vsel %vm13922_vm8, %v11160_v35, %v11162_v42  ;;  %vm13923_vm4 = vcmask 302080  }
 0x78b   : > { %v5004_v40 = vpop.permute.xlu0 %5003  ;;  %v11311_v46 = vpop.permute.xlu1 %4488  ;;  %v4629_v32 = vsel %vm13920_vm10, %v4523_v12, %v4465_v36  ;;  %vm13924_vm5 = vnez %v13787_v5  ;;  %vm13926_vm6 = vnez %v13791_v38  ;;  %vm13928_vm13 = vnez %v13794_v2 }
 0x78c   : > { %v4795_v36 = vsel %vm13924_vm5, %v4694_v9, %v4629_v32  ;;  %vm13929_vm15 = vnez %v13798_v21  ;;  %vm13930_vm10 = vnez %v13801_v18  ;;  %vm13931_vm11 = vcmask 859136  }
 0x78d   : > { %4677 = vrot.lane.b32.xlu0 %v11235_v39, %s8312_s19  ;;  %5009 = vrot.lane.b32.xlu1 %v11235_v39, %s8314_s26  ;;  %v4961_v55 = vsel %vm13926_vm6, %v4860_v24, %v4795_v36  ;;  %vm13932_vm8 = vnez %v13804_v16  ;;  %vm13938_vm5 = vnez %v13808_v63  ;;  %vm13942_vm6 = vnez %v13813_v3 }
 0x78f   : > { %v5155_v22 = vpop.permute.xlu0 %5154  ;;  %v11340_v62 = vpop.permute.xlu1 %4663 }
 0x790   : > { %v11347_v48 = vsel %vm11326_vm0, %v11340_v62, %v4625_v1  ;;  %v5026_v1 = vsel %vm13923_vm4, %v11187_v33, %v5004_v40  ;;  %v5176_v12 = vsel %vm13925_vm14, %v11201_v57, %v5155_v22  ;;  %vm13936_vm4 = vcmask 760832  }
 0x791   : > { %4180 = vrot.lane.b32.xlu0 %v11332_v52, %s8297_s11  ;;  %5160 = vrot.lane.b32.xlu1 %v11235_v39, %s8309_s30  ;;  %v5127_v35 = vsel %vm13928_vm13, %v5026_v1, %v4961_v55  ;;  %vm13939_vm14 = vcmask 777216   ;;  %vm13944_vm13 = vcmask 269312   ;;  %vm14025_vm0 = vcmask 236544  }
 0x792   : > { %v5273_v5 = vsel %vm13929_vm15, %v5176_v12, %v5127_v35  ;;  %v4360_v24 = vsel %vm13939_vm14, %v11225_v23, %v11239_v31  ;;  %v4695_v36 = vsel %vm13944_vm13, %v11162_v42, %v11264_v54  ;;  %vm13945_vm15 = vnez %v13815_v58 }
 0x793   : > { %v5301_v43 = vpop.permute.xlu0 %5300  ;;  %v11363_v60 = vpop.permute.xlu1 %4802  ;;  %v13987_v31 = vmov 0 }
 0x794   : > { %v5322_v6 = vsel %vm13927_vm1, %v11208_v17, %v5301_v43  ;;  %vm13943_vm1 = vcmask 793600  }
 0x795   : > { %4506 = vrot.lane.b32.xlu0 %v11332_v52, %s8299_s20  ;;  %5306 = vrot.lane.b32.xlu1 %v11235_v39, %s8310_s15  ;;  %v5419_v38 = vsel %vm13930_vm10, %v5322_v6, %v5273_v5  ;;  %vm13946_vm10 = vcmask 285696   ;;  %s14026_s20 = smov 58  }
 0x796   : > { %v4861_v3 = vsel %vm13946_vm10, %v11297_v13, %v11189_v28 }
 0x797   : > { %v5461_v33 = vpop.permute.xlu0 %5460  ;;  %v11381_v57 = vpop.permute.xlu1 %5426 }
 0x798   : > { %v5483_v17 = vsel %vm13931_vm11, %v11111_v34, %v5461_v33  ;;  %v13937_v34 = vld [vmem:[#allocation73_spill] sm:$0xff]  ;;  %vm13947_vm11 = vnez %v13818_v41 }
 0x799   : > { %v11389_v4 = vsel %vm13932_vm8, %v5483_v17, %v5419_v38  ;;  %4845 = vrot.lane.b32.xlu0 %v11332_v52, %s8311_s21  ;;  %5466 = vrot.lane.b32.xlu1 %v11235_v39, %s8313_s27  ;;  %v7937_v32 = vpack.c.bf16 %v11295_v14, %v13937_v34  ;;  %vm13948_vm8 = vcmask 302080   ;;  %v14036_v14 = vld [vmem:[#allocation19_spill] sm:$0xff] }
 0x79a   : > { %13933 = vst [vmem:[#allocation71_spill] sm:$0xff] %v11389_v4  ;;  %5603 = vst [vmem:[#allocation3 + $0x60] sm:$0xff] %v11389_v4  ;;  %v7935_v2 = vpack.c.bf16 %v11389_v4, %v10968_v26  ;;  %v5027_v23 = vsel %vm13948_vm8, %v5004_v40, %v11203_v44 }
 0x79b   : > { %v11398_v21 = vpop.permute.xlu0 %4176  ;;  %v11400_v18 = vpop.permute.xlu1 %4995 }
 0x79c   : > { %13934 = vst [vmem:[#allocation72_spill] sm:$0xff] %v11398_v21  ;;  %13935 = vst [vmem:[#allocation21_spill] sm:$0xff] %v11400_v18  ;;  %v4197_v16 = vsel %vm13936_vm4, %v11118_v11, %v11398_v21  ;;  %7936 = vmatprep.subr.bf16.mxu0 %v7935_v2  ;;  %vm13950_vm4 = vcmask 826368   ;;  %v4893_v2 = vld [vmem:[#allocation8 + $0x44] ss:$8 sm:$0x3] }
 0x79d   : > { %v4302_v39 = vsel %vm13938_vm5, %v4197_v16, 0.0  ;;  %5011 = vrot.lane.b32.xlu0 %v11332_v52, %s8314_s26  ;;  %4342 = vrot.lane.b32.xlu1 %v11332_v52, %s8298_s17  ;;  %v5177_v6 = vsel %vm13950_vm4, %v5155_v22, %v11210_v20  ;;  %vm13951_vm5 = vcmask 842752   ;;  %v13959_v16 = vmov 0  ;;  %v13981_v20 = vld [vmem:[#allocation59_spill] sm:$0xff]  ;;  %s13990_s17 = smov 59   ;;  %s13323_s26 = scalar_lea.vmem %s13343_s10, %s8098_s18 }
 0x79e   : > { %7938 = vmatpush1.bf16.msra.mxu0 %v7937_v32  ;;  %v4466_v1 = vsel %vm13942_vm6, %v4360_v24, %v4302_v39  ;;  %v5323_v41 = vsel %vm13951_vm5, %v5301_v43, %v11215_v10  ;;  %v13956_v43 = vld [vmem:[#allocation23_spill] sm:$0xff]  ;;  %v13962_v32 = vld [vmem:[#allocation33_spill] sm:$0xff]  ;;  %vm4895_vm6 = vcmp.gt.f32.partialorder %v4893_v2, 0.5  ;;  %vm13977_vm4 = vcmask 793600   ;;  %v13980_v10 = vld [vmem:[#allocation58_spill] sm:$0xff] }
 0x79f   : > { %v11416_v9 = vpop.permute.xlu0 %4502  ;;  %v11418_v11 = vpop.permute.xlu1 %5148  ;;  %v11473_v5 = vsub.s32 0, %v13956_v43  ;;  %v13963_v39 = vld [vmem:[#allocation25_spill] sm:$0xff]  ;;  %v13975_v2 = vld [vmem:[#allocation35_spill] sm:$0xff]  ;;  %vm13513_vm5 = vcmask 220160   ;;  %v14000_v21 = vmov 0 }
 0x7a0   : > { %13940 = vst [vmem:[#allocation42_spill] sm:$0xff] %v11416_v9  ;;  %13941 = vst [vmem:[#allocation77_spill] sm:$0xff] %v11418_v11  ;;  %v4524_v63 = vsel %vm13943_vm1, %v11136_v29, %v11416_v9  ;;  %vm13971_vm1 = vcmask 777216   ;;  %v13984_v9 = vmov 0 }
 0x7a1   : > { %v4630_v12 = vsel %vm13945_vm15, %v4524_v63, %v4466_v1  ;;  %5162 = vrot.lane.b32.xlu0 %v11332_v52, %s8309_s30  ;;  %4679 = vrot.lane.b32.xlu1 %v11332_v52, %s8312_s19  ;;  %v4405_v38 = vrot.slane %v10529_v61, %v11473_v5  ;;  %v5059_v1 = vld [vmem:[#allocation8 + $0x45] ss:$8 sm:$0x3]  ;;  %v13965_v63 = vmov 0 }
 0x7a2   : > { %v4796_v29 = vsel %vm13947_vm11, %v4695_v36, %v4630_v12  ;;  %v5205_v36 = vld [vmem:[#allocation8 + $0x46] ss:$8 sm:$0x3]  ;;  %v4569_v12 = vrot.slane %v10550_v15, %v11473_v5  ;;  %vm5061_vm13 = vcmp.gt.f32.partialorder %v5059_v1, 0.5 }
 0x7a3   : > { %v4962_v58 = vsel %vm11027_vm2, %v4861_v3, %v4796_v29  ;;  %v11443_v42 = vpop.permute.xlu0 %4841  ;;  %v11445_v55 = vpop.permute.xlu1 %5294  ;;  %vm13952_vm2 = vcmask 859136   ;;  %vm11506_vm14 = vcmp.eq.s32.totalorder %v4405_v38, 1  ;;  %vm5207_vm15 = vcmp.gt.f32.partialorder %v5205_v36, 0.5 }
 0x7a4   : > { %13949 = vst [vmem:[#allocation28_spill] sm:$0xff] %v11443_v42  ;;  %v5128_v35 = vsel %vm11039_vm12, %v5027_v23, %v4962_v58  ;;  %v5484_v25 = vsel %vm13952_vm2, %v5461_v33, %v11227_v0  ;;  %vm13953_vm12 = vnez %v13835_v7  ;;  %v4241_v33 = vrot.slane %v10520_v19, %v11473_v5  ;;  %v5351_v23 = vld [vmem:[#allocation8 + $0x47] ss:$8 sm:$0x3] }
 0x7a5   : > { %v5274_v13 = vsel %vm11052_vm3, %v5177_v6, %v5128_v35  ;;  %5308 = vrot.lane.b32.xlu0 %v11332_v52, %s8310_s15  ;;  %5631 = vrot.lane.b32.xlu1 %v13937_v34, %s8287_s14  ;;  %v13966_v63 = vsel %vm11506_vm14, 4294967295, %v13965_v63  ;;  %v5516_v58 = vld [vmem:[#allocation8 + $0x90] ss:$8 sm:$0x3]  ;;  %vm5353_vm10 = vcmp.gt.f32.partialorder %v5351_v23, 0.5  ;;  %vm11533_vm8 = vcmp.eq.s32.totalorder %v4569_v12, 1 }
 0x7a6   : > { %v5420_v40 = vsel %vm11063_vm7, %v5323_v41, %v5274_v13  ;;  %vm11495_vm3 = vcmp.eq.s32.totalorder %v4241_v33, 1  ;;  %vm13964_vm7 = vcmask 760832   ;;  %13967 = vst [vmem:[#allocation33_spill] sm:$0xff] %v13966_v63  ;;  %v13969_v35 = vld [vmem:[#allocation34_spill] sm:$0xff]  ;;  %vm5518_vm11 = vcmp.gt.f32.partialorder %v5516_v58, 0.5  ;;  %v13978_v12 = vld [vmem:[#allocation56_spill] sm:$0xff] }
 0x7a7   : > { %v11465_v53 = vsel %vm13953_vm12, %v5484_v25, %v5420_v40  ;;  %v11467_v22 = vpop.permute.xlu0 %5007  ;;  %v11469_v49 = vpop.permute.xlu1 %5452  ;;  %v13960_v16 = vsel %vm11495_vm3, 4294967295, %v13959_v16  ;;  %v4184_v24 = vsel %vm13964_vm7, %v13963_v39, %v13962_v32  ;;  %v13970_v41 = vld [vmem:[#allocation26_spill] sm:$0xff]  ;;  %v11522_v25 = vsub.s32 5, %v13956_v43  ;;  %v13976_v32 = vld [vmem:[#allocation13_spill] sm:$0xff]  ;;  %v13982_v58 = vld [vmem:[#allocation60_spill] sm:$0xff] }
 0x7a8   : > { %13954 = vst [vmem:[#allocation29_spill] sm:$0xff] %v11465_v53  ;;  %13955 = vst [vmem:[#allocation78_spill] sm:$0xff] %v11467_v22  ;;  %v4288_v6 = vsel %vm11495_vm3, %v4184_v24, 0.0  ;;  %v4347_v13 = vsel %vm13971_vm1, %v13970_v41, %v13969_v35  ;;  %v11529_v40 = vsel %vm4895_vm6, 1, %v13893_v56  ;;  %v13972_v38 = vmov 0 }
 0x7a9   : > { %5604 = vst [vmem:[#allocation3 + $0x68] sm:$0xff] %v11465_v53  ;;  %5468 = vrot.lane.b32.xlu0 %v11332_v52, %s8313_s27  ;;  %5719 = vrot.lane.b32.xlu1 %v13937_v34, %s8286_s12  ;;  %13961 = vst [vmem:[#allocation23_spill] sm:$0xff] %v13960_v16  ;;  %v4452_v33 = vsel %vm11506_vm14, %v4347_v13, %v4288_v6  ;;  %v13973_v38 = vsel %vm11533_vm8, 4294967295, %v13972_v38  ;;  %v4511_v39 = vsel %vm13977_vm4, %v13976_v32, %v13975_v2  ;;  %v13979_v2 = vld [vmem:[#allocation57_spill] sm:$0xff] }
 0x7aa   : > { %13974 = vst [vmem:[#allocation34_spill] sm:$0xff] %v13973_v38  ;;  %v11545_v36 = vsel %vm5061_vm13, 1, %v13893_v56  ;;  %v4261_v35 = vrot.slane %v10520_v19, %v11522_v25  ;;  %v4735_v6 = vrot.slane %v13978_v12, %v11473_v5  ;;  %v11552_v41 = vsel %vm5207_vm15, 1, %v13893_v56 }
 0x7ab   : > { %v11479_v8 = vpop.permute.xlu0 %5158  ;;  %v11481_v7 = vpop.permute.xlu1 %4158  ;;  %v4937_v13 = vrot.slane %v11529_v40, %v13902_v47  ;;  %v4901_v32 = vrot.slane %v13979_v2, %v11473_v5  ;;  %v11564_v4 = vsel %vm5353_vm10, 1, %v13893_v56  ;;  %v11568_v53 = vsel %vm5518_vm11, 1, %v13893_v56 }
 0x7ac   : > { %13957 = vst [vmem:[#allocation79_spill] sm:$0xff] %v11479_v8  ;;  %v4616_v0 = vsel %vm11533_vm8, %v4511_v39, %v4452_v33  ;;  %v5213_v8 = vrot.slane %v13981_v20, %v11473_v5  ;;  %v5359_v56 = vrot.slane %v13982_v58, %v11473_v5  ;;  %v5524_v22 = vrot.slane %v10604_v59, %v11473_v5  ;;  %v13983_v39 = vld [vmem:[#allocation16_spill] sm:$0xff] }
 0x7ad   : > { %5629 = vrot.lane.b32.xlu0 %v13867_v37, %s8287_s14  ;;  %5807 = vrot.lane.b32.xlu1 %v13937_v34, %s8307_s29  ;;  %v5249_v33 = vrot.slane %v11552_v41, %v13902_v47  ;;  %v5395_v42 = vrot.slane %v11564_v4, %v13902_v47  ;;  %v5560_v54 = vrot.slane %v11568_v53, %v13902_v47  ;;  %vm11592_vm7 = vcmp.eq.s32.totalorder %v4261_v35, 1 }
 0x7ae   : > { %v13985_v9 = vsel %vm11592_vm7, 4294967295, %v13984_v9  ;;  %vm11596_vm6 = vcmp.eq.s32.totalorder %v4735_v6, 1  ;;  %vm11604_vm1 = vcmp.eq.s32.totalorder %v4937_v13, 1  ;;  %vm11608_vm13 = vcmp.eq.s32.totalorder %v4901_v32, 1  ;;  %v14006_v32 = vld [vmem:[#allocation30_spill] sm:$0xff] }
 0x7af   : > { %v11491_v52 = vpop.permute.xlu0 %5304  ;;  %v11493_v17 = vpop.permute.xlu1 %4484  ;;  %13986 = vst [vmem:[#allocation26_spill] sm:$0xff] %v13985_v9  ;;  %v13988_v31 = vsel %vm11596_vm6, 4294967295, %v13987_v31  ;;  %v4425_v35 = vrot.slane %v10529_v61, %v11522_v25  ;;  %v13997_v6 = vmov 0  ;;  %vm11622_vm4 = vcmp.eq.s32.totalorder %v5213_v8, 1 }
 0x7b0   : > { %13958 = vst [vmem:[#allocation73_spill] sm:$0xff] %v11491_v52  ;;  %v5067_v52 = vrot.slane %v13980_v10, %v11473_v5  ;;  %13989 = vst [vmem:[#allocation35_spill] sm:$0xff] %v13988_v31  ;;  %v14003_v13 = vmov 0  ;;  %vm11632_vm2 = vcmp.eq.s32.totalorder %v5359_v56, 1  ;;  %vm11636_vm10 = vcmp.eq.s32.totalorder %v5524_v22, 1 }
 0x7b1   : > { %5717 = vrot.lane.b32.xlu0 %v13867_v37, %s8286_s12  ;;  %5895 = vrot.lane.b32.xlu1 %v13937_v34, %s8297_s11  ;;  %v14004_v13 = vsel %vm11622_vm4, 4294967295, %v14003_v13  ;;  %vm11640_vm12 = vcmp.eq.s32.totalorder %v5249_v33, 1  ;;  %v14015_v8 = vmov 0  ;;  %v14018_v56 = vmov 0  ;;  %v14024_v33 = vld [vmem:[#allocation17_spill] sm:$0xff] }
 0x7b2   : > { %vm11618_vm11 = vcmp.eq.s32.totalorder %v5067_v52, 1  ;;  %14005 = vst [vmem:[#allocation59_spill] sm:$0xff] %v14004_v13  ;;  %v14012_v52 = vmov 0  ;;  %v14016_v8 = vsel %vm11640_vm12, 4294967295, %v14015_v8  ;;  %vm11654_vm8 = vcmp.eq.s32.totalorder %v5560_v54, 1  ;;  %v14058_v13 = vld [vmem:[#allocation85_spill] sm:$0xff] }
 0x7b3   : > { %v11512_v3 = vpop.permute.xlu0 %5464  ;;  %v11514_v29 = vpop.permute.xlu1 %4659  ;;  %v14001_v21 = vsel %vm11618_vm11, 4294967295, %v14000_v21  ;;  %v14013_v52 = vsel %vm11636_vm10, 4294967295, %v14012_v52  ;;  %14017 = vst [vmem:[#allocation92_spill] sm:$0xff] %v14016_v8  ;;  %v14021_v22 = vmov 0  ;;  %v4809_v63 = vsel %vm14025_vm0, %v11363_v60, %v14024_v33  ;;  %v14032_v33 = vld [vmem:[#allocation14_spill] sm:$0xff]  ;;  %v14034_v8 = vld [vmem:[#allocation11_spill] sm:$0xff] }
 0x7b4   : > { %13968 = vst [vmem:[#allocation25_spill] sm:$0xff] %v11512_v3  ;;  %v5103_v3 = vrot.slane %v11545_v36, %v13902_v47  ;;  %v13994_v47 = vmov 0  ;;  %14002 = vst [vmem:[#allocation58_spill] sm:$0xff] %v14001_v21  ;;  %v14022_v22 = vsel %vm11654_vm8, 4294967295, %v14021_v22  ;;  %v4755_v54 = vrot.slane %v13978_v12, %v11522_v25 }
 0x7b5   : > { %5805 = vrot.lane.b32.xlu0 %v13867_v37, %s8307_s29  ;;  %5983 = vrot.lane.b32.xlu1 %v13937_v34, %s8291_s25  ;;  %v13995_v47 = vsel %vm11608_vm13, 4294967295, %v13994_v47  ;;  %14014 = vst [vmem:[#allocation91_spill] sm:$0xff] %v14013_v52  ;;  %14023 = vst [vmem:[#allocation94_spill] sm:$0xff] %v14022_v22  ;;  %vm14031_vm0 = vcmask 793600   ;;  %v14078_v52 = vld [vmem:[#allocation87_spill] sm:$0xff] }
 0x7b6   : > { %13996 = vst [vmem:[#allocation56_spill] sm:$0xff] %v13995_v47  ;;  %vm11614_vm15 = vcmp.eq.s32.totalorder %v5103_v3, 1  ;;  %v14009_v3 = vmov 0  ;;  %v11844_v47 = vsub.s32 7, %v13956_v43 }
 0x7b7   : > { %v11540_v24 = vpop.permute.xlu0 %4324  ;;  %v11542_v1 = vpop.permute.xlu1 %4991  ;;  %v13998_v6 = vsel %vm11614_vm15, 4294967295, %v13997_v6  ;;  %v14010_v3 = vsel %vm11632_vm2, 4294967295, %v14009_v3 }
 0x7b8   : > { %13999 = vst [vmem:[#allocation57_spill] sm:$0xff] %v13998_v6  ;;  %14011 = vst [vmem:[#allocation30_spill] sm:$0xff] %v14010_v3 }
 0x7b9   : > { %5893 = vrot.lane.b32.xlu0 %v13867_v37, %s8297_s11  ;;  %6073 = vrot.lane.b32.xlu1 %v13937_v34, %s8304_s24 }
 0x7bb   : > { %v4637_v23 = vpop.permute.xlu0 %4636  ;;  %v11578_v44 = vpop.permute.xlu1 %5144 }
 0x7bc   : > { %v4643_v28 = vsel %vm13513_vm5, %v4637_v23, %v13983_v39  ;;  %v13991_v23 = vmov 0  ;;  %vm14007_vm5 = vcmask 269312  }
 0x7bd   : > { %5981 = vrot.lane.b32.xlu0 %v13867_v37, %s8291_s25  ;;  %6167 = vrot.lane.b32.xlu1 %v13937_v34, %s13990_s17  ;;  %v13992_v23 = vsel %vm11604_vm1, 4294967295, %v13991_v23  ;;  %v4720_v38 = vsel %vm14007_vm5, %v4643_v28, %v14006_v32  ;;  %v4589_v32 = vrot.slane %v10550_v15, %v11522_v25  ;;  %vm11650_vm5 = vcmp.eq.s32.totalorder %v5395_v42, 1 }
 0x7be   : > { %13993 = vst [vmem:[#allocation13_spill] sm:$0xff] %v13992_v23  ;;  %v14019_v56 = vsel %vm11650_vm5, 4294967295, %v14018_v56  ;;  %v4782_v60 = vsel %vm11596_vm6, %v4720_v38, %v4616_v0  ;;  %v4921_v42 = vrot.slane %v13979_v2, %v11522_v25  ;;  %v5233_v38 = vrot.slane %v13981_v20, %v11522_v25 }
 0x7bf   : > { %v11628_v50 = vpop.permute.xlu0 %4829  ;;  %v11630_v45 = vpop.permute.xlu1 %5290  ;;  %14020 = vst [vmem:[#allocation93_spill] sm:$0xff] %v14019_v56  ;;  %vm14039_vm6 = vcmask 252928  }
 0x7c0   : > { %14008 = vst [vmem:[#allocation60_spill] sm:$0xff] %v11628_v50  ;;  %v4957_v28 = vsel %vm11604_vm1, %v11628_v50, %v11347_v48  ;;  %vm11668_vm1 = vcmp.eq.s32.totalorder %v4425_v35, 1  ;;  %v14027_v48 = vmov 0  ;;  %v14030_v35 = vld [vmem:[#allocation15_spill] sm:$0xff] }
 0x7c1   : > { %v5123_v23 = vsel %vm11614_vm15, %v11400_v18, %v4957_v28  ;;  %6071 = vrot.lane.b32.xlu0 %v13867_v37, %s8304_s24  ;;  %6261 = vrot.lane.b32.xlu1 %v13937_v34, %s14026_s20  ;;  %v14028_v48 = vsel %vm11668_vm1, 4294967295, %v14027_v48  ;;  %v5087_v28 = vrot.slane %v13980_v10, %v11522_v25  ;;  %v4519_v6 = vsel %vm14031_vm0, %v11311_v46, %v14030_v35  ;;  %v14041_v18 = vld [vmem:[#allocation83_spill] sm:$0xff] }
 0x7c2   : > { %14029 = vst [vmem:[#allocation95_spill] sm:$0xff] %v14028_v48  ;;  %v5269_v34 = vsel %vm11640_vm12, %v11418_v11, %v5123_v23  ;;  %vm14033_vm15 = vcmask 777216   ;;  %vm14035_vm12 = vcmask 285696   ;;  %vm14037_vm0 = vcmask 809984   ;;  %v14038_v11 = vld [vmem:[#allocation18_spill] sm:$0xff] }
 0x7c3   : > { %v4355_v16 = vsel %vm14033_vm15, %v11540_v24, %v14032_v33  ;;  %v4969_v31 = vpop.permute.xlu0 %4968  ;;  %v11689_v0 = vpop.permute.xlu1 %5448  ;;  %v5415_v39 = vsel %vm11650_vm5, %v11445_v55, %v5269_v34  ;;  %v4886_v23 = vsel %vm14035_vm12, %v4809_v63, %v14034_v8  ;;  %v5432_v35 = vsel %vm14037_vm0, %v11381_v57, %v14036_v14  ;;  %v14043_v63 = vld [vmem:[#allocation32_spill] sm:$0xff]  ;;  %v14048_v57 = vld [vmem:[#allocation27_spill] sm:$0xff] }
 0x7c4   : > { %v4975_v33 = vsel %vm14039_vm6, %v4969_v31, %v14038_v11  ;;  %v11706_v50 = vsel %vm11654_vm8, %v11469_v49, %v5415_v39  ;;  %vm14042_vm15 = vcmask 760832   ;;  %v4948_v34 = vsel %vm11608_vm13, %v4886_v23, %v4782_v60 }
 0x7c5   : > { %14040 = vst [vmem:[#allocation11_spill] sm:$0xff] %v11706_v50  ;;  %v4189_v56 = vsel %vm14042_vm15, %v14041_v18, %v11481_v7  ;;  %vm14044_vm12 = vcmask 302080   ;;  %6165 = vrot.lane.b32.xlu0 %v13867_v37, %s13990_s17  ;;  %5635 = vrot.lane.b32.xlu1 %v11097_v30, %s8287_s14  ;;  %vm11719_vm6 = vcmp.eq.s32.totalorder %v4589_v32, 1  ;;  %v14045_v31 = vmov 0 }
 0x7c6   : > { %v5052_v8 = vsel %vm14044_vm12, %v4975_v33, %v14043_v63  ;;  %v14046_v31 = vsel %vm11719_vm6, 4294967295, %v14045_v31  ;;  %vm14049_vm0 = vcmask 826368   ;;  %v5379_v33 = vrot.slane %v13982_v58, %v11522_v25 }
 0x7c7   : > { %14047 = vst [vmem:[#allocation19_spill] sm:$0xff] %v14046_v31  ;;  %v11725_v39 = vsel %vm14049_vm0, %v4355_v16, %v14048_v57  ;;  %v5114_v18 = vsel %vm11618_vm11, %v5052_v8, %v4948_v34  ;;  %v11732_v60 = vsub.s32 6, %v13956_v43  ;;  %vm14050_vm15 = vcmask 842752   ;;  %v4321_v63 = vpop.permute.xlu0 %4320  ;;  %v11745_v34 = vpop.permute.xlu1 %4322  ;;  %v14054_v57 = vld [vmem:[#allocation31_spill] sm:$0xff] }
 0x7c8   : > { %v11736_v23 = vsel %vm14050_vm15, %v4519_v6, %v13916_v27  ;;  %v5260_v32 = vsel %vm11622_vm4, %v11725_v39, %v5114_v18  ;;  %vm11741_vm12 = vcmp.eq.s32.totalorder %v4755_v54, 1  ;;  %v14051_v16 = vmov 0  ;;  %v14056_v54 = vld [vmem:[#allocation82_spill] sm:$0xff] }
 0x7c9   : > { %v14052_v16 = vsel %vm11741_vm12, 4294967295, %v14051_v16  ;;  %v5544_v8 = vrot.slane %v10604_v59, %v11522_v25  ;;  %vm14055_vm0 = vcmask 859136   ;;  %v4293_v27 = vsel %vm11592_vm7, %v4189_v56, 0.0  ;;  %6259 = vrot.lane.b32.xlu0 %v13867_v37, %s14026_s20  ;;  %5723 = vrot.lane.b32.xlu1 %v11097_v30, %s8286_s12 }
 0x7ca   : > { %14053 = vst [vmem:[#allocation83_spill] sm:$0xff] %v14052_v16  ;;  %v5509_v50 = vsel %vm14055_vm0, %v5432_v35, %v14054_v57  ;;  %v5406_v6 = vsel %vm11632_vm2, %v11736_v23, %v5260_v32  ;;  %vm14057_vm15 = vcmask 777216   ;;  %vm14059_vm4 = vcmask 793600   ;;  %v14064_v32 = vld [vmem:[#allocation86_spill] sm:$0xff]  ;;  %v14065_v57 = vld [vmem:[#allocation68_spill] sm:$0xff] }
 0x7cb   : > { %v4352_v18 = vsel %vm14057_vm15, %v14056_v54, %v4321_v63  ;;  %v4516_v21 = vsel %vm14059_vm4, %v14058_v13, %v11493_v17  ;;  %v11763_v25 = vsel %vm11636_vm10, %v5509_v50, %v5406_v6  ;;  %vm11765_vm11 = vcmp.eq.s32.totalorder %v4921_v42, 1  ;;  %v14070_v6 = vld [vmem:[#allocation22_spill] sm:$0xff]  ;;  %v14071_v54 = vld [vmem:[#allocation84_spill] sm:$0xff] }
 0x7cc   : > { %14060 = vst [vmem:[#allocation32_spill] sm:$0xff] %v11763_v25  ;;  %v14061_v35 = vmov 0  ;;  %v4457_v56 = vsel %vm11668_vm1, %v4352_v18, %v4293_v27  ;;  %vm14066_vm4 = vcmask 269312   ;;  %vm11778_vm0 = vcmp.eq.s32.totalorder %v5087_v28, 1  ;;  %v14072_v18 = vld [vmem:[#allocation74_spill] sm:$0xff]  ;;  %v14084_v16 = vld [vmem:[#allocation88_spill] sm:$0xff] }
 0x7cd   : > { %v14062_v35 = vsel %vm11765_vm11, 4294967295, %v14061_v35  ;;  %v4688_v13 = vsel %vm14066_vm4, %v14065_v57, %v14064_v32  ;;  %v14067_v50 = vmov 0  ;;  %v4621_v42 = vsel %vm11719_vm6, %v4516_v21, %v4457_v56  ;;  %v11797_v57 = vpop.permute.xlu0 %4825  ;;  %v11799_v21 = vpop.permute.xlu1 %4827  ;;  %v14077_v56 = vld [vmem:[#allocation20_spill] sm:$0xff]  ;;  %5633 = vrot.lane.b32.xlu0 %v10968_v26, %s8287_s14  ;;  %5811 = vrot.lane.b32.xlu1 %v11097_v30, %s8307_s29 }
 0x7ce   : > { %14063 = vst [vmem:[#allocation27_spill] sm:$0xff] %v14062_v35  ;;  %v14068_v50 = vsel %vm11778_vm0, 4294967295, %v14067_v50  ;;  %v4265_v27 = vrot.slane %v10520_v19, %v11732_v60  ;;  %v4273_v37 = vrot.slane %v14070_v6, %v11473_v5  ;;  %vm14073_vm15 = vcmask 285696   ;;  %v14079_v6 = vld [vmem:[#allocation75_spill] sm:$0xff]  ;;  %v14097_v35 = vld [vmem:[#allocation81_spill] sm:$0xff] }
 0x7cf   : > { %14069 = vst [vmem:[#allocation31_spill] sm:$0xff] %v14068_v50  ;;  %v4854_v25 = vsel %vm14073_vm15, %v14072_v18, %v14071_v54  ;;  %vm11791_vm1 = vcmp.eq.s32.totalorder %v5233_v38, 1  ;;  %v14074_v48 = vmov 0  ;;  %v4787_v28 = vsel %vm11741_vm12, %v4688_v13, %v4621_v42  ;;  %v14085_v13 = vld [vmem:[#allocation76_spill] sm:$0xff]  ;;  %v14096_v50 = vld [vmem:[#allocation90_spill] sm:$0xff] }
 0x7d0   : > { %v14075_v48 = vsel %vm11791_vm1, 4294967295, %v14074_v48  ;;  %v4437_v31 = vrot.slane %v14077_v56, %v11473_v5  ;;  %vm14080_vm4 = vcmask 302080   ;;  %vm11806_vm6 = vcmp.eq.s32.totalorder %v5379_v33, 1 }
 0x7d1   : > { %14076 = vst [vmem:[#allocation82_spill] sm:$0xff] %v14075_v48  ;;  %v5020_v3 = vsel %vm14080_vm4, %v14079_v6, %v14078_v52  ;;  %v14081_v18 = vmov 0  ;;  %v4953_v38 = vsel %vm11765_vm11, %v4854_v25, %v4787_v28  ;;  %vm14086_vm15 = vcmask 826368   ;;  %v14090_v25 = vld [vmem:[#allocation89_spill] sm:$0xff]  ;;  %v14091_v28 = vld [vmem:[#allocation80_spill] sm:$0xff]  ;;  %v11846_v48 = vpop.permute.xlu1 %4182  ;;  %5721 = vrot.lane.b32.xlu0 %v10968_v26, %s8286_s12  ;;  %5899 = vrot.lane.b32.xlu1 %v11097_v30, %s8297_s11 }
 0x7d2   : > { %v14082_v18 = vsel %vm11806_vm6, 4294967295, %v14081_v18  ;;  %v5170_v42 = vsel %vm14086_vm15, %v14085_v13, %v14084_v16  ;;  %v5119_v9 = vsel %vm11778_vm0, %v5020_v3, %v4953_v38  ;;  %v4429_v33 = vrot.slane %v10529_v61, %v11732_v60  ;;  %14099 = vst [vmem:[#allocation22_spill] sm:$0xff] %v11846_v48 }
 0x7d3   : > { %14083 = vst [vmem:[#allocation85_spill] sm:$0xff] %v14082_v18  ;;  %vm11823_vm4 = vcmp.eq.s32.totalorder %v5544_v8, 1  ;;  %v14087_v56 = vmov 0  ;;  %vm14092_vm11 = vcmask 842752   ;;  %v5265_v3 = vsel %vm11791_vm1, %v5170_v42, %v5119_v9 }
 0x7d4   : > { %v14088_v56 = vsel %vm11823_vm4, 4294967295, %v14087_v56  ;;  %v5316_v6 = vsel %vm14092_vm11, %v14091_v28, %v14090_v25  ;;  %vm11832_vm15 = vcmp.eq.s32.totalorder %v4265_v27, 1  ;;  %v14093_v38 = vmov 0  ;;  %v4161_v28 = vpop.permute.xlu0 %4160 }
 0x7d5   : > { %14089 = vst [vmem:[#allocation86_spill] sm:$0xff] %v14088_v56  ;;  %v14094_v38 = vsel %vm11832_vm15, 4294967295, %v14093_v38  ;;  %v4593_v13 = vrot.slane %v10550_v15, %v11732_v60  ;;  %vm14098_vm0 = vcmask 859136   ;;  %v5411_v22 = vsel %vm11806_vm6, %v5316_v6, %v5265_v3  ;;  %v11901_v56 = vpop.permute.xlu1 %4508  ;;  %5809 = vrot.lane.b32.xlu0 %v10968_v26, %s8307_s29  ;;  %5987 = vrot.lane.b32.xlu1 %v11097_v30, %s8291_s25 }
 0x7d6   : > { %14095 = vst [vmem:[#allocation68_spill] sm:$0xff] %v14094_v38  ;;  %v5477_v8 = vsel %vm14098_vm0, %v14097_v35, %v14096_v50  ;;  %v4759_v9 = vrot.slane %v13978_v12, %v11732_v60  ;;  %vm14100_vm11 = vcmask 760832   ;;  %v4925_v42 = vrot.slane %v13979_v2, %v11732_v60 }
 0x7d7   : > { %v4190_v27 = vsel %vm14100_vm11, %v11481_v7, %v4161_v28  ;;  %v11856_v35 = vsel %vm11823_vm4, %v5477_v8, %v5411_v22  ;;  %v4601_v43 = vrot.slane %v11283_v51, %v11473_v5  ;;  %vm11860_vm0 = vcmp.eq.s32.totalorder %v4429_v33, 1  ;;  %v14107_v22 = vld [vmem:[#allocation66_spill] sm:$0xff] }
 0x7d8   : > { %14101 = vst [vmem:[#allocation84_spill] sm:$0xff] %v11856_v35  ;;  %v14102_v6 = vmov 0  ;;  %v4294_v3 = vsel %vm11832_vm15, %v4190_v27, 0.0  ;;  %v5091_v7 = vrot.slane %v13980_v10, %v11732_v60  ;;  %5596 = vst [vmem:[#allocation3 + $0x28] sm:$0xff] %v11856_v35  ;;  %vm11873_vm11 = vcmp.eq.s32.totalorder %v4273_v37, 1 }
 0x7d9   : > { %v14103_v6 = vsel %vm11860_vm0, 4294967295, %v14102_v6  ;;  %v14105_v51 = vmov 0  ;;  %v4767_v33 = vrot.slane %v14107_v22, %v11473_v5  ;;  %v4933_v8 = vrot.slane %v11529_v40, %v11473_v5  ;;  %5897 = vrot.lane.b32.xlu0 %v10968_v26, %s8297_s11  ;;  %6077 = vrot.lane.b32.xlu1 %v11097_v30, %s8304_s24 }
 0x7da   : > { %14104 = vst [vmem:[#allocation74_spill] sm:$0xff] %v14103_v6  ;;  %v14106_v51 = vsel %vm11873_vm11, 4294967295, %v14105_v51  ;;  %vm11881_vm15 = vcmp.eq.s32.totalorder %v4593_v13, 1  ;;  %v14108_v27 = vmov 0  ;;  %v5237_v38 = vrot.slane %v13981_v20, %v11732_v60  ;;  %v4487_v13 = vpop.permute.xlu0 %4486 }
 0x7db   : > { %v14109_v27 = vsel %vm11881_vm15, 4294967295, %v14108_v27  ;;  %vm11887_vm4 = vcmp.eq.s32.totalorder %v4437_v31, 1  ;;  %v14110_v48 = vmov 0  ;;  %vm14112_vm6 = vcmask 777216  }
 0x7dc   : > { %v14111_v48 = vsel %vm11887_vm4, 4294967295, %v14110_v48  ;;  %v4353_v37 = vsel %vm14112_vm6, %v4321_v63, %v11745_v34  ;;  %v4269_v22 = vrot.slane %v10520_v19, %v11844_v47  ;;  %vm11895_vm1 = vcmp.eq.s32.totalorder %v4759_v9, 1 }
 0x7dd   : > { %v14113_v35 = vmov 0  ;;  %v5383_v40 = vrot.slane %v13982_v58, %v11732_v60  ;;  %v4458_v31 = vsel %vm11860_vm0, %v4353_v37, %v4294_v3  ;;  %vm11905_vm12 = vcmp.eq.s32.totalorder %v4925_v42, 1  ;;  %v14124_v3 = vld [vmem:[#allocation12_spill] sm:$0xff]  ;;  %5985 = vrot.lane.b32.xlu0 %v10968_v26, %s8291_s25  ;;  %6171 = vrot.lane.b32.xlu1 %v11097_v30, %s13990_s17 }
 0x7de   : > { %v14114_v35 = vsel %vm11895_vm1, 4294967295, %v14113_v35  ;;  %v14115_v18 = vmov 0  ;;  %v5548_v19 = vrot.slane %v10604_v59, %v11732_v60  ;;  %vm14117_vm6 = vcmask 793600  }
 0x7df   : > { %v14116_v18 = vsel %vm11905_vm12, 4294967295, %v14115_v18  ;;  %v4517_v63 = vsel %vm14117_vm6, %v11493_v17, %v4487_v13  ;;  %vm14118_vm10 = vcmask 269312   ;;  %v4433_v11 = vrot.slane %v10529_v61, %v11844_v47 }
 0x7e0   : > { %v4689_v9 = vsel %vm14118_vm10, %v14064_v32, %v11514_v29  ;;  %vm11918_vm2 = vcmp.eq.s32.totalorder %v5091_v7, 1  ;;  %v14119_v6 = vmov 0  ;;  %v4622_v42 = vsel %vm11881_vm15, %v4517_v63, %v4458_v31  ;;  %v14125_v7 = vld [vmem:[#allocation67_spill] sm:$0xff]  ;;  %v11951_v63 = vpop.permute.xlu1 %4806 }
 0x7e1   : > { %v14120_v6 = vsel %vm11918_vm2, 4294967295, %v14119_v6  ;;  %vm14121_vm6 = vcmask 285696   ;;  %v4597_v61 = vrot.slane %v10550_v15, %v11844_v47  ;;  %vm11933_vm10 = vcmp.eq.s32.totalorder %v5237_v38, 1  ;;  %v4662_v38 = vpop.permute.xlu0 %4661  ;;  %6075 = vrot.lane.b32.xlu0 %v10968_v26, %s8304_s24  ;;  %6265 = vrot.lane.b32.xlu1 %v11097_v30, %s14026_s20 }
 0x7e2   : > { %v4855_v17 = vsel %vm14121_vm6, %v14071_v54, %v11797_v57  ;;  %v14122_v60 = vmov 0  ;;  %v4788_v32 = vsel %vm11895_vm1, %v4689_v9, %v4622_v42  ;;  %vm14126_vm15 = vcmask 760832  }
 0x7e3   : > { %v14123_v60 = vsel %vm11933_vm10, 4294967295, %v14122_v60  ;;  %v4192_v37 = vsel %vm14126_vm15, %v14125_v7, %v14124_v3  ;;  %vm14127_vm0 = vcmask 302080   ;;  %vm11945_vm7 = vcmp.eq.s32.totalorder %v5383_v40, 1 }
 0x7e4   : > { %v5021_v31 = vsel %vm14127_vm0, %v14078_v52, %v11542_v1  ;;  %v14128_v54 = vmov 0  ;;  %v4954_v15 = vsel %vm11905_vm12, %v4855_v17, %v4788_v32  ;;  %vm14130_vm6 = vcmask 826368  }
 0x7e5   : > { %v14129_v54 = vsel %vm11945_vm7, 4294967295, %v14128_v54  ;;  %v5171_v9 = vsel %vm14130_vm6, %v14084_v16, %v11578_v44  ;;  %vm11956_vm1 = vcmp.eq.s32.totalorder %v5548_v19, 1  ;;  %v14131_v42 = vmov 0  ;;  %6169 = vrot.lane.b32.xlu0 %v10968_v26, %s13990_s17 }
 0x7e6   : > { %v14132_v42 = vsel %vm11956_vm1, 4294967295, %v14131_v42  ;;  %v5120_v52 = vsel %vm11918_vm2, %v5021_v31, %v4954_v15  ;;  %vm11962_vm15 = vcmp.eq.s32.totalorder %v4601_v43, 1  ;;  %v14133_v40 = vmov 0  ;;  %v14138_v43 = vld [vmem:[#allocation24_spill] sm:$0xff] }
 0x7e7   : > { %v14134_v40 = vsel %vm11962_vm15, 4294967295, %v14133_v40  ;;  %vm14135_vm0 = vcmask 842752   ;;  %vm11969_vm12 = vcmp.eq.s32.totalorder %v4269_v22, 1  ;;  %v14136_v32 = vmov 0 }
 0x7e8   : > { %v5317_v17 = vsel %vm14135_vm0, %v14090_v25, %v11630_v45  ;;  %v14137_v32 = vsel %vm11969_vm12, 4294967295, %v14136_v32  ;;  %v5266_v16 = vsel %vm11933_vm10, %v5171_v9, %v5120_v52  ;;  %v4763_v19 = vrot.slane %v13978_v12, %v11844_v47 }
 0x7e9   : > { %vm14139_vm6 = vcmask 809984   ;;  %vm14140_vm2 = vcmask 859136   ;;  %vm14141_vm0 = vcmask 760832   ;;  %v5412_v15 = vsel %vm11945_vm7, %v5317_v17, %v5266_v16 }
 0x7ea   : > { %v4227_v31 = vsel %vm14139_vm6, %v4192_v37, %v14138_v43  ;;  %v5478_v25 = vsel %vm14140_vm2, %v14096_v50, %v11689_v0  ;;  %v4191_v22 = vsel %vm14141_vm0, %v4161_v28, %v14125_v7  ;;  %vm11990_vm10 = vcmp.eq.s32.totalorder %v4933_v8, 1  ;;  %v4994_v28 = vpop.permute.xlu0 %4993  ;;  %v12006_v7 = vpop.permute.xlu1 %4847 }
 0x7eb   : > { %vm11994_vm8 = vcmp.eq.s32.totalorder %v4433_v11, 1  ;;  %v14144_v9 = vmov 0  ;;  %vm11998_vm6 = vcmp.eq.s32.totalorder %v4597_v61, 1  ;;  %v14146_v37 = vmov 0 }
 0x7ec   : > { %v14145_v9 = vsel %vm11994_vm8, 4294967295, %v14144_v9  ;;  %v14147_v37 = vsel %vm11998_vm6, 4294967295, %v14146_v37  ;;  %v12004_v50 = vsel %vm11956_vm1, %v5478_v25, %v5412_v15  ;;  %vm12009_vm2 = vcmp.eq.s32.totalorder %v4767_v33, 1 }
 0x7ed   : > { %14148 = vst [vmem:[#allocation20_spill] sm:$0xff] %v12004_v50  ;;  %5597 = vst [vmem:[#allocation3 + $0x30] sm:$0xff] %v12004_v50  ;;  %v14149_v8 = vmov 0  ;;  %v4929_v11 = vrot.slane %v13979_v2, %v11844_v47  ;;  %v5095_v61 = vrot.slane %v13980_v10, %v11844_v47  ;;  %v5099_v52 = vrot.slane %v11545_v36, %v11473_v5 }
 0x7ee   : > { %v14150_v8 = vsel %vm12009_vm2, 4294967295, %v14149_v8  ;;  %v4296_v17 = vsel %vm11873_vm11, %v4227_v31, 0.0  ;;  %v4295_v16 = vsel %vm11969_vm12, %v4191_v22, 0.0  ;;  %v5241_v33 = vrot.slane %v13981_v20, %v11844_v47 }
 0x7ef   : > { %v5245_v2 = vrot.slane %v11552_v41, %v11473_v5  ;;  %v4460_v10 = vsel %vm11887_vm4, %v11725_v39, %v4296_v17  ;;  %vm14151_vm0 = vcmask 793600   ;;  %vm12034_vm1 = vcmp.eq.s32.totalorder %v4763_v19, 1  ;;  %v12049_v19 = vpop.permute.xlu1 %5430 }
 0x7f0   : > { %v4518_v36 = vsel %vm14151_vm0, %v4487_v13, %v11311_v46  ;;  %v14152_v43 = vmov 0  ;;  %v5387_v20 = vrot.slane %v13982_v58, %v11844_v47  ;;  %vm14154_vm7 = vcmask 777216   ;;  %v5147_v13 = vpop.permute.xlu0 %5146 }
 0x7f1   : > { %v14153_v43 = vsel %vm12034_vm1, 4294967295, %v14152_v43  ;;  %v4354_v41 = vsel %vm14154_vm7, %v11745_v34, %v11540_v24  ;;  %vm14155_vm12 = vcmask 269312   ;;  %v5391_v31 = vrot.slane %v11564_v4, %v11473_v5 }
 0x7f2   : > { %v4690_v39 = vsel %vm14155_vm12, %v11514_v29, %v4662_v38  ;;  %vm14156_vm4 = vmmov %vm14155_vm12  ;;  %v4459_v25 = vsel %vm11994_vm8, %v4354_v41, %v4295_v16  ;;  %vm12055_vm0 = vcmp.eq.s32.totalorder %v4929_v11, 1  ;;  %vm12059_vm7 = vcmp.eq.s32.totalorder %v5095_v61, 1  ;;  %v14182_v41 = vld [vmem:[#allocation41_spill] sm:$0xff] }
 0x7f3   : > { %v4691_v46 = vsel %vm14156_vm4, %v4662_v38, %v11340_v62  ;;  %vm12063_vm12 = vcmp.eq.s32.totalorder %v5099_v52, 1  ;;  %v4623_v62 = vsel %vm11998_vm6, %v4518_v36, %v4459_v25  ;;  %v4624_v4 = vsel %vm11962_vm15, %v11736_v23, %v4460_v10  ;;  %v14168_v52 = vld [vmem:[#allocation21_spill] sm:$0xff]  ;;  %5649 = vrot.lane.b32.xlu1 %v14182_v41, %s8287_s14 }
 0x7f4   : > { %vm12072_vm4 = vcmp.eq.s32.totalorder %v5241_v33, 1  ;;  %vm12076_vm8 = vcmp.eq.s32.totalorder %v5245_v2, 1  ;;  %v4789_v22 = vsel %vm12034_vm1, %v4690_v39, %v4623_v62  ;;  %v4790_v15 = vsel %vm12009_vm2, %v4691_v46, %v4624_v4  ;;  %v5293_v30 = vpop.permute.xlu0 %5292  ;;  %v12104_v2 = vpop.permute.xlu1 %5013 }
 0x7f5   : > { %v5552_v23 = vrot.slane %v10604_v59, %v11844_v47  ;;  %v5556_v11 = vrot.slane %v11568_v53, %v11473_v5  ;;  %vm14167_vm6 = vcmask 302080   ;;  %vm12096_vm11 = vcmp.eq.s32.totalorder %v5387_v20, 1  ;;  %v14175_v53 = vld [vmem:[#allocation60_spill] sm:$0xff]  ;;  %v14178_v47 = vld [vmem:[#allocation77_spill] sm:$0xff] }
 0x7f6   : > { %v5022_v61 = vsel %vm14167_vm6, %v11542_v1, %v4994_v28  ;;  %vm14169_vm15 = vmmov %vm14167_vm6  ;;  %vm12100_vm2 = vcmp.eq.s32.totalorder %v5391_v31, 1  ;;  %vm14174_vm1 = vcmask 285696   ;;  %vm14180_vm5 = vcmask 842752  }
 0x7f7   : > { %v5023_v17 = vsel %vm14169_vm15, %v4994_v28, %v14168_v52  ;;  %v4856_v59 = vsel %vm14174_vm1, %v11797_v57, %v11799_v21  ;;  %vm14176_vm6 = vmmov %vm14174_vm1  ;;  %vm14177_vm15 = vcmask 826368   ;;  %v5318_v20 = vsel %vm14180_vm5, %v11630_v45, %v5293_v30  ;;  %5737 = vrot.lane.b32.xlu1 %v14182_v41, %s8286_s12  ;;  %v14193_v52 = vld [vmem:[#allocation37_spill] sm:$0xff] }
 0x7f8   : > { %v4857_v5 = vsel %vm14176_vm6, %v11799_v21, %v14175_v53  ;;  %v5172_v1 = vsel %vm14177_vm15, %v11578_v44, %v5147_v13  ;;  %vm14179_vm13 = vmmov %vm14177_vm15  ;;  %v4955_v10 = vsel %vm12055_vm0, %v4856_v59, %v4789_v22  ;;  %v14183_v39 = vmov 0  ;;  %v5451_v46 = vpop.permute.xlu0 %5450  ;;  %v14196_v59 = vld [vmem:[#allocation36_spill] sm:$0xff] }
 0x7f9   : > { %v5173_v28 = vsel %vm14179_vm13, %v5147_v13, %v14178_v47  ;;  %v4956_v36 = vsel %vm11990_vm10, %v4857_v5, %v4790_v15  ;;  %vm14181_vm1 = vmmov %vm14180_vm5  ;;  %v5121_v44 = vsel %vm12059_vm7, %v5022_v61, %v4955_v10  ;;  %vm12132_vm13 = vcmp.eq.s32.totalorder %v5552_v23, 1  ;;  %v12144_v13 = vpop.permute.xlu1 %5164  ;;  %v8174_v23 = vld [vmem:[#allocation3 + $0x18] sm:$0xff]  ;;  %v14192_v61 = vld [vmem:[#allocation50_spill] sm:$0xff] }
 0x7fa   : > { %v5319_v57 = vsel %vm14181_vm1, %v5293_v30, %v11445_v55  ;;  %v5122_v21 = vsel %vm12063_vm12, %v5023_v17, %v4956_v36  ;;  %v14184_v39 = vsel %vm12132_vm13, 4294967295, %v14183_v39  ;;  %vm12136_vm5 = vcmp.eq.s32.totalorder %v5556_v11, 1  ;;  %6263 = vrot.lane.b32.xlu0 %v8174_v23, %s14026_s20  ;;  %v14191_v11 = vld [vmem:[#allocation61_spill] sm:$0xff]  ;;  %v14198_v47 = vld [vmem:[#allocation16_spill] sm:$0xff]  ;;  %v14208_v23 = vld [vmem:[#allocation43_spill] sm:$0xff] }
 0x7fb   : > { %v14185_v45 = vmov 0  ;;  %v5267_v26 = vsel %vm12072_vm4, %v5172_v1, %v5121_v44  ;;  %v5268_v55 = vsel %vm12076_vm8, %v5173_v28, %v5122_v21  ;;  %vm14187_vm6 = vcmask 859136   ;;  %5825 = vrot.lane.b32.xlu1 %v14182_v41, %s8307_s29  ;;  %v14195_v30 = vld [vmem:[#allocation49_spill] sm:$0xff]  ;;  %v14202_v44 = vld [vmem:[#allocation46_spill] sm:$0xff]  ;;  %v14218_v10 = vld [vmem:[#allocation35_spill] sm:$0xff] }
 0x7fc   : > { %v14186_v45 = vsel %vm12136_vm5, 4294967295, %v14185_v45  ;;  %v5413_v31 = vsel %vm12096_vm11, %v5318_v20, %v5267_v26  ;;  %v5414_v25 = vsel %vm12100_vm2, %v5319_v57, %v5268_v55  ;;  %v5479_v62 = vsel %vm14187_vm6, %v11689_v0, %v5451_v46  ;;  %vm14188_vm15 = vmmov %vm14187_vm6  ;;  %v14204_v26 = vld [vmem:[#allocation40_spill] sm:$0xff]  ;;  %v14220_v20 = vld [vmem:[#allocation57_spill] sm:$0xff] }
 0x7fd   : > { %v5480_v4 = vsel %vm14188_vm15, %v5451_v46, %v11469_v49  ;;  %v12156_v22 = vsel %vm12132_vm13, %v5479_v62, %v5413_v31  ;;  %vm14190_vm1 = vcmask 523264   ;;  %v12168_v49 = vpop.permute.xlu0 %4344  ;;  %v12170_v0 = vpop.permute.xlu1 %5310  ;;  %vm14194_vm6 = vcmask 760832   ;;  %v14205_v55 = vld [vmem:[#allocation44_spill] sm:$0xff] }
 0x7fe   : > { %14189 = vst [vmem:[#allocation87_spill] sm:$0xff] %v12156_v22  ;;  %v12160_v15 = vsel %vm12136_vm5, %v5480_v4, %v5414_v25  ;;  %5598 = vst [vmem:[#allocation3 + $0x38] sm:$0xff] %v12156_v22  ;;  %5647 = vrot.lane.b32.xlu0 %v14191_v11, %s8287_s14  ;;  %v4193_v17 = vsel %vm14194_vm6, %v14193_v52, %v14192_v61  ;;  %vm14197_vm15 = vcmask 777216   ;;  %vm14203_vm6 = vcmask 269312   ;;  %v14207_v4 = vld [vmem:[#allocation51_spill] sm:$0xff]  ;;  %v14210_v52 = vld [vmem:[#allocation70_spill] sm:$0xff] }
 0x7ff   : > { %5599 = vst.msk [vmem:[#allocation3 + $0x40] sm:$0xff] %vm14190_vm1, %v12160_v15  ;;  %v4356_v53 = vsel %vm14197_vm15, %v14196_v59, %v14195_v30  ;;  %vm14199_vm1 = vcmask 220160   ;;  %v4298_v36 = vsel %vm11495_vm3, %v4193_v17, 0.0  ;;  %5913 = vrot.lane.b32.xlu1 %v14182_v41, %s8297_s11  ;;  %v4635_v31 = vsel %vm11315_vm9, %v14205_v55, %v14204_v26  ;;  %v14212_v30 = vld [vmem:[#allocation34_spill] sm:$0xff] }
 0x800   : > { %v4462_v57 = vsel %vm11506_vm14, %v4356_v53, %v4298_v36  ;;  %vm14209_vm3 = vcmask 793600   ;;  %vm14211_vm14 = vnez %v14210_v52  ;;  %vm14213_vm15 = vnez %v14212_v30  ;;  %v14214_v53 = vld [vmem:[#allocation17_spill] sm:$0xff]  ;;  %v14224_v26 = vld [vmem:[#allocation14_spill] sm:$0xff] }
 0x801   : > { %v4641_v5 = vpop.permute.xlu0 %4640  ;;  %v12182_v1 = vpop.permute.xlu1 %5470  ;;  %v4520_v61 = vsel %vm14209_vm3, %v14208_v23, %v14207_v4  ;;  %vm14221_vm3 = vnez %v14220_v20  ;;  %v14231_v30 = vld [vmem:[#allocation18_spill] sm:$0xff]  ;;  %v14237_v20 = vld [vmem:[#allocation56_spill] sm:$0xff]  ;;  %vm14317_vm5 = vcmask 793600   ;;  %vm14336_vm13 = vnez %v14153_v43 }
 0x802   : > { %v4644_v28 = vsel %vm14199_vm1, %v4641_v5, %v14198_v47  ;;  %5735 = vrot.lane.b32.xlu0 %v14191_v11, %s8286_s12  ;;  %v4626_v59 = vsel %vm14213_vm15, %v4520_v61, %v4462_v57  ;;  %vm14215_vm1 = vcmask 236544   ;;  %v14216_v47 = vld [vmem:[#allocation13_spill] sm:$0xff]  ;;  %v14222_v57 = vld [vmem:[#allocation15_spill] sm:$0xff]  ;;  %vm14225_vm15 = vcmask 777216   ;;  %v14283_v22 = vld [vmem:[#allocation62_spill] sm:$0xff] }
 0x803   : > { %v4721_v21 = vsel %vm14203_vm6, %v4644_v28, %v14202_v44  ;;  %v4810_v5 = vsel %vm14215_vm1, %v11951_v63, %v14214_v53  ;;  %vm14217_vm9 = vnez %v14216_v47  ;;  %vm14219_vm6 = vnez %v14218_v10  ;;  %6001 = vrot.lane.b32.xlu1 %v14182_v41, %s8291_s25  ;;  %v14228_v61 = vld [vmem:[#allocation45_spill] sm:$0xff] }
 0x804   : > { %v4792_v36 = vsel %vm14219_vm6, %v4721_v21, %v4626_v59  ;;  %v4364_v46 = vsel %vm14225_vm15, %v12168_v49, %v14224_v26  ;;  %v14226_v21 = vld [vmem:[#allocation92_spill] sm:$0xff]  ;;  %vm14230_vm6 = vcmask 809984   ;;  %v14233_v53 = vld [vmem:[#allocation93_spill] sm:$0xff]  ;;  %vm14236_vm15 = vcmask 760832   ;;  %v14244_v26 = vld [vmem:[#allocation39_spill] sm:$0xff] }
 0x805   : > { %v12200_v25 = vpop.permute.xlu0 %4681  ;;  %v12202_v62 = vpop.permute.xlu1 %4178  ;;  %vm14227_vm1 = vnez %v14226_v21  ;;  %v14246_v21 = vld [vmem:[#allocation58_spill] sm:$0xff] }
 0x806   : > { %v4801_v17 = vsel %vm14211_vm14, %v12200_v25, %v4635_v31  ;;  %5823 = vrot.lane.b32.xlu0 %v14191_v11, %s8307_s29  ;;  %vm14223_vm14 = vcmask 793600  }
 0x807   : > { %v4967_v28 = vsel %vm14217_vm9, %v12006_v7, %v4801_v17  ;;  %v4528_v63 = vsel %vm14223_vm14, %v11901_v56, %v14222_v57  ;;  %vm14229_vm9 = vcmask 285696   ;;  %v5433_v17 = vsel %vm14230_vm6, %v12049_v19, %v14036_v14  ;;  %v14239_v57 = vld [vmem:[#allocation48_spill] sm:$0xff]  ;;  %v14241_v14 = vld [vmem:[#allocation94_spill] sm:$0xff]  ;;  %6093 = vrot.lane.b32.xlu1 %v14182_v41, %s8304_s24 }
 0x808   : > { %v5133_v44 = vsel %vm14221_vm3, %v12104_v2, %v4967_v28  ;;  %v4887_v52 = vsel %vm14229_vm9, %v4810_v5, %v14228_v61  ;;  %vm14232_vm3 = vcmask 252928   ;;  %vm14234_vm14 = vnez %v14233_v53  ;;  %v14235_v28 = vld [vmem:[#allocation72_spill] sm:$0xff]  ;;  %v14249_v61 = vld [vmem:[#allocation59_spill] sm:$0xff] }
 0x809   : > { %v4973_v31 = vpop.permute.xlu0 %4972  ;;  %v12233_v4 = vpop.permute.xlu1 %4504  ;;  %v5279_v23 = vsel %vm14227_vm1, %v12144_v13, %v5133_v44  ;;  %v4198_v10 = vsel %vm14236_vm15, %v14235_v28, %v12202_v62  ;;  %vm14238_vm1 = vnez %v14237_v20  ;;  %vm14240_vm9 = vcmask 302080   ;;  %v14251_v53 = vld [vmem:[#allocation47_spill] sm:$0xff]  ;;  %v14255_v20 = vld [vmem:[#allocation30_spill] sm:$0xff] }
 0x80a   : > { %v4976_v59 = vsel %vm14232_vm3, %v4973_v31, %v14231_v30  ;;  %v5425_v47 = vsel %vm14234_vm14, %v12170_v0, %v5279_v23  ;;  %v4958_v44 = vsel %vm14238_vm1, %v4887_v52, %v4792_v36  ;;  %5911 = vrot.lane.b32.xlu0 %v14191_v11, %s8297_s11  ;;  %vm14242_vm6 = vnez %v14241_v14  ;;  %v14262_v14 = vld [vmem:[#allocation42_spill] sm:$0xff] }
 0x80b   : > { %v5053_v5 = vsel %vm14240_vm9, %v4976_v59, %v14239_v57  ;;  %v12260_v19 = vsel %vm14242_vm6, %v12182_v1, %v5425_v47  ;;  %vm14245_vm3 = vcmask 826368   ;;  %vm14247_vm14 = vnez %v14246_v21  ;;  %v14257_v57 = vld [vmem:[#allocation54_spill] sm:$0xff]  ;;  %v14264_v21 = vld [vmem:[#allocation95_spill] sm:$0xff]  ;;  %6187 = vrot.lane.b32.xlu1 %v14182_v41, %s13990_s17 }
 0x80c   : > { %14243 = vst [vmem:[#allocation75_spill] sm:$0xff] %v12260_v19  ;;  %v4391_v31 = vsel %vm14245_vm3, %v4364_v46, %v14244_v26  ;;  %v5124_v23 = vsel %vm14247_vm14, %v5053_v5, %v4958_v44  ;;  %vm14248_vm15 = vcmask 842752   ;;  %vm14250_vm1 = vnez %v14249_v61  ;;  %v14253_v46 = vld [vmem:[#allocation26_spill] sm:$0xff]  ;;  %v14282_v19 = vld [vmem:[#allocation79_spill] sm:$0xff] }
 0x80d   : > { %v12270_v36 = vsel %vm14248_vm15, %v4528_v63, %v14205_v55  ;;  %v5270_v52 = vsel %vm14250_vm1, %v4391_v31, %v5124_v23  ;;  %v4341_v30 = vpop.permute.xlu0 %4340  ;;  %v12274_v59 = vpop.permute.xlu1 %4843  ;;  %vm14252_vm9 = vcmask 859136   ;;  %vm14254_vm6 = vnez %v14253_v46  ;;  %v14259_v63 = vld [vmem:[#allocation91_spill] sm:$0xff]  ;;  %v14267_v23 = vld [vmem:[#allocation64_spill] sm:$0xff] }
 0x80e   : > { %v5510_v47 = vsel %vm14252_vm9, %v5433_v17, %v14251_v53  ;;  %v4303_v28 = vsel %vm14254_vm6, %v4198_v10, 0.0  ;;  %vm14256_vm3 = vnez %v14255_v20  ;;  %vm14258_vm14 = vcmask 777216   ;;  %5999 = vrot.lane.b32.xlu0 %v14191_v11, %s8291_s25  ;;  %v14266_v10 = vld [vmem:[#allocation65_spill] sm:$0xff]  ;;  %v14272_v20 = vld [vmem:[#allocation28_spill] sm:$0xff] }
 0x80f   : > { %v5416_v44 = vsel %vm14256_vm3, %v12270_v36, %v5270_v52  ;;  %v4361_v55 = vsel %vm14258_vm14, %v14257_v57, %v4341_v30  ;;  %vm14260_vm15 = vnez %v14259_v63  ;;  %vm14263_vm1 = vcmask 793600   ;;  %v14269_v52 = vld [vmem:[#allocation19_spill] sm:$0xff]  ;;  %6281 = vrot.lane.b32.xlu1 %v14182_v41, %s14026_s20  ;;  %v14302_v41 = vld [vmem:[#allocation29_spill] sm:$0xff] }
 0x810   : > { %v12287_v5 = vsel %vm14260_vm15, %v5510_v47, %v5416_v44  ;;  %v4525_v26 = vsel %vm14263_vm1, %v14262_v14, %v12233_v4  ;;  %vm14265_vm9 = vnez %v14264_v21  ;;  %vm14268_vm6 = vcmask 269312   ;;  %v14271_v47 = vld [vmem:[#allocation32_spill] sm:$0xff]  ;;  %v14275_v57 = vld [vmem:[#allocation83_spill] sm:$0xff]  ;;  %v14277_v21 = vld [vmem:[#allocation78_spill] sm:$0xff] }
 0x811   : > { %14261 = vst [vmem:[#allocation88_spill] sm:$0xff] %v12287_v5  ;;  %v4467_v17 = vsel %vm14265_vm9, %v4361_v55, %v4303_v28  ;;  %v4696_v61 = vsel %vm14268_vm6, %v14267_v23, %v14266_v10  ;;  %vm14270_vm3 = vnez %v14269_v52  ;;  %v7901_v46 = vpack.c.bf16 %v12287_v5, %v14271_v47  ;;  %v14273_v44 = vld [vmem:[#allocation52_spill] sm:$0xff]  ;;  %v4678_v63 = vpop.permute.xlu0 %4677  ;;  %v5010_v14 = vpop.permute.xlu1 %5009  ;;  %v14278_v23 = vld [vmem:[#allocation53_spill] sm:$0xff]  ;;  %v14285_v5 = vld [vmem:[#allocation31_spill] sm:$0xff] }
 0x812   : > { %v4631_v53 = vsel %vm14270_vm3, %v4525_v26, %v4467_v17  ;;  %vm14274_vm14 = vcmask 285696   ;;  %vm14276_vm15 = vnez %v14275_v57  ;;  %vm14279_vm1 = vcmask 302080   ;;  %v14280_v26 = vld [vmem:[#allocation27_spill] sm:$0xff]  ;;  %6091 = vrot.lane.b32.xlu0 %v14191_v11, %s8304_s24  ;;  %v14290_v47 = vld [vmem:[#allocation82_spill] sm:$0xff] }
 0x813   : > { %v4862_v28 = vsel %vm14274_vm14, %v14273_v44, %v14272_v20  ;;  %v4797_v55 = vsel %vm14276_vm15, %v4696_v61, %v4631_v53  ;;  %v5028_v52 = vsel %vm14279_vm1, %v14278_v23, %v14277_v21  ;;  %vm14281_vm9 = vnez %v14280_v26  ;;  %7902 = vmatpush1.bf16.msra.mxu1 %v7901_v46  ;;  %v14287_v61 = vld [vmem:[#allocation73_spill] sm:$0xff]  ;;  %v14288_v53 = vld [vmem:[#allocation55_spill] sm:$0xff]  ;;  %v14297_v11 = vld [vmem:[#allocation86_spill] sm:$0xff] }
 0x814   : > { %v4963_v17 = vsel %vm14281_vm9, %v4862_v28, %v4797_v55  ;;  %vm14284_vm6 = vcmask 826368   ;;  %vm14286_vm3 = vnez %v14285_v5  ;;  %vm14289_vm14 = vcmask 842752   ;;  %v14292_v46 = vld [vmem:[#allocation25_spill] sm:$0xff]  ;;  %v14293_v28 = vld [vmem:[#allocation63_spill] sm:$0xff]  ;;  %5653 = vrot.lane.b32.xlu1 %v14302_v41, %s8287_s14 }
 0x815   : > { %v5178_v50 = vsel %vm14284_vm6, %v14283_v22, %v14282_v19  ;;  %v5129_v44 = vsel %vm14286_vm3, %v5028_v52, %v4963_v17  ;;  %v5324_v57 = vsel %vm14289_vm14, %v14288_v53, %v14287_v61  ;;  %vm14291_vm15 = vnez %v14290_v47  ;;  %v14295_v55 = vld [vmem:[#allocation85_spill] sm:$0xff]  ;;  %v4181_v52 = vpop.permute.xlu0 %4180  ;;  %v5161_v26 = vpop.permute.xlu1 %5160  ;;  %v14300_v53 = vld [vmem:[#allocation22_spill] sm:$0xff]  ;;  %v8175_v47 = vld [vmem:[#allocation3 + $0x50] sm:$0xff] }
 0x816   : > { %v5275_v23 = vsel %vm14291_vm15, %v5178_v50, %v5129_v44  ;;  %vm14294_vm1 = vcmask 859136   ;;  %vm14296_vm9 = vnez %v14295_v55  ;;  %vm14298_vm6 = vnez %v14297_v11  ;;  %6185 = vrot.lane.b32.xlu0 %v8175_v47, %s13990_s17  ;;  %v14303_v55 = vld [vmem:[#allocation38_spill] sm:$0xff] }
 0x817   : > { %v5485_v22 = vsel %vm14294_vm1, %v14293_v28, %v14292_v46  ;;  %v5421_v5 = vsel %vm14296_vm9, %v5324_v57, %v5275_v23  ;;  %vm14301_vm3 = vcmask 760832   ;;  %vm14304_vm14 = vcmask 809984  }
 0x818   : > { %v12336_v17 = vsel %vm14298_vm6, %v5485_v22, %v5421_v5  ;;  %v4201_v50 = vsel %vm14301_vm3, %v14300_v53, %v14124_v3  ;;  %5741 = vrot.lane.b32.xlu1 %v14302_v41, %s8286_s12  ;;  %vm14305_vm15 = vnez %v14106_v51  ;;  %vm14306_vm1 = vnez %v14111_v48  ;;  %vm14307_vm9 = vmmov %vm14301_vm3  ;;  %v14311_v48 = vld [vmem:[#allocation68_spill] sm:$0xff] }
 0x819   : > { %14299 = vst [vmem:[#allocation76_spill] sm:$0xff] %v12336_v17  ;;  %v4507_v44 = vpop.permute.xlu0 %4506  ;;  %v5307_v28 = vpop.permute.xlu1 %5306  ;;  %v4228_v57 = vsel %vm14304_vm14, %v4201_v50, %v14303_v55  ;;  %v4199_v11 = vsel %vm14307_vm9, %v12202_v62, %v4181_v52  ;;  %vm14308_vm6 = vmmov %vm14301_vm3  ;;  %vm14310_vm3 = vnez %v14134_v40  ;;  %vm14312_vm14 = vnez %v14311_v48  ;;  %v14318_v40 = vld [vmem:[#allocation74_spill] sm:$0xff] }
 0x81a   : > { %6279 = vrot.lane.b32.xlu0 %v8175_v47, %s14026_s20  ;;  %v4306_v23 = vsel %vm14305_vm15, %v4228_v57, 0.0  ;;  %v4200_v50 = vsel %vm14308_vm6, %v4181_v52, %v14300_v53  ;;  %v14309_v47 = vld [vmem:[#allocation71_spill] sm:$0xff]  ;;  %vm14313_vm15 = vnez %v14137_v32  ;;  %vm14316_vm6 = vcmask 285696  }
 0x81b   : > { %v4470_v5 = vsel %vm14306_vm1, %v4391_v31, %v4306_v23  ;;  %v4304_v31 = vsel %vm14312_vm14, %v4199_v11, 0.0  ;;  %v4305_v62 = vsel %vm14313_vm15, %v4200_v50, 0.0  ;;  %vm14314_vm1 = vcmask 777216  }
 0x81c   : > { %5829 = vrot.lane.b32.xlu1 %v14302_v41, %s8307_s29  ;;  %v4634_v57 = vsel %vm14310_vm3, %v12270_v36, %v4470_v5  ;;  %vm14315_vm9 = vmmov %vm14314_vm1  ;;  %v4863_v23 = vsel %vm14316_vm6, %v14272_v20, %v12274_v59  ;;  %v4526_v17 = vsel %vm14317_vm5, %v12233_v4, %v4507_v44  ;;  %vm14319_vm3 = vnez %v14318_v40 }
 0x81d   : > { %v4846_v3 = vpop.permute.xlu0 %4845  ;;  %v12351_v22 = vpop.permute.xlu1 %5466  ;;  %vm14320_vm14 = vnez %v14145_v9  ;;  %vm14321_vm15 = vcmask 269312   ;;  %vm14324_vm5 = vnez %v14109_v27  ;;  %vm14325_vm6 = vcmask 793600  }
 0x81e   : > { %5651 = vrot.lane.b32.xlu0 %v14309_v47, %s8287_s14  ;;  %v4697_v32 = vsel %vm14321_vm15, %v14266_v10, %v4678_v63  ;;  %v4527_v9 = vsel %vm14325_vm6, %v4507_v44, %v11901_v56  ;;  %vm14328_vm15 = vnez %v14114_v35  ;;  %vm14332_vm6 = vcmask 269312  }
 0x820   : > { %5917 = vrot.lane.b32.xlu1 %v14302_v41, %s8297_s11 }
 0x821   : > { %v5012_v51 = vpop.permute.xlu0 %5011  ;;  %v4343_v55 = vpop.permute.xlu1 %4342 }
 0x822   : > { %v4362_v52 = vsel %vm14314_vm1, %v4341_v30, %v4343_v55  ;;  %v4363_v53 = vsel %vm14315_vm9, %v4343_v55, %v12168_v49  ;;  %5739 = vrot.lane.b32.xlu0 %v14309_v47, %s8286_s12  ;;  %vm14322_vm1 = vcmask 302080   ;;  %vm14323_vm9 = vcmask 826368  }
 0x823   : > { %v4468_v36 = vsel %vm14319_vm3, %v4362_v52, %v4304_v31  ;;  %v4469_v5 = vsel %vm14320_vm14, %v4363_v53, %v4305_v62  ;;  %v5029_v49 = vsel %vm14322_vm1, %v14277_v21, %v5010_v14  ;;  %v5179_v30 = vsel %vm14323_vm9, %v14282_v19, %v5161_v26  ;;  %v8176_v62 = vld [vmem:[#allocation3 + $0x60] sm:$0xff] }
 0x824   : > { %v4632_v4 = vsel %vm14324_vm5, %v4526_v17, %v4468_v36  ;;  %vm14326_vm3 = vcmask 842752   ;;  %vm14327_vm14 = vcmask 285696   ;;  %vm14330_vm9 = vnez %v14116_v18  ;;  %6005 = vrot.lane.b32.xlu1 %v14302_v41, %s8291_s25 }
 0x825   : > { %v5325_v20 = vsel %vm14326_vm3, %v14287_v61, %v5307_v28  ;;  %v4864_v10 = vsel %vm14327_vm14, %v12274_v59, %v4846_v3  ;;  %v4798_v21 = vsel %vm14328_vm15, %v4697_v32, %v4632_v4  ;;  %v5163_v11 = vpop.permute.xlu0 %5162  ;;  %v4680_v19 = vpop.permute.xlu1 %4679  ;;  %vm14329_vm1 = vmmov %vm14327_vm14  ;;  %vm14331_vm5 = vnez %v14147_v37 }
 0x826   : > { %v4865_v27 = vsel %vm14329_vm1, %v4846_v3, %v12006_v7  ;;  %v4964_v17 = vsel %vm14330_vm9, %v4863_v23, %v4798_v21  ;;  %v4633_v56 = vsel %vm14331_vm5, %v4527_v9, %v4469_v5  ;;  %v4698_v44 = vsel %vm14332_vm6, %v4678_v63, %v4680_v19  ;;  %vm14335_vm15 = vmmov %vm14332_vm6  ;;  %5827 = vrot.lane.b32.xlu0 %v14309_v47, %s8307_s29  ;;  %v14358_v23 = vld [vmem:[#allocation32_spill] sm:$0xff] }
 0x827   : > { %vm14333_vm3 = vcmask 302080   ;;  %vm14334_vm14 = vnez %v14120_v6  ;;  %v4699_v35 = vsel %vm14335_vm15, %v4680_v19, %v12200_v25  ;;  %v4799_v50 = vsel %vm14336_vm13, %v4698_v44, %v4633_v56 }
 0x828   : > { %v5030_v61 = vsel %vm14333_vm3, %v5010_v14, %v5012_v51  ;;  %v5130_v59 = vsel %vm14334_vm14, %v5029_v49, %v4964_v17  ;;  %vm14337_vm1 = vmmov %vm14333_vm3  ;;  %vm14338_vm9 = vnez %v14123_v60  ;;  %vm14339_vm5 = vnez %v14150_v8  ;;  %6097 = vrot.lane.b32.xlu1 %v14302_v41, %s8304_s24 }
 0x829   : > { %v5031_v18 = vsel %vm14337_vm1, %v5012_v51, %v12104_v2  ;;  %v5276_v37 = vsel %vm14338_vm9, %v5179_v30, %v5130_v59  ;;  %v4800_v7 = vsel %vm14339_vm5, %v4699_v35, %v4634_v57  ;;  %v4965_v6 = vsel %vm12055_vm0, %v4864_v10, %v4799_v50  ;;  %v5309_v63 = vpop.permute.xlu0 %5308  ;;  %v12435_v8 = vpop.permute.xlu1 %5631  ;;  %v14365_v10 = vld [vmem:[#allocation88_spill] sm:$0xff] }
 0x82a   : > { %vm14340_vm13 = vnez %v14129_v54  ;;  %vm14341_vm6 = vcmask 826368   ;;  %v4966_v2 = vsel %vm11990_vm10, %v4865_v27, %v4800_v7  ;;  %v5131_v60 = vsel %vm12059_vm7, %v5030_v61, %v4965_v6  ;;  %5915 = vrot.lane.b32.xlu0 %v14309_v47, %s8297_s11 }
 0x82b   : > { %v5422_v43 = vsel %vm14340_vm13, %v5325_v20, %v5276_v37  ;;  %v5180_v25 = vsel %vm14341_vm6, %v5161_v26, %v5163_v11  ;;  %vm14342_vm0 = vcmask 859136   ;;  %vm14343_vm3 = vmmov %vm14341_vm6  ;;  %v5132_v54 = vsel %vm12063_vm12, %v5031_v18, %v4966_v2 }
 0x82c   : > { %v5486_v58 = vsel %vm14342_vm0, %v14292_v46, %v12351_v22  ;;  %v5181_v14 = vsel %vm14343_vm3, %v5163_v11, %v12144_v13  ;;  %v5277_v12 = vsel %vm12072_vm4, %v5180_v25, %v5131_v60  ;;  %vm14344_vm10 = vcmask 842752   ;;  %vm14348_vm12 = vmmov %vm14342_vm0  ;;  %6191 = vrot.lane.b32.xlu1 %v14302_v41, %s13990_s17  ;;  %v14380_v60 = vld [vmem:[#allocation84_spill] sm:$0xff] }
 0x82d   : > { %v5278_v26 = vsel %vm12076_vm8, %v5181_v14, %v5132_v54  ;;  %v5326_v24 = vsel %vm14344_vm10, %v5307_v28, %v5309_v63  ;;  %vm14345_vm7 = vmmov %vm14344_vm10  ;;  %vm14346_vm14 = vnez %v14132_v42  ;;  %v5469_v29 = vpop.permute.xlu0 %5468  ;;  %v12460_v34 = vpop.permute.xlu1 %5719  ;;  %vm14349_vm4 = vnez %v14184_v39 }
 0x82e   : > { %v5327_v3 = vsel %vm14345_vm7, %v5309_v63, %v12170_v0  ;;  %v12455_v13 = vsel %vm14346_vm14, %v5486_v58, %v5422_v43  ;;  %v5423_v38 = vsel %vm12096_vm11, %v5326_v24, %v5277_v12  ;;  %vm14347_vm8 = vmmov %vm14342_vm0  ;;  %v5488_v42 = vsel %vm14348_vm12, %v5469_v29, %v12182_v1  ;;  %6003 = vrot.lane.b32.xlu0 %v14309_v47, %s8291_s25 }
 0x82f   : > { %5606 = vst [vmem:[#allocation3 + $0x78] sm:$0xff] %v12455_v13  ;;  %v5424_v0 = vsel %vm12100_vm2, %v5327_v3, %v5278_v26  ;;  %v5487_v46 = vsel %vm14347_vm8, %v12351_v22, %v5469_v29  ;;  %vm14350_vm15 = vnez %v14186_v45  ;;  %vm14351_vm11 = vcmask 523264   ;;  %v12499_v45 = vld [vmem:[%s13341_s8] sm:$0x77] }
 0x830   : > { %v12472_v28 = vsel %vm14349_vm4, %v5487_v46, %v5423_v38  ;;  %v12476_v51 = vsel %vm14350_vm15, %v5488_v42, %v5424_v0  ;;  %vm14352_vm2 = vcmask 1039360   ;;  %6285 = vrot.lane.b32.xlu1 %v14302_v41, %s14026_s20  ;;  %v12505_v55 = vcombine.high %v12499_v45, %v12499_v45  ;;  %v14389_v46 = vld [vmem:[#allocation20_spill] sm:$0xff] }
 0x831   : > { %5607 = vst [vmem:[#allocation3 + $0x80] sm:$0xff] %v12472_v28  ;;  %5608 = vst.msk [vmem:[#allocation3 + $0x88] sm:$0xff] %vm14351_vm11, %v12476_v51  ;;  %v12485_v16 = vpop.permute.xlu0 %5629  ;;  %v5808_v33 = vpop.permute.xlu1 %5807  ;;  %vm14353_vm1 = vcmask 1031168   ;;  %vm14354_vm9 = vcmask 130048   ;;  %vm14356_vm13 = vcmask 769024   ;;  %vm14357_vm6 = vcmask 760832  }
 0x832   : > { %v12490_v39 = vsel %vm14352_vm2, %v12485_v16, %v12435_v8  ;;  %6095 = vrot.lane.b32.xlu0 %v14309_v47, %s8304_s24  ;;  %7044 = vmatprep.mubr.msk.f32.mxu0 %vm14354_vm9, %v12505_v55  ;;  %vm14355_vm5 = vmmov %vm14354_vm9  ;;  %vm14359_vm0 = vcmask 752640   ;;  %vm14360_vm3 = vcmask 490496   ;;  %vm14363_vm10 = vcmask 482304  }
 0x833   : > { %7043 = vmatprep.mubr.msk.f32.mxu1 %vm14355_vm5, %v12505_v55  ;;  %vm14367_vm7 = vcmask 474112   ;;  %vm14369_vm14 = vmmov %vm14352_vm2 }
 0x834   : > { %5643 = vrot.lane.b32.xlu1 %v12160_v15, %s8287_s14  ;;  %vm14370_vm8 = vmmov %vm14352_vm2 }
 0x835   : > { %v12501_v1 = vpop.permute.xlu0 %5717  ;;  %v5896_v22 = vpop.permute.xlu1 %5895  ;;  %vm14372_vm12 = vmmov %vm14353_vm1 }
 0x836   : > { %v12510_v57 = vsel %vm14353_vm1, %v12501_v1, %v12460_v34  ;;  %6189 = vrot.lane.b32.xlu0 %v14309_v47, %s13990_s17  ;;  %vm14373_vm4 = vmmov %vm14353_vm1 }
 0x837   : > { %vm14375_vm15 = vmmov %vm14356_vm13 }
 0x838   : > { %5731 = vrot.lane.b32.xlu1 %v12160_v15, %s8286_s12  ;;  %vm14376_vm11 = vmmov %vm14356_vm13 }
 0x839   : > { %v12520_v41 = vpop.permute.xlu0 %5805  ;;  %v5984_v48 = vpop.permute.xlu1 %5983  ;;  %vm14377_vm2 = vmmov %vm14357_vm6 }
 0x83a   : > { %v12524_v31 = vsel %vm14356_vm13, %v12520_v41, %v5808_v33  ;;  %6283 = vrot.lane.b32.xlu0 %v8176_v62, %s14026_s20  ;;  %vm14378_vm1 = vmmov %vm14377_vm2 }
 0x83b   : > { %vm14381_vm9 = vmmov %vm14359_vm0 }
 0x83c   : > { %5819 = vrot.lane.b32.xlu1 %v12160_v15, %s8307_s29  ;;  %vm14382_vm5 = vmmov %vm14359_vm0 }
 0x83d   : > { %v12529_v47 = vpop.permute.xlu0 %5893  ;;  %v6074_v52 = vpop.permute.xlu1 %6073  ;;  %vm14384_vm13 = vmmov %vm14360_vm3 }
 0x83e   : > { %v12533_v53 = vsel %vm14357_vm6, %v12529_v47, %v5896_v22  ;;  %5627 = vrot.lane.b32.xlu0 %v14358_v23, %s8287_s14  ;;  %vm14385_vm6 = vmmov %vm14360_vm3 }
 0x840   : > { %5907 = vrot.lane.b32.xlu1 %v12160_v15, %s8297_s11 }
 0x841   : > { %v12539_v40 = vpop.permute.xlu0 %5981  ;;  %v6168_v36 = vpop.permute.xlu1 %6167 }
 0x842   : > { %v12543_v5 = vsel %vm14359_vm0, %v12539_v40, %v5984_v48  ;;  %5715 = vrot.lane.b32.xlu0 %v14358_v23, %s8286_s12  ;;  %vm14387_vm0 = vmmov %vm14363_vm10 }
 0x844   : > { %5995 = vrot.lane.b32.xlu1 %v12160_v15, %s8291_s25 }
 0x845   : > { %v12549_v32 = vpop.permute.xlu0 %6071  ;;  %v6262_v49 = vpop.permute.xlu1 %6261 }
 0x846   : > { %v12553_v30 = vsel %vm14360_vm3, %v12549_v32, %v6074_v52  ;;  %5803 = vrot.lane.b32.xlu0 %v14358_v23, %s8307_s29  ;;  %vm14388_vm3 = vmmov %vm14387_vm0 }
 0x847   : > { %14361 = vst [vmem:[#allocation89_spill] sm:$0xff] %v12553_v30 }
 0x848   : > { %5645 = vrot.lane.b32.xlu1 %v14365_v10, %s8287_s14 }
 0x849   : > { %v12559_v4 = vpop.permute.xlu0 %6165  ;;  %v12561_v9 = vpop.permute.xlu1 %5635 }
 0x84a   : > { %14362 = vst [vmem:[#allocation80_spill] sm:$0xff] %v12561_v9  ;;  %v12565_v20 = vsel %vm14363_vm10, %v12559_v4, %v6168_v36  ;;  %5891 = vrot.lane.b32.xlu0 %v14358_v23, %s8297_s11  ;;  %vm14390_vm10 = vmmov %vm14367_vm7 }
 0x84b   : > { %14364 = vst [vmem:[#allocation90_spill] sm:$0xff] %v12565_v20 }
 0x84c   : > { %5733 = vrot.lane.b32.xlu1 %v14365_v10, %s8286_s12 }
 0x84d   : > { %v12571_v21 = vpop.permute.xlu0 %6259  ;;  %v12573_v11 = vpop.permute.xlu1 %5723 }
 0x84e   : > { %14366 = vst [vmem:[#allocation81_spill] sm:$0xff] %v12573_v11  ;;  %v12577_v19 = vsel %vm14367_vm7, %v12571_v21, %v6262_v49  ;;  %5979 = vrot.lane.b32.xlu0 %v14358_v23, %s8291_s25 }
 0x850   : > { %5821 = vrot.lane.b32.xlu1 %v14365_v10, %s8307_s29 }
 0x851   : > { %v5634_v27 = vpop.permute.xlu0 %5633  ;;  %v12583_v17 = vpop.permute.xlu1 %5811 }
 0x852   : > { %14368 = vst [vmem:[#allocation66_spill] sm:$0xff] %v12583_v17  ;;  %v12587_v56 = vsel %vm14369_vm14, %v12435_v8, %v5634_v27  ;;  %v12591_v44 = vsel %vm14370_vm8, %v5634_v27, %v12561_v9  ;;  %6069 = vrot.lane.b32.xlu0 %v14358_v23, %s8304_s24  ;;  %vm14391_vm14 = vmmov %vm14370_vm8 }
 0x853   : > { %vm14392_vm8 = vmmov %vm14373_vm4 }
 0x854   : > { %5909 = vrot.lane.b32.xlu1 %v14365_v10, %s8297_s11 }
 0x855   : > { %v5722_v61 = vpop.permute.xlu0 %5721  ;;  %v12597_v59 = vpop.permute.xlu1 %5899 }
 0x856   : > { %14371 = vst [vmem:[#allocation12_spill] sm:$0xff] %v12597_v59  ;;  %v12601_v35 = vsel %vm14372_vm12, %v12460_v34, %v5722_v61  ;;  %v12605_v50 = vsel %vm14373_vm4, %v5722_v61, %v12573_v11  ;;  %6163 = vrot.lane.b32.xlu0 %v14358_v23, %s13990_s17  ;;  %vm14393_vm12 = vmmov %vm14376_vm11 }
 0x857   : > { %vm14394_vm4 = vmmov %vm14378_vm1 }
 0x858   : > { %5997 = vrot.lane.b32.xlu1 %v14365_v10, %s8291_s25 }
 0x859   : > { %v5810_v18 = vpop.permute.xlu0 %5809  ;;  %v12611_v37 = vpop.permute.xlu1 %5987 }
 0x85a   : > { %14374 = vst [vmem:[#allocation67_spill] sm:$0xff] %v12611_v37  ;;  %v12614_v7 = vsel %vm14375_vm15, %v5808_v33, %v5810_v18  ;;  %v12618_v6 = vsel %vm14376_vm11, %v5810_v18, %v12583_v17  ;;  %6257 = vrot.lane.b32.xlu0 %v14358_v23, %s14026_s20  ;;  %vm14396_vm15 = vmmov %vm14382_vm5 }
 0x85b   : > { %vm14398_vm11 = vmmov %vm14385_vm6 }
 0x85c   : > { %6089 = vrot.lane.b32.xlu1 %v14365_v10, %s8304_s24 }
 0x85d   : > { %v5898_v43 = vpop.permute.xlu0 %5897  ;;  %v12631_v63 = vpop.permute.xlu1 %6077 }
 0x85e   : > { %v12625_v25 = vsel %vm14377_vm2, %v5896_v22, %v5898_v43  ;;  %v12629_v2 = vsel %vm14378_vm1, %v5898_v43, %v12597_v59  ;;  %14379 = vst [vmem:[#allocation24_spill] sm:$0xff] %v12631_v63  ;;  %5637 = vrot.lane.b32.xlu0 %v14380_v60, %s8287_s14  ;;  %vm14401_vm2 = vmmov %vm14387_vm0 }
 0x85f   : > { %vm14405_vm1 = vmmov %vm14367_vm7 }
 0x860   : > { %6183 = vrot.lane.b32.xlu1 %v14365_v10, %s13990_s17 }
 0x861   : > { %v5986_v8 = vpop.permute.xlu0 %5985  ;;  %v12644_v54 = vpop.permute.xlu1 %6171 }
 0x862   : > { %v12638_v58 = vsel %vm14381_vm9, %v5984_v48, %v5986_v8  ;;  %v12642_v14 = vsel %vm14382_vm5, %v5986_v8, %v12611_v37  ;;  %14383 = vst [vmem:[#allocation21_spill] sm:$0xff] %v12644_v54  ;;  %5725 = vrot.lane.b32.xlu0 %v14380_v60, %s8286_s12  ;;  %vm14406_vm9 = vmmov %vm14391_vm14 }
 0x863   : > { %vm14407_vm5 = vmmov %vm14406_vm9 }
 0x864   : > { %6277 = vrot.lane.b32.xlu1 %v14365_v10, %s14026_s20 }
 0x865   : > { %v6076_v12 = vpop.permute.xlu0 %6075  ;;  %v12657_v3 = vpop.permute.xlu1 %6265 }
 0x866   : > { %v12651_v26 = vsel %vm14384_vm13, %v6074_v52, %v6076_v12  ;;  %v12655_v24 = vsel %vm14385_vm6, %v6076_v12, %v12631_v63  ;;  %14386 = vst [vmem:[#allocation60_spill] sm:$0xff] %v12657_v3  ;;  %5813 = vrot.lane.b32.xlu0 %v14380_v60, %s8307_s29  ;;  %vm14409_vm13 = vmmov %vm14392_vm8 }
 0x867   : > { %vm14410_vm6 = vmmov %vm14392_vm8 }
 0x868   : > { %5639 = vrot.lane.b32.xlu1 %v14389_v46, %s8287_s14 }
 0x869   : > { %v6170_v29 = vpop.permute.xlu0 %6169  ;;  %v5650_v0 = vpop.permute.xlu1 %5649 }
 0x86a   : > { %v12664_v34 = vsel %vm14387_vm0, %v6168_v36, %v6170_v29  ;;  %v12668_v38 = vsel %vm14388_vm3, %v6170_v29, %v12644_v54  ;;  %5901 = vrot.lane.b32.xlu0 %v14380_v60, %s8297_s11  ;;  %vm14411_vm0 = vmmov %vm14393_vm12 }
 0x86b   : > { %vm14412_vm3 = vmmov %vm14411_vm0 }
 0x86c   : > { %5727 = vrot.lane.b32.xlu1 %v14389_v46, %s8286_s12 }
 0x86d   : > { %v6264_v42 = vpop.permute.xlu0 %6263  ;;  %v12681_v48 = vpop.permute.xlu1 %5737 }
 0x86e   : > { %v12675_v33 = vsel %vm14390_vm10, %v6262_v49, %v6264_v42  ;;  %v12679_v22 = vsel %vm14367_vm7, %v6264_v42, %v12657_v3  ;;  %5989 = vrot.lane.b32.xlu0 %v14380_v60, %s8291_s25  ;;  %vm14413_vm10 = vmmov %vm14394_vm4 }
 0x86f   : > { %6335 = vst [vmem:[#allocation3 + $0x490] sm:$0xff] %v12675_v33  ;;  %vm14414_vm7 = vmmov %vm14394_vm4 }
 0x870   : > { %5815 = vrot.lane.b32.xlu1 %v14389_v46, %s8307_s29 }
 0x871   : > { %v12688_v62 = vpop.permute.xlu0 %5647  ;;  %v12692_v23 = vpop.permute.xlu1 %5825 }
 0x872   : > { %v5672_v52 = vsel %vm14391_vm14, %v12688_v62, %v5650_v0  ;;  %6079 = vrot.lane.b32.xlu0 %v14380_v60, %s8304_s24  ;;  %vm14415_vm14 = vmmov %vm14396_vm15 }
 0x873   : > { %v7903_v36 = vpack.c.bf16 %v5672_v52, %v12490_v39  ;;  %v14395_v52 = vld [vmem:[#allocation87_spill] sm:$0xff] }
 0x874   : > { %5903 = vrot.lane.b32.xlu1 %v14389_v46, %s8297_s11 }
 0x875   : > { %v12699_v49 = vpop.permute.xlu0 %5735  ;;  %7904 = vmatprep.subr.bf16.mxu1 %v7903_v36  ;;  %v12706_v27 = vpop.permute.xlu1 %5913 }
 0x876   : > { %v12704_v10 = vsel %vm14392_vm8, %v12699_v49, %v12681_v48  ;;  %6173 = vrot.lane.b32.xlu0 %v14380_v60, %s13990_s17  ;;  %vm14416_vm8 = vmmov %vm14415_vm14 }
 0x878   : > { %5991 = vrot.lane.b32.xlu1 %v14389_v46, %s8291_s25 }
 0x879   : > { %v12714_v39 = vpop.permute.xlu0 %5823  ;;  %v12721_v43 = vpop.permute.xlu1 %6001 }
 0x87a   : > { %v12719_v18 = vsel %vm14393_vm12, %v12714_v39, %v12692_v23  ;;  %6267 = vrot.lane.b32.xlu0 %v14380_v60, %s14026_s20  ;;  %vm14417_vm12 = vmmov %vm14398_vm11 }
 0x87c   : > { %6081 = vrot.lane.b32.xlu1 %v14389_v46, %s8304_s24 }
 0x87d   : > { %v12729_v12 = vpop.permute.xlu0 %5911  ;;  %v12736_v42 = vpop.permute.xlu1 %6093 }
 0x87e   : > { %v12734_v29 = vsel %vm14394_vm4, %v12729_v12, %v12706_v27  ;;  %5641 = vrot.lane.b32.xlu0 %v14395_v52, %s8287_s14  ;;  %vm14418_vm4 = vmmov %vm14398_vm11 }
 0x880   : > { %6175 = vrot.lane.b32.xlu1 %v14389_v46, %s13990_s17 }
 0x881   : > { %v12744_v36 = vpop.permute.xlu0 %5999  ;;  %v12751_v61 = vpop.permute.xlu1 %6187 }
 0x882   : > { %v12749_v8 = vsel %vm14396_vm15, %v12744_v36, %v12721_v43  ;;  %5729 = vrot.lane.b32.xlu0 %v14395_v52, %s8286_s12  ;;  %vm14419_vm15 = vmmov %vm14401_vm2 }
 0x884   : > { %6269 = vrot.lane.b32.xlu1 %v14389_v46, %s14026_s20 }
 0x885   : > { %v12759_v60 = vpop.permute.xlu0 %6091  ;;  %v12766_v63 = vpop.permute.xlu1 %6281 }
 0x886   : > { %14397 = vst [vmem:[#allocation77_spill] sm:$0xff] %v12759_v60  ;;  %v12764_v54 = vsel %vm14398_vm11, %v12759_v60, %v12736_v42  ;;  %5817 = vrot.lane.b32.xlu0 %v14395_v52, %s8307_s29  ;;  %vm14420_vm11 = vmmov %vm14401_vm2 }
 0x887   : > { %14399 = vst [vmem:[#allocation41_spill] sm:$0xff] %v12764_v54 }
 0x888   : > { %5661 = vrot.lane.b32.xlu1 %v12476_v51, %s8287_s14 }
 0x889   : > { %v12774_v3 = vpop.permute.xlu0 %6185  ;;  %v12781_v17 = vpop.permute.xlu1 %5653 }
 0x88a   : > { %14400 = vst [vmem:[#allocation61_spill] sm:$0xff] %v12774_v3  ;;  %v12779_v59 = vsel %vm14401_vm2, %v12774_v3, %v12751_v61  ;;  %14403 = vst [vmem:[#allocation37_spill] sm:$0xff] %v12781_v17  ;;  %5905 = vrot.lane.b32.xlu0 %v14395_v52, %s8297_s11  ;;  %vm14421_vm2 = vcmask 523264  }
 0x88b   : > { %14402 = vst [vmem:[#allocation50_spill] sm:$0xff] %v12779_v59 }
 0x88c   : > { %5749 = vrot.lane.b32.xlu1 %v12476_v51, %s8286_s12 }
 0x88d   : > { %v12789_v37 = vpop.permute.xlu0 %6279  ;;  %v12796_v3 = vpop.permute.xlu1 %5741 }
 0x88e   : > { %14404 = vst [vmem:[#allocation49_spill] sm:$0xff] %v12789_v37  ;;  %v12794_v46 = vsel %vm14405_vm1, %v12789_v37, %v12766_v63  ;;  %5993 = vrot.lane.b32.xlu0 %v14395_v52, %s8291_s25  ;;  %v14408_v37 = vld [vmem:[#allocation76_spill] sm:$0xff] }
 0x890   : > { %5837 = vrot.lane.b32.xlu1 %v12476_v51, %s8307_s29 }
 0x891   : > { %v5652_v11 = vpop.permute.xlu0 %5651  ;;  %v12807_v54 = vpop.permute.xlu1 %5829 }
 0x892   : > { %v5673_v20 = vsel %vm14406_vm9, %v5650_v0, %v5652_v11  ;;  %v5674_v59 = vsel %vm14407_vm5, %v5652_v11, %v12781_v17  ;;  %5655 = vrot.lane.b32.xlu0 %v14408_v37, %s8287_s14  ;;  %vm14422_vm9 = vmmov %vm14405_vm1 }
 0x893   : > { %v7939_v60 = vpack.c.bf16 %v5674_v59, %v12591_v44  ;;  %v7941_v9 = vpack.c.bf16 %v5673_v20, %v12587_v56  ;;  %vm14423_vm5 = vmmov %vm14421_vm2 }
 0x894   : > { %5925 = vrot.lane.b32.xlu1 %v12476_v51, %s8297_s11 }
 0x895   : > { %v5740_v30 = vpop.permute.xlu0 %5739  ;;  %7940 = vmatprep.subr.bf16.mxu0 %v7939_v60  ;;  %v12819_v17 = vpop.permute.xlu1 %5917 }
 0x896   : > { %v5761_v0 = vsel %vm14409_vm13, %v12681_v48, %v5740_v30  ;;  %v5762_v11 = vsel %vm14410_vm6, %v5740_v30, %v12796_v3  ;;  %7942 = vmatpush1.bf16.msra.mxu0 %v7941_v9  ;;  %5743 = vrot.lane.b32.xlu0 %v14408_v37, %s8286_s12  ;;  %vm14424_vm13 = vcmask 1039360   ;;  %vm14425_vm6 = vmmov %vm14421_vm2 }
 0x897   : > { %v7943_v44 = vpack.c.bf16 %v5762_v11, %v12605_v50  ;;  %v7945_v20 = vpack.c.bf16 %v5761_v0, %v12601_v35 }
 0x898   : > { %5657 = vrot.lane.b32.xlu1 %v12455_v13, %s8287_s14 }
 0x899   : > { %v5828_v56 = vpop.permute.xlu0 %5827  ;;  %7944 = vmatprep.subr.bf16.mxu0 %v7943_v44  ;;  %v12831_v48 = vpop.permute.xlu1 %6005 }
 0x89a   : > { %v5849_v59 = vsel %vm14411_vm0, %v12692_v23, %v5828_v56  ;;  %v5850_v30 = vsel %vm14412_vm3, %v5828_v56, %v12807_v54  ;;  %7946 = vmatpush1.bf16.msra.mxu0 %v7945_v20  ;;  %5831 = vrot.lane.b32.xlu0 %v14408_v37, %s8307_s29  ;;  %vm14426_vm0 = vcmask 1031168   ;;  %vm14427_vm3 = vcmask 130048  }
 0x89b   : > { %v7947_v9 = vpack.c.bf16 %v5850_v30, %v12618_v6  ;;  %v7949_v35 = vpack.c.bf16 %v5849_v59, %v12614_v7 }
 0x89c   : > { %5745 = vrot.lane.b32.xlu1 %v12455_v13, %s8286_s12 }
 0x89d   : > { %v5916_v50 = vpop.permute.xlu0 %5915  ;;  %7948 = vmatprep.subr.bf16.mxu0 %v7947_v9  ;;  %v12843_v0 = vpop.permute.xlu1 %6097 }
 0x89e   : > { %v5937_v23 = vsel %vm14413_vm10, %v12706_v27, %v5916_v50  ;;  %v5938_v60 = vsel %vm14414_vm7, %v5916_v50, %v12819_v17  ;;  %7950 = vmatpush1.bf16.msra.mxu0 %v7949_v35  ;;  %5919 = vrot.lane.b32.xlu0 %v14408_v37, %s8297_s11  ;;  %vm14428_vm10 = vmmov %vm14421_vm2  ;;  %vm14430_vm7 = vcmask 769024  }
 0x89f   : > { %v7951_v6 = vpack.c.bf16 %v5938_v60, %v12629_v2  ;;  %v7953_v7 = vpack.c.bf16 %v5937_v23, %v12625_v25 }
 0x8a0   : > { %5833 = vrot.lane.b32.xlu1 %v12455_v13, %s8307_s29 }
 0x8a1   : > { %v6004_v11 = vpop.permute.xlu0 %6003  ;;  %7952 = vmatprep.subr.bf16.mxu0 %v7951_v6  ;;  %v12855_v20 = vpop.permute.xlu1 %6191 }
 0x8a2   : > { %v6025_v27 = vsel %vm14415_vm14, %v12721_v43, %v6004_v11  ;;  %v6026_v44 = vsel %vm14416_vm8, %v6004_v11, %v12831_v48  ;;  %7954 = vmatpush1.bf16.msra.mxu0 %v7953_v7  ;;  %6007 = vrot.lane.b32.xlu0 %v14408_v37, %s8291_s25  ;;  %v8007_v7 = vpack.c.bf16 %v12472_v28, %v14395_v52  ;;  %vm14431_vm14 = vmmov %vm14421_vm2  ;;  %vm14432_vm8 = vcmask 760832  }
 0x8a3   : > { %v7955_v2 = vpack.c.bf16 %v6026_v44, %v12642_v14  ;;  %v7957_v25 = vpack.c.bf16 %v6025_v27, %v12638_v58 }
 0x8a4   : > { %5921 = vrot.lane.b32.xlu1 %v12455_v13, %s8297_s11 }
 0x8a5   : > { %v6096_v56 = vpop.permute.xlu0 %6095  ;;  %7956 = vmatprep.subr.bf16.mxu0 %v7955_v2  ;;  %v12867_v30 = vpop.permute.xlu1 %6285 }
 0x8a6   : > { %v6120_v43 = vsel %vm14417_vm12, %v12736_v42, %v6096_v56  ;;  %v6121_v59 = vsel %vm14418_vm4, %v6096_v56, %v12843_v0  ;;  %7958 = vmatpush1.bf16.msra.mxu0 %v7957_v25  ;;  %6099 = vrot.lane.b32.xlu0 %v14408_v37, %s8304_s24  ;;  %v14429_v25 = vld [vmem:[#allocation11_spill] sm:$0xff]  ;;  %vm14433_vm12 = vmmov %vm14424_vm13  ;;  %vm14434_vm4 = vcmask 752640  }
 0x8a7   : > { %v7959_v14 = vpack.c.bf16 %v6121_v59, %v12655_v24  ;;  %v7961_v58 = vpack.c.bf16 %v6120_v43, %v12651_v26 }
 0x8a8   : > { %6009 = vrot.lane.b32.xlu1 %v12455_v13, %s8291_s25 }
 0x8a9   : > { %v6190_v9 = vpop.permute.xlu0 %6189  ;;  %7960 = vmatprep.subr.bf16.mxu0 %v7959_v14  ;;  %v12879_v50 = vpop.permute.xlu1 %5643 }
 0x8aa   : > { %v6214_v42 = vsel %vm14419_vm15, %v12751_v61, %v6190_v9  ;;  %v6215_v35 = vsel %vm14420_vm11, %v6190_v9, %v12855_v20  ;;  %7962 = vmatpush1.bf16.msra.mxu0 %v7961_v58  ;;  %5705 = vst.msk [vmem:[#allocation3 + $0xd0] sm:$0xff] %vm14421_vm2, %v12879_v50  ;;  %6193 = vrot.lane.b32.xlu0 %v14408_v37, %s13990_s17  ;;  %vm14435_vm15 = vmmov %vm14426_vm0  ;;  %vm14437_vm11 = vcmask 490496  }
 0x8ab   : > { %v7963_v26 = vpack.c.bf16 %v6215_v35, %v12668_v38  ;;  %v7965_v24 = vpack.c.bf16 %v6214_v42, %v12664_v34  ;;  %vm14438_vm2 = vmmov %vm14430_vm7 }
 0x8ac   : > { %6101 = vrot.lane.b32.xlu1 %v12455_v13, %s8304_s24 }
 0x8ad   : > { %v6284_v61 = vpop.permute.xlu0 %6283  ;;  %7964 = vmatprep.subr.bf16.mxu0 %v7963_v26  ;;  %v12893_v6 = vpop.permute.xlu1 %5731 }
 0x8ae   : > { %v6308_v23 = vsel %vm14405_vm1, %v12766_v63, %v6284_v61  ;;  %v6309_v60 = vsel %vm14422_vm9, %v6284_v61, %v12867_v30  ;;  %7966 = vmatpush1.bf16.msra.mxu0 %v7965_v24  ;;  %5793 = vst.msk [vmem:[#allocation3 + $0x160] sm:$0xff] %vm14423_vm5, %v12893_v6  ;;  %6287 = vrot.lane.b32.xlu0 %v14408_v37, %s14026_s20  ;;  %vm14441_vm1 = vcmask 482304   ;;  %vm14442_vm9 = vmmov %vm14432_vm8  ;;  %vm14444_vm5 = vcmask 474112  }
 0x8af   : > { %v7967_v34 = vpack.c.bf16 %v6309_v60, %v12679_v22  ;;  %v7969_v38 = vpack.c.bf16 %v6308_v23, %v12675_v33  ;;  %v6358_v33 = vld [vmem:[#allocation3 + $0x30] sm:$0xff] }
 0x8b0   : > { %6195 = vrot.lane.b32.xlu1 %v12455_v13, %s13990_s17  ;;  %v8009_v22 = vpack.c.bf16 %v12455_v13, %v6358_v33  ;;  %v14449_v33 = vld [vmem:[#allocation77_spill] sm:$0xff] }
 0x8b1   : > { %v5628_v63 = vpop.permute.xlu0 %5627  ;;  %7968 = vmatprep.subr.bf16.mxu0 %v7967_v34  ;;  %v12907_v27 = vpop.permute.xlu1 %5819 }
 0x8b2   : > { %v5663_v11 = vsel %vm14424_vm13, %v5628_v63, %v12485_v16  ;;  %7970 = vmatpush1.bf16.msra.mxu0 %v7969_v38  ;;  %5881 = vst.msk [vmem:[#allocation3 + $0x1f0] sm:$0xff] %vm14425_vm6, %v12907_v27  ;;  %6083 = vrot.lane.b32.xlu0 %v14395_v52, %s8304_s24  ;;  %vm14445_vm13 = vmmov %vm14434_vm4 }
 0x8b3   : > { %8008 = vmatprep.subr.bf16.mxu0 %v8007_v7  ;;  %v14447_v7 = vld [vmem:[#allocation80_spill] sm:$0xff]  ;;  %vm14448_vm6 = vmmov %vm14433_vm12 }
 0x8b4   : > { %6289 = vrot.lane.b32.xlu1 %v12455_v13, %s14026_s20 }
 0x8b5   : > { %v5716_v44 = vpop.permute.xlu0 %5715  ;;  %6660 = vmatmul.mubr.f32.vlgmr.msra.gmra.mrb[34].mxu0 %v12499_v45  ;;  %v12919_v2 = vpop.permute.xlu1 %5907 }
 0x8b6   : > { %v5751_v16 = vsel %vm14426_vm0, %v5716_v44, %v12501_v1  ;;  %8010 = vmatpush1.bf16.msra.mxu0 %v8009_v22  ;;  %7046 = vmatprep.mubr.msk.f32.mxu0 %vm14427_vm3, %v12505_v55  ;;  %5969 = vst.msk [vmem:[#allocation3 + $0x280] sm:$0xff] %vm14428_vm10, %v12919_v2  ;;  %vm14450_vm0 = vmmov %vm14437_vm11  ;;  %v14451_v22 = vld [vmem:[#allocation41_spill] sm:$0xff] }
 0x8b7   : > { %6087 = vrot.lane.b32.xlu0 %v14429_v25, %s8304_s24  ;;  %vm14455_vm3 = vmmov %vm14435_vm15 }
 0x8b8   : > { %6013 = vrot.lane.b32.xlu1 %v12476_v51, %s8291_s25  ;;  %vm14457_vm10 = vmmov %vm14441_vm1 }
 0x8b9   : > { %v5804_v56 = vpop.permute.xlu0 %5803  ;;  %v12931_v1 = vpop.permute.xlu1 %5995 }
 0x8ba   : > { %v5839_v43 = vsel %vm14430_vm7, %v5804_v56, %v12520_v41  ;;  %6057 = vst.msk [vmem:[#allocation3 + $0x310] sm:$0xff] %vm14431_vm14, %v12931_v1  ;;  %v14454_v56 = vld [vmem:[#allocation81_spill] sm:$0xff]  ;;  %vm14462_vm7 = vmmov %vm14438_vm2 }
 0x8bb   : > { %6177 = vrot.lane.b32.xlu0 %v14395_v52, %s13990_s17  ;;  %vm14464_vm14 = vmmov %vm14444_vm5 }
 0x8bc   : > { %6085 = vrot.lane.b32.xlu1 %v12160_v15, %s8304_s24 }
 0x8bd   : > { %v5892_v59 = vpop.permute.xlu0 %5891  ;;  %v5646_v13 = vpop.permute.xlu1 %5645 }
 0x8be   : > { %v5927_v14 = vsel %vm14432_vm8, %v5892_v59, %v12529_v47  ;;  %v5671_v58 = vsel %vm14433_vm12, %v5646_v13, %v12688_v62  ;;  %v14436_v62 = vpack.c.bf16 %v12704_v10, %v12510_v57  ;;  %v14439_v57 = vpack.c.bf16 %v12719_v18, %v12524_v31  ;;  %v14440_v10 = vld [vmem:[#allocation75_spill] sm:$0xff]  ;;  %vm14467_vm12 = vmmov %vm14448_vm6 }
 0x8bf   : > { %6181 = vrot.lane.b32.xlu0 %v14429_v25, %s13990_s17  ;;  %v7905_v41 = vpack.c.bf16 %v5671_v58, %v5663_v11  ;;  %v14443_v31 = vpack.c.bf16 %v12734_v29, %v12533_v53  ;;  %v14446_v53 = vpack.c.bf16 %v12749_v8, %v12543_v5  ;;  %v14452_v5 = vld [vmem:[#allocation89_spill] sm:$0xff]  ;;  %v14458_v58 = vld [vmem:[#allocation50_spill] sm:$0xff] }
 0x8c0   : > { %6105 = vrot.lane.b32.xlu1 %v12476_v51, %s8304_s24  ;;  %v14453_v8 = vpack.c.bf16 %v14451_v22, %v14452_v5  ;;  %v14477_v22 = vld [vmem:[#allocation60_spill] sm:$0xff] }
 0x8c1   : > { %v5980_v9 = vpop.permute.xlu0 %5979  ;;  %v5734_v35 = vpop.permute.xlu1 %5733  ;;  %7906 = vmatpush1.bf16.msra.mxu1 %v7905_v41  ;;  %v14459_v41 = vld [vmem:[#allocation90_spill] sm:$0xff] }
 0x8c2   : > { %v6015_v42 = vsel %vm14434_vm4, %v5980_v9, %v12539_v40  ;;  %v5759_v47 = vsel %vm14435_vm15, %v5734_v35, %v12699_v49  ;;  %7908 = vmatprep.subr.bf16.mxu1 %v14436_v62  ;;  %v14460_v9 = vpack.c.bf16 %v14458_v58, %v14459_v41  ;;  %vm14469_vm15 = vcmask 130048  }
 0x8c3   : > { %6271 = vrot.lane.b32.xlu0 %v14395_v52, %s14026_s20  ;;  %v7909_v26 = vpack.c.bf16 %v5759_v47, %v5751_v16  ;;  %v14461_v47 = vld [vmem:[#allocation66_spill] sm:$0xff] }
 0x8c4   : > { %6107 = vrot.lane.b32.xlu1 %v14440_v10, %s8304_s24 }
 0x8c5   : > { %v6070_v24 = vpop.permute.xlu0 %6069  ;;  %v5822_v61 = vpop.permute.xlu1 %5821  ;;  %7910 = vmatpush1.bf16.msra.mxu1 %v7909_v26 }
 0x8c6   : > { %v6109_v40 = vsel %vm14437_vm11, %v6070_v24, %v12549_v32  ;;  %v5847_v49 = vsel %vm14438_vm2, %v5822_v61, %v12714_v39  ;;  %7912 = vmatprep.subr.bf16.mxu1 %v14439_v57  ;;  %v14463_v24 = vld [vmem:[#allocation49_spill] sm:$0xff]  ;;  %v14465_v61 = vpack.c.bf16 %v12794_v46, %v12577_v19  ;;  %v8177_v57 = vld [vmem:[#allocation3 + $0x28] sm:$0xff]  ;;  %v14468_v46 = vld [vmem:[#allocation67_spill] sm:$0xff] }
 0x8c7   : > { %5659 = vrot.lane.b32.xlu0 %v12472_v28, %s8287_s14  ;;  %v7913_v52 = vpack.c.bf16 %v5847_v49, %v5839_v43  ;;  %vm14470_vm11 = vmmov %vm14455_vm3 }
 0x8c8   : > { %6179 = vrot.lane.b32.xlu1 %v12160_v15, %s13990_s17  ;;  %vm14472_vm2 = vmmov %vm14450_vm0 }
 0x8c9   : > { %v6164_v23 = vpop.permute.xlu0 %6163  ;;  %v5910_v60 = vpop.permute.xlu1 %5909  ;;  %7914 = vmatpush1.bf16.msra.mxu1 %v7913_v52  ;;  %v7971_v52 = vpack.c.bf16 %v14408_v37, %v8177_v57 }
 0x8ca   : > { %v6203_v32 = vsel %vm14441_vm1, %v6164_v23, %v12559_v4  ;;  %v5935_v39 = vsel %vm14442_vm9, %v5910_v60, %v12729_v12  ;;  %7916 = vmatprep.subr.bf16.mxu1 %v14443_v31  ;;  %v6365_v23 = vld [vmem:[#allocation3 + $0x68] sm:$0xff]  ;;  %vm14473_vm1 = vmmov %vm14462_vm7 }
 0x8cb   : > { %5747 = vrot.lane.b32.xlu0 %v12472_v28, %s8286_s12  ;;  %v7917_v18 = vpack.c.bf16 %v5935_v39, %v5927_v14  ;;  %v14456_v14 = vld [vmem:[#allocation61_spill] sm:$0xff]  ;;  %vm14475_vm9 = vmmov %vm14457_vm10 }
 0x8cc   : > { %6199 = vrot.lane.b32.xlu1 %v12476_v51, %s13990_s17 }
 0x8cd   : > { %v6258_v34 = vpop.permute.xlu0 %6257  ;;  %v5998_v38 = vpop.permute.xlu1 %5997  ;;  %7918 = vmatpush1.bf16.msra.mxu1 %v7917_v18 }
 0x8ce   : > { %v6297_v4 = vsel %vm14444_vm5, %v6258_v34, %v12571_v21  ;;  %v6023_v12 = vsel %vm14445_vm13, %v5998_v38, %v12744_v36  ;;  %7920 = vmatprep.subr.bf16.mxu1 %v14446_v53  ;;  %v14471_v38 = vld [vmem:[#allocation24_spill] sm:$0xff]  ;;  %vm14476_vm5 = vmmov %vm14432_vm8 }
 0x8cf   : > { %5835 = vrot.lane.b32.xlu0 %v12472_v28, %s8307_s29  ;;  %v7921_v29 = vpack.c.bf16 %v6023_v12, %v6015_v42  ;;  %vm14478_vm13 = vmmov %vm14464_vm14 }
 0x8d0   : > { %6201 = vrot.lane.b32.xlu1 %v14440_v10, %s13990_s17 }
 0x8d1   : > { %v5638_v63 = vpop.permute.xlu0 %5637  ;;  %v6090_v11 = vpop.permute.xlu1 %6089  ;;  %7922 = vmatpush1.bf16.msra.mxu1 %v7921_v29  ;;  %v6514_v29 = vld [vmem:[%s13342_s9] sm:$0x7] }
 0x8d2   : > { %v12993_v21 = vsel %vm14448_vm6, %v14447_v7, %v5638_v63  ;;  %v6118_v36 = vsel %vm14450_vm0, %v6090_v11, %v14449_v33  ;;  %7924 = vmatprep.subr.bf16.mxu1 %v14453_v8  ;;  %v14474_v7 = vld [vmem:[#allocation21_spill] sm:$0xff]  ;;  %vm14479_vm6 = vmmov %vm14434_vm4 }
 0x8d3   : > { %5923 = vrot.lane.b32.xlu0 %v12472_v28, %s8297_s11  ;;  %v7925_v44 = vpack.c.bf16 %v6118_v36, %v6109_v40  ;;  %vm14480_vm0 = vmmov %vm14467_vm12 }
 0x8d4   : > { %6273 = vrot.lane.b32.xlu1 %v12160_v15, %s14026_s20 }
 0x8d5   : > { %v5726_v16 = vpop.permute.xlu0 %5725  ;;  %v6184_v59 = vpop.permute.xlu1 %6183  ;;  %7926 = vmatpush1.bf16.msra.mxu1 %v7925_v44 }
 0x8d6   : > { %v13006_v43 = vsel %vm14455_vm3, %v14454_v56, %v5726_v16  ;;  %v6212_v13 = vsel %vm14457_vm10, %v6184_v59, %v14456_v14  ;;  %7928 = vmatprep.subr.bf16.mxu1 %v14460_v9  ;;  %vm14481_vm3 = vmmov %vm14480_vm0 }
 0x8d7   : > { %6011 = vrot.lane.b32.xlu0 %v12472_v28, %s8291_s25  ;;  %v7929_v42 = vpack.c.bf16 %v6212_v13, %v6203_v32  ;;  %v14466_v32 = vld [vmem:[#allocation12_spill] sm:$0xff]  ;;  %vm14482_vm10 = vmmov %vm14472_vm2 }
 0x8d8   : > { %6293 = vrot.lane.b32.xlu1 %v12476_v51, %s14026_s20  ;;  %v6356_v51 = vld [vmem:[#allocation3 + $0x20] sm:$0xff] }
 0x8d9   : > { %v5814_v35 = vpop.permute.xlu0 %5813  ;;  %v6278_v26 = vpop.permute.xlu1 %6277  ;;  %7930 = vmatpush1.bf16.msra.mxu1 %v7929_v42  ;;  %v7973_v19 = vpack.c.bf16 %v6365_v23, %v6356_v51  ;;  %v14495_v23 = vld [vmem:[#allocation37_spill] sm:$0xff] }
 0x8da   : > { %v13019_v62 = vsel %vm14462_vm7, %v14461_v47, %v5814_v35  ;;  %v6306_v40 = vsel %vm14464_vm14, %v6278_v26, %v14463_v24  ;;  %7932 = vmatprep.subr.bf16.mxu1 %v14465_v61  ;;  %vm14483_vm7 = vmmov %vm14470_vm11 }
 0x8db   : > { %6103 = vrot.lane.b32.xlu0 %v12472_v28, %s8304_s24  ;;  %v7933_v15 = vpack.c.bf16 %v6306_v40, %v6297_v4  ;;  %vm14484_vm14 = vmmov %vm14483_vm7 }
 0x8dc   : > { %6295 = vrot.lane.b32.xlu1 %v14440_v10, %s14026_s20 }
 0x8dd   : > { %v5902_v49 = vpop.permute.xlu0 %5901  ;;  %v5640_v39 = vpop.permute.xlu1 %5639  ;;  %7934 = vmatpush1.bf16.msra.mxu1 %v7933_v15 }
 0x8de   : > { %v13033_v60 = vsel %vm14432_vm8, %v14466_v32, %v5902_v49  ;;  %v13036_v31 = vsel %vm14467_vm12, %v5638_v63, %v5640_v39  ;;  %7972 = vmatprep.subr.bf16.mxu1 %v7971_v52  ;;  %vm14485_vm8 = vmmov %vm14475_vm9 }
 0x8df   : > { %6197 = vrot.lane.b32.xlu0 %v12472_v28, %s13990_s17  ;;  %vm14486_vm12 = vmmov %vm14473_vm1 }
 0x8e0   : > { %6589 = vmatmul.mubr.f32.vlgmr.msra.gmra.mrb[32].mxu1 %v12499_v45 }
 0x8e1   : > { %v5990_v37 = vpop.permute.xlu0 %5989  ;;  %v5728_v34 = vpop.permute.xlu1 %5727  ;;  %7974 = vmatpush1.bf16.msra.mxu1 %v7973_v19  ;;  %7045 = vmatprep.mubr.msk.f32.mxu1 %vm14469_vm15, %v12505_v55  ;;  %vm14488_vm15 = vmmov %vm14478_vm13 }
 0x8e2   : > { %v13045_v18 = vsel %vm14434_vm4, %v14468_v46, %v5990_v37  ;;  %v13050_v4 = vsel %vm14470_vm11, %v5726_v16, %v5728_v34  ;;  %vm14487_vm4 = vmmov %vm14473_vm1 }
 0x8e3   : > { %6291 = vrot.lane.b32.xlu0 %v12472_v28, %s14026_s20  ;;  %vm14489_vm11 = vmmov %vm14476_vm5 }
 0x8e5   : > { %v6080_v10 = vpop.permute.xlu0 %6079  ;;  %v5816_v45 = vpop.permute.xlu1 %5815 }
 0x8e6   : > { %v13056_v12 = vsel %vm14472_vm2, %v14471_v38, %v6080_v10  ;;  %v13059_v53 = vsel %vm14473_vm1, %v5814_v35, %v5816_v45  ;;  %vm14490_vm2 = vmmov %vm14476_vm5  ;;  %vm14491_vm1 = vcmask 523264  }
 0x8e7   : > { %6275 = vrot.lane.b32.xlu0 %v14429_v25, %s14026_s20 }
 0x8e9   : > { %v6174_v63 = vpop.permute.xlu0 %6173  ;;  %v5904_v11 = vpop.permute.xlu1 %5903 }
 0x8ea   : > { %v13068_v28 = vsel %vm14475_vm9, %v14474_v7, %v6174_v63  ;;  %v13071_v33 = vsel %vm14476_vm5, %v5902_v49, %v5904_v11  ;;  %vm14492_vm9 = vmmov %vm14479_vm6 }
 0x8eb   : > { %6517 = vperm.xlu0 %8171, %v6514_v29   ;;  %vm14493_vm5 = vmmov %vm14479_vm6 }
 0x8ed   : > { %v6268_v36 = vpop.permute.xlu0 %6267  ;;  %v5992_v25 = vpop.permute.xlu1 %5991 }
 0x8ee   : > { %v13075_v5 = vsel %vm14478_vm13, %v14477_v22, %v6268_v36  ;;  %v13078_v8 = vsel %vm14479_vm6, %v5990_v37, %v5992_v25  ;;  %vm14494_vm13 = vmmov %vm14491_vm1 }
 0x8ef   : > { %vm14496_vm6 = vmmov %vm14480_vm0 }
 0x8f1   : > { %v5642_v44 = vpop.permute.xlu0 %5641  ;;  %v13087_v59 = vpop.permute.xlu1 %6081 }
 0x8f2   : > { %v13081_v16 = vsel %vm14480_vm0, %v5640_v39, %v5642_v44  ;;  %v13085_v56 = vsel %vm14481_vm3, %v5642_v44, %v12879_v50  ;;  %v13091_v14 = vsel %vm14482_vm10, %v6080_v10, %v13087_v59  ;;  %vm14497_vm0 = vmmov %vm14491_vm1 }
 0x8f3   : > { %vm14498_vm3 = vmmov %vm14483_vm7 }
 0x8f4   : > { %vm14499_vm10 = vmmov %vm14497_vm0 }
 0x8f5   : > { %v5730_v13 = vpop.permute.xlu0 %5729  ;;  %v13100_v9 = vpop.permute.xlu1 %6175 }
 0x8f6   : > { %v13094_v58 = vsel %vm14483_vm7, %v5728_v34, %v5730_v13  ;;  %v13098_v41 = vsel %vm14484_vm14, %v5730_v13, %v12893_v6  ;;  %v13104_v50 = vsel %vm14485_vm8, %v6174_v63, %v13100_v9  ;;  %vm14500_vm7 = vmmov %vm14487_vm4 }
 0x8f7   : > { %vm14501_vm14 = vmmov %vm14496_vm6 }
 0x8f8   : > { %vm14502_vm8 = vmmov %vm14490_vm2 }
 0x8f9   : > { %v5818_v42 = vpop.permute.xlu0 %5817  ;;  %v13113_v26 = vpop.permute.xlu1 %6269 }
 0x8fa   : > { %v13107_v35 = vsel %vm14486_vm12, %v5816_v45, %v5818_v42  ;;  %v13111_v47 = vsel %vm14487_vm4, %v5818_v42, %v12907_v27  ;;  %v13117_v6 = vsel %vm14488_vm15, %v6268_v36, %v13113_v26  ;;  %vm14503_vm12 = vmmov %vm14498_vm3 }
 0x8fb   : > { %vm14504_vm4 = vmmov %vm14493_vm5 }
 0x8fc   : > { %vm14505_vm15 = vmmov %vm14500_vm7 }
 0x8fd   : > { %v5906_v24 = vpop.permute.xlu0 %5905  ;;  %v13126_v15 = vpop.permute.xlu1 %5661 }
 0x8fe   : > { %v13120_v40 = vsel %vm14489_vm11, %v5904_v11, %v5906_v24  ;;  %v13124_v61 = vsel %vm14490_vm2, %v5906_v24, %v12919_v2  ;;  %5714 = vst.msk [vmem:[#allocation3 + $0x118] sm:$0xff] %vm14491_vm1, %v13126_v15  ;;  %vm14506_vm11 = vcmask 490496   ;;  %vm14507_vm1 = vcmask 482304  }
 0x901   : > { %v5994_v27 = vpop.permute.xlu0 %5993  ;;  %v13137_v52 = vpop.permute.xlu1 %5749 }
 0x902   : > { %v13131_v49 = vsel %vm14492_vm9, %v5992_v25, %v5994_v27  ;;  %v13135_v57 = vsel %vm14493_vm5, %v5994_v27, %v12931_v1  ;;  %5802 = vst.msk [vmem:[#allocation3 + $0x1a8] sm:$0xff] %vm14494_vm13, %v13137_v52  ;;  %vm14508_vm9 = vmmov %vm14504_vm4  ;;  %vm14509_vm5 = vcmask 474112  }
 0x903   : > { %vm14510_vm13 = vmmov %vm14506_vm11 }
 0x905   : > { %v5656_v2 = vpop.permute.xlu0 %5655  ;;  %v13143_v39 = vpop.permute.xlu1 %5837 }
 0x906   : > { %v5675_v32 = vsel %vm14496_vm6, %v14495_v23, %v5656_v2  ;;  %5890 = vst.msk [vmem:[#allocation3 + $0x238] sm:$0xff] %vm14497_vm0, %v13143_v39  ;;  %vm14511_vm6 = vmmov %vm14506_vm11 }
 0x907   : > { %v7977_v29 = vpack.c.bf16 %v5675_v32, %v12993_v21  ;;  %vm14512_vm0 = vmmov %vm14507_vm1 }
 0x909   : > { %v5744_v51 = vpop.permute.xlu0 %5743  ;;  %v13149_v1 = vpop.permute.xlu1 %5925 }
 0x90a   : > { %v5763_v19 = vsel %vm14498_vm3, %v12796_v3, %v5744_v51  ;;  %5978 = vst.msk [vmem:[#allocation3 + $0x2c8] sm:$0xff] %vm14499_vm10, %v13149_v1  ;;  %vm14513_vm3 = vmmov %vm14509_vm5 }
 0x90b   : > { %v7981_v36 = vpack.c.bf16 %v5763_v19, %v13006_v43  ;;  %vm14514_vm10 = vmmov %vm14512_vm0 }
 0x90d   : > { %v5832_v37 = vpop.permute.xlu0 %5831  ;;  %v13155_v34 = vpop.permute.xlu1 %5657 }
 0x90e   : > { %v5851_v46 = vsel %vm14500_vm7, %v12807_v54, %v5832_v37  ;;  %v5676_v10 = vsel %vm14501_vm14, %v5656_v2, %v13155_v34  ;;  %vm14515_vm7 = vcmask 523264   ;;  %vm14517_vm14 = vmmov %vm14511_vm6 }
 0x90f   : > { %v7975_v38 = vpack.c.bf16 %v5676_v10, %v13036_v31  ;;  %v7985_v44 = vpack.c.bf16 %v5851_v46, %v13019_v62 }
 0x911   : > { %v5920_v45 = vpop.permute.xlu0 %5919  ;;  %v13163_v63 = vpop.permute.xlu1 %5745  ;;  %7976 = vmatprep.subr.bf16.mxu1 %v7975_v38 }
 0x912   : > { %v5939_v3 = vsel %vm14502_vm8, %v12819_v17, %v5920_v45  ;;  %v5764_v7 = vsel %vm14503_vm12, %v5744_v51, %v13163_v63  ;;  %7978 = vmatpush1.bf16.msra.mxu1 %v7977_v29  ;;  %vm14518_vm8 = vmmov %vm14511_vm6  ;;  %vm14519_vm12 = vcmask 130048  }
 0x913   : > { %v7979_v54 = vpack.c.bf16 %v5764_v7, %v13050_v4  ;;  %v7989_v24 = vpack.c.bf16 %v5939_v3, %v13033_v60  ;;  %v14516_v3 = vmov 0.0|0.0   ;;  %v6360_v7 = vld [vmem:[#allocation3 + $0x40] sm:$0xff] }
 0x915   : > { %v6008_v11 = vpop.permute.xlu0 %6007  ;;  %v13171_v22 = vpop.permute.xlu1 %5833  ;;  %7980 = vmatprep.subr.bf16.mxu1 %v7979_v54 }
 0x916   : > { %v6027_v31 = vsel %vm14504_vm4, %v12831_v48, %v6008_v11  ;;  %v5852_v17 = vsel %vm14505_vm15, %v5832_v37, %v13171_v22  ;;  %7982 = vmatpush1.bf16.msra.mxu1 %v7981_v36  ;;  %vm14520_vm4 = vmmov %vm14515_vm7 }
 0x917   : > { %v7983_v21 = vpack.c.bf16 %v5852_v17, %v13059_v53  ;;  %v7993_v23 = vpack.c.bf16 %v6027_v31, %v13045_v18  ;;  %v6378_v17 = vld [vmem:[#allocation3 + $0xd0] sm:$0xff]  ;;  %vm14521_vm15 = vmmov %vm14513_vm3 }
 0x919   : > { %v6100_v25 = vpop.permute.xlu0 %6099  ;;  %v13179_v13 = vpop.permute.xlu1 %5921  ;;  %7984 = vmatprep.subr.bf16.mxu1 %v7983_v21 }
 0x91a   : > { %v6122_v4 = vsel %vm14506_vm11, %v12843_v0, %v6100_v25  ;;  %v5940_v48 = vsel %vm14490_vm2, %v5920_v45, %v13179_v13  ;;  %7986 = vmatpush1.bf16.msra.mxu1 %v7985_v44  ;;  %vm14522_vm11 = vcmask 1039360  }
 0x91b   : > { %v7987_v43 = vpack.c.bf16 %v5940_v48, %v13071_v33  ;;  %v7997_v19 = vpack.c.bf16 %v6122_v4, %v13056_v12  ;;  %v6405_v48 = vld [vmem:[#allocation3 + $0x1a8] sm:$0xff]  ;;  %vm14523_vm2 = vmmov %vm14522_vm11 }
 0x91d   : > { %v6194_v42 = vpop.permute.xlu0 %6193  ;;  %v13187_v27 = vpop.permute.xlu1 %6009  ;;  %7988 = vmatprep.subr.bf16.mxu1 %v7987_v43 }
 0x91e   : > { %v6216_v53 = vsel %vm14507_vm1, %v12855_v20, %v6194_v42  ;;  %v6028_v0 = vsel %vm14508_vm9, %v6008_v11, %v13187_v27  ;;  %7990 = vmatpush1.bf16.msra.mxu1 %v7989_v24  ;;  %vm14524_vm1 = vmmov %vm14511_vm6 }
 0x91f   : > { %v7991_v62 = vpack.c.bf16 %v6028_v0, %v13078_v8  ;;  %v8001_v10 = vpack.c.bf16 %v6216_v53, %v13068_v28  ;;  %v6369_v28 = vld [vmem:[#allocation3 + $0x88] sm:$0xff]  ;;  %vm14525_vm9 = vmmov %vm14520_vm4 }
 0x921   : > { %v6288_v2 = vpop.permute.xlu0 %6287  ;;  %v13195_v32 = vpop.permute.xlu1 %6101  ;;  %7992 = vmatprep.subr.bf16.mxu1 %v7991_v62  ;;  %v6423_v62 = vld [vmem:[#allocation3 + $0x238] sm:$0xff] }
 0x922   : > { %v6310_v33 = vsel %vm14509_vm5, %v12867_v30, %v6288_v2  ;;  %v6123_v20 = vsel %vm14510_vm13, %v6100_v25, %v13195_v32  ;;  %7994 = vmatpush1.bf16.msra.mxu1 %v7993_v23  ;;  %vm14526_vm5 = vcmask 1031168  }
 0x923   : > { %v7995_v60 = vpack.c.bf16 %v6123_v20, %v13091_v14  ;;  %v8005_v45 = vpack.c.bf16 %v6310_v33, %v13075_v5  ;;  %v13229_v5 = vld [vmem:[%s13341_s8] sm:$0x77]  ;;  %v6414_v33 = vld [vmem:[#allocation3 + $0x1f0] sm:$0xff]  ;;  %vm14527_vm13 = vmmov %vm14526_vm5 }
 0x925   : > { %v6084_v51 = vpop.permute.xlu0 %6083  ;;  %v13205_v18 = vpop.permute.xlu1 %6195  ;;  %7996 = vmatprep.subr.bf16.mxu1 %v7995_v60 }
 0x926   : > { %v13203_v8 = vsel %vm14511_vm6, %v13087_v59, %v6084_v51  ;;  %v6217_v30 = vsel %vm14512_vm0, %v6194_v42, %v13205_v18  ;;  %7998 = vmatpush1.bf16.msra.mxu1 %v7997_v19  ;;  %v6441_v19 = vld [vmem:[#allocation3 + $0x2c8] sm:$0xff]  ;;  %vm14528_vm6 = vmmov %vm14512_vm0 }
 0x927   : > { %v7999_v37 = vpack.c.bf16 %v6217_v30, %v13104_v50 }
 0x929   : > { %v6088_v46 = vpop.permute.xlu0 %6087  ;;  %v13211_v14 = vpop.permute.xlu1 %6289  ;;  %8000 = vmatprep.subr.bf16.mxu1 %v7999_v37 }
 0x92a   : > { %v6311_v12 = vsel %vm14513_vm3, %v6288_v2, %v13211_v14  ;;  %8002 = vmatpush1.bf16.msra.mxu1 %v8001_v10  ;;  %vm14529_vm3 = vmmov %vm14520_vm4 }
 0x92b   : > { %v8003_v59 = vpack.c.bf16 %v6311_v12, %v13117_v6  ;;  %v8044_v6 = vpack.c.bf16 %v6369_v28, %v6360_v7 }
 0x92d   : > { %v6178_v38 = vpop.permute.xlu0 %6177  ;;  %v13221_v50 = vpop.permute.xlu1 %6013  ;;  %8004 = vmatprep.subr.bf16.mxu1 %v8003_v59 }
 0x92e   : > { %v13219_v29 = vsel %vm14514_vm10, %v13100_v9, %v6178_v38  ;;  %6066 = vst.msk [vmem:[#allocation3 + $0x358] sm:$0xff] %vm14515_vm7, %v13221_v50  ;;  %8006 = vmatpush1.bf16.msra.mxu1 %v8005_v45  ;;  %v6387_v9 = vld [vmem:[#allocation3 + $0x118] sm:$0xff]  ;;  %vm14530_vm10 = vcmask 769024   ;;  %v6450_v45 = vld [vmem:[#allocation3 + $0x310] sm:$0xff] }
 0x92f   : > { %8043 = vmatprep.subr.bf16.mxu1 %v14516_v3  ;;  %v8047_v25 = vpack.c.bf16 %v6387_v9, %v6378_v17  ;;  %vm14531_vm7 = vmmov %vm14530_vm10 }
 0x931   : > { %v6182_v54 = vpop.permute.xlu0 %6181  ;;  %v6086_v11 = vpop.permute.xlu1 %6085  ;;  %6731 = vmatmul.mubr.f32.vlgmr.msra.gmra.mrb[34].mxu1 %v13229_v5 }
 0x932   : > { %v13233_v36 = vsel %vm14517_vm14, %v6084_v51, %v6086_v11  ;;  %v6117_v31 = vsel %vm14518_vm8, %v6086_v11, %v6088_v46  ;;  %8045 = vmatpush1.bf16.msra.mxu1 %v8044_v6  ;;  %7047 = vmatprep.mubr.msk.f32.mxu1 %vm14519_vm12, %v12505_v55  ;;  %v6396_v55 = vld [vmem:[#allocation3 + $0x160] sm:$0xff]  ;;  %vm14532_vm14 = vcmask 760832   ;;  %vm14534_vm12 = vmmov %vm14512_vm0 }
 0x933   : > { %6153 = vst.msk [vmem:[#allocation3 + $0x3a0] sm:$0xff] %vm14520_vm4, %v6117_v31  ;;  %8046 = vmatprep.subr.bf16.mxu1 %v14516_v3  ;;  %v8050_v42 = vpack.c.bf16 %v6405_v48, %v6396_v55  ;;  %vm14533_vm8 = vmmov %vm14532_vm14 }
 0x934   : > { %vm14535_vm4 = vmmov %vm14529_vm3 }
 0x935   : > { %v13240_v21 = vpop.permute.xlu0 %6271  ;;  %v13247_v4 = vpop.permute.xlu1 %6105 }
 0x936   : > { %v13245_v44 = vsel %vm14521_vm15, %v13113_v26, %v13240_v21  ;;  %8048 = vmatpush1.bf16.msra.mxu1 %v8047_v25  ;;  %vm14536_vm15 = vcmask 752640  }
 0x937   : > { %8049 = vmatprep.subr.bf16.mxu1 %v14516_v3 }
 0x939   : > { %v5660_v43 = vpop.permute.xlu0 %5659  ;;  %v6108_v0 = vpop.permute.xlu1 %6107 }
 0x93a   : > { %v5677_v24 = vsel %vm14522_vm11, %v13155_v34, %v5660_v43  ;;  %v5678_v53 = vsel %vm14523_vm2, %v5660_v43, %v13126_v15  ;;  %v6126_v26 = vsel %vm14524_vm1, %v13247_v4, %v6108_v0  ;;  %8051 = vmatpush1.bf16.msra.mxu1 %v8050_v42  ;;  %v8053_v34 = vpack.c.bf16 %v6423_v62, %v6414_v33  ;;  %v6468_v9 = vld [vmem:[#allocation3 + $0x3a0] sm:$0xff]  ;;  %vm14537_vm11 = vmmov %vm14536_vm15 }
 0x93b   : > { %v8011_v2 = vpack.c.bf16 %v5678_v53, %v13085_v56  ;;  %v8013_v23 = vpack.c.bf16 %v5677_v24, %v13081_v16  ;;  %6162 = vst.msk [vmem:[#allocation3 + $0x3e8] sm:$0xff] %vm14525_vm9, %v6126_v26  ;;  %8052 = vmatprep.subr.bf16.mxu1 %v14516_v3  ;;  %vm14538_vm2 = vcmask 474112   ;;  %vm14539_vm9 = vmmov %vm14524_vm1 }
 0x93d   : > { %v5748_v20 = vpop.permute.xlu0 %5747  ;;  %8012 = vmatprep.subr.bf16.mxu0 %v8011_v2  ;;  %v6180_v51 = vpop.permute.xlu1 %6179 }
 0x93e   : > { %v5765_v15 = vsel %vm14526_vm5, %v13163_v63, %v5748_v20  ;;  %v5766_v60 = vsel %vm14527_vm13, %v5748_v20, %v13137_v52  ;;  %8014 = vmatpush1.bf16.msra.mxu0 %v8013_v23  ;;  %v13265_v56 = vsel %vm14528_vm6, %v6178_v38, %v6180_v51  ;;  %v6211_v16 = vsel %vm14512_vm0, %v6180_v51, %v6182_v54  ;;  %v6432_v63 = vld [vmem:[#allocation3 + $0x280] sm:$0xff]  ;;  %v6459_v38 = vld [vmem:[#allocation3 + $0x358] sm:$0xff]  ;;  %vm14540_vm5 = vmmov %vm14512_vm0 }
 0x93f   : > { %8054 = vmatpush1.bf16.msra.mxu1 %v8053_v34  ;;  %v8015_v30 = vpack.c.bf16 %v5766_v60, %v13098_v41  ;;  %v8017_v37 = vpack.c.bf16 %v5765_v15, %v13094_v58  ;;  %6247 = vst.msk [vmem:[#allocation3 + $0x430] sm:$0xff] %vm14529_vm3, %v6211_v16  ;;  %v8056_v52 = vpack.c.bf16 %v6441_v19, %v6432_v63  ;;  %vm14541_vm13 = vmmov %vm14512_vm0 }
 0x940   : > { %8055 = vmatprep.subr.bf16.mxu1 %v14516_v3  ;;  %v8059_v7 = vpack.c.bf16 %v6459_v38, %v6450_v45  ;;  %vm14542_vm6 = vmmov %vm14538_vm2 }
 0x941   : > { %v5836_v46 = vpop.permute.xlu0 %5835  ;;  %8016 = vmatprep.subr.bf16.mxu0 %v8015_v30  ;;  %v6200_v59 = vpop.permute.xlu1 %6199  ;;  %vm14543_vm0 = vmmov %vm14529_vm3 }
 0x942   : > { %v5853_v10 = vsel %vm14530_vm10, %v13171_v22, %v5836_v46  ;;  %v5854_v12 = vsel %vm14531_vm7, %v5836_v46, %v13143_v39  ;;  %8018 = vmatpush1.bf16.msra.mxu0 %v8017_v37  ;;  %v6477_v6 = vld [vmem:[#allocation3 + $0x3e8] sm:$0xff]  ;;  %vm14544_vm3 = vmmov %vm14538_vm2 }
 0x943   : > { %8057 = vmatpush1.bf16.msra.mxu1 %v8056_v52  ;;  %v8019_v58 = vpack.c.bf16 %v5854_v12, %v13111_v47  ;;  %v8021_v41 = vpack.c.bf16 %v5853_v10, %v13107_v35  ;;  %vm14545_vm10 = vmmov %vm14538_vm2 }
 0x944   : > { %8058 = vmatprep.subr.bf16.mxu1 %v14516_v3  ;;  %vm14546_vm7 = vmmov %vm14538_vm2 }
 0x945   : > { %v5924_v28 = vpop.permute.xlu0 %5923  ;;  %8020 = vmatprep.subr.bf16.mxu0 %v8019_v58  ;;  %v6202_v54 = vpop.permute.xlu1 %6201 }
 0x946   : > { %v5941_v22 = vsel %vm14532_vm14, %v13179_v13, %v5924_v28  ;;  %v5942_v39 = vsel %vm14533_vm8, %v5924_v28, %v13149_v1  ;;  %8022 = vmatpush1.bf16.msra.mxu0 %v8021_v41  ;;  %v6220_v11 = vsel %vm14534_vm12, %v6200_v59, %v6202_v54  ;;  %v8062_v13 = vpack.c.bf16 %v6477_v6, %v6468_v9  ;;  %v6486_v42 = vld [vmem:[#allocation3 + $0x430] sm:$0xff]  ;;  %vm14547_vm14 = vmmov %vm14543_vm0 }
 0x947   : > { %8060 = vmatpush1.bf16.msra.mxu1 %v8059_v7  ;;  %v8023_v35 = vpack.c.bf16 %v5942_v39, %v13124_v61  ;;  %v8025_v47 = vpack.c.bf16 %v5941_v22, %v13120_v40  ;;  %6256 = vst.msk [vmem:[#allocation3 + $0x478] sm:$0xff] %vm14535_vm4, %v6220_v11  ;;  %vm6907_vm8 = vcmask 518144  }
 0x948   : > { %8061 = vmatprep.subr.bf16.mxu1 %v14516_v3 }
 0x949   : > { %v6012_v31 = vpop.permute.xlu0 %6011  ;;  %8024 = vmatprep.subr.bf16.mxu0 %v8023_v35  ;;  %v6274_v25 = vpop.permute.xlu1 %6273 }
 0x94a   : > { %v6029_v1 = vsel %vm14536_vm15, %v13187_v27, %v6012_v31  ;;  %v6030_v17 = vsel %vm14537_vm11, %v6012_v31, %v13221_v50  ;;  %8026 = vmatpush1.bf16.msra.mxu0 %v8025_v47  ;;  %v6304_v61 = vsel %vm14538_vm2, %v13240_v21, %v6274_v25 }
 0x94b   : > { %8063 = vmatpush1.bf16.msra.mxu1 %v8062_v13  ;;  %v8027_v40 = vpack.c.bf16 %v6030_v17, %v13135_v57  ;;  %v8029_v48 = vpack.c.bf16 %v6029_v1, %v13131_v49 }
 0x94c   : > { %8064 = vmatprep.subr.bf16.mxu1 %v14516_v3 }
 0x94d   : > { %v6104_v55 = vpop.permute.xlu0 %6103  ;;  %8028 = vmatprep.subr.bf16.mxu0 %v8027_v40  ;;  %v6294_v43 = vpop.permute.xlu1 %6293 }
 0x94e   : > { %v6124_v27 = vsel %vm14524_vm1, %v13195_v32, %v6104_v55  ;;  %v6125_v50 = vsel %vm14539_vm9, %v6104_v55, %v13247_v4  ;;  %8030 = vmatpush1.bf16.msra.mxu0 %v8029_v48  ;;  %v6495_v24 = vld [vmem:[#allocation3 + $0x478] sm:$0xff] }
 0x94f   : > { %v8031_v21 = vpack.c.bf16 %v6125_v50, %v13233_v36  ;;  %v8033_v57 = vpack.c.bf16 %v6124_v27, %v13203_v8  ;;  %v8065_v53 = vpack.c.bf16 %v6495_v24, %v6486_v42 }
 0x951   : > { %v6198_v49 = vpop.permute.xlu0 %6197  ;;  %8032 = vmatprep.subr.bf16.mxu0 %v8031_v21  ;;  %v6296_v32 = vpop.permute.xlu1 %6295  ;;  %8066 = vmatpush1.bf16.msra.mxu1 %v8065_v53 }
 0x952   : > { %v6218_v0 = vsel %vm14540_vm5, %v13205_v18, %v6198_v49  ;;  %v6219_v62 = vsel %vm14541_vm13, %v6198_v49, %v6200_v59  ;;  %8034 = vmatpush1.bf16.msra.mxu0 %v8033_v57  ;;  %v6314_v4 = vsel %vm14542_vm6, %v6294_v43, %v6296_v32  ;;  %8067 = vmatprep.subr.bf16.mxu1 %v14516_v3 }
 0x953   : > { %v8035_v26 = vpack.c.bf16 %v6219_v62, %v13265_v56  ;;  %v8037_v2 = vpack.c.bf16 %v6218_v0, %v13219_v29  ;;  %6350 = vst.msk [vmem:[#allocation3 + $0x508] sm:$0xff] %vm14543_vm0, %v6314_v4 }
 0x955   : > { %v6292_v8 = vpop.permute.xlu0 %6291  ;;  %8036 = vmatprep.subr.bf16.mxu0 %v8035_v26 }
 0x956   : > { %v6312_v18 = vsel %vm14544_vm3, %v13211_v14, %v6292_v8  ;;  %v6313_v36 = vsel %vm14545_vm10, %v6292_v8, %v6294_v43  ;;  %8038 = vmatpush1.bf16.msra.mxu0 %v8037_v2 }
 0x957   : > { %v8039_v23 = vpack.c.bf16 %v6313_v36, %v6304_v61  ;;  %v8041_v33 = vpack.c.bf16 %v6312_v18, %v13245_v44 }
 0x959   : > { %v6276_v20 = vpop.permute.xlu0 %6275  ;;  %8040 = vmatprep.subr.bf16.mxu0 %v8039_v23 }
 0x95a   : > { %v6305_v29 = vsel %vm14546_vm7, %v6274_v25, %v6276_v20  ;;  %8042 = vmatpush1.bf16.msra.mxu0 %v8041_v33  ;;  %v6513_v34 = vld [vmem:[#allocation3 + $0x508] sm:$0xff] }
 0x95b   : > { %6341 = vst.msk [vmem:[#allocation3 + $0x4c0] sm:$0xff] %vm14547_vm14, %v6305_v29 }
 0x95d   : > { %6802 = vmatmul.mubr.f32.vlgmr.msra.gmra.mrb[36].mxu0 %v13229_v5 }
 0x962   : > { %v6504_v3 = vld [vmem:[#allocation3 + $0x4c0] sm:$0xff] }
 0x963   : > { %v8068_v15 = vpack.c.bf16 %v6513_v34, %v6504_v3 }
 0x965   : > { %8069 = vmatpush1.bf16.msra.mxu1 %v8068_v15 }
 0x968   : > { %6873 = vmatmul.mubr.f32.vlgmr.msra.gmra.mrb[36].mxu1 %v13229_v5 }
 0x96a   : > { %v6518_v14 = vpop.permute.xlu0 %6517 }
 0x988   : > { %v6661_v60 = vpop.f32.mrb[34].mxu0 }
 0x989   : > { %v6662_v51 = vadd.f32 %v6661_v60, %v6518_v14  ;;  %v6663_v44 = vpop.f32.mrb[35].mxu0 }
 0x98a   : > { %v6664_v19 = vadd.f32 %v6663_v44, %v6518_v14 }
 0x98b   : > { %v6880_v56 = vmax.f32 %v6662_v51, 0.0 }
 0x98c   : > { %v6881_v16 = vmax.f32 %v6664_v19, 0.0 }
 0x98e   : > { %v6896_v30 = vcombine.low %v6880_v56, %v6881_v16 }
 0x990   : > { %6904 = vst [vmem:[%s13323_s26 + $0x8] sm:$0x77] %v6896_v30 }
 0x9b3   : > { %v6590_v37 = vpop.f32.mrb[32].mxu1 }
 0x9b4   : > { %v6591_v5 = vadd.f32 %v6590_v37, %v6518_v14  ;;  %v6592_v63 = vpop.f32.mrb[33].mxu1 }
 0x9b5   : > { %v6593_v46 = vadd.f32 %v6592_v63, %v6518_v14 }
 0x9b6   : > { %v6878_v52 = vmax.f32 %v6591_v5, 0.0 }
 0x9b7   : > { %v6879_v10 = vmax.f32 %v6593_v46, 0.0 }
 0x9b9   : > { %v6895_v12 = vcombine.low %v6878_v52, %v6879_v10 }
 0x9bb   : > { %6903 = vst [vmem:[%s13323_s26] sm:$0x77] %v6895_v12 }
 0xa04   : > { %v6732_v59 = vpop.f32.mrb[34].mxu1 }
 0xa05   : > { %v6733_v38 = vadd.f32 %v6732_v59, %v6518_v14  ;;  %v6734_v58 = vpop.f32.mrb[35].mxu1 }
 0xa06   : > { %v6735_v41 = vadd.f32 %v6734_v58, %v6518_v14 }
 0xa07   : > { %v6882_v45 = vmax.f32 %v6733_v38, 0.0 }
 0xa08   : > { %v6883_v28 = vmax.f32 %v6735_v41, 0.0 }
 0xa0a   : > { %v6897_v7 = vcombine.low %v6882_v45, %v6883_v28 }
 0xa0c   : > { %6905 = vst [vmem:[%s13323_s26 + $0x10] sm:$0x77] %v6897_v7 }
 0xa30   : > { %v6803_v22 = vpop.f32.mrb[36].mxu0 }
 0xa31   : > { %v6804_v39 = vadd.f32 %v6803_v22, %v6518_v14  ;;  %v6805_v54 = vpop.f32.mrb[37].mxu0 }
 0xa32   : > { %v6806_v6 = vadd.f32 %v6805_v54, %v6518_v14 }
 0xa33   : > { %v6884_v11 = vmax.f32 %v6804_v39, 0.0 }
 0xa34   : > { %v6885_v35 = vmax.f32 %v6806_v6, 0.0 }
 0xa36   : > { %v6898_v47 = vcombine.low %v6884_v11, %v6885_v35 }
 0xa38   : > { %6906 = vst [vmem:[%s13323_s26 + $0x18] sm:$0x77] %v6898_v47 }
 0xa3b   : > { %v6874_v9 = vpop.f32.mrb[36].mxu1 }
 0xa3c   : > { %v6875_v31 = vadd.f32 %v6874_v9, %v6518_v14  ;;  %v6876_v13 = vpop.f32.mrb[37].mxu1 }
 0xa3e   : > { %v6886_v1 = vmax.f32 %v6875_v31, 0.0 }
 0xa40   : > { %6908 = vst.msk [vmem:[%s13323_s26 + $0x20] sm:$0x7] %vm6907_vm8, %v6886_v1 }
 0xa41 PF: > { %s22_s13 = sadd.s32 1, %s8277_s13  }
 0xa42   : > { %p19_p13 = scmp.ge.s32.totalorder %s22_s13, 4  }
 0xa44   :  { %21 = sbr.rel (!%p19_p13) target bundleno = 2 (0x2), region = 120 }
 0xa4b   :  { %6930 = vsyncpa [#allocation5], 1 }
 0xa4c   :  { %6932 = vsyncpa [#allocation5 + $0x1], 1 }
 0xa4d   :  { %6933 = vsyncpa [#allocation7], 1 }

</bundles_post_ra>
